<compile_context>
chip_gen: v6e
topology: v6e:2x2x1
jax: 0.10.0
libtpu: 0.0.40
codegen_flags: <defaults>
</compile_context>

<pallas_src>
import jax
import jax.numpy as jnp
from jax import lax
from jax.experimental import pallas as pl
from jax.experimental.pallas import tpu as pltpu

# ---- problem sizes (from the torch module) ----
T = 8              # sequence length
B = 2              # batch
N_CODES = 5        # n_diagnosis_codes
H = 30             # input_size == hidden_size
NUM_LAYERS = 4
N_LABELS = 3
ATT_HIDDEN = 64

# ---- padded kernel layout ----
HP = 128           # hidden/feature dim padded to one full lane tile
GP = 128           # each LSTM gate gets its own 128-lane slab (4*GP gate cols)


def gene_rnn_kernel(x_ref, emb_ref, w_ih_ref, w_hh_ref, bias_ref,
                    att_w1_ref, att_b1_ref, att_w2_ref, att_b2_ref,
                    fc_w_ref, fc_b_ref,
                    out_ref,
                    seq_ref):
    # ---------------- 1) embedding mix ----------------
    # x rows are (t, b) pairs (row r = t*B + b); features live on the lane axis.
    x = x_ref[...]                                    # (T*B, C)
    emb = emb_ref[...]                                # (C, HP), lanes >= H are zero
    mixed = jnp.maximum(x[:, :, None] * emb[None, :, :], 0.0)     # (T*B, C, HP)
    seq_ref[...] = jnp.mean(mixed, axis=1)            # (T*B, HP); pad lanes stay 0

    # ---------------- 2) 4-layer LSTM, layer-outer (cuDNN-style) ----------------
    for l in range(NUM_LAYERS):                       # static unroll over layers
        # Hoisted: input projection + (b_ih + b_hh) for the whole sequence,
        # one batched MXU matmul per layer -> off the recurrent critical path.
        xproj = (jnp.dot(seq_ref[...], w_ih_ref[l],
                         preferred_element_type=jnp.float32)
                 + bias_ref[l])                       # (T*B, 4*GP)
        w_hh_l = w_hh_ref[l]                          # (HP, 4*GP), loop-invariant

        h = jnp.zeros((B, HP), dtype=jnp.float32)     # carried in vregs
        c = jnp.zeros((B, HP), dtype=jnp.float32)
        for t in range(T):                            # fully unrolled (T == 8)
            gates = (xproj[t * B:(t + 1) * B, :]
                     + jnp.dot(h, w_hh_l, preferred_element_type=jnp.float32))
            # tile-aligned 128-lane gate slabs (torch gate order i, f, g, o)
            i_g = jax.nn.sigmoid(gates[:, 0 * GP:1 * GP])
            f_g = jax.nn.sigmoid(gates[:, 1 * GP:2 * GP])
            g_g = jnp.tanh(gates[:, 2 * GP:3 * GP])
            o_g = jax.nn.sigmoid(gates[:, 3 * GP:4 * GP])
            c = f_g * c + i_g * g_g
            h = o_g * jnp.tanh(c)                     # pad lanes remain exactly 0
            # this layer's output at time t (next layer's / attention's input)
            seq_ref[pl.ds(t * B, B), :] = h

    # ---------------- 3) self-attention over time (MXU) ----------------
    seq = seq_ref[...]                                # (T*B, HP) top-layer outputs
    e1 = jnp.maximum(
        jnp.dot(seq, att_w1_ref[...], preferred_element_type=jnp.float32)
        + att_b1_ref[...], 0.0)                       # (T*B, 64)
    energy = (jnp.dot(e1, att_w2_ref[...], preferred_element_type=jnp.float32)
              + att_b2_ref[...])                      # (T*B, 1)

    # per-batch softmax over time: row r of seq belongs to batch r % B, time r // B
    r_ids = lax.broadcasted_iota(jnp.int32, (T * B, B), 0)
    b_ids = lax.broadcasted_iota(jnp.int32, (T * B, B), 1)
    scores = jnp.where((r_ids % B) == b_ids, energy, -jnp.inf)    # (T*B, B)
    m = jnp.max(scores, axis=0, keepdims=True)
    p = jnp.exp(scores - m)                           # masked entries -> exactly 0
    attw = p / jnp.sum(p, axis=0, keepdims=True)      # (T*B, B)

    # attention-weighted sum over time as one MXU matmul
    att_out = jnp.dot(attw.T, seq, preferred_element_type=jnp.float32)   # (B, HP)

    # ---------------- 4) dropout ----------------
    # TODO(synk): dropout(p=0.5) is identity here (inference mode).

    # ---------------- 5) fc + softmax over labels ----------------
    logits = (jnp.dot(att_out, fc_w_ref[...], preferred_element_type=jnp.float32)
              + fc_b_ref[...])                        # (B, N_LABELS)
    m2 = jnp.max(logits, axis=1, keepdims=True)
    e2 = jnp.exp(logits - m2)
    out_ref[...] = e2 / jnp.sum(e2, axis=1, keepdims=True)


def gene_rnn_forward(x, params):
    """x: (T, B, N_CODES) float32; params: padded kernel-layout params."""
    x2 = x.reshape(T * B, N_CODES)                    # row r = t*B + b
    n_in = 1 + len(params)
    return pl.pallas_call(
        gene_rnn_kernel,
        out_shape=jax.ShapeDtypeStruct((B, N_LABELS), jnp.float32),
        in_specs=[pl.BlockSpec(memory_space=pltpu.MemorySpace.VMEM)] * n_in,
        out_specs=pl.BlockSpec(memory_space=pltpu.MemorySpace.VMEM),
        scratch_shapes=[
            pltpu.VMEM((T * B, HP), jnp.float32),     # sequence buffer (in -> out)
        ],
    )(x2, *params)


def init_params(key):
    """Parameters in the torch module's native shapes (gate order i, f, g, o)."""
    ks = jax.random.split(key, 11)
    s = 0.1
    emb = s * jax.random.normal(ks[0], (N_CODES, H), jnp.float32)
    w_ih = s * jax.random.normal(ks[1], (NUM_LAYERS, 4 * H, H), jnp.float32)
    w_hh = s * jax.random.normal(ks[2], (NUM_LAYERS, 4 * H, H), jnp.float32)
    b_ih = s * jax.random.normal(ks[3], (NUM_LAYERS, 4 * H), jnp.float32)
    b_hh = s * jax.random.normal(ks[4], (NUM_LAYERS, 4 * H), jnp.float32)
    att_w1 = s * jax.random.normal(ks[5], (ATT_HIDDEN, H), jnp.float32)
    att_b1 = s * jax.random.normal(ks[6], (ATT_HIDDEN,), jnp.float32)
    att_w2 = s * jax.random.normal(ks[7], (1, ATT_HIDDEN), jnp.float32)
    att_b2 = s * jax.random.normal(ks[8], (1,), jnp.float32)
    fc_w = s * jax.random.normal(ks[9], (N_LABELS, H), jnp.float32)
    fc_b = s * jax.random.normal(ks[10], (N_LABELS,), jnp.float32)
    return (emb, w_ih, w_hh, b_ih, b_hh, att_w1, att_b1, att_w2, att_b2, fc_w, fc_b)


def prepare_params(tp):
    """Pad / transpose torch-layout params into the kernel layout (done once).

    Feature (input) dims are zero-padded to HP=128 lanes; each LSTM gate gets
    its own GP=128-lane slab so in-kernel gate slices are tile-aligned.
    """
    (emb, w_ih, w_hh, b_ih, b_hh, att_w1, att_b1, att_w2, att_b2, fc_w, fc_b) = tp

    def pad_lstm_w(w):                                 # (L, 4H, H) -> (L, HP, 4*GP)
        w = jnp.transpose(w, (0, 2, 1)).reshape(NUM_LAYERS, H, 4, H)
        w = jnp.pad(w, ((0, 0), (0, HP - H), (0, 0), (0, GP - H)))
        return w.reshape(NUM_LAYERS, HP, 4 * GP)

    bias = (b_ih + b_hh).reshape(NUM_LAYERS, 4, H)     # fold the two biases
    bias = jnp.pad(bias, ((0, 0), (0, 0), (0, GP - H))).reshape(NUM_LAYERS, 1, 4 * GP)

    emb_p = jnp.pad(emb, ((0, 0), (0, HP - H)))                          # (C, HP)
    att_w1_p = jnp.pad(att_w1.T, ((0, HP - H), (0, 0)))                  # (HP, 64)
    att_b1_p = att_b1.reshape(1, ATT_HIDDEN)
    att_w2_p = att_w2.T                                                  # (64, 1)
    att_b2_p = att_b2.reshape(1, 1)
    fc_w_p = jnp.pad(fc_w.T, ((0, HP - H), (0, 0)))                      # (HP, 3)
    fc_b_p = fc_b.reshape(1, N_LABELS)

    return (emb_p, pad_lstm_w(w_ih), pad_lstm_w(w_hh), bias,
            att_w1_p, att_b1_p, att_w2_p, att_b2_p, fc_w_p, fc_b_p)


def gene_rnn_reference(x, tp):
    """Pure-JAX re-implementation of the torch forward (inference mode)."""
    (emb, w_ih, w_hh, b_ih, b_hh, att_w1, att_b1, att_w2, att_b2, fc_w, fc_b) = tp
    seq = jnp.mean(jax.nn.relu(x[..., None] * emb[None, None, :, :]), axis=2)  # (T,B,H)
    for l in range(NUM_LAYERS):
        h = jnp.zeros((B, H), jnp.float32)
        c = jnp.zeros((B, H), jnp.float32)
        outs = []
        for t in range(T):
            gates = seq[t] @ w_ih[l].T + b_ih[l] + h @ w_hh[l].T + b_hh[l]
            i_g = jax.nn.sigmoid(gates[:, 0:H])
            f_g = jax.nn.sigmoid(gates[:, H:2 * H])
            g_g = jnp.tanh(gates[:, 2 * H:3 * H])
            o_g = jax.nn.sigmoid(gates[:, 3 * H:4 * H])
            c = f_g * c + i_g * g_g
            h = o_g * jnp.tanh(c)
            outs.append(h)
        seq = jnp.stack(outs, axis=0)
    enc = jnp.transpose(seq, (1, 0, 2))                                   # (B,T,H)
    e1 = jax.nn.relu(enc @ att_w1.T + att_b1)                             # (B,T,64)
    energy = (e1 @ att_w2.T)[..., 0] + att_b2                             # (B,T)
    w = jax.nn.softmax(energy, axis=1)
    att = jnp.sum(enc * w[..., None], axis=1)                             # (B,H)
    logits = att @ fc_w.T + fc_b
    return jax.nn.softmax(logits, axis=1)


if __name__ == "__main__":
    key = jax.random.PRNGKey(0)
    k_x, k_p = jax.random.split(key)
    # x: (T, B, N_CODES) float, as implied by `x * embed_weight` broadcasting.
    x = jax.random.uniform(k_x, (T, B, N_CODES), jnp.float32)
    torch_params = init_params(k_p)
    kernel_params = prepare_params(torch_params)

    out = jax.jit(gene_rnn_forward)(x, kernel_params)
    out = jax.block_until_ready(out)

    assert out.shape == (B, N_LABELS)
    # rows are softmax probabilities -> must sum to 1
    assert bool(jnp.all(jnp.abs(jnp.sum(out, axis=1) - 1.0) < 1e-5))

    # compare against a pure-JAX reference of the torch forward
    with jax.default_matmul_precision("highest"):
        ref = jax.block_until_ready(gene_rnn_reference(x, torch_params))
    assert bool(jnp.max(jnp.abs(out - ref)) < 1e-3)

    print("KERNEL_OK")
</pallas_src>

<mosaic_0001>
module attributes {stable_mosaic.version = 11 : i64} {
  func.func @gene_rnn_kernel(%arg0: memref<16x5xf32, #tpu.memory_space<vmem>>, %arg1: memref<5x128xf32, #tpu.memory_space<vmem>>, %arg2: memref<4x128x512xf32, #tpu.memory_space<vmem>>, %arg3: memref<4x128x512xf32, #tpu.memory_space<vmem>>, %arg4: memref<4x1x512xf32, #tpu.memory_space<vmem>>, %arg5: memref<128x64xf32, #tpu.memory_space<vmem>>, %arg6: memref<1x64xf32, #tpu.memory_space<vmem>>, %arg7: memref<64x1xf32, #tpu.memory_space<vmem>>, %arg8: memref<1x1xf32, #tpu.memory_space<vmem>>, %arg9: memref<128x3xf32, #tpu.memory_space<vmem>>, %arg10: memref<1x3xf32, #tpu.memory_space<vmem>>, %arg11: memref<2x3xf32, #tpu.memory_space<vmem>>, %arg12: memref<16x128xf32, #tpu.memory_space<vmem>>) attributes {dimension_semantics = [], scalar_prefetch = 0 : i64, scratch_operands = 1 : i64, tpu.core_type = #tpu.core_type<tc>} {
    %c0 = arith.constant 0 : index
    %c0_0 = arith.constant 0 : index
    %0 = vector.load %arg0[%c0, %c0_0] : memref<16x5xf32, #tpu.memory_space<vmem>>, vector<16x5xf32>
    %c0_1 = arith.constant 0 : index
    %c0_2 = arith.constant 0 : index
    %1 = vector.load %arg1[%c0_1, %c0_2] : memref<5x128xf32, #tpu.memory_space<vmem>>, vector<5x128xf32>
    %2 = vector.shape_cast %0 : vector<16x5xf32> to vector<16x5x1xf32>
    %3 = vector.shape_cast %1 : vector<5x128xf32> to vector<1x5x128xf32>
    %4 = vector.broadcast %2 : vector<16x5x1xf32> to vector<16x5x128xf32>
    %5 = vector.broadcast %3 : vector<1x5x128xf32> to vector<16x5x128xf32>
    %6 = arith.mulf %4, %5 : vector<16x5x128xf32>
    %cst = arith.constant 0.000000e+00 : f32
    %7 = vector.broadcast %cst : f32 to vector<16x5x128xf32>
    %8 = arith.maximumf %6, %7 : vector<16x5x128xf32>
    %cst_3 = arith.constant dense<0.000000e+00> : vector<16x128xf32>
    %9 = vector.multi_reduction <add>, %8, %cst_3 [1] : vector<16x5x128xf32> to vector<16x128xf32>
    %cst_4 = arith.constant 5.000000e+00 : f32
    %10 = vector.broadcast %cst_4 : f32 to vector<16x128xf32>
    %11 = arith.divf %9, %10 : vector<16x128xf32>
    %c0_5 = arith.constant 0 : index
    %c0_6 = arith.constant 0 : index
    %12 = vector.load %arg12[%c0_5, %c0_6] : memref<16x128xf32, #tpu.memory_space<vmem>>, vector<16x128xf32>
    tpu.vector_store %arg12[%c0_5, %c0_6], %11 {strides = array<i32>} : memref<16x128xf32, #tpu.memory_space<vmem>>, vector<16x128xf32>,
    %c0_7 = arith.constant 0 : index
    %c0_8 = arith.constant 0 : index
    %13 = vector.load %arg12[%c0_7, %c0_8] : memref<16x128xf32, #tpu.memory_space<vmem>>, vector<16x128xf32>
    %c0_9 = arith.constant 0 : index
    %c0_10 = arith.constant 0 : index
    %c0_11 = arith.constant 0 : index
    %14 = vector.load %arg2[%c0_9, %c0_10, %c0_11] : memref<4x128x512xf32, #tpu.memory_space<vmem>>, vector<1x128x512xf32>
    %15 = vector.shape_cast %14 : vector<1x128x512xf32> to vector<128x512xf32>
    %cst_12 = arith.constant dense<0.000000e+00> : vector<16x512xf32>
    %16 = tpu.matmul %13, %15, %cst_12 {dimension_numbers = #tpu.dot_dimension_numbers<[1], [0], [0], [1], [0, 0, 1, 1], [], []>} : vector<16x128xf32>, vector<128x512xf32>, vector<16x512xf32> -> vector<16x512xf32>
    %c0_13 = arith.constant 0 : index
    %c0_14 = arith.constant 0 : index
    %c0_15 = arith.constant 0 : index
    %17 = vector.load %arg4[%c0_13, %c0_14, %c0_15] : memref<4x1x512xf32, #tpu.memory_space<vmem>>, vector<1x1x512xf32>
    %18 = vector.shape_cast %17 : vector<1x1x512xf32> to vector<1x512xf32>
    %19 = vector.broadcast %18 : vector<1x512xf32> to vector<16x512xf32>
    %20 = arith.addf %16, %19 : vector<16x512xf32>
    %c0_16 = arith.constant 0 : index
    %c0_17 = arith.constant 0 : index
    %c0_18 = arith.constant 0 : index
    %21 = vector.load %arg3[%c0_16, %c0_17, %c0_18] : memref<4x128x512xf32, #tpu.memory_space<vmem>>, vector<1x128x512xf32>
    %22 = vector.shape_cast %21 : vector<1x128x512xf32> to vector<128x512xf32>
    %cst_19 = arith.constant 0.000000e+00 : f32
    %23 = vector.broadcast %cst_19 : f32 to vector<2x128xf32>
    %cst_20 = arith.constant 0.000000e+00 : f32
    %24 = vector.broadcast %cst_20 : f32 to vector<2x128xf32>
    %25 = vector.extract_strided_slice %20 {offsets = [0, 0], sizes = [2, 512], strides = [1, 1]} : vector<16x512xf32> to vector<2x512xf32>
    %cst_21 = arith.constant dense<0.000000e+00> : vector<2x512xf32>
    %26 = tpu.matmul %23, %22, %cst_21 {dimension_numbers = #tpu.dot_dimension_numbers<[1], [0], [0], [1], [0, 0, 1, 1], [], []>} : vector<2x128xf32>, vector<128x512xf32>, vector<2x512xf32> -> vector<2x512xf32>
    %27 = arith.addf %25, %26 : vector<2x512xf32>
    %28 = vector.extract_strided_slice %27 {offsets = [0, 0], sizes = [2, 128], strides = [1, 1]} : vector<2x512xf32> to vector<2x128xf32>
    %29 = arith.negf %28 : vector<2x128xf32>
    %30 = math.exp %29 : vector<2x128xf32>
    %cst_22 = arith.constant 1.000000e+00 : f32
    %31 = vector.broadcast %cst_22 : f32 to vector<2x128xf32>
    %32 = arith.addf %31, %30 : vector<2x128xf32>
    %33 = arith.divf %31, %32 : vector<2x128xf32>
    %34 = vector.extract_strided_slice %27 {offsets = [0, 128], sizes = [2, 128], strides = [1, 1]} : vector<2x512xf32> to vector<2x128xf32>
    %35 = arith.negf %34 : vector<2x128xf32>
    %36 = math.exp %35 : vector<2x128xf32>
    %cst_23 = arith.constant 1.000000e+00 : f32
    %37 = vector.broadcast %cst_23 : f32 to vector<2x128xf32>
    %38 = arith.addf %37, %36 : vector<2x128xf32>
    %39 = arith.divf %37, %38 : vector<2x128xf32>
    %40 = vector.extract_strided_slice %27 {offsets = [0, 256], sizes = [2, 128], strides = [1, 1]} : vector<2x512xf32> to vector<2x128xf32>
    %41 = math.tanh %40 : vector<2x128xf32>
    %42 = vector.extract_strided_slice %27 {offsets = [0, 384], sizes = [2, 128], strides = [1, 1]} : vector<2x512xf32> to vector<2x128xf32>
    %43 = arith.negf %42 : vector<2x128xf32>
    %44 = math.exp %43 : vector<2x128xf32>
    %cst_24 = arith.constant 1.000000e+00 : f32
    %45 = vector.broadcast %cst_24 : f32 to vector<2x128xf32>
    %46 = arith.addf %45, %44 : vector<2x128xf32>
    %47 = arith.divf %45, %46 : vector<2x128xf32>
    %48 = arith.mulf %39, %24 : vector<2x128xf32>
    %49 = arith.mulf %33, %41 : vector<2x128xf32>
    %50 = arith.addf %48, %49 : vector<2x128xf32>
    %51 = math.tanh %50 : vector<2x128xf32>
    %52 = arith.mulf %47, %51 : vector<2x128xf32>
    %c0_25 = arith.constant 0 : index
    %c0_26 = arith.constant 0 : index
    %53 = vector.load %arg12[%c0_25, %c0_26] : memref<16x128xf32, #tpu.memory_space<vmem>>, vector<2x128xf32>
    tpu.vector_store %arg12[%c0_25, %c0_26], %52 {strides = array<i32>} : memref<16x128xf32, #tpu.memory_space<vmem>>, vector<2x128xf32>,
    %54 = vector.extract_strided_slice %20 {offsets = [2, 0], sizes = [2, 512], strides = [1, 1]} : vector<16x512xf32> to vector<2x512xf32>
    %cst_27 = arith.constant dense<0.000000e+00> : vector<2x512xf32>
    %55 = tpu.matmul %52, %22, %cst_27 {dimension_numbers = #tpu.dot_dimension_numbers<[1], [0], [0], [1], [0, 0, 1, 1], [], []>} : vector<2x128xf32>, vector<128x512xf32>, vector<2x512xf32> -> vector<2x512xf32>
    %56 = arith.addf %54, %55 : vector<2x512xf32>
    %57 = vector.extract_strided_slice %56 {offsets = [0, 0], sizes = [2, 128], strides = [1, 1]} : vector<2x512xf32> to vector<2x128xf32>
    %58 = arith.negf %57 : vector<2x128xf32>
    %59 = math.exp %58 : vector<2x128xf32>
    %cst_28 = arith.constant 1.000000e+00 : f32
    %60 = vector.broadcast %cst_28 : f32 to vector<2x128xf32>
    %61 = arith.addf %60, %59 : vector<2x128xf32>
    %62 = arith.divf %60, %61 : vector<2x128xf32>
    %63 = vector.extract_strided_slice %56 {offsets = [0, 128], sizes = [2, 128], strides = [1, 1]} : vector<2x512xf32> to vector<2x128xf32>
    %64 = arith.negf %63 : vector<2x128xf32>
    %65 = math.exp %64 : vector<2x128xf32>
    %cst_29 = arith.constant 1.000000e+00 : f32
    %66 = vector.broadcast %cst_29 : f32 to vector<2x128xf32>
    %67 = arith.addf %66, %65 : vector<2x128xf32>
    %68 = arith.divf %66, %67 : vector<2x128xf32>
    %69 = vector.extract_strided_slice %56 {offsets = [0, 256], sizes = [2, 128], strides = [1, 1]} : vector<2x512xf32> to vector<2x128xf32>
    %70 = math.tanh %69 : vector<2x128xf32>
    %71 = vector.extract_strided_slice %56 {offsets = [0, 384], sizes = [2, 128], strides = [1, 1]} : vector<2x512xf32> to vector<2x128xf32>
    %72 = arith.negf %71 : vector<2x128xf32>
    %73 = math.exp %72 : vector<2x128xf32>
    %cst_30 = arith.constant 1.000000e+00 : f32
    %74 = vector.broadcast %cst_30 : f32 to vector<2x128xf32>
    %75 = arith.addf %74, %73 : vector<2x128xf32>
    %76 = arith.divf %74, %75 : vector<2x128xf32>
    %77 = arith.mulf %68, %50 : vector<2x128xf32>
    %78 = arith.mulf %62, %70 : vector<2x128xf32>
    %79 = arith.addf %77, %78 : vector<2x128xf32>
    %80 = math.tanh %79 : vector<2x128xf32>
    %81 = arith.mulf %76, %80 : vector<2x128xf32>
    %c2 = arith.constant 2 : index
    %c0_31 = arith.constant 0 : index
    %82 = vector.load %arg12[%c2, %c0_31] : memref<16x128xf32, #tpu.memory_space<vmem>>, vector<2x128xf32>
    tpu.vector_store %arg12[%c2, %c0_31], %81 {strides = array<i32>} : memref<16x128xf32, #tpu.memory_space<vmem>>, vector<2x128xf32>,
    %83 = vector.extract_strided_slice %20 {offsets = [4, 0], sizes = [2, 512], strides = [1, 1]} : vector<16x512xf32> to vector<2x512xf32>
    %cst_32 = arith.constant dense<0.000000e+00> : vector<2x512xf32>
    %84 = tpu.matmul %81, %22, %cst_32 {dimension_numbers = #tpu.dot_dimension_numbers<[1], [0], [0], [1], [0, 0, 1, 1], [], []>} : vector<2x128xf32>, vector<128x512xf32>, vector<2x512xf32> -> vector<2x512xf32>
    %85 = arith.addf %83, %84 : vector<2x512xf32>
    %86 = vector.extract_strided_slice %85 {offsets = [0, 0], sizes = [2, 128], strides = [1, 1]} : vector<2x512xf32> to vector<2x128xf32>
    %87 = arith.negf %86 : vector<2x128xf32>
    %88 = math.exp %87 : vector<2x128xf32>
    %cst_33 = arith.constant 1.000000e+00 : f32
    %89 = vector.broadcast %cst_33 : f32 to vector<2x128xf32>
    %90 = arith.addf %89, %88 : vector<2x128xf32>
    %91 = arith.divf %89, %90 : vector<2x128xf32>
    %92 = vector.extract_strided_slice %85 {offsets = [0, 128], sizes = [2, 128], strides = [1, 1]} : vector<2x512xf32> to vector<2x128xf32>
    %93 = arith.negf %92 : vector<2x128xf32>
    %94 = math.exp %93 : vector<2x128xf32>
    %cst_34 = arith.constant 1.000000e+00 : f32
    %95 = vector.broadcast %cst_34 : f32 to vector<2x128xf32>
    %96 = arith.addf %95, %94 : vector<2x128xf32>
    %97 = arith.divf %95, %96 : vector<2x128xf32>
    %98 = vector.extract_strided_slice %85 {offsets = [0, 256], sizes = [2, 128], strides = [1, 1]} : vector<2x512xf32> to vector<2x128xf32>
    %99 = math.tanh %98 : vector<2x128xf32>
    %100 = vector.extract_strided_slice %85 {offsets = [0, 384], sizes = [2, 128], strides = [1, 1]} : vector<2x512xf32> to vector<2x128xf32>
    %101 = arith.negf %100 : vector<2x128xf32>
    %102 = math.exp %101 : vector<2x128xf32>
    %cst_35 = arith.constant 1.000000e+00 : f32
    %103 = vector.broadcast %cst_35 : f32 to vector<2x128xf32>
    %104 = arith.addf %103, %102 : vector<2x128xf32>
    %105 = arith.divf %103, %104 : vector<2x128xf32>
    %106 = arith.mulf %97, %79 : vector<2x128xf32>
    %107 = arith.mulf %91, %99 : vector<2x128xf32>
    %108 = arith.addf %106, %107 : vector<2x128xf32>
    %109 = math.tanh %108 : vector<2x128xf32>
    %110 = arith.mulf %105, %109 : vector<2x128xf32>
    %c4 = arith.constant 4 : index
    %c0_36 = arith.constant 0 : index
    %111 = vector.load %arg12[%c4, %c0_36] : memref<16x128xf32, #tpu.memory_space<vmem>>, vector<2x128xf32>
    tpu.vector_store %arg12[%c4, %c0_36], %110 {strides = array<i32>} : memref<16x128xf32, #tpu.memory_space<vmem>>, vector<2x128xf32>,
    %112 = vector.extract_strided_slice %20 {offsets = [6, 0], sizes = [2, 512], strides = [1, 1]} : vector<16x512xf32> to vector<2x512xf32>
    %cst_37 = arith.constant dense<0.000000e+00> : vector<2x512xf32>
    %113 = tpu.matmul %110, %22, %cst_37 {dimension_numbers = #tpu.dot_dimension_numbers<[1], [0], [0], [1], [0, 0, 1, 1], [], []>} : vector<2x128xf32>, vector<128x512xf32>, vector<2x512xf32> -> vector<2x512xf32>
    %114 = arith.addf %112, %113 : vector<2x512xf32>
    %115 = vector.extract_strided_slice %114 {offsets = [0, 0], sizes = [2, 128], strides = [1, 1]} : vector<2x512xf32> to vector<2x128xf32>
    %116 = arith.negf %115 : vector<2x128xf32>
    %117 = math.exp %116 : vector<2x128xf32>
    %cst_38 = arith.constant 1.000000e+00 : f32
    %118 = vector.broadcast %cst_38 : f32 to vector<2x128xf32>
    %119 = arith.addf %118, %117 : vector<2x128xf32>
    %120 = arith.divf %118, %119 : vector<2x128xf32>
    %121 = vector.extract_strided_slice %114 {offsets = [0, 128], sizes = [2, 128], strides = [1, 1]} : vector<2x512xf32> to vector<2x128xf32>
    %122 = arith.negf %121 : vector<2x128xf32>
    %123 = math.exp %122 : vector<2x128xf32>
    %cst_39 = arith.constant 1.000000e+00 : f32
    %124 = vector.broadcast %cst_39 : f32 to vector<2x128xf32>
    %125 = arith.addf %124, %123 : vector<2x128xf32>
    %126 = arith.divf %124, %125 : vector<2x128xf32>
    %127 = vector.extract_strided_slice %114 {offsets = [0, 256], sizes = [2, 128], strides = [1, 1]} : vector<2x512xf32> to vector<2x128xf32>
    %128 = math.tanh %127 : vector<2x128xf32>
    %129 = vector.extract_strided_slice %114 {offsets = [0, 384], sizes = [2, 128], strides = [1, 1]} : vector<2x512xf32> to vector<2x128xf32>
    %130 = arith.negf %129 : vector<2x128xf32>
    %131 = math.exp %130 : vector<2x128xf32>
    %cst_40 = arith.constant 1.000000e+00 : f32
    %132 = vector.broadcast %cst_40 : f32 to vector<2x128xf32>
    %133 = arith.addf %132, %131 : vector<2x128xf32>
    %134 = arith.divf %132, %133 : vector<2x128xf32>
    %135 = arith.mulf %126, %108 : vector<2x128xf32>
    %136 = arith.mulf %120, %128 : vector<2x128xf32>
    %137 = arith.addf %135, %136 : vector<2x128xf32>
    %138 = math.tanh %137 : vector<2x128xf32>
    %139 = arith.mulf %134, %138 : vector<2x128xf32>
    %c6 = arith.constant 6 : index
    %c0_41 = arith.constant 0 : index
    %140 = vector.load %arg12[%c6, %c0_41] : memref<16x128xf32, #tpu.memory_space<vmem>>, vector<2x128xf32>
    tpu.vector_store %arg12[%c6, %c0_41], %139 {strides = array<i32>} : memref<16x128xf32, #tpu.memory_space<vmem>>, vector<2x128xf32>,
    %141 = vector.extract_strided_slice %20 {offsets = [8, 0], sizes = [2, 512], strides = [1, 1]} : vector<16x512xf32> to vector<2x512xf32>
    %cst_42 = arith.constant dense<0.000000e+00> : vector<2x512xf32>
    %142 = tpu.matmul %139, %22, %cst_42 {dimension_numbers = #tpu.dot_dimension_numbers<[1], [0], [0], [1], [0, 0, 1, 1], [], []>} : vector<2x128xf32>, vector<128x512xf32>, vector<2x512xf32> -> vector<2x512xf32>
    %143 = arith.addf %141, %142 : vector<2x512xf32>
    %144 = vector.extract_strided_slice %143 {offsets = [0, 0], sizes = [2, 128], strides = [1, 1]} : vector<2x512xf32> to vector<2x128xf32>
    %145 = arith.negf %144 : vector<2x128xf32>
    %146 = math.exp %145 : vector<2x128xf32>
    %cst_43 = arith.constant 1.000000e+00 : f32
    %147 = vector.broadcast %cst_43 : f32 to vector<2x128xf32>
    %148 = arith.addf %147, %146 : vector<2x128xf32>
    %149 = arith.divf %147, %148 : vector<2x128xf32>
    %150 = vector.extract_strided_slice %143 {offsets = [0, 128], sizes = [2, 128], strides = [1, 1]} : vector<2x512xf32> to vector<2x128xf32>
    %151 = arith.negf %150 : vector<2x128xf32>
    %152 = math.exp %151 : vector<2x128xf32>
    %cst_44 = arith.constant 1.000000e+00 : f32
    %153 = vector.broadcast %cst_44 : f32 to vector<2x128xf32>
    %154 = arith.addf %153, %152 : vector<2x128xf32>
    %155 = arith.divf %153, %154 : vector<2x128xf32>
    %156 = vector.extract_strided_slice %143 {offsets = [0, 256], sizes = [2, 128], strides = [1, 1]} : vector<2x512xf32> to vector<2x128xf32>
    %157 = math.tanh %156 : vector<2x128xf32>
    %158 = vector.extract_strided_slice %143 {offsets = [0, 384], sizes = [2, 128], strides = [1, 1]} : vector<2x512xf32> to vector<2x128xf32>
    %159 = arith.negf %158 : vector<2x128xf32>
    %160 = math.exp %159 : vector<2x128xf32>
    %cst_45 = arith.constant 1.000000e+00 : f32
    %161 = vector.broadcast %cst_45 : f32 to vector<2x128xf32>
    %162 = arith.addf %161, %160 : vector<2x128xf32>
    %163 = arith.divf %161, %162 : vector<2x128xf32>
    %164 = arith.mulf %155, %137 : vector<2x128xf32>
    %165 = arith.mulf %149, %157 : vector<2x128xf32>
    %166 = arith.addf %164, %165 : vector<2x128xf32>
    %167 = math.tanh %166 : vector<2x128xf32>
    %168 = arith.mulf %163, %167 : vector<2x128xf32>
    %c8 = arith.constant 8 : index
    %c0_46 = arith.constant 0 : index
    %169 = vector.load %arg12[%c8, %c0_46] : memref<16x128xf32, #tpu.memory_space<vmem>>, vector<2x128xf32>
    tpu.vector_store %arg12[%c8, %c0_46], %168 {strides = array<i32>} : memref<16x128xf32, #tpu.memory_space<vmem>>, vector<2x128xf32>,
    %170 = vector.extract_strided_slice %20 {offsets = [10, 0], sizes = [2, 512], strides = [1, 1]} : vector<16x512xf32> to vector<2x512xf32>
    %cst_47 = arith.constant dense<0.000000e+00> : vector<2x512xf32>
    %171 = tpu.matmul %168, %22, %cst_47 {dimension_numbers = #tpu.dot_dimension_numbers<[1], [0], [0], [1], [0, 0, 1, 1], [], []>} : vector<2x128xf32>, vector<128x512xf32>, vector<2x512xf32> -> vector<2x512xf32>
    %172 = arith.addf %170, %171 : vector<2x512xf32>
    %173 = vector.extract_strided_slice %172 {offsets = [0, 0], sizes = [2, 128], strides = [1, 1]} : vector<2x512xf32> to vector<2x128xf32>
    %174 = arith.negf %173 : vector<2x128xf32>
    %175 = math.exp %174 : vector<2x128xf32>
    %cst_48 = arith.constant 1.000000e+00 : f32
    %176 = vector.broadcast %cst_48 : f32 to vector<2x128xf32>
    %177 = arith.addf %176, %175 : vector<2x128xf32>
    %178 = arith.divf %176, %177 : vector<2x128xf32>
    %179 = vector.extract_strided_slice %172 {offsets = [0, 128], sizes = [2, 128], strides = [1, 1]} : vector<2x512xf32> to vector<2x128xf32>
    %180 = arith.negf %179 : vector<2x128xf32>
    %181 = math.exp %180 : vector<2x128xf32>
    %cst_49 = arith.constant 1.000000e+00 : f32
    %182 = vector.broadcast %cst_49 : f32 to vector<2x128xf32>
    %183 = arith.addf %182, %181 : vector<2x128xf32>
    %184 = arith.divf %182, %183 : vector<2x128xf32>
    %185 = vector.extract_strided_slice %172 {offsets = [0, 256], sizes = [2, 128], strides = [1, 1]} : vector<2x512xf32> to vector<2x128xf32>
    %186 = math.tanh %185 : vector<2x128xf32>
    %187 = vector.extract_strided_slice %172 {offsets = [0, 384], sizes = [2, 128], strides = [1, 1]} : vector<2x512xf32> to vector<2x128xf32>
    %188 = arith.negf %187 : vector<2x128xf32>
    %189 = math.exp %188 : vector<2x128xf32>
    %cst_50 = arith.constant 1.000000e+00 : f32
    %190 = vector.broadcast %cst_50 : f32 to vector<2x128xf32>
    %191 = arith.addf %190, %189 : vector<2x128xf32>
    %192 = arith.divf %190, %191 : vector<2x128xf32>
    %193 = arith.mulf %184, %166 : vector<2x128xf32>
    %194 = arith.mulf %178, %186 : vector<2x128xf32>
    %195 = arith.addf %193, %194 : vector<2x128xf32>
    %196 = math.tanh %195 : vector<2x128xf32>
    %197 = arith.mulf %192, %196 : vector<2x128xf32>
    %c10 = arith.constant 10 : index
    %c0_51 = arith.constant 0 : index
    %198 = vector.load %arg12[%c10, %c0_51] : memref<16x128xf32, #tpu.memory_space<vmem>>, vector<2x128xf32>
    tpu.vector_store %arg12[%c10, %c0_51], %197 {strides = array<i32>} : memref<16x128xf32, #tpu.memory_space<vmem>>, vector<2x128xf32>,
    %199 = vector.extract_strided_slice %20 {offsets = [12, 0], sizes = [2, 512], strides = [1, 1]} : vector<16x512xf32> to vector<2x512xf32>
    %cst_52 = arith.constant dense<0.000000e+00> : vector<2x512xf32>
    %200 = tpu.matmul %197, %22, %cst_52 {dimension_numbers = #tpu.dot_dimension_numbers<[1], [0], [0], [1], [0, 0, 1, 1], [], []>} : vector<2x128xf32>, vector<128x512xf32>, vector<2x512xf32> -> vector<2x512xf32>
    %201 = arith.addf %199, %200 : vector<2x512xf32>
    %202 = vector.extract_strided_slice %201 {offsets = [0, 0], sizes = [2, 128], strides = [1, 1]} : vector<2x512xf32> to vector<2x128xf32>
    %203 = arith.negf %202 : vector<2x128xf32>
    %204 = math.exp %203 : vector<2x128xf32>
    %cst_53 = arith.constant 1.000000e+00 : f32
    %205 = vector.broadcast %cst_53 : f32 to vector<2x128xf32>
    %206 = arith.addf %205, %204 : vector<2x128xf32>
    %207 = arith.divf %205, %206 : vector<2x128xf32>
    %208 = vector.extract_strided_slice %201 {offsets = [0, 128], sizes = [2, 128], strides = [1, 1]} : vector<2x512xf32> to vector<2x128xf32>
    %209 = arith.negf %208 : vector<2x128xf32>
    %210 = math.exp %209 : vector<2x128xf32>
    %cst_54 = arith.constant 1.000000e+00 : f32
    %211 = vector.broadcast %cst_54 : f32 to vector<2x128xf32>
    %212 = arith.addf %211, %210 : vector<2x128xf32>
    %213 = arith.divf %211, %212 : vector<2x128xf32>
    %214 = vector.extract_strided_slice %201 {offsets = [0, 256], sizes = [2, 128], strides = [1, 1]} : vector<2x512xf32> to vector<2x128xf32>
    %215 = math.tanh %214 : vector<2x128xf32>
    %216 = vector.extract_strided_slice %201 {offsets = [0, 384], sizes = [2, 128], strides = [1, 1]} : vector<2x512xf32> to vector<2x128xf32>
    %217 = arith.negf %216 : vector<2x128xf32>
    %218 = math.exp %217 : vector<2x128xf32>
    %cst_55 = arith.constant 1.000000e+00 : f32
    %219 = vector.broadcast %cst_55 : f32 to vector<2x128xf32>
    %220 = arith.addf %219, %218 : vector<2x128xf32>
    %221 = arith.divf %219, %220 : vector<2x128xf32>
    %222 = arith.mulf %213, %195 : vector<2x128xf32>
    %223 = arith.mulf %207, %215 : vector<2x128xf32>
    %224 = arith.addf %222, %223 : vector<2x128xf32>
    %225 = math.tanh %224 : vector<2x128xf32>
    %226 = arith.mulf %221, %225 : vector<2x128xf32>
    %c12 = arith.constant 12 : index
    %c0_56 = arith.constant 0 : index
    %227 = vector.load %arg12[%c12, %c0_56] : memref<16x128xf32, #tpu.memory_space<vmem>>, vector<2x128xf32>
    tpu.vector_store %arg12[%c12, %c0_56], %226 {strides = array<i32>} : memref<16x128xf32, #tpu.memory_space<vmem>>, vector<2x128xf32>,
    %228 = vector.extract_strided_slice %20 {offsets = [14, 0], sizes = [2, 512], strides = [1, 1]} : vector<16x512xf32> to vector<2x512xf32>
    %cst_57 = arith.constant dense<0.000000e+00> : vector<2x512xf32>
    %229 = tpu.matmul %226, %22, %cst_57 {dimension_numbers = #tpu.dot_dimension_numbers<[1], [0], [0], [1], [0, 0, 1, 1], [], []>} : vector<2x128xf32>, vector<128x512xf32>, vector<2x512xf32> -> vector<2x512xf32>
    %230 = arith.addf %228, %229 : vector<2x512xf32>
    %231 = vector.extract_strided_slice %230 {offsets = [0, 0], sizes = [2, 128], strides = [1, 1]} : vector<2x512xf32> to vector<2x128xf32>
    %232 = arith.negf %231 : vector<2x128xf32>
    %233 = math.exp %232 : vector<2x128xf32>
    %cst_58 = arith.constant 1.000000e+00 : f32
    %234 = vector.broadcast %cst_58 : f32 to vector<2x128xf32>
    %235 = arith.addf %234, %233 : vector<2x128xf32>
    %236 = arith.divf %234, %235 : vector<2x128xf32>
    %237 = vector.extract_strided_slice %230 {offsets = [0, 128], sizes = [2, 128], strides = [1, 1]} : vector<2x512xf32> to vector<2x128xf32>
    %238 = arith.negf %237 : vector<2x128xf32>
    %239 = math.exp %238 : vector<2x128xf32>
    %cst_59 = arith.constant 1.000000e+00 : f32
    %240 = vector.broadcast %cst_59 : f32 to vector<2x128xf32>
    %241 = arith.addf %240, %239 : vector<2x128xf32>
    %242 = arith.divf %240, %241 : vector<2x128xf32>
    %243 = vector.extract_strided_slice %230 {offsets = [0, 256], sizes = [2, 128], strides = [1, 1]} : vector<2x512xf32> to vector<2x128xf32>
    %244 = math.tanh %243 : vector<2x128xf32>
    %245 = vector.extract_strided_slice %230 {offsets = [0, 384], sizes = [2, 128], strides = [1, 1]} : vector<2x512xf32> to vector<2x128xf32>
    %246 = arith.negf %245 : vector<2x128xf32>
    %247 = math.exp %246 : vector<2x128xf32>
    %cst_60 = arith.constant 1.000000e+00 : f32
    %248 = vector.broadcast %cst_60 : f32 to vector<2x128xf32>
    %249 = arith.addf %248, %247 : vector<2x128xf32>
    %250 = arith.divf %248, %249 : vector<2x128xf32>
    %251 = arith.mulf %242, %224 : vector<2x128xf32>
    %252 = arith.mulf %236, %244 : vector<2x128xf32>
    %253 = arith.addf %251, %252 : vector<2x128xf32>
    %254 = math.tanh %253 : vector<2x128xf32>
    %255 = arith.mulf %250, %254 : vector<2x128xf32>
    %c14 = arith.constant 14 : index
    %c0_61 = arith.constant 0 : index
    %256 = vector.load %arg12[%c14, %c0_61] : memref<16x128xf32, #tpu.memory_space<vmem>>, vector<2x128xf32>
    tpu.vector_store %arg12[%c14, %c0_61], %255 {strides = array<i32>} : memref<16x128xf32, #tpu.memory_space<vmem>>, vector<2x128xf32>,
    %c0_62 = arith.constant 0 : index
    %c0_63 = arith.constant 0 : index
    %257 = vector.load %arg12[%c0_62, %c0_63] : memref<16x128xf32, #tpu.memory_space<vmem>>, vector<16x128xf32>
    %c1 = arith.constant 1 : index
    %c0_64 = arith.constant 0 : index
    %c0_65 = arith.constant 0 : index
    %258 = vector.load %arg2[%c1, %c0_64, %c0_65] : memref<4x128x512xf32, #tpu.memory_space<vmem>>, vector<1x128x512xf32>
    %259 = vector.shape_cast %258 : vector<1x128x512xf32> to vector<128x512xf32>
    %cst_66 = arith.constant dense<0.000000e+00> : vector<16x512xf32>
    %260 = tpu.matmul %257, %259, %cst_66 {dimension_numbers = #tpu.dot_dimension_numbers<[1], [0], [0], [1], [0, 0, 1, 1], [], []>} : vector<16x128xf32>, vector<128x512xf32>, vector<16x512xf32> -> vector<16x512xf32>
    %c1_67 = arith.constant 1 : index
    %c0_68 = arith.constant 0 : index
    %c0_69 = arith.constant 0 : index
    %261 = vector.load %arg4[%c1_67, %c0_68, %c0_69] : memref<4x1x512xf32, #tpu.memory_space<vmem>>, vector<1x1x512xf32>
    %262 = vector.shape_cast %261 : vector<1x1x512xf32> to vector<1x512xf32>
    %263 = vector.broadcast %262 : vector<1x512xf32> to vector<16x512xf32>
    %264 = arith.addf %260, %263 : vector<16x512xf32>
    %c1_70 = arith.constant 1 : index
    %c0_71 = arith.constant 0 : index
    %c0_72 = arith.constant 0 : index
    %265 = vector.load %arg3[%c1_70, %c0_71, %c0_72] : memref<4x128x512xf32, #tpu.memory_space<vmem>>, vector<1x128x512xf32>
    %266 = vector.shape_cast %265 : vector<1x128x512xf32> to vector<128x512xf32>
    %cst_73 = arith.constant 0.000000e+00 : f32
    %267 = vector.broadcast %cst_73 : f32 to vector<2x128xf32>
    %cst_74 = arith.constant 0.000000e+00 : f32
    %268 = vector.broadcast %cst_74 : f32 to vector<2x128xf32>
    %269 = vector.extract_strided_slice %264 {offsets = [0, 0], sizes = [2, 512], strides = [1, 1]} : vector<16x512xf32> to vector<2x512xf32>
    %cst_75 = arith.constant dense<0.000000e+00> : vector<2x512xf32>
    %270 = tpu.matmul %267, %266, %cst_75 {dimension_numbers = #tpu.dot_dimension_numbers<[1], [0], [0], [1], [0, 0, 1, 1], [], []>} : vector<2x128xf32>, vector<128x512xf32>, vector<2x512xf32> -> vector<2x512xf32>
    %271 = arith.addf %269, %270 : vector<2x512xf32>
    %272 = vector.extract_strided_slice %271 {offsets = [0, 0], sizes = [2, 128], strides = [1, 1]} : vector<2x512xf32> to vector<2x128xf32>
    %273 = arith.negf %272 : vector<2x128xf32>
    %274 = math.exp %273 : vector<2x128xf32>
    %cst_76 = arith.constant 1.000000e+00 : f32
    %275 = vector.broadcast %cst_76 : f32 to vector<2x128xf32>
    %276 = arith.addf %275, %274 : vector<2x128xf32>
    %277 = arith.divf %275, %276 : vector<2x128xf32>
    %278 = vector.extract_strided_slice %271 {offsets = [0, 128], sizes = [2, 128], strides = [1, 1]} : vector<2x512xf32> to vector<2x128xf32>
    %279 = arith.negf %278 : vector<2x128xf32>
    %280 = math.exp %279 : vector<2x128xf32>
    %cst_77 = arith.constant 1.000000e+00 : f32
    %281 = vector.broadcast %cst_77 : f32 to vector<2x128xf32>
    %282 = arith.addf %281, %280 : vector<2x128xf32>
    %283 = arith.divf %281, %282 : vector<2x128xf32>
    %284 = vector.extract_strided_slice %271 {offsets = [0, 256], sizes = [2, 128], strides = [1, 1]} : vector<2x512xf32> to vector<2x128xf32>
    %285 = math.tanh %284 : vector<2x128xf32>
    %286 = vector.extract_strided_slice %271 {offsets = [0, 384], sizes = [2, 128], strides = [1, 1]} : vector<2x512xf32> to vector<2x128xf32>
    %287 = arith.negf %286 : vector<2x128xf32>
    %288 = math.exp %287 : vector<2x128xf32>
    %cst_78 = arith.constant 1.000000e+00 : f32
    %289 = vector.broadcast %cst_78 : f32 to vector<2x128xf32>
    %290 = arith.addf %289, %288 : vector<2x128xf32>
    %291 = arith.divf %289, %290 : vector<2x128xf32>
    %292 = arith.mulf %283, %268 : vector<2x128xf32>
    %293 = arith.mulf %277, %285 : vector<2x128xf32>
    %294 = arith.addf %292, %293 : vector<2x128xf32>
    %295 = math.tanh %294 : vector<2x128xf32>
    %296 = arith.mulf %291, %295 : vector<2x128xf32>
    %c0_79 = arith.constant 0 : index
    %c0_80 = arith.constant 0 : index
    %297 = vector.load %arg12[%c0_79, %c0_80] : memref<16x128xf32, #tpu.memory_space<vmem>>, vector<2x128xf32>
    tpu.vector_store %arg12[%c0_79, %c0_80], %296 {strides = array<i32>} : memref<16x128xf32, #tpu.memory_space<vmem>>, vector<2x128xf32>,
    %298 = vector.extract_strided_slice %264 {offsets = [2, 0], sizes = [2, 512], strides = [1, 1]} : vector<16x512xf32> to vector<2x512xf32>
    %cst_81 = arith.constant dense<0.000000e+00> : vector<2x512xf32>
    %299 = tpu.matmul %296, %266, %cst_81 {dimension_numbers = #tpu.dot_dimension_numbers<[1], [0], [0], [1], [0, 0, 1, 1], [], []>} : vector<2x128xf32>, vector<128x512xf32>, vector<2x512xf32> -> vector<2x512xf32>
    %300 = arith.addf %298, %299 : vector<2x512xf32>
    %301 = vector.extract_strided_slice %300 {offsets = [0, 0], sizes = [2, 128], strides = [1, 1]} : vector<2x512xf32> to vector<2x128xf32>
    %302 = arith.negf %301 : vector<2x128xf32>
    %303 = math.exp %302 : vector<2x128xf32>
    %cst_82 = arith.constant 1.000000e+00 : f32
    %304 = vector.broadcast %cst_82 : f32 to vector<2x128xf32>
    %305 = arith.addf %304, %303 : vector<2x128xf32>
    %306 = arith.divf %304, %305 : vector<2x128xf32>
    %307 = vector.extract_strided_slice %300 {offsets = [0, 128], sizes = [2, 128], strides = [1, 1]} : vector<2x512xf32> to vector<2x128xf32>
    %308 = arith.negf %307 : vector<2x128xf32>
    %309 = math.exp %308 : vector<2x128xf32>
    %cst_83 = arith.constant 1.000000e+00 : f32
    %310 = vector.broadcast %cst_83 : f32 to vector<2x128xf32>
    %311 = arith.addf %310, %309 : vector<2x128xf32>
    %312 = arith.divf %310, %311 : vector<2x128xf32>
    %313 = vector.extract_strided_slice %300 {offsets = [0, 256], sizes = [2, 128], strides = [1, 1]} : vector<2x512xf32> to vector<2x128xf32>
    %314 = math.tanh %313 : vector<2x128xf32>
    %315 = vector.extract_strided_slice %300 {offsets = [0, 384], sizes = [2, 128], strides = [1, 1]} : vector<2x512xf32> to vector<2x128xf32>
    %316 = arith.negf %315 : vector<2x128xf32>
    %317 = math.exp %316 : vector<2x128xf32>
    %cst_84 = arith.constant 1.000000e+00 : f32
    %318 = vector.broadcast %cst_84 : f32 to vector<2x128xf32>
    %319 = arith.addf %318, %317 : vector<2x128xf32>
    %320 = arith.divf %318, %319 : vector<2x128xf32>
    %321 = arith.mulf %312, %294 : vector<2x128xf32>
    %322 = arith.mulf %306, %314 : vector<2x128xf32>
    %323 = arith.addf %321, %322 : vector<2x128xf32>
    %324 = math.tanh %323 : vector<2x128xf32>
    %325 = arith.mulf %320, %324 : vector<2x128xf32>
    %c2_85 = arith.constant 2 : index
    %c0_86 = arith.constant 0 : index
    %326 = vector.load %arg12[%c2_85, %c0_86] : memref<16x128xf32, #tpu.memory_space<vmem>>, vector<2x128xf32>
    tpu.vector_store %arg12[%c2_85, %c0_86], %325 {strides = array<i32>} : memref<16x128xf32, #tpu.memory_space<vmem>>, vector<2x128xf32>,
    %327 = vector.extract_strided_slice %264 {offsets = [4, 0], sizes = [2, 512], strides = [1, 1]} : vector<16x512xf32> to vector<2x512xf32>
    %cst_87 = arith.constant dense<0.000000e+00> : vector<2x512xf32>
    %328 = tpu.matmul %325, %266, %cst_87 {dimension_numbers = #tpu.dot_dimension_numbers<[1], [0], [0], [1], [0, 0, 1, 1], [], []>} : vector<2x128xf32>, vector<128x512xf32>, vector<2x512xf32> -> vector<2x512xf32>
    %329 = arith.addf %327, %328 : vector<2x512xf32>
    %330 = vector.extract_strided_slice %329 {offsets = [0, 0], sizes = [2, 128], strides = [1, 1]} : vector<2x512xf32> to vector<2x128xf32>
    %331 = arith.negf %330 : vector<2x128xf32>
    %332 = math.exp %331 : vector<2x128xf32>
    %cst_88 = arith.constant 1.000000e+00 : f32
    %333 = vector.broadcast %cst_88 : f32 to vector<2x128xf32>
    %334 = arith.addf %333, %332 : vector<2x128xf32>
    %335 = arith.divf %333, %334 : vector<2x128xf32>
    %336 = vector.extract_strided_slice %329 {offsets = [0, 128], sizes = [2, 128], strides = [1, 1]} : vector<2x512xf32> to vector<2x128xf32>
    %337 = arith.negf %336 : vector<2x128xf32>
    %338 = math.exp %337 : vector<2x128xf32>
    %cst_89 = arith.constant 1.000000e+00 : f32
    %339 = vector.broadcast %cst_89 : f32 to vector<2x128xf32>
    %340 = arith.addf %339, %338 : vector<2x128xf32>
    %341 = arith.divf %339, %340 : vector<2x128xf32>
    %342 = vector.extract_strided_slice %329 {offsets = [0, 256], sizes = [2, 128], strides = [1, 1]} : vector<2x512xf32> to vector<2x128xf32>
    %343 = math.tanh %342 : vector<2x128xf32>
    %344 = vector.extract_strided_slice %329 {offsets = [0, 384], sizes = [2, 128], strides = [1, 1]} : vector<2x512xf32> to vector<2x128xf32>
    %345 = arith.negf %344 : vector<2x128xf32>
    %346 = math.exp %345 : vector<2x128xf32>
    %cst_90 = arith.constant 1.000000e+00 : f32
    %347 = vector.broadcast %cst_90 : f32 to vector<2x128xf32>
    %348 = arith.addf %347, %346 : vector<2x128xf32>
    %349 = arith.divf %347, %348 : vector<2x128xf32>
    %350 = arith.mulf %341, %323 : vector<2x128xf32>
    %351 = arith.mulf %335, %343 : vector<2x128xf32>
    %352 = arith.addf %350, %351 : vector<2x128xf32>
    %353 = math.tanh %352 : vector<2x128xf32>
    %354 = arith.mulf %349, %353 : vector<2x128xf32>
    %c4_91 = arith.constant 4 : index
    %c0_92 = arith.constant 0 : index
    %355 = vector.load %arg12[%c4_91, %c0_92] : memref<16x128xf32, #tpu.memory_space<vmem>>, vector<2x128xf32>
    tpu.vector_store %arg12[%c4_91, %c0_92], %354 {strides = array<i32>} : memref<16x128xf32, #tpu.memory_space<vmem>>, vector<2x128xf32>,
    %356 = vector.extract_strided_slice %264 {offsets = [6, 0], sizes = [2, 512], strides = [1, 1]} : vector<16x512xf32> to vector<2x512xf32>
    %cst_93 = arith.constant dense<0.000000e+00> : vector<2x512xf32>
    %357 = tpu.matmul %354, %266, %cst_93 {dimension_numbers = #tpu.dot_dimension_numbers<[1], [0], [0], [1], [0, 0, 1, 1], [], []>} : vector<2x128xf32>, vector<128x512xf32>, vector<2x512xf32> -> vector<2x512xf32>
    %358 = arith.addf %356, %357 : vector<2x512xf32>
    %359 = vector.extract_strided_slice %358 {offsets = [0, 0], sizes = [2, 128], strides = [1, 1]} : vector<2x512xf32> to vector<2x128xf32>
    %360 = arith.negf %359 : vector<2x128xf32>
    %361 = math.exp %360 : vector<2x128xf32>
    %cst_94 = arith.constant 1.000000e+00 : f32
    %362 = vector.broadcast %cst_94 : f32 to vector<2x128xf32>
    %363 = arith.addf %362, %361 : vector<2x128xf32>
    %364 = arith.divf %362, %363 : vector<2x128xf32>
    %365 = vector.extract_strided_slice %358 {offsets = [0, 128], sizes = [2, 128], strides = [1, 1]} : vector<2x512xf32> to vector<2x128xf32>
    %366 = arith.negf %365 : vector<2x128xf32>
    %367 = math.exp %366 : vector<2x128xf32>
    %cst_95 = arith.constant 1.000000e+00 : f32
    %368 = vector.broadcast %cst_95 : f32 to vector<2x128xf32>
    %369 = arith.addf %368, %367 : vector<2x128xf32>
    %370 = arith.divf %368, %369 : vector<2x128xf32>
    %371 = vector.extract_strided_slice %358 {offsets = [0, 256], sizes = [2, 128], strides = [1, 1]} : vector<2x512xf32> to vector<2x128xf32>
    %372 = math.tanh %371 : vector<2x128xf32>
    %373 = vector.extract_strided_slice %358 {offsets = [0, 384], sizes = [2, 128], strides = [1, 1]} : vector<2x512xf32> to vector<2x128xf32>
    %374 = arith.negf %373 : vector<2x128xf32>
    %375 = math.exp %374 : vector<2x128xf32>
    %cst_96 = arith.constant 1.000000e+00 : f32
    %376 = vector.broadcast %cst_96 : f32 to vector<2x128xf32>
    %377 = arith.addf %376, %375 : vector<2x128xf32>
    %378 = arith.divf %376, %377 : vector<2x128xf32>
    %379 = arith.mulf %370, %352 : vector<2x128xf32>
    %380 = arith.mulf %364, %372 : vector<2x128xf32>
    %381 = arith.addf %379, %380 : vector<2x128xf32>
    %382 = math.tanh %381 : vector<2x128xf32>
    %383 = arith.mulf %378, %382 : vector<2x128xf32>
    %c6_97 = arith.constant 6 : index
    %c0_98 = arith.constant 0 : index
    %384 = vector.load %arg12[%c6_97, %c0_98] : memref<16x128xf32, #tpu.memory_space<vmem>>, vector<2x128xf32>
    tpu.vector_store %arg12[%c6_97, %c0_98], %383 {strides = array<i32>} : memref<16x128xf32, #tpu.memory_space<vmem>>, vector<2x128xf32>,
    %385 = vector.extract_strided_slice %264 {offsets = [8, 0], sizes = [2, 512], strides = [1, 1]} : vector<16x512xf32> to vector<2x512xf32>
    %cst_99 = arith.constant dense<0.000000e+00> : vector<2x512xf32>
    %386 = tpu.matmul %383, %266, %cst_99 {dimension_numbers = #tpu.dot_dimension_numbers<[1], [0], [0], [1], [0, 0, 1, 1], [], []>} : vector<2x128xf32>, vector<128x512xf32>, vector<2x512xf32> -> vector<2x512xf32>
    %387 = arith.addf %385, %386 : vector<2x512xf32>
    %388 = vector.extract_strided_slice %387 {offsets = [0, 0], sizes = [2, 128], strides = [1, 1]} : vector<2x512xf32> to vector<2x128xf32>
    %389 = arith.negf %388 : vector<2x128xf32>
    %390 = math.exp %389 : vector<2x128xf32>
    %cst_100 = arith.constant 1.000000e+00 : f32
    %391 = vector.broadcast %cst_100 : f32 to vector<2x128xf32>
    %392 = arith.addf %391, %390 : vector<2x128xf32>
    %393 = arith.divf %391, %392 : vector<2x128xf32>
    %394 = vector.extract_strided_slice %387 {offsets = [0, 128], sizes = [2, 128], strides = [1, 1]} : vector<2x512xf32> to vector<2x128xf32>
    %395 = arith.negf %394 : vector<2x128xf32>
    %396 = math.exp %395 : vector<2x128xf32>
    %cst_101 = arith.constant 1.000000e+00 : f32
    %397 = vector.broadcast %cst_101 : f32 to vector<2x128xf32>
    %398 = arith.addf %397, %396 : vector<2x128xf32>
    %399 = arith.divf %397, %398 : vector<2x128xf32>
    %400 = vector.extract_strided_slice %387 {offsets = [0, 256], sizes = [2, 128], strides = [1, 1]} : vector<2x512xf32> to vector<2x128xf32>
    %401 = math.tanh %400 : vector<2x128xf32>
    %402 = vector.extract_strided_slice %387 {offsets = [0, 384], sizes = [2, 128], strides = [1, 1]} : vector<2x512xf32> to vector<2x128xf32>
    %403 = arith.negf %402 : vector<2x128xf32>
    %404 = math.exp %403 : vector<2x128xf32>
    %cst_102 = arith.constant 1.000000e+00 : f32
    %405 = vector.broadcast %cst_102 : f32 to vector<2x128xf32>
    %406 = arith.addf %405, %404 : vector<2x128xf32>
    %407 = arith.divf %405, %406 : vector<2x128xf32>
    %408 = arith.mulf %399, %381 : vector<2x128xf32>
    %409 = arith.mulf %393, %401 : vector<2x128xf32>
    %410 = arith.addf %408, %409 : vector<2x128xf32>
    %411 = math.tanh %410 : vector<2x128xf32>
    %412 = arith.mulf %407, %411 : vector<2x128xf32>
    %c8_103 = arith.constant 8 : index
    %c0_104 = arith.constant 0 : index
    %413 = vector.load %arg12[%c8_103, %c0_104] : memref<16x128xf32, #tpu.memory_space<vmem>>, vector<2x128xf32>
    tpu.vector_store %arg12[%c8_103, %c0_104], %412 {strides = array<i32>} : memref<16x128xf32, #tpu.memory_space<vmem>>, vector<2x128xf32>,
    %414 = vector.extract_strided_slice %264 {offsets = [10, 0], sizes = [2, 512], strides = [1, 1]} : vector<16x512xf32> to vector<2x512xf32>
    %cst_105 = arith.constant dense<0.000000e+00> : vector<2x512xf32>
    %415 = tpu.matmul %412, %266, %cst_105 {dimension_numbers = #tpu.dot_dimension_numbers<[1], [0], [0], [1], [0, 0, 1, 1], [], []>} : vector<2x128xf32>, vector<128x512xf32>, vector<2x512xf32> -> vector<2x512xf32>
    %416 = arith.addf %414, %415 : vector<2x512xf32>
    %417 = vector.extract_strided_slice %416 {offsets = [0, 0], sizes = [2, 128], strides = [1, 1]} : vector<2x512xf32> to vector<2x128xf32>
    %418 = arith.negf %417 : vector<2x128xf32>
    %419 = math.exp %418 : vector<2x128xf32>
    %cst_106 = arith.constant 1.000000e+00 : f32
    %420 = vector.broadcast %cst_106 : f32 to vector<2x128xf32>
    %421 = arith.addf %420, %419 : vector<2x128xf32>
    %422 = arith.divf %420, %421 : vector<2x128xf32>
    %423 = vector.extract_strided_slice %416 {offsets = [0, 128], sizes = [2, 128], strides = [1, 1]} : vector<2x512xf32> to vector<2x128xf32>
    %424 = arith.negf %423 : vector<2x128xf32>
    %425 = math.exp %424 : vector<2x128xf32>
    %cst_107 = arith.constant 1.000000e+00 : f32
    %426 = vector.broadcast %cst_107 : f32 to vector<2x128xf32>
    %427 = arith.addf %426, %425 : vector<2x128xf32>
    %428 = arith.divf %426, %427 : vector<2x128xf32>
    %429 = vector.extract_strided_slice %416 {offsets = [0, 256], sizes = [2, 128], strides = [1, 1]} : vector<2x512xf32> to vector<2x128xf32>
    %430 = math.tanh %429 : vector<2x128xf32>
    %431 = vector.extract_strided_slice %416 {offsets = [0, 384], sizes = [2, 128], strides = [1, 1]} : vector<2x512xf32> to vector<2x128xf32>
    %432 = arith.negf %431 : vector<2x128xf32>
    %433 = math.exp %432 : vector<2x128xf32>
    %cst_108 = arith.constant 1.000000e+00 : f32
    %434 = vector.broadcast %cst_108 : f32 to vector<2x128xf32>
    %435 = arith.addf %434, %433 : vector<2x128xf32>
    %436 = arith.divf %434, %435 : vector<2x128xf32>
    %437 = arith.mulf %428, %410 : vector<2x128xf32>
    %438 = arith.mulf %422, %430 : vector<2x128xf32>
    %439 = arith.addf %437, %438 : vector<2x128xf32>
    %440 = math.tanh %439 : vector<2x128xf32>
    %441 = arith.mulf %436, %440 : vector<2x128xf32>
    %c10_109 = arith.constant 10 : index
    %c0_110 = arith.constant 0 : index
    %442 = vector.load %arg12[%c10_109, %c0_110] : memref<16x128xf32, #tpu.memory_space<vmem>>, vector<2x128xf32>
    tpu.vector_store %arg12[%c10_109, %c0_110], %441 {strides = array<i32>} : memref<16x128xf32, #tpu.memory_space<vmem>>, vector<2x128xf32>,
    %443 = vector.extract_strided_slice %264 {offsets = [12, 0], sizes = [2, 512], strides = [1, 1]} : vector<16x512xf32> to vector<2x512xf32>
    %cst_111 = arith.constant dense<0.000000e+00> : vector<2x512xf32>
    %444 = tpu.matmul %441, %266, %cst_111 {dimension_numbers = #tpu.dot_dimension_numbers<[1], [0], [0], [1], [0, 0, 1, 1], [], []>} : vector<2x128xf32>, vector<128x512xf32>, vector<2x512xf32> -> vector<2x512xf32>
    %445 = arith.addf %443, %444 : vector<2x512xf32>
    %446 = vector.extract_strided_slice %445 {offsets = [0, 0], sizes = [2, 128], strides = [1, 1]} : vector<2x512xf32> to vector<2x128xf32>
    %447 = arith.negf %446 : vector<2x128xf32>
    %448 = math.exp %447 : vector<2x128xf32>
    %cst_112 = arith.constant 1.000000e+00 : f32
    %449 = vector.broadcast %cst_112 : f32 to vector<2x128xf32>
    %450 = arith.addf %449, %448 : vector<2x128xf32>
    %451 = arith.divf %449, %450 : vector<2x128xf32>
    %452 = vector.extract_strided_slice %445 {offsets = [0, 128], sizes = [2, 128], strides = [1, 1]} : vector<2x512xf32> to vector<2x128xf32>
    %453 = arith.negf %452 : vector<2x128xf32>
    %454 = math.exp %453 : vector<2x128xf32>
    %cst_113 = arith.constant 1.000000e+00 : f32
    %455 = vector.broadcast %cst_113 : f32 to vector<2x128xf32>
    %456 = arith.addf %455, %454 : vector<2x128xf32>
    %457 = arith.divf %455, %456 : vector<2x128xf32>
    %458 = vector.extract_strided_slice %445 {offsets = [0, 256], sizes = [2, 128], strides = [1, 1]} : vector<2x512xf32> to vector<2x128xf32>
    %459 = math.tanh %458 : vector<2x128xf32>
    %460 = vector.extract_strided_slice %445 {offsets = [0, 384], sizes = [2, 128], strides = [1, 1]} : vector<2x512xf32> to vector<2x128xf32>
    %461 = arith.negf %460 : vector<2x128xf32>
    %462 = math.exp %461 : vector<2x128xf32>
    %cst_114 = arith.constant 1.000000e+00 : f32
    %463 = vector.broadcast %cst_114 : f32 to vector<2x128xf32>
    %464 = arith.addf %463, %462 : vector<2x128xf32>
    %465 = arith.divf %463, %464 : vector<2x128xf32>
    %466 = arith.mulf %457, %439 : vector<2x128xf32>
    %467 = arith.mulf %451, %459 : vector<2x128xf32>
    %468 = arith.addf %466, %467 : vector<2x128xf32>
    %469 = math.tanh %468 : vector<2x128xf32>
    %470 = arith.mulf %465, %469 : vector<2x128xf32>
    %c12_115 = arith.constant 12 : index
    %c0_116 = arith.constant 0 : index
    %471 = vector.load %arg12[%c12_115, %c0_116] : memref<16x128xf32, #tpu.memory_space<vmem>>, vector<2x128xf32>
    tpu.vector_store %arg12[%c12_115, %c0_116], %470 {strides = array<i32>} : memref<16x128xf32, #tpu.memory_space<vmem>>, vector<2x128xf32>,
    %472 = vector.extract_strided_slice %264 {offsets = [14, 0], sizes = [2, 512], strides = [1, 1]} : vector<16x512xf32> to vector<2x512xf32>
    %cst_117 = arith.constant dense<0.000000e+00> : vector<2x512xf32>
    %473 = tpu.matmul %470, %266, %cst_117 {dimension_numbers = #tpu.dot_dimension_numbers<[1], [0], [0], [1], [0, 0, 1, 1], [], []>} : vector<2x128xf32>, vector<128x512xf32>, vector<2x512xf32> -> vector<2x512xf32>
    %474 = arith.addf %472, %473 : vector<2x512xf32>
    %475 = vector.extract_strided_slice %474 {offsets = [0, 0], sizes = [2, 128], strides = [1, 1]} : vector<2x512xf32> to vector<2x128xf32>
    %476 = arith.negf %475 : vector<2x128xf32>
    %477 = math.exp %476 : vector<2x128xf32>
    %cst_118 = arith.constant 1.000000e+00 : f32
    %478 = vector.broadcast %cst_118 : f32 to vector<2x128xf32>
    %479 = arith.addf %478, %477 : vector<2x128xf32>
    %480 = arith.divf %478, %479 : vector<2x128xf32>
    %481 = vector.extract_strided_slice %474 {offsets = [0, 128], sizes = [2, 128], strides = [1, 1]} : vector<2x512xf32> to vector<2x128xf32>
    %482 = arith.negf %481 : vector<2x128xf32>
    %483 = math.exp %482 : vector<2x128xf32>
    %cst_119 = arith.constant 1.000000e+00 : f32
    %484 = vector.broadcast %cst_119 : f32 to vector<2x128xf32>
    %485 = arith.addf %484, %483 : vector<2x128xf32>
    %486 = arith.divf %484, %485 : vector<2x128xf32>
    %487 = vector.extract_strided_slice %474 {offsets = [0, 256], sizes = [2, 128], strides = [1, 1]} : vector<2x512xf32> to vector<2x128xf32>
    %488 = math.tanh %487 : vector<2x128xf32>
    %489 = vector.extract_strided_slice %474 {offsets = [0, 384], sizes = [2, 128], strides = [1, 1]} : vector<2x512xf32> to vector<2x128xf32>
    %490 = arith.negf %489 : vector<2x128xf32>
    %491 = math.exp %490 : vector<2x128xf32>
    %cst_120 = arith.constant 1.000000e+00 : f32
    %492 = vector.broadcast %cst_120 : f32 to vector<2x128xf32>
    %493 = arith.addf %492, %491 : vector<2x128xf32>
    %494 = arith.divf %492, %493 : vector<2x128xf32>
    %495 = arith.mulf %486, %468 : vector<2x128xf32>
    %496 = arith.mulf %480, %488 : vector<2x128xf32>
    %497 = arith.addf %495, %496 : vector<2x128xf32>
    %498 = math.tanh %497 : vector<2x128xf32>
    %499 = arith.mulf %494, %498 : vector<2x128xf32>
    %c14_121 = arith.constant 14 : index
    %c0_122 = arith.constant 0 : index
    %500 = vector.load %arg12[%c14_121, %c0_122] : memref<16x128xf32, #tpu.memory_space<vmem>>, vector<2x128xf32>
    tpu.vector_store %arg12[%c14_121, %c0_122], %499 {strides = array<i32>} : memref<16x128xf32, #tpu.memory_space<vmem>>, vector<2x128xf32>,
    %c0_123 = arith.constant 0 : index
    %c0_124 = arith.constant 0 : index
    %501 = vector.load %arg12[%c0_123, %c0_124] : memref<16x128xf32, #tpu.memory_space<vmem>>, vector<16x128xf32>
    %c2_125 = arith.constant 2 : index
    %c0_126 = arith.constant 0 : index
    %c0_127 = arith.constant 0 : index
    %502 = vector.load %arg2[%c2_125, %c0_126, %c0_127] : memref<4x128x512xf32, #tpu.memory_space<vmem>>, vector<1x128x512xf32>
    %503 = vector.shape_cast %502 : vector<1x128x512xf32> to vector<128x512xf32>
    %cst_128 = arith.constant dense<0.000000e+00> : vector<16x512xf32>
    %504 = tpu.matmul %501, %503, %cst_128 {dimension_numbers = #tpu.dot_dimension_numbers<[1], [0], [0], [1], [0, 0, 1, 1], [], []>} : vector<16x128xf32>, vector<128x512xf32>, vector<16x512xf32> -> vector<16x512xf32>
    %c2_129 = arith.constant 2 : index
    %c0_130 = arith.constant 0 : index
    %c0_131 = arith.constant 0 : index
    %505 = vector.load %arg4[%c2_129, %c0_130, %c0_131] : memref<4x1x512xf32, #tpu.memory_space<vmem>>, vector<1x1x512xf32>
    %506 = vector.shape_cast %505 : vector<1x1x512xf32> to vector<1x512xf32>
    %507 = vector.broadcast %506 : vector<1x512xf32> to vector<16x512xf32>
    %508 = arith.addf %504, %507 : vector<16x512xf32>
    %c2_132 = arith.constant 2 : index
    %c0_133 = arith.constant 0 : index
    %c0_134 = arith.constant 0 : index
    %509 = vector.load %arg3[%c2_132, %c0_133, %c0_134] : memref<4x128x512xf32, #tpu.memory_space<vmem>>, vector<1x128x512xf32>
    %510 = vector.shape_cast %509 : vector<1x128x512xf32> to vector<128x512xf32>
    %cst_135 = arith.constant 0.000000e+00 : f32
    %511 = vector.broadcast %cst_135 : f32 to vector<2x128xf32>
    %cst_136 = arith.constant 0.000000e+00 : f32
    %512 = vector.broadcast %cst_136 : f32 to vector<2x128xf32>
    %513 = vector.extract_strided_slice %508 {offsets = [0, 0], sizes = [2, 512], strides = [1, 1]} : vector<16x512xf32> to vector<2x512xf32>
    %cst_137 = arith.constant dense<0.000000e+00> : vector<2x512xf32>
    %514 = tpu.matmul %511, %510, %cst_137 {dimension_numbers = #tpu.dot_dimension_numbers<[1], [0], [0], [1], [0, 0, 1, 1], [], []>} : vector<2x128xf32>, vector<128x512xf32>, vector<2x512xf32> -> vector<2x512xf32>
    %515 = arith.addf %513, %514 : vector<2x512xf32>
    %516 = vector.extract_strided_slice %515 {offsets = [0, 0], sizes = [2, 128], strides = [1, 1]} : vector<2x512xf32> to vector<2x128xf32>
    %517 = arith.negf %516 : vector<2x128xf32>
    %518 = math.exp %517 : vector<2x128xf32>
    %cst_138 = arith.constant 1.000000e+00 : f32
    %519 = vector.broadcast %cst_138 : f32 to vector<2x128xf32>
    %520 = arith.addf %519, %518 : vector<2x128xf32>
    %521 = arith.divf %519, %520 : vector<2x128xf32>
    %522 = vector.extract_strided_slice %515 {offsets = [0, 128], sizes = [2, 128], strides = [1, 1]} : vector<2x512xf32> to vector<2x128xf32>
    %523 = arith.negf %522 : vector<2x128xf32>
    %524 = math.exp %523 : vector<2x128xf32>
    %cst_139 = arith.constant 1.000000e+00 : f32
    %525 = vector.broadcast %cst_139 : f32 to vector<2x128xf32>
    %526 = arith.addf %525, %524 : vector<2x128xf32>
    %527 = arith.divf %525, %526 : vector<2x128xf32>
    %528 = vector.extract_strided_slice %515 {offsets = [0, 256], sizes = [2, 128], strides = [1, 1]} : vector<2x512xf32> to vector<2x128xf32>
    %529 = math.tanh %528 : vector<2x128xf32>
    %530 = vector.extract_strided_slice %515 {offsets = [0, 384], sizes = [2, 128], strides = [1, 1]} : vector<2x512xf32> to vector<2x128xf32>
    %531 = arith.negf %530 : vector<2x128xf32>
    %532 = math.exp %531 : vector<2x128xf32>
    %cst_140 = arith.constant 1.000000e+00 : f32
    %533 = vector.broadcast %cst_140 : f32 to vector<2x128xf32>
    %534 = arith.addf %533, %532 : vector<2x128xf32>
    %535 = arith.divf %533, %534 : vector<2x128xf32>
    %536 = arith.mulf %527, %512 : vector<2x128xf32>
    %537 = arith.mulf %521, %529 : vector<2x128xf32>
    %538 = arith.addf %536, %537 : vector<2x128xf32>
    %539 = math.tanh %538 : vector<2x128xf32>
    %540 = arith.mulf %535, %539 : vector<2x128xf32>
    %c0_141 = arith.constant 0 : index
    %c0_142 = arith.constant 0 : index
    %541 = vector.load %arg12[%c0_141, %c0_142] : memref<16x128xf32, #tpu.memory_space<vmem>>, vector<2x128xf32>
    tpu.vector_store %arg12[%c0_141, %c0_142], %540 {strides = array<i32>} : memref<16x128xf32, #tpu.memory_space<vmem>>, vector<2x128xf32>,
    %542 = vector.extract_strided_slice %508 {offsets = [2, 0], sizes = [2, 512], strides = [1, 1]} : vector<16x512xf32> to vector<2x512xf32>
    %cst_143 = arith.constant dense<0.000000e+00> : vector<2x512xf32>
    %543 = tpu.matmul %540, %510, %cst_143 {dimension_numbers = #tpu.dot_dimension_numbers<[1], [0], [0], [1], [0, 0, 1, 1], [], []>} : vector<2x128xf32>, vector<128x512xf32>, vector<2x512xf32> -> vector<2x512xf32>
    %544 = arith.addf %542, %543 : vector<2x512xf32>
    %545 = vector.extract_strided_slice %544 {offsets = [0, 0], sizes = [2, 128], strides = [1, 1]} : vector<2x512xf32> to vector<2x128xf32>
    %546 = arith.negf %545 : vector<2x128xf32>
    %547 = math.exp %546 : vector<2x128xf32>
    %cst_144 = arith.constant 1.000000e+00 : f32
    %548 = vector.broadcast %cst_144 : f32 to vector<2x128xf32>
    %549 = arith.addf %548, %547 : vector<2x128xf32>
    %550 = arith.divf %548, %549 : vector<2x128xf32>
    %551 = vector.extract_strided_slice %544 {offsets = [0, 128], sizes = [2, 128], strides = [1, 1]} : vector<2x512xf32> to vector<2x128xf32>
    %552 = arith.negf %551 : vector<2x128xf32>
    %553 = math.exp %552 : vector<2x128xf32>
    %cst_145 = arith.constant 1.000000e+00 : f32
    %554 = vector.broadcast %cst_145 : f32 to vector<2x128xf32>
    %555 = arith.addf %554, %553 : vector<2x128xf32>
    %556 = arith.divf %554, %555 : vector<2x128xf32>
    %557 = vector.extract_strided_slice %544 {offsets = [0, 256], sizes = [2, 128], strides = [1, 1]} : vector<2x512xf32> to vector<2x128xf32>
    %558 = math.tanh %557 : vector<2x128xf32>
    %559 = vector.extract_strided_slice %544 {offsets = [0, 384], sizes = [2, 128], strides = [1, 1]} : vector<2x512xf32> to vector<2x128xf32>
    %560 = arith.negf %559 : vector<2x128xf32>
    %561 = math.exp %560 : vector<2x128xf32>
    %cst_146 = arith.constant 1.000000e+00 : f32
    %562 = vector.broadcast %cst_146 : f32 to vector<2x128xf32>
    %563 = arith.addf %562, %561 : vector<2x128xf32>
    %564 = arith.divf %562, %563 : vector<2x128xf32>
    %565 = arith.mulf %556, %538 : vector<2x128xf32>
    %566 = arith.mulf %550, %558 : vector<2x128xf32>
    %567 = arith.addf %565, %566 : vector<2x128xf32>
    %568 = math.tanh %567 : vector<2x128xf32>
    %569 = arith.mulf %564, %568 : vector<2x128xf32>
    %c2_147 = arith.constant 2 : index
    %c0_148 = arith.constant 0 : index
    %570 = vector.load %arg12[%c2_147, %c0_148] : memref<16x128xf32, #tpu.memory_space<vmem>>, vector<2x128xf32>
    tpu.vector_store %arg12[%c2_147, %c0_148], %569 {strides = array<i32>} : memref<16x128xf32, #tpu.memory_space<vmem>>, vector<2x128xf32>,
    %571 = vector.extract_strided_slice %508 {offsets = [4, 0], sizes = [2, 512], strides = [1, 1]} : vector<16x512xf32> to vector<2x512xf32>
    %cst_149 = arith.constant dense<0.000000e+00> : vector<2x512xf32>
    %572 = tpu.matmul %569, %510, %cst_149 {dimension_numbers = #tpu.dot_dimension_numbers<[1], [0], [0], [1], [0, 0, 1, 1], [], []>} : vector<2x128xf32>, vector<128x512xf32>, vector<2x512xf32> -> vector<2x512xf32>
    %573 = arith.addf %571, %572 : vector<2x512xf32>
    %574 = vector.extract_strided_slice %573 {offsets = [0, 0], sizes = [2, 128], strides = [1, 1]} : vector<2x512xf32> to vector<2x128xf32>
    %575 = arith.negf %574 : vector<2x128xf32>
    %576 = math.exp %575 : vector<2x128xf32>
    %cst_150 = arith.constant 1.000000e+00 : f32
    %577 = vector.broadcast %cst_150 : f32 to vector<2x128xf32>
    %578 = arith.addf %577, %576 : vector<2x128xf32>
    %579 = arith.divf %577, %578 : vector<2x128xf32>
    %580 = vector.extract_strided_slice %573 {offsets = [0, 128], sizes = [2, 128], strides = [1, 1]} : vector<2x512xf32> to vector<2x128xf32>
    %581 = arith.negf %580 : vector<2x128xf32>
    %582 = math.exp %581 : vector<2x128xf32>
    %cst_151 = arith.constant 1.000000e+00 : f32
    %583 = vector.broadcast %cst_151 : f32 to vector<2x128xf32>
    %584 = arith.addf %583, %582 : vector<2x128xf32>
    %585 = arith.divf %583, %584 : vector<2x128xf32>
    %586 = vector.extract_strided_slice %573 {offsets = [0, 256], sizes = [2, 128], strides = [1, 1]} : vector<2x512xf32> to vector<2x128xf32>
    %587 = math.tanh %586 : vector<2x128xf32>
    %588 = vector.extract_strided_slice %573 {offsets = [0, 384], sizes = [2, 128], strides = [1, 1]} : vector<2x512xf32> to vector<2x128xf32>
    %589 = arith.negf %588 : vector<2x128xf32>
    %590 = math.exp %589 : vector<2x128xf32>
    %cst_152 = arith.constant 1.000000e+00 : f32
    %591 = vector.broadcast %cst_152 : f32 to vector<2x128xf32>
    %592 = arith.addf %591, %590 : vector<2x128xf32>
    %593 = arith.divf %591, %592 : vector<2x128xf32>
    %594 = arith.mulf %585, %567 : vector<2x128xf32>
    %595 = arith.mulf %579, %587 : vector<2x128xf32>
    %596 = arith.addf %594, %595 : vector<2x128xf32>
    %597 = math.tanh %596 : vector<2x128xf32>
    %598 = arith.mulf %593, %597 : vector<2x128xf32>
    %c4_153 = arith.constant 4 : index
    %c0_154 = arith.constant 0 : index
    %599 = vector.load %arg12[%c4_153, %c0_154] : memref<16x128xf32, #tpu.memory_space<vmem>>, vector<2x128xf32>
    tpu.vector_store %arg12[%c4_153, %c0_154], %598 {strides = array<i32>} : memref<16x128xf32, #tpu.memory_space<vmem>>, vector<2x128xf32>,
    %600 = vector.extract_strided_slice %508 {offsets = [6, 0], sizes = [2, 512], strides = [1, 1]} : vector<16x512xf32> to vector<2x512xf32>
    %cst_155 = arith.constant dense<0.000000e+00> : vector<2x512xf32>
    %601 = tpu.matmul %598, %510, %cst_155 {dimension_numbers = #tpu.dot_dimension_numbers<[1], [0], [0], [1], [0, 0, 1, 1], [], []>} : vector<2x128xf32>, vector<128x512xf32>, vector<2x512xf32> -> vector<2x512xf32>
    %602 = arith.addf %600, %601 : vector<2x512xf32>
    %603 = vector.extract_strided_slice %602 {offsets = [0, 0], sizes = [2, 128], strides = [1, 1]} : vector<2x512xf32> to vector<2x128xf32>
    %604 = arith.negf %603 : vector<2x128xf32>
    %605 = math.exp %604 : vector<2x128xf32>
    %cst_156 = arith.constant 1.000000e+00 : f32
    %606 = vector.broadcast %cst_156 : f32 to vector<2x128xf32>
    %607 = arith.addf %606, %605 : vector<2x128xf32>
    %608 = arith.divf %606, %607 : vector<2x128xf32>
    %609 = vector.extract_strided_slice %602 {offsets = [0, 128], sizes = [2, 128], strides = [1, 1]} : vector<2x512xf32> to vector<2x128xf32>
    %610 = arith.negf %609 : vector<2x128xf32>
    %611 = math.exp %610 : vector<2x128xf32>
    %cst_157 = arith.constant 1.000000e+00 : f32
    %612 = vector.broadcast %cst_157 : f32 to vector<2x128xf32>
    %613 = arith.addf %612, %611 : vector<2x128xf32>
    %614 = arith.divf %612, %613 : vector<2x128xf32>
    %615 = vector.extract_strided_slice %602 {offsets = [0, 256], sizes = [2, 128], strides = [1, 1]} : vector<2x512xf32> to vector<2x128xf32>
    %616 = math.tanh %615 : vector<2x128xf32>
    %617 = vector.extract_strided_slice %602 {offsets = [0, 384], sizes = [2, 128], strides = [1, 1]} : vector<2x512xf32> to vector<2x128xf32>
    %618 = arith.negf %617 : vector<2x128xf32>
    %619 = math.exp %618 : vector<2x128xf32>
    %cst_158 = arith.constant 1.000000e+00 : f32
    %620 = vector.broadcast %cst_158 : f32 to vector<2x128xf32>
    %621 = arith.addf %620, %619 : vector<2x128xf32>
    %622 = arith.divf %620, %621 : vector<2x128xf32>
    %623 = arith.mulf %614, %596 : vector<2x128xf32>
    %624 = arith.mulf %608, %616 : vector<2x128xf32>
    %625 = arith.addf %623, %624 : vector<2x128xf32>
    %626 = math.tanh %625 : vector<2x128xf32>
    %627 = arith.mulf %622, %626 : vector<2x128xf32>
    %c6_159 = arith.constant 6 : index
    %c0_160 = arith.constant 0 : index
    %628 = vector.load %arg12[%c6_159, %c0_160] : memref<16x128xf32, #tpu.memory_space<vmem>>, vector<2x128xf32>
    tpu.vector_store %arg12[%c6_159, %c0_160], %627 {strides = array<i32>} : memref<16x128xf32, #tpu.memory_space<vmem>>, vector<2x128xf32>,
    %629 = vector.extract_strided_slice %508 {offsets = [8, 0], sizes = [2, 512], strides = [1, 1]} : vector<16x512xf32> to vector<2x512xf32>
    %cst_161 = arith.constant dense<0.000000e+00> : vector<2x512xf32>
    %630 = tpu.matmul %627, %510, %cst_161 {dimension_numbers = #tpu.dot_dimension_numbers<[1], [0], [0], [1], [0, 0, 1, 1], [], []>} : vector<2x128xf32>, vector<128x512xf32>, vector<2x512xf32> -> vector<2x512xf32>
    %631 = arith.addf %629, %630 : vector<2x512xf32>
    %632 = vector.extract_strided_slice %631 {offsets = [0, 0], sizes = [2, 128], strides = [1, 1]} : vector<2x512xf32> to vector<2x128xf32>
    %633 = arith.negf %632 : vector<2x128xf32>
    %634 = math.exp %633 : vector<2x128xf32>
    %cst_162 = arith.constant 1.000000e+00 : f32
    %635 = vector.broadcast %cst_162 : f32 to vector<2x128xf32>
    %636 = arith.addf %635, %634 : vector<2x128xf32>
    %637 = arith.divf %635, %636 : vector<2x128xf32>
    %638 = vector.extract_strided_slice %631 {offsets = [0, 128], sizes = [2, 128], strides = [1, 1]} : vector<2x512xf32> to vector<2x128xf32>
    %639 = arith.negf %638 : vector<2x128xf32>
    %640 = math.exp %639 : vector<2x128xf32>
    %cst_163 = arith.constant 1.000000e+00 : f32
    %641 = vector.broadcast %cst_163 : f32 to vector<2x128xf32>
    %642 = arith.addf %641, %640 : vector<2x128xf32>
    %643 = arith.divf %641, %642 : vector<2x128xf32>
    %644 = vector.extract_strided_slice %631 {offsets = [0, 256], sizes = [2, 128], strides = [1, 1]} : vector<2x512xf32> to vector<2x128xf32>
    %645 = math.tanh %644 : vector<2x128xf32>
    %646 = vector.extract_strided_slice %631 {offsets = [0, 384], sizes = [2, 128], strides = [1, 1]} : vector<2x512xf32> to vector<2x128xf32>
    %647 = arith.negf %646 : vector<2x128xf32>
    %648 = math.exp %647 : vector<2x128xf32>
    %cst_164 = arith.constant 1.000000e+00 : f32
    %649 = vector.broadcast %cst_164 : f32 to vector<2x128xf32>
    %650 = arith.addf %649, %648 : vector<2x128xf32>
    %651 = arith.divf %649, %650 : vector<2x128xf32>
    %652 = arith.mulf %643, %625 : vector<2x128xf32>
    %653 = arith.mulf %637, %645 : vector<2x128xf32>
    %654 = arith.addf %652, %653 : vector<2x128xf32>
    %655 = math.tanh %654 : vector<2x128xf32>
    %656 = arith.mulf %651, %655 : vector<2x128xf32>
    %c8_165 = arith.constant 8 : index
    %c0_166 = arith.constant 0 : index
    %657 = vector.load %arg12[%c8_165, %c0_166] : memref<16x128xf32, #tpu.memory_space<vmem>>, vector<2x128xf32>
    tpu.vector_store %arg12[%c8_165, %c0_166], %656 {strides = array<i32>} : memref<16x128xf32, #tpu.memory_space<vmem>>, vector<2x128xf32>,
    %658 = vector.extract_strided_slice %508 {offsets = [10, 0], sizes = [2, 512], strides = [1, 1]} : vector<16x512xf32> to vector<2x512xf32>
    %cst_167 = arith.constant dense<0.000000e+00> : vector<2x512xf32>
    %659 = tpu.matmul %656, %510, %cst_167 {dimension_numbers = #tpu.dot_dimension_numbers<[1], [0], [0], [1], [0, 0, 1, 1], [], []>} : vector<2x128xf32>, vector<128x512xf32>, vector<2x512xf32> -> vector<2x512xf32>
    %660 = arith.addf %658, %659 : vector<2x512xf32>
    %661 = vector.extract_strided_slice %660 {offsets = [0, 0], sizes = [2, 128], strides = [1, 1]} : vector<2x512xf32> to vector<2x128xf32>
    %662 = arith.negf %661 : vector<2x128xf32>
    %663 = math.exp %662 : vector<2x128xf32>
    %cst_168 = arith.constant 1.000000e+00 : f32
    %664 = vector.broadcast %cst_168 : f32 to vector<2x128xf32>
    %665 = arith.addf %664, %663 : vector<2x128xf32>
    %666 = arith.divf %664, %665 : vector<2x128xf32>
    %667 = vector.extract_strided_slice %660 {offsets = [0, 128], sizes = [2, 128], strides = [1, 1]} : vector<2x512xf32> to vector<2x128xf32>
    %668 = arith.negf %667 : vector<2x128xf32>
    %669 = math.exp %668 : vector<2x128xf32>
    %cst_169 = arith.constant 1.000000e+00 : f32
    %670 = vector.broadcast %cst_169 : f32 to vector<2x128xf32>
    %671 = arith.addf %670, %669 : vector<2x128xf32>
    %672 = arith.divf %670, %671 : vector<2x128xf32>
    %673 = vector.extract_strided_slice %660 {offsets = [0, 256], sizes = [2, 128], strides = [1, 1]} : vector<2x512xf32> to vector<2x128xf32>
    %674 = math.tanh %673 : vector<2x128xf32>
    %675 = vector.extract_strided_slice %660 {offsets = [0, 384], sizes = [2, 128], strides = [1, 1]} : vector<2x512xf32> to vector<2x128xf32>
    %676 = arith.negf %675 : vector<2x128xf32>
    %677 = math.exp %676 : vector<2x128xf32>
    %cst_170 = arith.constant 1.000000e+00 : f32
    %678 = vector.broadcast %cst_170 : f32 to vector<2x128xf32>
    %679 = arith.addf %678, %677 : vector<2x128xf32>
    %680 = arith.divf %678, %679 : vector<2x128xf32>
    %681 = arith.mulf %672, %654 : vector<2x128xf32>
    %682 = arith.mulf %666, %674 : vector<2x128xf32>
    %683 = arith.addf %681, %682 : vector<2x128xf32>
    %684 = math.tanh %683 : vector<2x128xf32>
    %685 = arith.mulf %680, %684 : vector<2x128xf32>
    %c10_171 = arith.constant 10 : index
    %c0_172 = arith.constant 0 : index
    %686 = vector.load %arg12[%c10_171, %c0_172] : memref<16x128xf32, #tpu.memory_space<vmem>>, vector<2x128xf32>
    tpu.vector_store %arg12[%c10_171, %c0_172], %685 {strides = array<i32>} : memref<16x128xf32, #tpu.memory_space<vmem>>, vector<2x128xf32>,
    %687 = vector.extract_strided_slice %508 {offsets = [12, 0], sizes = [2, 512], strides = [1, 1]} : vector<16x512xf32> to vector<2x512xf32>
    %cst_173 = arith.constant dense<0.000000e+00> : vector<2x512xf32>
    %688 = tpu.matmul %685, %510, %cst_173 {dimension_numbers = #tpu.dot_dimension_numbers<[1], [0], [0], [1], [0, 0, 1, 1], [], []>} : vector<2x128xf32>, vector<128x512xf32>, vector<2x512xf32> -> vector<2x512xf32>
    %689 = arith.addf %687, %688 : vector<2x512xf32>
    %690 = vector.extract_strided_slice %689 {offsets = [0, 0], sizes = [2, 128], strides = [1, 1]} : vector<2x512xf32> to vector<2x128xf32>
    %691 = arith.negf %690 : vector<2x128xf32>
    %692 = math.exp %691 : vector<2x128xf32>
    %cst_174 = arith.constant 1.000000e+00 : f32
    %693 = vector.broadcast %cst_174 : f32 to vector<2x128xf32>
    %694 = arith.addf %693, %692 : vector<2x128xf32>
    %695 = arith.divf %693, %694 : vector<2x128xf32>
    %696 = vector.extract_strided_slice %689 {offsets = [0, 128], sizes = [2, 128], strides = [1, 1]} : vector<2x512xf32> to vector<2x128xf32>
    %697 = arith.negf %696 : vector<2x128xf32>
    %698 = math.exp %697 : vector<2x128xf32>
    %cst_175 = arith.constant 1.000000e+00 : f32
    %699 = vector.broadcast %cst_175 : f32 to vector<2x128xf32>
    %700 = arith.addf %699, %698 : vector<2x128xf32>
    %701 = arith.divf %699, %700 : vector<2x128xf32>
    %702 = vector.extract_strided_slice %689 {offsets = [0, 256], sizes = [2, 128], strides = [1, 1]} : vector<2x512xf32> to vector<2x128xf32>
    %703 = math.tanh %702 : vector<2x128xf32>
    %704 = vector.extract_strided_slice %689 {offsets = [0, 384], sizes = [2, 128], strides = [1, 1]} : vector<2x512xf32> to vector<2x128xf32>
    %705 = arith.negf %704 : vector<2x128xf32>
    %706 = math.exp %705 : vector<2x128xf32>
    %cst_176 = arith.constant 1.000000e+00 : f32
    %707 = vector.broadcast %cst_176 : f32 to vector<2x128xf32>
    %708 = arith.addf %707, %706 : vector<2x128xf32>
    %709 = arith.divf %707, %708 : vector<2x128xf32>
    %710 = arith.mulf %701, %683 : vector<2x128xf32>
    %711 = arith.mulf %695, %703 : vector<2x128xf32>
    %712 = arith.addf %710, %711 : vector<2x128xf32>
    %713 = math.tanh %712 : vector<2x128xf32>
    %714 = arith.mulf %709, %713 : vector<2x128xf32>
    %c12_177 = arith.constant 12 : index
    %c0_178 = arith.constant 0 : index
    %715 = vector.load %arg12[%c12_177, %c0_178] : memref<16x128xf32, #tpu.memory_space<vmem>>, vector<2x128xf32>
    tpu.vector_store %arg12[%c12_177, %c0_178], %714 {strides = array<i32>} : memref<16x128xf32, #tpu.memory_space<vmem>>, vector<2x128xf32>,
    %716 = vector.extract_strided_slice %508 {offsets = [14, 0], sizes = [2, 512], strides = [1, 1]} : vector<16x512xf32> to vector<2x512xf32>
    %cst_179 = arith.constant dense<0.000000e+00> : vector<2x512xf32>
    %717 = tpu.matmul %714, %510, %cst_179 {dimension_numbers = #tpu.dot_dimension_numbers<[1], [0], [0], [1], [0, 0, 1, 1], [], []>} : vector<2x128xf32>, vector<128x512xf32>, vector<2x512xf32> -> vector<2x512xf32>
    %718 = arith.addf %716, %717 : vector<2x512xf32>
    %719 = vector.extract_strided_slice %718 {offsets = [0, 0], sizes = [2, 128], strides = [1, 1]} : vector<2x512xf32> to vector<2x128xf32>
    %720 = arith.negf %719 : vector<2x128xf32>
    %721 = math.exp %720 : vector<2x128xf32>
    %cst_180 = arith.constant 1.000000e+00 : f32
    %722 = vector.broadcast %cst_180 : f32 to vector<2x128xf32>
    %723 = arith.addf %722, %721 : vector<2x128xf32>
    %724 = arith.divf %722, %723 : vector<2x128xf32>
    %725 = vector.extract_strided_slice %718 {offsets = [0, 128], sizes = [2, 128], strides = [1, 1]} : vector<2x512xf32> to vector<2x128xf32>
    %726 = arith.negf %725 : vector<2x128xf32>
    %727 = math.exp %726 : vector<2x128xf32>
    %cst_181 = arith.constant 1.000000e+00 : f32
    %728 = vector.broadcast %cst_181 : f32 to vector<2x128xf32>
    %729 = arith.addf %728, %727 : vector<2x128xf32>
    %730 = arith.divf %728, %729 : vector<2x128xf32>
    %731 = vector.extract_strided_slice %718 {offsets = [0, 256], sizes = [2, 128], strides = [1, 1]} : vector<2x512xf32> to vector<2x128xf32>
    %732 = math.tanh %731 : vector<2x128xf32>
    %733 = vector.extract_strided_slice %718 {offsets = [0, 384], sizes = [2, 128], strides = [1, 1]} : vector<2x512xf32> to vector<2x128xf32>
    %734 = arith.negf %733 : vector<2x128xf32>
    %735 = math.exp %734 : vector<2x128xf32>
    %cst_182 = arith.constant 1.000000e+00 : f32
    %736 = vector.broadcast %cst_182 : f32 to vector<2x128xf32>
    %737 = arith.addf %736, %735 : vector<2x128xf32>
    %738 = arith.divf %736, %737 : vector<2x128xf32>
    %739 = arith.mulf %730, %712 : vector<2x128xf32>
    %740 = arith.mulf %724, %732 : vector<2x128xf32>
    %741 = arith.addf %739, %740 : vector<2x128xf32>
    %742 = math.tanh %741 : vector<2x128xf32>
    %743 = arith.mulf %738, %742 : vector<2x128xf32>
    %c14_183 = arith.constant 14 : index
    %c0_184 = arith.constant 0 : index
    %744 = vector.load %arg12[%c14_183, %c0_184] : memref<16x128xf32, #tpu.memory_space<vmem>>, vector<2x128xf32>
    tpu.vector_store %arg12[%c14_183, %c0_184], %743 {strides = array<i32>} : memref<16x128xf32, #tpu.memory_space<vmem>>, vector<2x128xf32>,
    %c0_185 = arith.constant 0 : index
    %c0_186 = arith.constant 0 : index
    %745 = vector.load %arg12[%c0_185, %c0_186] : memref<16x128xf32, #tpu.memory_space<vmem>>, vector<16x128xf32>
    %c3 = arith.constant 3 : index
    %c0_187 = arith.constant 0 : index
    %c0_188 = arith.constant 0 : index
    %746 = vector.load %arg2[%c3, %c0_187, %c0_188] : memref<4x128x512xf32, #tpu.memory_space<vmem>>, vector<1x128x512xf32>
    %747 = vector.shape_cast %746 : vector<1x128x512xf32> to vector<128x512xf32>
    %cst_189 = arith.constant dense<0.000000e+00> : vector<16x512xf32>
    %748 = tpu.matmul %745, %747, %cst_189 {dimension_numbers = #tpu.dot_dimension_numbers<[1], [0], [0], [1], [0, 0, 1, 1], [], []>} : vector<16x128xf32>, vector<128x512xf32>, vector<16x512xf32> -> vector<16x512xf32>
    %c3_190 = arith.constant 3 : index
    %c0_191 = arith.constant 0 : index
    %c0_192 = arith.constant 0 : index
    %749 = vector.load %arg4[%c3_190, %c0_191, %c0_192] : memref<4x1x512xf32, #tpu.memory_space<vmem>>, vector<1x1x512xf32>
    %750 = vector.shape_cast %749 : vector<1x1x512xf32> to vector<1x512xf32>
    %751 = vector.broadcast %750 : vector<1x512xf32> to vector<16x512xf32>
    %752 = arith.addf %748, %751 : vector<16x512xf32>
    %c3_193 = arith.constant 3 : index
    %c0_194 = arith.constant 0 : index
    %c0_195 = arith.constant 0 : index
    %753 = vector.load %arg3[%c3_193, %c0_194, %c0_195] : memref<4x128x512xf32, #tpu.memory_space<vmem>>, vector<1x128x512xf32>
    %754 = vector.shape_cast %753 : vector<1x128x512xf32> to vector<128x512xf32>
    %cst_196 = arith.constant 0.000000e+00 : f32
    %755 = vector.broadcast %cst_196 : f32 to vector<2x128xf32>
    %cst_197 = arith.constant 0.000000e+00 : f32
    %756 = vector.broadcast %cst_197 : f32 to vector<2x128xf32>
    %757 = vector.extract_strided_slice %752 {offsets = [0, 0], sizes = [2, 512], strides = [1, 1]} : vector<16x512xf32> to vector<2x512xf32>
    %cst_198 = arith.constant dense<0.000000e+00> : vector<2x512xf32>
    %758 = tpu.matmul %755, %754, %cst_198 {dimension_numbers = #tpu.dot_dimension_numbers<[1], [0], [0], [1], [0, 0, 1, 1], [], []>} : vector<2x128xf32>, vector<128x512xf32>, vector<2x512xf32> -> vector<2x512xf32>
    %759 = arith.addf %757, %758 : vector<2x512xf32>
    %760 = vector.extract_strided_slice %759 {offsets = [0, 0], sizes = [2, 128], strides = [1, 1]} : vector<2x512xf32> to vector<2x128xf32>
    %761 = arith.negf %760 : vector<2x128xf32>
    %762 = math.exp %761 : vector<2x128xf32>
    %cst_199 = arith.constant 1.000000e+00 : f32
    %763 = vector.broadcast %cst_199 : f32 to vector<2x128xf32>
    %764 = arith.addf %763, %762 : vector<2x128xf32>
    %765 = arith.divf %763, %764 : vector<2x128xf32>
    %766 = vector.extract_strided_slice %759 {offsets = [0, 128], sizes = [2, 128], strides = [1, 1]} : vector<2x512xf32> to vector<2x128xf32>
    %767 = arith.negf %766 : vector<2x128xf32>
    %768 = math.exp %767 : vector<2x128xf32>
    %cst_200 = arith.constant 1.000000e+00 : f32
    %769 = vector.broadcast %cst_200 : f32 to vector<2x128xf32>
    %770 = arith.addf %769, %768 : vector<2x128xf32>
    %771 = arith.divf %769, %770 : vector<2x128xf32>
    %772 = vector.extract_strided_slice %759 {offsets = [0, 256], sizes = [2, 128], strides = [1, 1]} : vector<2x512xf32> to vector<2x128xf32>
    %773 = math.tanh %772 : vector<2x128xf32>
    %774 = vector.extract_strided_slice %759 {offsets = [0, 384], sizes = [2, 128], strides = [1, 1]} : vector<2x512xf32> to vector<2x128xf32>
    %775 = arith.negf %774 : vector<2x128xf32>
    %776 = math.exp %775 : vector<2x128xf32>
    %cst_201 = arith.constant 1.000000e+00 : f32
    %777 = vector.broadcast %cst_201 : f32 to vector<2x128xf32>
    %778 = arith.addf %777, %776 : vector<2x128xf32>
    %779 = arith.divf %777, %778 : vector<2x128xf32>
    %780 = arith.mulf %771, %756 : vector<2x128xf32>
    %781 = arith.mulf %765, %773 : vector<2x128xf32>
    %782 = arith.addf %780, %781 : vector<2x128xf32>
    %783 = math.tanh %782 : vector<2x128xf32>
    %784 = arith.mulf %779, %783 : vector<2x128xf32>
    %c0_202 = arith.constant 0 : index
    %c0_203 = arith.constant 0 : index
    %785 = vector.load %arg12[%c0_202, %c0_203] : memref<16x128xf32, #tpu.memory_space<vmem>>, vector<2x128xf32>
    tpu.vector_store %arg12[%c0_202, %c0_203], %784 {strides = array<i32>} : memref<16x128xf32, #tpu.memory_space<vmem>>, vector<2x128xf32>,
    %786 = vector.extract_strided_slice %752 {offsets = [2, 0], sizes = [2, 512], strides = [1, 1]} : vector<16x512xf32> to vector<2x512xf32>
    %cst_204 = arith.constant dense<0.000000e+00> : vector<2x512xf32>
    %787 = tpu.matmul %784, %754, %cst_204 {dimension_numbers = #tpu.dot_dimension_numbers<[1], [0], [0], [1], [0, 0, 1, 1], [], []>} : vector<2x128xf32>, vector<128x512xf32>, vector<2x512xf32> -> vector<2x512xf32>
    %788 = arith.addf %786, %787 : vector<2x512xf32>
    %789 = vector.extract_strided_slice %788 {offsets = [0, 0], sizes = [2, 128], strides = [1, 1]} : vector<2x512xf32> to vector<2x128xf32>
    %790 = arith.negf %789 : vector<2x128xf32>
    %791 = math.exp %790 : vector<2x128xf32>
    %cst_205 = arith.constant 1.000000e+00 : f32
    %792 = vector.broadcast %cst_205 : f32 to vector<2x128xf32>
    %793 = arith.addf %792, %791 : vector<2x128xf32>
    %794 = arith.divf %792, %793 : vector<2x128xf32>
    %795 = vector.extract_strided_slice %788 {offsets = [0, 128], sizes = [2, 128], strides = [1, 1]} : vector<2x512xf32> to vector<2x128xf32>
    %796 = arith.negf %795 : vector<2x128xf32>
    %797 = math.exp %796 : vector<2x128xf32>
    %cst_206 = arith.constant 1.000000e+00 : f32
    %798 = vector.broadcast %cst_206 : f32 to vector<2x128xf32>
    %799 = arith.addf %798, %797 : vector<2x128xf32>
    %800 = arith.divf %798, %799 : vector<2x128xf32>
    %801 = vector.extract_strided_slice %788 {offsets = [0, 256], sizes = [2, 128], strides = [1, 1]} : vector<2x512xf32> to vector<2x128xf32>
    %802 = math.tanh %801 : vector<2x128xf32>
    %803 = vector.extract_strided_slice %788 {offsets = [0, 384], sizes = [2, 128], strides = [1, 1]} : vector<2x512xf32> to vector<2x128xf32>
    %804 = arith.negf %803 : vector<2x128xf32>
    %805 = math.exp %804 : vector<2x128xf32>
    %cst_207 = arith.constant 1.000000e+00 : f32
    %806 = vector.broadcast %cst_207 : f32 to vector<2x128xf32>
    %807 = arith.addf %806, %805 : vector<2x128xf32>
    %808 = arith.divf %806, %807 : vector<2x128xf32>
    %809 = arith.mulf %800, %782 : vector<2x128xf32>
    %810 = arith.mulf %794, %802 : vector<2x128xf32>
    %811 = arith.addf %809, %810 : vector<2x128xf32>
    %812 = math.tanh %811 : vector<2x128xf32>
    %813 = arith.mulf %808, %812 : vector<2x128xf32>
    %c2_208 = arith.constant 2 : index
    %c0_209 = arith.constant 0 : index
    %814 = vector.load %arg12[%c2_208, %c0_209] : memref<16x128xf32, #tpu.memory_space<vmem>>, vector<2x128xf32>
    tpu.vector_store %arg12[%c2_208, %c0_209], %813 {strides = array<i32>} : memref<16x128xf32, #tpu.memory_space<vmem>>, vector<2x128xf32>,
    %815 = vector.extract_strided_slice %752 {offsets = [4, 0], sizes = [2, 512], strides = [1, 1]} : vector<16x512xf32> to vector<2x512xf32>
    %cst_210 = arith.constant dense<0.000000e+00> : vector<2x512xf32>
    %816 = tpu.matmul %813, %754, %cst_210 {dimension_numbers = #tpu.dot_dimension_numbers<[1], [0], [0], [1], [0, 0, 1, 1], [], []>} : vector<2x128xf32>, vector<128x512xf32>, vector<2x512xf32> -> vector<2x512xf32>
    %817 = arith.addf %815, %816 : vector<2x512xf32>
    %818 = vector.extract_strided_slice %817 {offsets = [0, 0], sizes = [2, 128], strides = [1, 1]} : vector<2x512xf32> to vector<2x128xf32>
    %819 = arith.negf %818 : vector<2x128xf32>
    %820 = math.exp %819 : vector<2x128xf32>
    %cst_211 = arith.constant 1.000000e+00 : f32
    %821 = vector.broadcast %cst_211 : f32 to vector<2x128xf32>
    %822 = arith.addf %821, %820 : vector<2x128xf32>
    %823 = arith.divf %821, %822 : vector<2x128xf32>
    %824 = vector.extract_strided_slice %817 {offsets = [0, 128], sizes = [2, 128], strides = [1, 1]} : vector<2x512xf32> to vector<2x128xf32>
    %825 = arith.negf %824 : vector<2x128xf32>
    %826 = math.exp %825 : vector<2x128xf32>
    %cst_212 = arith.constant 1.000000e+00 : f32
    %827 = vector.broadcast %cst_212 : f32 to vector<2x128xf32>
    %828 = arith.addf %827, %826 : vector<2x128xf32>
    %829 = arith.divf %827, %828 : vector<2x128xf32>
    %830 = vector.extract_strided_slice %817 {offsets = [0, 256], sizes = [2, 128], strides = [1, 1]} : vector<2x512xf32> to vector<2x128xf32>
    %831 = math.tanh %830 : vector<2x128xf32>
    %832 = vector.extract_strided_slice %817 {offsets = [0, 384], sizes = [2, 128], strides = [1, 1]} : vector<2x512xf32> to vector<2x128xf32>
    %833 = arith.negf %832 : vector<2x128xf32>
    %834 = math.exp %833 : vector<2x128xf32>
    %cst_213 = arith.constant 1.000000e+00 : f32
    %835 = vector.broadcast %cst_213 : f32 to vector<2x128xf32>
    %836 = arith.addf %835, %834 : vector<2x128xf32>
    %837 = arith.divf %835, %836 : vector<2x128xf32>
    %838 = arith.mulf %829, %811 : vector<2x128xf32>
    %839 = arith.mulf %823, %831 : vector<2x128xf32>
    %840 = arith.addf %838, %839 : vector<2x128xf32>
    %841 = math.tanh %840 : vector<2x128xf32>
    %842 = arith.mulf %837, %841 : vector<2x128xf32>
    %c4_214 = arith.constant 4 : index
    %c0_215 = arith.constant 0 : index
    %843 = vector.load %arg12[%c4_214, %c0_215] : memref<16x128xf32, #tpu.memory_space<vmem>>, vector<2x128xf32>
    tpu.vector_store %arg12[%c4_214, %c0_215], %842 {strides = array<i32>} : memref<16x128xf32, #tpu.memory_space<vmem>>, vector<2x128xf32>,
    %844 = vector.extract_strided_slice %752 {offsets = [6, 0], sizes = [2, 512], strides = [1, 1]} : vector<16x512xf32> to vector<2x512xf32>
    %cst_216 = arith.constant dense<0.000000e+00> : vector<2x512xf32>
    %845 = tpu.matmul %842, %754, %cst_216 {dimension_numbers = #tpu.dot_dimension_numbers<[1], [0], [0], [1], [0, 0, 1, 1], [], []>} : vector<2x128xf32>, vector<128x512xf32>, vector<2x512xf32> -> vector<2x512xf32>
    %846 = arith.addf %844, %845 : vector<2x512xf32>
    %847 = vector.extract_strided_slice %846 {offsets = [0, 0], sizes = [2, 128], strides = [1, 1]} : vector<2x512xf32> to vector<2x128xf32>
    %848 = arith.negf %847 : vector<2x128xf32>
    %849 = math.exp %848 : vector<2x128xf32>
    %cst_217 = arith.constant 1.000000e+00 : f32
    %850 = vector.broadcast %cst_217 : f32 to vector<2x128xf32>
    %851 = arith.addf %850, %849 : vector<2x128xf32>
    %852 = arith.divf %850, %851 : vector<2x128xf32>
    %853 = vector.extract_strided_slice %846 {offsets = [0, 128], sizes = [2, 128], strides = [1, 1]} : vector<2x512xf32> to vector<2x128xf32>
    %854 = arith.negf %853 : vector<2x128xf32>
    %855 = math.exp %854 : vector<2x128xf32>
    %cst_218 = arith.constant 1.000000e+00 : f32
    %856 = vector.broadcast %cst_218 : f32 to vector<2x128xf32>
    %857 = arith.addf %856, %855 : vector<2x128xf32>
    %858 = arith.divf %856, %857 : vector<2x128xf32>
    %859 = vector.extract_strided_slice %846 {offsets = [0, 256], sizes = [2, 128], strides = [1, 1]} : vector<2x512xf32> to vector<2x128xf32>
    %860 = math.tanh %859 : vector<2x128xf32>
    %861 = vector.extract_strided_slice %846 {offsets = [0, 384], sizes = [2, 128], strides = [1, 1]} : vector<2x512xf32> to vector<2x128xf32>
    %862 = arith.negf %861 : vector<2x128xf32>
    %863 = math.exp %862 : vector<2x128xf32>
    %cst_219 = arith.constant 1.000000e+00 : f32
    %864 = vector.broadcast %cst_219 : f32 to vector<2x128xf32>
    %865 = arith.addf %864, %863 : vector<2x128xf32>
    %866 = arith.divf %864, %865 : vector<2x128xf32>
    %867 = arith.mulf %858, %840 : vector<2x128xf32>
    %868 = arith.mulf %852, %860 : vector<2x128xf32>
    %869 = arith.addf %867, %868 : vector<2x128xf32>
    %870 = math.tanh %869 : vector<2x128xf32>
    %871 = arith.mulf %866, %870 : vector<2x128xf32>
    %c6_220 = arith.constant 6 : index
    %c0_221 = arith.constant 0 : index
    %872 = vector.load %arg12[%c6_220, %c0_221] : memref<16x128xf32, #tpu.memory_space<vmem>>, vector<2x128xf32>
    tpu.vector_store %arg12[%c6_220, %c0_221], %871 {strides = array<i32>} : memref<16x128xf32, #tpu.memory_space<vmem>>, vector<2x128xf32>,
    %873 = vector.extract_strided_slice %752 {offsets = [8, 0], sizes = [2, 512], strides = [1, 1]} : vector<16x512xf32> to vector<2x512xf32>
    %cst_222 = arith.constant dense<0.000000e+00> : vector<2x512xf32>
    %874 = tpu.matmul %871, %754, %cst_222 {dimension_numbers = #tpu.dot_dimension_numbers<[1], [0], [0], [1], [0, 0, 1, 1], [], []>} : vector<2x128xf32>, vector<128x512xf32>, vector<2x512xf32> -> vector<2x512xf32>
    %875 = arith.addf %873, %874 : vector<2x512xf32>
    %876 = vector.extract_strided_slice %875 {offsets = [0, 0], sizes = [2, 128], strides = [1, 1]} : vector<2x512xf32> to vector<2x128xf32>
    %877 = arith.negf %876 : vector<2x128xf32>
    %878 = math.exp %877 : vector<2x128xf32>
    %cst_223 = arith.constant 1.000000e+00 : f32
    %879 = vector.broadcast %cst_223 : f32 to vector<2x128xf32>
    %880 = arith.addf %879, %878 : vector<2x128xf32>
    %881 = arith.divf %879, %880 : vector<2x128xf32>
    %882 = vector.extract_strided_slice %875 {offsets = [0, 128], sizes = [2, 128], strides = [1, 1]} : vector<2x512xf32> to vector<2x128xf32>
    %883 = arith.negf %882 : vector<2x128xf32>
    %884 = math.exp %883 : vector<2x128xf32>
    %cst_224 = arith.constant 1.000000e+00 : f32
    %885 = vector.broadcast %cst_224 : f32 to vector<2x128xf32>
    %886 = arith.addf %885, %884 : vector<2x128xf32>
    %887 = arith.divf %885, %886 : vector<2x128xf32>
    %888 = vector.extract_strided_slice %875 {offsets = [0, 256], sizes = [2, 128], strides = [1, 1]} : vector<2x512xf32> to vector<2x128xf32>
    %889 = math.tanh %888 : vector<2x128xf32>
    %890 = vector.extract_strided_slice %875 {offsets = [0, 384], sizes = [2, 128], strides = [1, 1]} : vector<2x512xf32> to vector<2x128xf32>
    %891 = arith.negf %890 : vector<2x128xf32>
    %892 = math.exp %891 : vector<2x128xf32>
    %cst_225 = arith.constant 1.000000e+00 : f32
    %893 = vector.broadcast %cst_225 : f32 to vector<2x128xf32>
    %894 = arith.addf %893, %892 : vector<2x128xf32>
    %895 = arith.divf %893, %894 : vector<2x128xf32>
    %896 = arith.mulf %887, %869 : vector<2x128xf32>
    %897 = arith.mulf %881, %889 : vector<2x128xf32>
    %898 = arith.addf %896, %897 : vector<2x128xf32>
    %899 = math.tanh %898 : vector<2x128xf32>
    %900 = arith.mulf %895, %899 : vector<2x128xf32>
    %c8_226 = arith.constant 8 : index
    %c0_227 = arith.constant 0 : index
    %901 = vector.load %arg12[%c8_226, %c0_227] : memref<16x128xf32, #tpu.memory_space<vmem>>, vector<2x128xf32>
    tpu.vector_store %arg12[%c8_226, %c0_227], %900 {strides = array<i32>} : memref<16x128xf32, #tpu.memory_space<vmem>>, vector<2x128xf32>,
    %902 = vector.extract_strided_slice %752 {offsets = [10, 0], sizes = [2, 512], strides = [1, 1]} : vector<16x512xf32> to vector<2x512xf32>
    %cst_228 = arith.constant dense<0.000000e+00> : vector<2x512xf32>
    %903 = tpu.matmul %900, %754, %cst_228 {dimension_numbers = #tpu.dot_dimension_numbers<[1], [0], [0], [1], [0, 0, 1, 1], [], []>} : vector<2x128xf32>, vector<128x512xf32>, vector<2x512xf32> -> vector<2x512xf32>
    %904 = arith.addf %902, %903 : vector<2x512xf32>
    %905 = vector.extract_strided_slice %904 {offsets = [0, 0], sizes = [2, 128], strides = [1, 1]} : vector<2x512xf32> to vector<2x128xf32>
    %906 = arith.negf %905 : vector<2x128xf32>
    %907 = math.exp %906 : vector<2x128xf32>
    %cst_229 = arith.constant 1.000000e+00 : f32
    %908 = vector.broadcast %cst_229 : f32 to vector<2x128xf32>
    %909 = arith.addf %908, %907 : vector<2x128xf32>
    %910 = arith.divf %908, %909 : vector<2x128xf32>
    %911 = vector.extract_strided_slice %904 {offsets = [0, 128], sizes = [2, 128], strides = [1, 1]} : vector<2x512xf32> to vector<2x128xf32>
    %912 = arith.negf %911 : vector<2x128xf32>
    %913 = math.exp %912 : vector<2x128xf32>
    %cst_230 = arith.constant 1.000000e+00 : f32
    %914 = vector.broadcast %cst_230 : f32 to vector<2x128xf32>
    %915 = arith.addf %914, %913 : vector<2x128xf32>
    %916 = arith.divf %914, %915 : vector<2x128xf32>
    %917 = vector.extract_strided_slice %904 {offsets = [0, 256], sizes = [2, 128], strides = [1, 1]} : vector<2x512xf32> to vector<2x128xf32>
    %918 = math.tanh %917 : vector<2x128xf32>
    %919 = vector.extract_strided_slice %904 {offsets = [0, 384], sizes = [2, 128], strides = [1, 1]} : vector<2x512xf32> to vector<2x128xf32>
    %920 = arith.negf %919 : vector<2x128xf32>
    %921 = math.exp %920 : vector<2x128xf32>
    %cst_231 = arith.constant 1.000000e+00 : f32
    %922 = vector.broadcast %cst_231 : f32 to vector<2x128xf32>
    %923 = arith.addf %922, %921 : vector<2x128xf32>
    %924 = arith.divf %922, %923 : vector<2x128xf32>
    %925 = arith.mulf %916, %898 : vector<2x128xf32>
    %926 = arith.mulf %910, %918 : vector<2x128xf32>
    %927 = arith.addf %925, %926 : vector<2x128xf32>
    %928 = math.tanh %927 : vector<2x128xf32>
    %929 = arith.mulf %924, %928 : vector<2x128xf32>
    %c10_232 = arith.constant 10 : index
    %c0_233 = arith.constant 0 : index
    %930 = vector.load %arg12[%c10_232, %c0_233] : memref<16x128xf32, #tpu.memory_space<vmem>>, vector<2x128xf32>
    tpu.vector_store %arg12[%c10_232, %c0_233], %929 {strides = array<i32>} : memref<16x128xf32, #tpu.memory_space<vmem>>, vector<2x128xf32>,
    %931 = vector.extract_strided_slice %752 {offsets = [12, 0], sizes = [2, 512], strides = [1, 1]} : vector<16x512xf32> to vector<2x512xf32>
    %cst_234 = arith.constant dense<0.000000e+00> : vector<2x512xf32>
    %932 = tpu.matmul %929, %754, %cst_234 {dimension_numbers = #tpu.dot_dimension_numbers<[1], [0], [0], [1], [0, 0, 1, 1], [], []>} : vector<2x128xf32>, vector<128x512xf32>, vector<2x512xf32> -> vector<2x512xf32>
    %933 = arith.addf %931, %932 : vector<2x512xf32>
    %934 = vector.extract_strided_slice %933 {offsets = [0, 0], sizes = [2, 128], strides = [1, 1]} : vector<2x512xf32> to vector<2x128xf32>
    %935 = arith.negf %934 : vector<2x128xf32>
    %936 = math.exp %935 : vector<2x128xf32>
    %cst_235 = arith.constant 1.000000e+00 : f32
    %937 = vector.broadcast %cst_235 : f32 to vector<2x128xf32>
    %938 = arith.addf %937, %936 : vector<2x128xf32>
    %939 = arith.divf %937, %938 : vector<2x128xf32>
    %940 = vector.extract_strided_slice %933 {offsets = [0, 128], sizes = [2, 128], strides = [1, 1]} : vector<2x512xf32> to vector<2x128xf32>
    %941 = arith.negf %940 : vector<2x128xf32>
    %942 = math.exp %941 : vector<2x128xf32>
    %cst_236 = arith.constant 1.000000e+00 : f32
    %943 = vector.broadcast %cst_236 : f32 to vector<2x128xf32>
    %944 = arith.addf %943, %942 : vector<2x128xf32>
    %945 = arith.divf %943, %944 : vector<2x128xf32>
    %946 = vector.extract_strided_slice %933 {offsets = [0, 256], sizes = [2, 128], strides = [1, 1]} : vector<2x512xf32> to vector<2x128xf32>
    %947 = math.tanh %946 : vector<2x128xf32>
    %948 = vector.extract_strided_slice %933 {offsets = [0, 384], sizes = [2, 128], strides = [1, 1]} : vector<2x512xf32> to vector<2x128xf32>
    %949 = arith.negf %948 : vector<2x128xf32>
    %950 = math.exp %949 : vector<2x128xf32>
    %cst_237 = arith.constant 1.000000e+00 : f32
    %951 = vector.broadcast %cst_237 : f32 to vector<2x128xf32>
    %952 = arith.addf %951, %950 : vector<2x128xf32>
    %953 = arith.divf %951, %952 : vector<2x128xf32>
    %954 = arith.mulf %945, %927 : vector<2x128xf32>
    %955 = arith.mulf %939, %947 : vector<2x128xf32>
    %956 = arith.addf %954, %955 : vector<2x128xf32>
    %957 = math.tanh %956 : vector<2x128xf32>
    %958 = arith.mulf %953, %957 : vector<2x128xf32>
    %c12_238 = arith.constant 12 : index
    %c0_239 = arith.constant 0 : index
    %959 = vector.load %arg12[%c12_238, %c0_239] : memref<16x128xf32, #tpu.memory_space<vmem>>, vector<2x128xf32>
    tpu.vector_store %arg12[%c12_238, %c0_239], %958 {strides = array<i32>} : memref<16x128xf32, #tpu.memory_space<vmem>>, vector<2x128xf32>,
    %960 = vector.extract_strided_slice %752 {offsets = [14, 0], sizes = [2, 512], strides = [1, 1]} : vector<16x512xf32> to vector<2x512xf32>
    %cst_240 = arith.constant dense<0.000000e+00> : vector<2x512xf32>
    %961 = tpu.matmul %958, %754, %cst_240 {dimension_numbers = #tpu.dot_dimension_numbers<[1], [0], [0], [1], [0, 0, 1, 1], [], []>} : vector<2x128xf32>, vector<128x512xf32>, vector<2x512xf32> -> vector<2x512xf32>
    %962 = arith.addf %960, %961 : vector<2x512xf32>
    %963 = vector.extract_strided_slice %962 {offsets = [0, 0], sizes = [2, 128], strides = [1, 1]} : vector<2x512xf32> to vector<2x128xf32>
    %964 = arith.negf %963 : vector<2x128xf32>
    %965 = math.exp %964 : vector<2x128xf32>
    %cst_241 = arith.constant 1.000000e+00 : f32
    %966 = vector.broadcast %cst_241 : f32 to vector<2x128xf32>
    %967 = arith.addf %966, %965 : vector<2x128xf32>
    %968 = arith.divf %966, %967 : vector<2x128xf32>
    %969 = vector.extract_strided_slice %962 {offsets = [0, 128], sizes = [2, 128], strides = [1, 1]} : vector<2x512xf32> to vector<2x128xf32>
    %970 = arith.negf %969 : vector<2x128xf32>
    %971 = math.exp %970 : vector<2x128xf32>
    %cst_242 = arith.constant 1.000000e+00 : f32
    %972 = vector.broadcast %cst_242 : f32 to vector<2x128xf32>
    %973 = arith.addf %972, %971 : vector<2x128xf32>
    %974 = arith.divf %972, %973 : vector<2x128xf32>
    %975 = vector.extract_strided_slice %962 {offsets = [0, 256], sizes = [2, 128], strides = [1, 1]} : vector<2x512xf32> to vector<2x128xf32>
    %976 = math.tanh %975 : vector<2x128xf32>
    %977 = vector.extract_strided_slice %962 {offsets = [0, 384], sizes = [2, 128], strides = [1, 1]} : vector<2x512xf32> to vector<2x128xf32>
    %978 = arith.negf %977 : vector<2x128xf32>
    %979 = math.exp %978 : vector<2x128xf32>
    %cst_243 = arith.constant 1.000000e+00 : f32
    %980 = vector.broadcast %cst_243 : f32 to vector<2x128xf32>
    %981 = arith.addf %980, %979 : vector<2x128xf32>
    %982 = arith.divf %980, %981 : vector<2x128xf32>
    %983 = arith.mulf %974, %956 : vector<2x128xf32>
    %984 = arith.mulf %968, %976 : vector<2x128xf32>
    %985 = arith.addf %983, %984 : vector<2x128xf32>
    %986 = math.tanh %985 : vector<2x128xf32>
    %987 = arith.mulf %982, %986 : vector<2x128xf32>
    %c14_244 = arith.constant 14 : index
    %c0_245 = arith.constant 0 : index
    %988 = vector.load %arg12[%c14_244, %c0_245] : memref<16x128xf32, #tpu.memory_space<vmem>>, vector<2x128xf32>
    tpu.vector_store %arg12[%c14_244, %c0_245], %987 {strides = array<i32>} : memref<16x128xf32, #tpu.memory_space<vmem>>, vector<2x128xf32>,
    %c0_246 = arith.constant 0 : index
    %c0_247 = arith.constant 0 : index
    %989 = vector.load %arg12[%c0_246, %c0_247] : memref<16x128xf32, #tpu.memory_space<vmem>>, vector<16x128xf32>
    %c0_248 = arith.constant 0 : index
    %c0_249 = arith.constant 0 : index
    %990 = vector.load %arg5[%c0_248, %c0_249] : memref<128x64xf32, #tpu.memory_space<vmem>>, vector<128x64xf32>
    %cst_250 = arith.constant dense<0.000000e+00> : vector<16x64xf32>
    %991 = tpu.matmul %989, %990, %cst_250 {dimension_numbers = #tpu.dot_dimension_numbers<[1], [0], [0], [1], [0, 0, 1, 1], [], []>} : vector<16x128xf32>, vector<128x64xf32>, vector<16x64xf32> -> vector<16x64xf32>
    %c0_251 = arith.constant 0 : index
    %c0_252 = arith.constant 0 : index
    %992 = vector.load %arg6[%c0_251, %c0_252] : memref<1x64xf32, #tpu.memory_space<vmem>>, vector<1x64xf32>
    %993 = vector.broadcast %992 : vector<1x64xf32> to vector<16x64xf32>
    %994 = arith.addf %991, %993 : vector<16x64xf32>
    %cst_253 = arith.constant 0.000000e+00 : f32
    %995 = vector.broadcast %cst_253 : f32 to vector<16x64xf32>
    %996 = arith.maximumf %994, %995 : vector<16x64xf32>
    %c0_254 = arith.constant 0 : index
    %c0_255 = arith.constant 0 : index
    %997 = vector.load %arg7[%c0_254, %c0_255] : memref<64x1xf32, #tpu.memory_space<vmem>>, vector<64x1xf32>
    %cst_256 = arith.constant dense<0.000000e+00> : vector<16x1xf32>
    %998 = tpu.matmul %996, %997, %cst_256 {dimension_numbers = #tpu.dot_dimension_numbers<[1], [0], [0], [1], [0, 0, 1, 1], [], []>} : vector<16x64xf32>, vector<64x1xf32>, vector<16x1xf32> -> vector<16x1xf32>
    %c0_257 = arith.constant 0 : index
    %c0_258 = arith.constant 0 : index
    %999 = vector.load %arg8[%c0_257, %c0_258] : memref<1x1xf32, #tpu.memory_space<vmem>>, vector<1x1xf32>
    %1000 = vector.broadcast %999 : vector<1x1xf32> to vector<16x1xf32>
    %1001 = arith.addf %998, %1000 : vector<16x1xf32>
    %1002 = tpu.iota {dimensions = array<i32: 0>} : vector<16x2xi32>
    %1003 = tpu.iota {dimensions = array<i32: 1>} : vector<16x2xi32>
    %c2_i32 = arith.constant 2 : i32
    %c0_i32 = arith.constant 0 : i32
    %1004 = arith.cmpi eq, %c2_i32, %c0_i32 : i32
    %c1_i32 = arith.constant 1 : i32
    %1005 = arith.select %1004, %c1_i32, %c2_i32 : i32
    %1006 = vector.broadcast %1005 : i32 to vector<16x2xi32>
    %1007 = arith.remsi %1002, %1006 : vector<16x2xi32>
    %c0_i32_259 = arith.constant 0 : i32
    %1008 = vector.broadcast %c0_i32_259 : i32 to vector<16x2xi32>
    %1009 = arith.cmpi ne, %1007, %1008 : vector<16x2xi32>
    %c0_i32_260 = arith.constant 0 : i32
    %1010 = vector.broadcast %c0_i32_260 : i32 to vector<16x2xi32>
    %1011 = arith.cmpi slt, %1007, %1010 : vector<16x2xi32>
    %c0_i32_261 = arith.constant 0 : i32
    %1012 = arith.cmpi slt, %1005, %c0_i32_261 : i32
    %1013 = vector.broadcast %1012 : i1 to vector<16x2xi1>
    %1014 = vector.broadcast %1013 : vector<16x2xi1> to vector<16x2xi1>
    %1015 = arith.xori %1011, %1014 : vector<16x2xi1>
    %1016 = arith.andi %1015, %1009 : vector<16x2xi1>
    %1017 = vector.broadcast %1005 : i32 to vector<16x2xi32>
    %1018 = arith.addi %1007, %1017 : vector<16x2xi32>
    %1019 = arith.select %1016, %1018, %1007 : vector<16x2xi1>, vector<16x2xi32>
    %1020 = arith.cmpi eq, %1019, %1003 : vector<16x2xi32>
    %cst_262 = arith.constant 0xFF800000 : f32
    %1021 = vector.shape_cast %1001 : vector<16x1xf32> to vector<16x1xf32>
    %1022 = vector.broadcast %1021 : vector<16x1xf32> to vector<16x2xf32>
    %1023 = vector.broadcast %cst_262 : f32 to vector<16x2xf32>
    %1024 = arith.select %1020, %1022, %1023 : vector<16x2xi1>, vector<16x2xf32>
    %cst_263 = arith.constant dense<0xFF800000> : vector<2xf32>
    %1025 = vector.multi_reduction <maximumf>, %1024, %cst_263 [0] : vector<16x2xf32> to vector<2xf32>
    %1026 = vector.shape_cast %1025 : vector<2xf32> to vector<1x2xf32>
    %1027 = vector.broadcast %1026 : vector<1x2xf32> to vector<16x2xf32>
    %1028 = arith.subf %1024, %1027 : vector<16x2xf32>
    %1029 = math.exp %1028 : vector<16x2xf32>
    %cst_264 = arith.constant dense<0.000000e+00> : vector<2xf32>
    %1030 = vector.multi_reduction <add>, %1029, %cst_264 [0] : vector<16x2xf32> to vector<2xf32>
    %1031 = vector.shape_cast %1030 : vector<2xf32> to vector<1x2xf32>
    %1032 = vector.broadcast %1031 : vector<1x2xf32> to vector<16x2xf32>
    %1033 = arith.divf %1029, %1032 : vector<16x2xf32>
    %1034 = tpu.transpose %1033, [1, 0] : vector<16x2xf32> -> vector<2x16xf32>
    %cst_265 = arith.constant dense<0.000000e+00> : vector<2x128xf32>
    %1035 = tpu.matmul %1034, %989, %cst_265 {dimension_numbers = #tpu.dot_dimension_numbers<[1], [0], [0], [1], [0, 0, 1, 1], [], []>} : vector<2x16xf32>, vector<16x128xf32>, vector<2x128xf32> -> vector<2x128xf32>
    %c0_266 = arith.constant 0 : index
    %c0_267 = arith.constant 0 : index
    %1036 = vector.load %arg9[%c0_266, %c0_267] : memref<128x3xf32, #tpu.memory_space<vmem>>, vector<128x3xf32>
    %cst_268 = arith.constant dense<0.000000e+00> : vector<2x3xf32>
    %1037 = tpu.matmul %1035, %1036, %cst_268 {dimension_numbers = #tpu.dot_dimension_numbers<[1], [0], [0], [1], [0, 0, 1, 1], [], []>} : vector<2x128xf32>, vector<128x3xf32>, vector<2x3xf32> -> vector<2x3xf32>
    %c0_269 = arith.constant 0 : index
    %c0_270 = arith.constant 0 : index
    %1038 = vector.load %arg10[%c0_269, %c0_270] : memref<1x3xf32, #tpu.memory_space<vmem>>, vector<1x3xf32>
    %1039 = vector.broadcast %1038 : vector<1x3xf32> to vector<2x3xf32>
    %1040 = arith.addf %1037, %1039 : vector<2x3xf32>
    %cst_271 = arith.constant dense<0xFF800000> : vector<2xf32>
    %1041 = vector.multi_reduction <maximumf>, %1040, %cst_271 [1] : vector<2x3xf32> to vector<2xf32>
    %1042 = vector.shape_cast %1041 : vector<2xf32> to vector<2x1xf32>
    %1043 = vector.broadcast %1042 : vector<2x1xf32> to vector<2x3xf32>
    %1044 = arith.subf %1040, %1043 : vector<2x3xf32>
    %1045 = math.exp %1044 : vector<2x3xf32>
    %cst_272 = arith.constant dense<0.000000e+00> : vector<2xf32>
    %1046 = vector.multi_reduction <add>, %1045, %cst_272 [1] : vector<2x3xf32> to vector<2xf32>
    %1047 = vector.shape_cast %1046 : vector<2xf32> to vector<2x1xf32>
    %1048 = vector.broadcast %1047 : vector<2x1xf32> to vector<2x3xf32>
    %1049 = arith.divf %1045, %1048 : vector<2x3xf32>
    %c0_273 = arith.constant 0 : index
    %c0_274 = arith.constant 0 : index
    %1050 = vector.load %arg11[%c0_273, %c0_274] : memref<2x3xf32, #tpu.memory_space<vmem>>, vector<2x3xf32>
    tpu.vector_store %arg11[%c0_273, %c0_274], %1049 {strides = array<i32>} : memref<2x3xf32, #tpu.memory_space<vmem>>, vector<2x3xf32>,
    return
  }
}

</mosaic_0001>

<bundles_post_ra>
// kernel: gene_rnn_forward.1
= control target key start
LH: loop header
LB: loop body
LE: loop exit
PB: predicated region body
PF: predicated region fallthrough
CT: control target
= control target key end

     0   :  { %s13043_s0 = inlined_call_operand.vmem [shape: f32[16,5], index: 0, kind: input, shape index: {}]   ;;  %s13044_s1 = inlined_call_operand.vmem [shape: f32[5,128], index: 1, kind: input, shape index: {}]   ;;  %s13045_s2 = inlined_call_operand.hbm [shape: f32[4,128,512], index: 2, kind: input, shape index: {}]   ;;  %s13046_s3 = inlined_call_operand.hbm [shape: f32[4,128,512], index: 3, kind: input, shape index: {}]   ;;  %s13047_s4 = inlined_call_operand.vmem [shape: f32[4,1,512], index: 4, kind: input, shape index: {}]   ;;  %s13048_s5 = inlined_call_operand.vmem [shape: f32[128,64], index: 5, kind: input, shape index: {}]   ;;  %s13049_s6 = inlined_call_operand.vmem [shape: f32[1,64], index: 6, kind: input, shape index: {}]   ;;  %s13050_s7 = inlined_call_operand.vmem [shape: f32[64,1], index: 7, kind: input, shape index: {}]   ;;  %s13051_s8 = inlined_call_operand.<no memory space> [shape: f32[1,1], index: 8, kind: input, shape index: {}]   ;;  %s13052_s9 = inlined_call_operand.vmem [shape: f32[128,3], index: 9, kind: input, shape index: {}]   ;;  %s13053_s10 = inlined_call_operand.vmem [shape: f32[1,3], index: 10, kind: input, shape index: {}]   ;;  %s13054_s11 = inlined_call_operand.hbm [shape: f32[2,3], index: 11, kind: output, shape index: {}]  }
   0x1   :  { %v16_v0 = vstv %s13051_s8 }
   0x2   :  { %17 = vst [vmem:[#allocation3] sm:$0x1] %v16_v0 }
   0x3   :  { %18 = vsyncpa [#allocation5], 0 }
   0x4   :  { %19 = vsyncpa [#allocation8], 0 }
   0x5   :  { %20 = vsyncpa [#allocation6], 0  ;;  %s9125_s19 = smov [#allocation4]  }
   0x6   :  { %s30_s20 = sshll.u32 %s9125_s19, 4  ;;  %s31_s20 = int_to_ptr.vmem [resolvable:$true] %s30_s20 }
   0x7   :  { %s9067_s21 = scalar_lea.vmem %s31_s20, 32768  ;;  %p9072_p1 = scmp.lt.s32.totalorder %s31_s20, %s31_s20 }
   0x8   :  { %p9068_p0 = scmp.ne.s32.totalorder %s31_s20, %s9067_s21  ;;  %p9073_p2 = scmp.lt.s32.totalorder %s9067_s21, %s9067_s21 }
   0xa   :  { %p9074_p3 = por %p9073_p2, %p9072_p1 }
   0xc   :  { %p9075_p4 = pnand %p9074_p3, %p9068_p0 }
   0xe   :  { %9078 = shalt.err (!%p9075_p4)
}
   0xf   :  { %s9126_s22 = smov 512   ;;  %s9127_s23 = smov 32  }
  0x10   :  { %36 = dma.hbm_to_vmem [thread:$0]  %s13045_s2, 32768, %s31_s20, [#allocation5], %s9126_s22, %s9126_s22, %s9127_s23  }
  0x11   :  { %s9128_s8 = smov [#allocation7]  }
  0x12   :  { %s42_s26 = sshll.u32 %s9128_s8, 4  ;;  %s43_s26 = int_to_ptr.vmem [resolvable:$true] %s42_s26 }
  0x13   :  { %s9087_s27 = scalar_lea.vmem %s43_s26, 32768  ;;  %p9092_p6 = scmp.lt.s32.totalorder %s43_s26, %s43_s26 }
  0x14   :  { %p9088_p5 = scmp.ne.s32.totalorder %s43_s26, %s9087_s27  ;;  %p9093_p7 = scmp.lt.s32.totalorder %s9087_s27, %s9087_s27 }
  0x16   :  { %p9094_p8 = por %p9093_p7, %p9092_p6 }
  0x18   :  { %p9095_p9 = pnand %p9094_p8, %p9088_p5 }
  0x1a   :  { %9098 = shalt.err (!%p9095_p9)
}
  0x1b   :  { %48 = dma.hbm_to_vmem [thread:$0]  %s13046_s3, 32768, %s43_s26, [#allocation8], %s9126_s22, %s9126_s22, %s9127_s23  }
  0x1c   :  { %9119 = dma.done.wait [#allocation5], 32768  }
  0x1d   :  { %9120 = vsyncadd [#allocation5], 4294934528 }
  0x1e   :  { %9121 = dma.done.wait [#allocation8], 32768  }
  0x1f   :  { %9122 = vsyncadd [#allocation8], 4294934528  ;;  %v13055_v1 = vlaneseq  ;;  %v69_v7 = vld [vmem:[%s13043_s0] sm:$0xff]  ;;  %v452_v11 = vld [vmem:[#allocation4 + $0x1f8] sm:$0xff]  ;;  %vm216_vm0 = vcmask 1044480   ;;  %vm362_vm1 = vcmask 1041409  }
  0x20   :  { %v450_v10 = vld [vmem:[#allocation4 + $0x1e8] sm:$0xff]  ;;  %v449_v12 = vld [vmem:[#allocation4 + $0x1e0] sm:$0xff]  ;;  %v451_v13 = vld [vmem:[#allocation4 + $0x1f0] sm:$0xff]  ;;  %552 = vmatprep.subr.mxu1 %v452_v11  ;;  %vm364_vm2 = vcmask 1042434   ;;  %vm366_vm3 = vcmask 1043459   ;;  %vm368_vm4 = vcmask 1044484  }
  0x21   :  { %v9203_v2 = vshrl.u32 %v13055_v1, 7  ;;  %475 = vmatprep.subr.mxu0 %v450_v10  ;;  %v446_v18 = vld [vmem:[#allocation4 + $0x1c8] sm:$0xff]  ;;  %v448_v19 = vld [vmem:[#allocation4 + $0x1d8] sm:$0xff]  ;;  %553 = vmatpush1.msra.mxu1 %v451_v13  ;;  %v445_v20 = vld [vmem:[#allocation4 + $0x1c0] sm:$0xff]  ;;  %vm370_vm5 = vcmask 1045509   ;;  %vm372_vm6 = vcmask 1046534  }
  0x22   :  { %476 = vmatpush1.msra.mxu0 %v449_v12  ;;  %v447_v21 = vld [vmem:[#allocation4 + $0x1d0] sm:$0xff]  ;;  %554 = vmatprep.subr.mxu1 %v448_v19  ;;  %v442_v22 = vld [vmem:[#allocation4 + $0x1a8] sm:$0xff]  ;;  %v444_v23 = vld [vmem:[#allocation4 + $0x1b8] sm:$0xff]  ;;  %vm374_vm7 = vcmask 1047559   ;;  %vm7641_vm8 = vcmask 523264   ;;  %vm9131_vm9 = vmmov 0  }
  0x23   :  { %13482 = vst [vmem:[#allocation13_spill] sm:$0xff] %v9203_v2  ;;  %v9206_v3 = vsub.s32 2, %v9203_v2  ;;  %v9209_v4 = vsub.s32 0, %v9203_v2  ;;  %v9212_v5 = vsub.s32 3, %v9203_v2  ;;  %v9215_v6 = vsub.s32 1, %v9203_v2  ;;  %477 = vmatprep.subr.mxu0 %v446_v18  ;;  %v441_v28 = vld [vmem:[#allocation4 + $0x1a0] sm:$0xff]  ;;  %555 = vmatpush1.msra.mxu1 %v447_v21 }
  0x24   :  { %v109_v16 = vsub.s32 5, %v9203_v2  ;;  %v102_v17 = vsub.s32 4, %v9203_v2  ;;  %v123_v26 = vsub.s32 7, %v9203_v2  ;;  %v116_v27 = vsub.s32 6, %v9203_v2  ;;  %v443_v29 = vld [vmem:[#allocation4 + $0x1b0] sm:$0xff]  ;;  %478 = vmatpush1.msra.mxu0 %v445_v20  ;;  %556 = vmatprep.subr.mxu1 %v444_v23  ;;  %v438_v30 = vld [vmem:[#allocation4 + $0x188] sm:$0xff] }
  0x25   :  { %13483 = vst [vmem:[#allocation14_spill] sm:$0xff] %v9206_v3  ;;  %13484 = vst [vmem:[#allocation15_spill] sm:$0xff] %v9209_v4  ;;  %v89_v8 = vrot.slane %v69_v7, %v9206_v3  ;;  %v75_v9 = vrot.slane %v69_v7, %v9209_v4  ;;  %v96_v14 = vrot.slane %v69_v7, %v9212_v5  ;;  %479 = vmatprep.subr.mxu0 %v442_v22  ;;  %v440_v31 = vld [vmem:[#allocation4 + $0x198] sm:$0xff]  ;;  %v437_v32 = vld [vmem:[#allocation4 + $0x180] sm:$0xff]  ;;  %vm7766_vm12 = vcmask 15360  }
  0x26   :  { %13485 = vst [vmem:[#allocation16_spill] sm:$0xff] %v9212_v5  ;;  %13486 = vst [vmem:[#allocation17_spill] sm:$0xff] %v9215_v6  ;;  %v82_v15 = vrot.slane %v69_v7, %v9215_v6  ;;  %v110_v24 = vrot.slane %v69_v7, %v109_v16  ;;  %v103_v25 = vrot.slane %v69_v7, %v102_v17  ;;  %480 = vmatpush1.msra.mxu0 %v441_v28  ;;  %v439_v33 = vld [vmem:[#allocation4 + $0x190] sm:$0xff]  ;;  %v434_v36 = vld [vmem:[#allocation4 + $0x168] sm:$0xff]  ;;  %vm7826_vm13 = vcmask 130048  }
  0x27   :  { %91 = vbcast.lane.b32.xlu1 %v89_v8, 256  ;;  %77 = vbcast.lane.b32.xlu0 %v75_v9, 256  ;;  %v124_v34 = vrot.slane %v69_v7, %v123_v26  ;;  %v117_v35 = vrot.slane %v69_v7, %v116_v27  ;;  %v436_v37 = vld [vmem:[#allocation4 + $0x178] sm:$0xff]  ;;  %v433_v39 = vld [vmem:[#allocation4 + $0x160] sm:$0xff]  ;;  %v435_v40 = vld [vmem:[#allocation4 + $0x170] sm:$0xff]  ;;  %vm7993_vm14 = vcmask 17408  }
  0x28   :  { %557 = vmatpush1.msra.mxu1 %v443_v29  ;;  %v70_v38 = vld [vmem:[%s13043_s0 + $0x8] sm:$0xff]  ;;  %481 = vmatprep.subr.mxu0 %v438_v30  ;;  %v430_v41 = vld [vmem:[#allocation4 + $0x148] sm:$0xff]  ;;  %v429_v45 = vld [vmem:[#allocation4 + $0x140] sm:$0xff] }
  0x29   :  { %558 = vmatprep.subr.mxu1 %v440_v31  ;;  %482 = vmatpush1.msra.mxu0 %v437_v32  ;;  %v432_v42 = vld [vmem:[#allocation4 + $0x158] sm:$0xff]  ;;  %v131_v43 = vrot.slane %v70_v38, %v9209_v4  ;;  %v138_v44 = vrot.slane %v70_v38, %v9215_v6  ;;  %v431_v46 = vld [vmem:[#allocation4 + $0x150] sm:$0xff]  ;;  %v426_v47 = vld [vmem:[#allocation4 + $0x128] sm:$0xff]  ;;  %v145_v51 = vrot.slane %v70_v38, %v9206_v3 }
  0x2a   :  { %559 = vmatpush1.msra.mxu1 %v439_v33  ;;  %483 = vmatprep.subr.mxu0 %v434_v36  ;;  %v428_v48 = vld [vmem:[#allocation4 + $0x138] sm:$0xff]  ;;  %v425_v49 = vld [vmem:[#allocation4 + $0x120] sm:$0xff]  ;;  %v427_v50 = vld [vmem:[#allocation4 + $0x130] sm:$0xff]  ;;  %v152_v52 = vrot.slane %v70_v38, %v9212_v5  ;;  %v159_v59 = vrot.slane %v70_v38, %v102_v17  ;;  %v166_v60 = vrot.slane %v70_v38, %v109_v16 }
  0x2b   :  { %98 = vbcast.lane.b32.xlu1 %v96_v14, 256  ;;  %84 = vbcast.lane.b32.xlu0 %v82_v15, 256  ;;  %v422_v53 = vld [vmem:[#allocation4 + $0x108] sm:$0xff]  ;;  %v424_v54 = vld [vmem:[#allocation4 + $0x118] sm:$0xff]  ;;  %v421_v55 = vld [vmem:[#allocation4 + $0x100] sm:$0xff]  ;;  %v173_v9 = vrot.slane %v70_v38, %v116_v27  ;;  %v180_v10 = vrot.slane %v70_v38, %v123_v26 }
  0x2c   :  { %560 = vmatprep.subr.mxu1 %v436_v37  ;;  %484 = vmatpush1.msra.mxu0 %v433_v39  ;;  %v423_v56 = vld [vmem:[#allocation4 + $0x110] sm:$0xff]  ;;  %v418_v57 = vld [vmem:[#allocation4 + $0xe8] sm:$0xff]  ;;  %v420_v58 = vld [vmem:[#allocation4 + $0xf8] sm:$0xff]  ;;  %v13056_v37 = vmov 0.0  }
  0x2d   :  { %561 = vmatpush1.msra.mxu1 %v435_v40  ;;  %485 = vmatprep.subr.mxu0 %v430_v41  ;;  %v417_v61 = vld [vmem:[#allocation4 + $0xe0] sm:$0xff]  ;;  %v419_v62 = vld [vmem:[#allocation4 + $0xf0] sm:$0xff]  ;;  %v414_v63 = vld [vmem:[#allocation4 + $0xc8] sm:$0xff] }
  0x2e   :  { %562 = vmatprep.subr.mxu1 %v432_v42  ;;  %486 = vmatpush1.msra.mxu0 %v429_v45  ;;  %v416_v0 = vld [vmem:[#allocation4 + $0xd8] sm:$0xff]  ;;  %v413_v7 = vld [vmem:[#allocation4 + $0xc0] sm:$0xff]  ;;  %v415_v8 = vld [vmem:[#allocation4 + $0xd0] sm:$0xff] }
  0x2f   :  { %112 = vbcast.lane.b32.xlu1 %v110_v24, 256  ;;  %105 = vbcast.lane.b32.xlu0 %v103_v25, 256  ;;  %v410_v11 = vld [vmem:[#allocation4 + $0xa8] sm:$0xff]  ;;  %v412_v12 = vld [vmem:[#allocation4 + $0xb8] sm:$0xff]  ;;  %v409_v13 = vld [vmem:[#allocation4 + $0xa0] sm:$0xff] }
  0x30   :  { %563 = vmatpush1.msra.mxu1 %v431_v46  ;;  %487 = vmatprep.subr.mxu0 %v426_v47  ;;  %v411_v14 = vld [vmem:[#allocation4 + $0xb0] sm:$0xff]  ;;  %v406_v15 = vld [vmem:[#allocation4 + $0x88] sm:$0xff]  ;;  %v408_v16 = vld [vmem:[#allocation4 + $0x98] sm:$0xff] }
  0x31   :  { %564 = vmatprep.subr.mxu1 %v428_v48  ;;  %488 = vmatpush1.msra.mxu0 %v425_v49  ;;  %v405_v17 = vld [vmem:[#allocation4 + $0x80] sm:$0xff]  ;;  %v407_v18 = vld [vmem:[#allocation4 + $0x90] sm:$0xff]  ;;  %v402_v19 = vld [vmem:[#allocation4 + $0x68] sm:$0xff] }
  0x32   :  { %565 = vmatpush1.msra.mxu1 %v427_v50  ;;  %489 = vmatprep.subr.mxu0 %v422_v53  ;;  %v404_v20 = vld [vmem:[#allocation4 + $0x78] sm:$0xff]  ;;  %v401_v21 = vld [vmem:[#allocation4 + $0x60] sm:$0xff]  ;;  %v403_v22 = vld [vmem:[#allocation4 + $0x70] sm:$0xff] }
  0x33   :  { %126 = vbcast.lane.b32.xlu1 %v124_v34, 256  ;;  %119 = vbcast.lane.b32.xlu0 %v117_v35, 256  ;;  %v398_v23 = vld [vmem:[#allocation4 + $0x48] sm:$0xff]  ;;  %v400_v24 = vld [vmem:[#allocation4 + $0x58] sm:$0xff]  ;;  %v397_v25 = vld [vmem:[#allocation4 + $0x40] sm:$0xff] }
  0x34   :  { %566 = vmatprep.subr.mxu1 %v424_v54  ;;  %490 = vmatpush1.msra.mxu0 %v421_v55  ;;  %v399_v26 = vld [vmem:[#allocation4 + $0x50] sm:$0xff]  ;;  %v394_v27 = vld [vmem:[#allocation4 + $0x28] sm:$0xff]  ;;  %v396_v28 = vld [vmem:[#allocation4 + $0x38] sm:$0xff] }
  0x35   :  { %567 = vmatpush1.msra.mxu1 %v423_v56  ;;  %491 = vmatprep.subr.mxu0 %v418_v57  ;;  %v393_v29 = vld [vmem:[#allocation4 + $0x20] sm:$0xff]  ;;  %v395_v30 = vld [vmem:[#allocation4 + $0x30] sm:$0xff]  ;;  %v390_v31 = vld [vmem:[#allocation4 + $0x8] sm:$0xff] }
  0x36   :  { %568 = vmatprep.subr.mxu1 %v420_v58  ;;  %492 = vmatpush1.msra.mxu0 %v417_v61  ;;  %v392_v32 = vld [vmem:[#allocation4 + $0x18] sm:$0xff]  ;;  %v389_v33 = vld [vmem:[#allocation4] sm:$0xff]  ;;  %v391_v34 = vld [vmem:[#allocation4 + $0x10] sm:$0xff] }
  0x37   :  { %133 = vbcast.lane.b32.xlu0 %v131_v43, 256  ;;  %140 = vbcast.lane.b32.xlu1 %v138_v44, 256  ;;  %v9251_v35 = vld [vmem:[#allocation7 + $0x1e8] sm:$0xff]  ;;  %v9253_v36 = vld [vmem:[#allocation7 + $0x1f8] sm:$0xff]  ;;  %v9478_v2 = vld [vmem:[#allocation7 + $0x30] sm:$0xff] }
  0x38   :  { %569 = vmatpush1.msra.mxu1 %v419_v62  ;;  %493 = vmatprep.subr.mxu0 %v414_v63  ;;  %v9262_v38 = vld [vmem:[%s13044_s1] sm:$0x1f]  ;;  %v9472_v1 = vld [vmem:[#allocation7 + $0x38] sm:$0xff]  ;;  %13504 = vst [vmem:[#allocation35_spill] sm:$0xff] %v9478_v2  ;;  %v9488_v3 = vld [vmem:[#allocation7] sm:$0xff] }
  0x39   :  { %570 = vmatprep.subr.mxu1 %v416_v0  ;;  %494 = vmatpush1.msra.mxu0 %v413_v7  ;;  %13502 = vst [vmem:[#allocation33_spill] sm:$0xff] %v9472_v1  ;;  %v9482_v5 = vld [vmem:[#allocation7 + $0x8] sm:$0xff]  ;;  %v9484_v6 = vld [vmem:[#allocation7 + $0x18] sm:$0xff]  ;;  %13507 = vst [vmem:[#allocation38_spill] sm:$0xff] %v9488_v3 }
  0x3a   :  { %571 = vmatpush1.msra.mxu1 %v415_v8  ;;  %495 = vmatprep.subr.mxu0 %v410_v11  ;;  %13505 = vst [vmem:[#allocation36_spill] sm:$0xff] %v9482_v5  ;;  %13506 = vst [vmem:[#allocation37_spill] sm:$0xff] %v9484_v6  ;;  %v9492_v4 = vld [vmem:[#allocation7 + $0x10] sm:$0xff] }
  0x3b   :  { %147 = vbcast.lane.b32.xlu0 %v145_v51, 256  ;;  %154 = vbcast.lane.b32.xlu1 %v152_v52, 256  ;;  %13508 = vst [vmem:[#allocation39_spill] sm:$0xff] %v9492_v4 }
  0x3c   :  { %572 = vmatprep.subr.mxu1 %v412_v12  ;;  %496 = vmatpush1.msra.mxu0 %v409_v13 }
  0x3d   :  { %573 = vmatpush1.msra.mxu1 %v411_v14  ;;  %497 = vmatprep.subr.mxu0 %v406_v15 }
  0x3e   :  { %574 = vmatprep.subr.mxu1 %v408_v16  ;;  %498 = vmatpush1.msra.mxu0 %v405_v17 }
  0x3f   :  { %161 = vbcast.lane.b32.xlu0 %v159_v59, 256  ;;  %168 = vbcast.lane.b32.xlu1 %v166_v60, 256 }
  0x40   :  { %575 = vmatpush1.msra.mxu1 %v407_v18  ;;  %499 = vmatprep.subr.mxu0 %v402_v19 }
  0x41   :  { %576 = vmatprep.subr.mxu1 %v404_v20  ;;  %500 = vmatpush1.msra.mxu0 %v401_v21 }
  0x42   :  { %577 = vmatpush1.msra.mxu1 %v403_v22  ;;  %501 = vmatprep.subr.mxu0 %v398_v23 }
  0x43   :  { %175 = vbcast.lane.b32.xlu0 %v173_v9, 256  ;;  %182 = vbcast.lane.b32.xlu1 %v180_v10, 256 }
  0x44   :  { %578 = vmatprep.subr.mxu1 %v400_v24  ;;  %502 = vmatpush1.msra.mxu0 %v397_v25 }
  0x45   :  { %579 = vmatpush1.msra.mxu1 %v399_v26  ;;  %503 = vmatprep.subr.mxu0 %v394_v27 }
  0x46   :  { %580 = vmatprep.subr.mxu1 %v396_v28  ;;  %504 = vmatpush1.msra.mxu0 %v393_v29 }
  0x47   :  { %581 = vmatpush1.msra.mxu1 %v395_v30  ;;  %505 = vmatprep.subr.mxu0 %v390_v31 }
  0x48   :  { %582 = vmatprep.subr.mxu1 %v392_v32  ;;  %506 = vmatpush1.msra.mxu0 %v389_v33 }
  0x49   :  { %583 = vmatpush1.msra.mxu1 %v391_v34  ;;  %539 = vmatprep.mubr.f32.mxu0 %v13056_v37 }
  0x4a   :  { %616 = vmatprep.mubr.f32.mxu1 %v13056_v37  ;;  %693 = vmatprep.subr.mxu0 %v9251_v35 }
  0x4b   :  { %764 = vmatprep.subr.mxu1 %v9253_v36 }
  0x99   :  { %v92_v39 = vpop.permute.xlu1 %91  ;;  %v78_v40 = vpop.permute.xlu0 %77 }
  0x9a   :  { %v186_v41 = vmul.f32 %v92_v39, %v9262_v38  ;;  %v184_v42 = vmul.f32 %v78_v40, %v9262_v38 }
  0x9c   :  { %v202_v43 = vmax.f32 %v186_v41, 0.0  ;;  %v200_v44 = vmax.f32 %v184_v42, 0.0 }
  0x9d   :  { %v99_v45 = vpop.permute.xlu1 %98  ;;  %v85_v46 = vpop.permute.xlu0 %84 }
  0x9e   :  { %v231_v47 = vsel %vm216_vm0, %v202_v43, 0.0  ;;  %v217_v48 = vsel %vm216_vm0, %v200_v44, 0.0  ;;  %v187_v49 = vmul.f32 %v99_v45, %v9262_v38  ;;  %v185_v50 = vmul.f32 %v85_v46, %v9262_v38 }
  0x9f   :  { %v232_v51 = vrot.slane %v231_v47, 4  ;;  %v218_v52 = vrot.slane %v217_v48, 4 }
  0xa0   :  { %v203_v53 = vmax.f32 %v187_v49, 0.0  ;;  %v201_v54 = vmax.f32 %v185_v50, 0.0 }
  0xa1   :  { %v233_v55 = vadd.f32 %v232_v51, %v231_v47  ;;  %v219_v56 = vadd.f32 %v218_v52, %v217_v48  ;;  %v113_v57 = vpop.permute.xlu1 %112  ;;  %v106_v58 = vpop.permute.xlu0 %105 }
  0xa2   :  { %v238_v59 = vsel %vm216_vm0, %v203_v53, 0.0  ;;  %v224_v60 = vsel %vm216_vm0, %v201_v54, 0.0  ;;  %v189_v61 = vmul.f32 %v113_v57, %v9262_v38  ;;  %v188_v62 = vmul.f32 %v106_v58, %v9262_v38 }
  0xa3   :  { %v234_v63 = vrot.slane %v233_v55, 2  ;;  %v220_v0 = vrot.slane %v219_v56, 2  ;;  %v239_v7 = vrot.slane %v238_v59, 4  ;;  %v225_v8 = vrot.slane %v224_v60, 4 }
  0xa4   :  { %v205_v9 = vmax.f32 %v189_v61, 0.0  ;;  %v204_v10 = vmax.f32 %v188_v62, 0.0 }
  0xa5   :  { %v235_v11 = vadd.f32 %v234_v63, %v233_v55  ;;  %v221_v12 = vadd.f32 %v220_v0, %v219_v56  ;;  %v240_v13 = vadd.f32 %v239_v7, %v238_v59  ;;  %v226_v14 = vadd.f32 %v225_v8, %v224_v60  ;;  %v127_v15 = vpop.permute.xlu1 %126  ;;  %v120_v16 = vpop.permute.xlu0 %119 }
  0xa6   :  { %v252_v17 = vsel %vm216_vm0, %v205_v9, 0.0  ;;  %v245_v18 = vsel %vm216_vm0, %v204_v10, 0.0  ;;  %v191_v19 = vmul.f32 %v127_v15, %v9262_v38  ;;  %v190_v20 = vmul.f32 %v120_v16, %v9262_v38 }
  0xa7   :  { %v236_v21 = vrot.slane %v235_v11, 1  ;;  %v222_v22 = vrot.slane %v221_v12, 1  ;;  %v241_v23 = vrot.slane %v240_v13, 2  ;;  %v227_v24 = vrot.slane %v226_v14, 2 }
  0xa8   :  { %v253_v25 = vrot.slane %v252_v17, 4  ;;  %v246_v26 = vrot.slane %v245_v18, 4  ;;  %v207_v27 = vmax.f32 %v191_v19, 0.0  ;;  %v206_v28 = vmax.f32 %v190_v20, 0.0 }
  0xa9   :  { %v237_v29 = vadd.f32 %v236_v21, %v235_v11  ;;  %v223_v30 = vadd.f32 %v222_v22, %v221_v12  ;;  %v242_v31 = vadd.f32 %v241_v23, %v240_v13  ;;  %v228_v32 = vadd.f32 %v227_v24, %v226_v14  ;;  %v134_v33 = vpop.permute.xlu0 %133  ;;  %v141_v34 = vpop.permute.xlu1 %140 }
  0xaa   :  { %v254_v39 = vadd.f32 %v253_v25, %v252_v17  ;;  %v247_v40 = vadd.f32 %v246_v26, %v245_v18  ;;  %v266_v41 = vsel %vm216_vm0, %v207_v27, 0.0  ;;  %v259_v42 = vsel %vm216_vm0, %v206_v28, 0.0 }
  0xab   :  { %v332_v43 = vmul.f32 0.2, %v237_v29  ;;  %v330_v44 = vmul.f32 0.2, %v223_v30  ;;  %v243_v45 = vrot.slane %v242_v31, 1  ;;  %v229_v46 = vrot.slane %v228_v32, 1 }
  0xac   :  { %v255_v47 = vrot.slane %v254_v39, 2  ;;  %v248_v48 = vrot.slane %v247_v40, 2  ;;  %v267_v49 = vrot.slane %v266_v41, 4  ;;  %v260_v50 = vrot.slane %v259_v42, 4 }
  0xad   :  { %v244_v51 = vadd.f32 %v243_v45, %v242_v31  ;;  %v230_v52 = vadd.f32 %v229_v46, %v228_v32  ;;  %v192_v53 = vmul.f32 %v134_v33, %v9262_v38  ;;  %v193_v54 = vmul.f32 %v141_v34, %v9262_v38  ;;  %v148_v55 = vpop.permute.xlu0 %147  ;;  %v155_v0 = vpop.permute.xlu1 %154 }
  0xae   :  { %v256_v56 = vadd.f32 %v255_v47, %v254_v39  ;;  %v249_v57 = vadd.f32 %v248_v48, %v247_v40  ;;  %v268_v58 = vadd.f32 %v267_v49, %v266_v41  ;;  %v261_v59 = vadd.f32 %v260_v50, %v259_v42 }
  0xaf   :  { %v333_v60 = vmul.f32 0.2, %v244_v51  ;;  %v331_v61 = vmul.f32 0.2, %v230_v52  ;;  %v208_v62 = vmax.f32 %v192_v53, 0.0  ;;  %v209_v63 = vmax.f32 %v193_v54, 0.0 }
  0xb0   :  { %v257_v7 = vrot.slane %v256_v56, 1  ;;  %v250_v8 = vrot.slane %v249_v57, 1  ;;  %v269_v9 = vrot.slane %v268_v58, 2  ;;  %v262_v10 = vrot.slane %v261_v59, 2 }
  0xb1   :  { %v363_v11 = vsel %vm362_vm1, %v331_v61, %v330_v44  ;;  %v273_v12 = vsel %vm216_vm0, %v208_v62, 0.0  ;;  %v280_v13 = vsel %vm216_vm0, %v209_v63, 0.0  ;;  %v194_v14 = vmul.f32 %v148_v55, %v9262_v38  ;;  %v162_v15 = vpop.permute.xlu0 %161  ;;  %v169_v32 = vpop.permute.xlu1 %168  ;;  %v9298_v63 = vld [vmem:[#allocation7 + $0x1e0] sm:$0xff] }
  0xb2   :  { %v365_v16 = vsel %vm364_vm2, %v332_v43, %v363_v11  ;;  %v258_v17 = vadd.f32 %v257_v7, %v256_v56  ;;  %v251_v18 = vadd.f32 %v250_v8, %v249_v57  ;;  %v270_v19 = vadd.f32 %v269_v9, %v268_v58  ;;  %v9303_v11 = vld [vmem:[#allocation7 + $0x1c8] sm:$0xff] }
  0xb3   :  { %v367_v20 = vsel %vm366_vm3, %v333_v60, %v365_v16  ;;  %v263_v21 = vadd.f32 %v262_v10, %v261_v59  ;;  %v274_v22 = vrot.slane %v273_v12, 4  ;;  %v281_v23 = vrot.slane %v280_v13, 4 }
  0xb4   :  { %v335_v24 = vmul.f32 0.2, %v258_v17  ;;  %v334_v25 = vmul.f32 0.2, %v251_v18  ;;  %v271_v26 = vrot.slane %v270_v19, 1  ;;  %v210_v27 = vmax.f32 %v194_v14, 0.0 }
  0xb5   :  { %v264_v28 = vrot.slane %v263_v21, 1  ;;  %v275_v29 = vadd.f32 %v274_v22, %v273_v12  ;;  %v282_v30 = vadd.f32 %v281_v23, %v280_v13  ;;  %v195_v31 = vmul.f32 %v155_v0, %v9262_v38  ;;  %v176_v45 = vpop.permute.xlu0 %175  ;;  %v183_v62 = vpop.permute.xlu1 %182  ;;  %v9300_v0 = vld [vmem:[#allocation7 + $0x1f0] sm:$0xff]  ;;  %v9305_v12 = vld [vmem:[#allocation7 + $0x1d8] sm:$0xff]  ;;  %v9307_v17 = vld [vmem:[#allocation7 + $0x1c0] sm:$0xff] }
  0xb6   :  { %v369_v33 = vsel %vm368_vm4, %v334_v25, %v367_v20  ;;  %v272_v34 = vadd.f32 %v271_v26, %v270_v19  ;;  %v287_v39 = vsel %vm216_vm0, %v210_v27, 0.0  ;;  %v196_v40 = vmul.f32 %v162_v15, %v9262_v38  ;;  %v9309_v18 = vld [vmem:[#allocation7 + $0x1d0] sm:$0xff]  ;;  %v9311_v19 = vld [vmem:[#allocation7 + $0x1a8] sm:$0xff]  ;;  %v9319_v25 = vld [vmem:[#allocation7 + $0x1a0] sm:$0xff] }
  0xb7   :  { %v371_v41 = vsel %vm370_vm5, %v335_v24, %v369_v33  ;;  %v265_v42 = vadd.f32 %v264_v28, %v263_v21  ;;  %v276_v43 = vrot.slane %v275_v29, 2  ;;  %v283_v44 = vrot.slane %v282_v30, 2  ;;  %v9317_v24 = vld [vmem:[#allocation7 + $0x1b8] sm:$0xff]  ;;  %v9321_v26 = vld [vmem:[#allocation7 + $0x1b0] sm:$0xff] }
  0xb8   :  { %v337_v46 = vmul.f32 0.2, %v272_v34  ;;  %v288_v47 = vrot.slane %v287_v39, 4  ;;  %v211_v48 = vmax.f32 %v195_v31, 0.0  ;;  %v212_v49 = vmax.f32 %v196_v40, 0.0  ;;  %v9328_v34 = vld [vmem:[#allocation7 + $0x188] sm:$0xff] }
  0xb9   :  { %v336_v50 = vmul.f32 0.2, %v265_v42  ;;  %v277_v51 = vadd.f32 %v276_v43, %v275_v29  ;;  %v284_v52 = vadd.f32 %v283_v44, %v282_v30  ;;  %v197_v53 = vmul.f32 %v169_v32, %v9262_v38  ;;  %v9334_v43 = vld [vmem:[#allocation7 + $0x180] sm:$0xff]  ;;  %v9336_v44 = vld [vmem:[#allocation7 + $0x190] sm:$0xff] }
  0xba   :  { %v289_v54 = vadd.f32 %v288_v47, %v287_v39  ;;  %v294_v55 = vsel %vm216_vm0, %v211_v48, 0.0  ;;  %v301_v56 = vsel %vm216_vm0, %v212_v49, 0.0  ;;  %v198_v57 = vmul.f32 %v176_v45, %v9262_v38  ;;  %v9330_v39 = vld [vmem:[#allocation7 + $0x198] sm:$0xff]  ;;  %v9342_v49 = vld [vmem:[#allocation7 + $0x168] sm:$0xff] }
  0xbb   :  { %v373_v58 = vsel %vm372_vm6, %v336_v50, %v371_v41  ;;  %v278_v59 = vrot.slane %v277_v51, 1  ;;  %v285_v60 = vrot.slane %v284_v52, 1  ;;  %v295_v61 = vrot.slane %v294_v55, 4  ;;  %v9344_v50 = vld [vmem:[#allocation7 + $0x178] sm:$0xff] }
  0xbc   :  { %v375_v7 = vsel %vm374_vm7, %v337_v46, %v373_v58  ;;  %v290_v8 = vrot.slane %v289_v54, 2  ;;  %v302_v9 = vrot.slane %v301_v56, 4  ;;  %v213_v10 = vmax.f32 %v197_v53, 0.0 }
  0xbd   :  { %385 = vst [vmem:[#allocation2] sm:$0xff] %v375_v7  ;;  %v279_v13 = vadd.f32 %v278_v59, %v277_v51  ;;  %v286_v14 = vadd.f32 %v285_v60, %v284_v52  ;;  %v296_v15 = vadd.f32 %v295_v61, %v294_v55  ;;  %v214_v16 = vmax.f32 %v198_v57, 0.0  ;;  %540 = vmatmul.mubr.f32.vlgmr.msra.gmra.mxu0 %v375_v7  ;;  %v9348_v55 = vld [vmem:[#allocation7 + $0x160] sm:$0xff]  ;;  %v9354_v59 = vld [vmem:[#allocation7 + $0x148] sm:$0xff]  ;;  %v9356_v60 = vld [vmem:[#allocation7 + $0x158] sm:$0xff] }
  0xbe   :  { %617 = vmatmul.mubr.f32.vlgmr.msra.gmra.mxu1 %v375_v7  ;;  %v291_v20 = vadd.f32 %v290_v8, %v289_v54  ;;  %v303_v21 = vadd.f32 %v302_v9, %v301_v56  ;;  %v308_v22 = vsel %vm216_vm0, %v213_v10, 0.0  ;;  %v199_v23 = vmul.f32 %v183_v62, %v9262_v38  ;;  %694 = vmatpush1.msra.mxu0 %v9298_v63  ;;  %v9350_v56 = vld [vmem:[#allocation7 + $0x170] sm:$0xff]  ;;  %v9360_v9 = vld [vmem:[#allocation7 + $0x140] sm:$0xff] }
  0xbf   :  { %765 = vmatpush1.msra.mxu1 %v9300_v0  ;;  %v338_v27 = vmul.f32 0.2, %v279_v13  ;;  %v339_v28 = vmul.f32 0.2, %v286_v14  ;;  %v297_v29 = vrot.slane %v296_v15, 2  ;;  %v309_v30 = vrot.slane %v308_v22, 4  ;;  %695 = vmatprep.subr.mxu0 %v9303_v11 }
  0xc0   :  { %766 = vmatprep.subr.mxu1 %v9305_v12  ;;  %v292_v31 = vrot.slane %v291_v20, 1  ;;  %v304_v38 = vrot.slane %v303_v21, 2  ;;  %v315_v32 = vsel %vm216_vm0, %v214_v16, 0.0  ;;  %v215_v33 = vmax.f32 %v199_v23, 0.0  ;;  %696 = vmatpush1.msra.mxu0 %v9307_v17  ;;  %v9362_v10 = vld [vmem:[#allocation7 + $0x150] sm:$0xff]  ;;  %v9369_v16 = vld [vmem:[#allocation7 + $0x138] sm:$0xff] }
  0xc1   :  { %767 = vmatpush1.msra.mxu1 %v9309_v18  ;;  %v298_v40 = vadd.f32 %v297_v29, %v296_v15  ;;  %v310_v41 = vadd.f32 %v309_v30, %v308_v22  ;;  %v316_v42 = vrot.slane %v315_v32, 4  ;;  %697 = vmatprep.subr.mxu0 %v9311_v19  ;;  %v376_v45 = vsel %vm362_vm1, %v339_v28, %v338_v27  ;;  %v9367_v15 = vld [vmem:[#allocation7 + $0x128] sm:$0xff]  ;;  %v9373_v27 = vld [vmem:[#allocation7 + $0x120] sm:$0xff]  ;;  %v9375_v28 = vld [vmem:[#allocation7 + $0x130] sm:$0xff] }
  0xc2   :  { %768 = vmatprep.subr.mxu1 %v9317_v24  ;;  %v293_v46 = vadd.f32 %v292_v31, %v291_v20  ;;  %v305_v47 = vadd.f32 %v304_v38, %v303_v21  ;;  %v322_v48 = vsel %vm216_vm0, %v215_v33, 0.0  ;;  %698 = vmatpush1.msra.mxu0 %v9319_v25  ;;  %v9379_v30 = vld [vmem:[#allocation7 + $0x108] sm:$0xff]  ;;  %v9381_v31 = vld [vmem:[#allocation7 + $0x118] sm:$0xff] }
  0xc3   :  { %769 = vmatpush1.msra.mxu1 %v9321_v26  ;;  %v299_v51 = vrot.slane %v298_v40, 1  ;;  %v311_v52 = vrot.slane %v310_v41, 2  ;;  %v317_v53 = vadd.f32 %v316_v42, %v315_v32  ;;  %v323_v54 = vrot.slane %v322_v48, 4  ;;  %699 = vmatprep.subr.mxu0 %v9328_v34  ;;  %v9388_v42 = vld [vmem:[#allocation7 + $0x110] sm:$0xff] }
  0xc4   :  { %770 = vmatprep.subr.mxu1 %v9330_v39  ;;  %v340_v57 = vmul.f32 0.2, %v293_v46  ;;  %v306_v58 = vrot.slane %v305_v47, 1  ;;  %700 = vmatpush1.msra.mxu0 %v9334_v43 }
  0xc5   :  { %771 = vmatpush1.msra.mxu1 %v9336_v44  ;;  %v300_v61 = vadd.f32 %v299_v51, %v298_v40  ;;  %v312_v62 = vadd.f32 %v311_v52, %v310_v41  ;;  %v318_v7 = vrot.slane %v317_v53, 2  ;;  %v324_v8 = vadd.f32 %v323_v54, %v322_v48  ;;  %701 = vmatprep.subr.mxu0 %v9342_v49  ;;  %v9386_v41 = vld [vmem:[#allocation7 + $0x100] sm:$0xff]  ;;  %v9395_v51 = vld [vmem:[#allocation7 + $0xe8] sm:$0xff]  ;;  %v9397_v52 = vld [vmem:[#allocation7 + $0xf8] sm:$0xff] }
  0xc6   :  { %772 = vmatprep.subr.mxu1 %v9344_v50  ;;  %v377_v13 = vsel %vm364_vm2, %v340_v57, %v376_v45  ;;  %v307_v14 = vadd.f32 %v306_v58, %v305_v47  ;;  %702 = vmatpush1.msra.mxu0 %v9348_v55  ;;  %v9403_v54 = vld [vmem:[#allocation7 + $0xf0] sm:$0xff] }
  0xc7   :  { %773 = vmatpush1.msra.mxu1 %v9350_v56  ;;  %v341_v20 = vmul.f32 0.2, %v300_v61  ;;  %v313_v21 = vrot.slane %v312_v62, 1  ;;  %v319_v22 = vadd.f32 %v318_v7, %v317_v53  ;;  %v325_v23 = vrot.slane %v324_v8, 2  ;;  %703 = vmatprep.subr.mxu0 %v9354_v59  ;;  %v9401_v53 = vld [vmem:[#allocation7 + $0xe0] sm:$0xff]  ;;  %v9407_v61 = vld [vmem:[#allocation7 + $0xc8] sm:$0xff] }
  0xc8   :  { %774 = vmatprep.subr.mxu1 %v9356_v60  ;;  %v342_v29 = vmul.f32 0.2, %v307_v14  ;;  %704 = vmatpush1.msra.mxu0 %v9360_v9 }
  0xc9   :  { %775 = vmatpush1.msra.mxu1 %v9362_v10  ;;  %v378_v38 = vsel %vm366_vm3, %v341_v20, %v377_v13  ;;  %v314_v32 = vadd.f32 %v313_v21, %v312_v62  ;;  %v320_v33 = vrot.slane %v319_v22, 1  ;;  %v326_v40 = vadd.f32 %v325_v23, %v324_v8  ;;  %705 = vmatprep.subr.mxu0 %v9367_v15  ;;  %v9409_v62 = vld [vmem:[#allocation7 + $0xd8] sm:$0xff]  ;;  %v9414_v8 = vld [vmem:[#allocation7 + $0xc0] sm:$0xff]  ;;  %v9416_v13 = vld [vmem:[#allocation7 + $0xd0] sm:$0xff] }
  0xca   :  { %776 = vmatprep.subr.mxu1 %v9369_v16  ;;  %706 = vmatpush1.msra.mxu0 %v9373_v27  ;;  %v379_v45 = vsel %vm368_vm4, %v342_v29, %v378_v38  ;;  %v9423_v21 = vld [vmem:[#allocation7 + $0xa8] sm:$0xff]  ;;  %v9430_v29 = vld [vmem:[#allocation7 + $0xa0] sm:$0xff]  ;;  %v9432_v38 = vld [vmem:[#allocation7 + $0xb0] sm:$0xff] }
  0xcb   :  { %777 = vmatpush1.msra.mxu1 %v9375_v28  ;;  %v343_v46 = vmul.f32 0.2, %v314_v32  ;;  %v321_v47 = vadd.f32 %v320_v33, %v319_v22  ;;  %v327_v48 = vrot.slane %v326_v40, 1  ;;  %707 = vmatprep.subr.mxu0 %v9379_v30  ;;  %v9425_v22 = vld [vmem:[#allocation7 + $0xb8] sm:$0xff]  ;;  %13487 = vst [vmem:[#allocation18_spill] sm:$0xff] %v9430_v29  ;;  %13488 = vst [vmem:[#allocation19_spill] sm:$0xff] %v9432_v38 }
  0xcc   :  { %778 = vmatprep.subr.mxu1 %v9381_v31  ;;  %708 = vmatpush1.msra.mxu0 %v9386_v41  ;;  %v9434_v32 = vld [vmem:[#allocation7 + $0x88] sm:$0xff]  ;;  %v9436_v33 = vld [vmem:[#allocation7 + $0x98] sm:$0xff] }
  0xcd   :  { %779 = vmatpush1.msra.mxu1 %v9388_v42  ;;  %v344_v57 = vmul.f32 0.2, %v321_v47  ;;  %v328_v58 = vadd.f32 %v327_v48, %v326_v40  ;;  %545 = vmatprep.mubr.f32.mxu0 %v13056_v37  ;;  %v380_v7 = vsel %vm370_vm5, %v343_v46, %v379_v45  ;;  %13489 = vst [vmem:[#allocation20_spill] sm:$0xff] %v9434_v32  ;;  %13490 = vst [vmem:[#allocation21_spill] sm:$0xff] %v9436_v33  ;;  %v9440_v40 = vld [vmem:[#allocation7 + $0x80] sm:$0xff]  ;;  %v9442_v45 = vld [vmem:[#allocation7 + $0x90] sm:$0xff] }
  0xce   :  { %622 = vmatprep.mubr.f32.mxu1 %v13056_v37  ;;  %709 = vmatprep.subr.mxu0 %v9395_v51  ;;  %13491 = vst [vmem:[#allocation22_spill] sm:$0xff] %v9440_v40  ;;  %13492 = vst [vmem:[#allocation23_spill] sm:$0xff] %v9442_v45  ;;  %v9446_v46 = vld [vmem:[#allocation7 + $0x68] sm:$0xff]  ;;  %v9448_v47 = vld [vmem:[#allocation7 + $0x78] sm:$0xff] }
  0xcf   :  { %780 = vmatprep.subr.mxu1 %v9397_v52  ;;  %v381_v14 = vsel %vm372_vm6, %v344_v57, %v380_v7  ;;  %v345_v20 = vmul.f32 0.2, %v328_v58  ;;  %710 = vmatpush1.msra.mxu0 %v9401_v53  ;;  %13493 = vst [vmem:[#allocation24_spill] sm:$0xff] %v9446_v46  ;;  %13494 = vst [vmem:[#allocation25_spill] sm:$0xff] %v9448_v47  ;;  %v9452_v48 = vld [vmem:[#allocation7 + $0x60] sm:$0xff]  ;;  %v9454_v57 = vld [vmem:[#allocation7 + $0x70] sm:$0xff] }
  0xd0   :  { %781 = vmatpush1.msra.mxu1 %v9403_v54  ;;  %711 = vmatprep.subr.mxu0 %v9407_v61  ;;  %13495 = vst [vmem:[#allocation26_spill] sm:$0xff] %v9452_v48  ;;  %13496 = vst [vmem:[#allocation27_spill] sm:$0xff] %v9454_v57  ;;  %v9458_v58 = vld [vmem:[#allocation7 + $0x48] sm:$0xff]  ;;  %v9460_v7 = vld [vmem:[#allocation7 + $0x58] sm:$0xff] }
  0xd1   :  { %782 = vmatprep.subr.mxu1 %v9409_v62  ;;  %v382_v23 = vsel %vm374_vm7, %v345_v20, %v381_v14  ;;  %712 = vmatpush1.msra.mxu0 %v9414_v8  ;;  %13497 = vst [vmem:[#allocation28_spill] sm:$0xff] %v9458_v58  ;;  %13498 = vst [vmem:[#allocation29_spill] sm:$0xff] %v9460_v7  ;;  %v9464_v14 = vld [vmem:[#allocation7 + $0x40] sm:$0xff]  ;;  %v9466_v20 = vld [vmem:[#allocation7 + $0x50] sm:$0xff] }
  0xd2   :  { %783 = vmatpush1.msra.mxu1 %v9416_v13  ;;  %386 = vst [vmem:[#allocation2 + $0x8] sm:$0xff] %v382_v23  ;;  %546 = vmatmul.mubr.f32.gmra.mxu0 %v382_v23  ;;  %13499 = vst [vmem:[#allocation30_spill] sm:$0xff] %v9464_v14  ;;  %v9476_v37 = vld [vmem:[#allocation7 + $0x20] sm:$0xff] }
  0xd3   :  { %623 = vmatmul.mubr.f32.gmra.mxu1 %v382_v23  ;;  %713 = vmatprep.subr.mxu0 %v9423_v21  ;;  %13500 = vst [vmem:[#allocation31_spill] sm:$0xff] %v9466_v20  ;;  %v9470_v23 = vld [vmem:[#allocation7 + $0x28] sm:$0xff]  ;;  %13503 = vst [vmem:[#allocation34_spill] sm:$0xff] %v9476_v37 }
  0xd4   :  { %784 = vmatprep.subr.mxu1 %v9425_v22  ;;  %714 = vmatpush1.msra.mxu0 %v9430_v29  ;;  %13501 = vst [vmem:[#allocation32_spill] sm:$0xff] %v9470_v23 }
  0xd5   :  { %785 = vmatpush1.msra.mxu1 %v9432_v38  ;;  %715 = vmatprep.subr.mxu0 %v9434_v32 }
  0xd6   :  { %786 = vmatprep.subr.mxu1 %v9436_v33  ;;  %716 = vmatpush1.msra.mxu0 %v9440_v40 }
  0xd7   :  { %787 = vmatpush1.msra.mxu1 %v9442_v45  ;;  %717 = vmatprep.subr.mxu0 %v9446_v46 }
  0xd8   :  { %788 = vmatprep.subr.mxu1 %v9448_v47  ;;  %718 = vmatpush1.msra.mxu0 %v9452_v48 }
  0xd9   :  { %789 = vmatpush1.msra.mxu1 %v9454_v57  ;;  %719 = vmatprep.subr.mxu0 %v9458_v58 }
  0xda   :  { %790 = vmatprep.subr.mxu1 %v9460_v7  ;;  %720 = vmatpush1.msra.mxu0 %v9464_v14 }
  0xdb   :  { %791 = vmatpush1.msra.mxu1 %v9466_v20  ;;  %721 = vmatprep.subr.mxu0 %v9470_v23  ;;  %v13509_v20 = vmov 0.0  }
  0xdc   :  { %792 = vmatprep.subr.mxu1 %v9472_v1  ;;  %722 = vmatpush1.msra.mxu0 %v9476_v37 }
  0xdd   :  { %793 = vmatpush1.msra.mxu1 %v9478_v2  ;;  %723 = vmatprep.subr.mxu0 %v9482_v5 }
  0xde   :  { %794 = vmatprep.subr.mxu1 %v9484_v6  ;;  %724 = vmatpush1.msra.mxu0 %v9488_v3 }
  0xdf   :  { %757 = vmatprep.mubr.f32.mxu0 %v13509_v20  ;;  %795 = vmatpush1.msra.mxu1 %v9492_v4 }
  0xe0   :  { %828 = vmatprep.mubr.f32.mxu1 %v13509_v20  ;;  %758 = vmatmul.mubr.f32.vlgmr.msra.gmra.mxu0 %v13509_v20 }
  0xe1   :  { %829 = vmatmul.mubr.f32.vlgmr.msra.gmra.mxu1 %v13509_v20  ;;  %864 = vmatprep.subr.mxu0 %v9251_v35 }
  0xe2   :  { %935 = vmatprep.subr.mxu1 %v9253_v36  ;;  %865 = vmatpush1.msra.mxu0 %v9298_v63 }
  0xe3   :  { %936 = vmatpush1.msra.mxu1 %v9300_v0  ;;  %866 = vmatprep.subr.mxu0 %v9303_v11 }
  0xe4   :  { %937 = vmatprep.subr.mxu1 %v9305_v12  ;;  %867 = vmatpush1.msra.mxu0 %v9307_v17 }
  0xe5   :  { %938 = vmatpush1.msra.mxu1 %v9309_v18  ;;  %868 = vmatprep.subr.mxu0 %v9311_v19 }
  0xe6   :  { %939 = vmatprep.subr.mxu1 %v9317_v24  ;;  %869 = vmatpush1.msra.mxu0 %v9319_v25 }
  0xe7   :  { %940 = vmatpush1.msra.mxu1 %v9321_v26  ;;  %870 = vmatprep.subr.mxu0 %v9328_v34 }
  0xe8   :  { %941 = vmatprep.subr.mxu1 %v9330_v39  ;;  %871 = vmatpush1.msra.mxu0 %v9334_v43 }
  0xe9   :  { %942 = vmatpush1.msra.mxu1 %v9336_v44  ;;  %872 = vmatprep.subr.mxu0 %v9342_v49 }
  0xea   :  { %943 = vmatprep.subr.mxu1 %v9344_v50  ;;  %873 = vmatpush1.msra.mxu0 %v9348_v55 }
  0xeb   :  { %944 = vmatpush1.msra.mxu1 %v9350_v56  ;;  %874 = vmatprep.subr.mxu0 %v9354_v59 }
  0xec   :  { %945 = vmatprep.subr.mxu1 %v9356_v60  ;;  %875 = vmatpush1.msra.mxu0 %v9360_v9 }
  0xed   :  { %946 = vmatpush1.msra.mxu1 %v9362_v10  ;;  %876 = vmatprep.subr.mxu0 %v9367_v15 }
  0xee   :  { %947 = vmatprep.subr.mxu1 %v9369_v16  ;;  %877 = vmatpush1.msra.mxu0 %v9373_v27 }
  0xef   :  { %948 = vmatpush1.msra.mxu1 %v9375_v28  ;;  %878 = vmatprep.subr.mxu0 %v9379_v30 }
  0xf0   :  { %949 = vmatprep.subr.mxu1 %v9381_v31  ;;  %879 = vmatpush1.msra.mxu0 %v9386_v41 }
  0xf1   :  { %950 = vmatpush1.msra.mxu1 %v9388_v42  ;;  %880 = vmatprep.subr.mxu0 %v9395_v51 }
  0xf2   :  { %951 = vmatprep.subr.mxu1 %v9397_v52  ;;  %881 = vmatpush1.msra.mxu0 %v9401_v53 }
  0xf3   :  { %952 = vmatpush1.msra.mxu1 %v9403_v54  ;;  %882 = vmatprep.subr.mxu0 %v9407_v61 }
  0xf4   :  { %953 = vmatprep.subr.mxu1 %v9409_v62  ;;  %883 = vmatpush1.msra.mxu0 %v9414_v8 }
  0xf5   :  { %954 = vmatpush1.msra.mxu1 %v9416_v13  ;;  %884 = vmatprep.subr.mxu0 %v9423_v21 }
  0xf6   :  { %955 = vmatprep.subr.mxu1 %v9425_v22  ;;  %885 = vmatpush1.msra.mxu0 %v9430_v29 }
  0xf7   :  { %956 = vmatpush1.msra.mxu1 %v9432_v38  ;;  %886 = vmatprep.subr.mxu0 %v9434_v32  ;;  %v13510_v32 = vld [vmem:[#allocation31_spill] sm:$0xff] }
  0xf8   :  { %957 = vmatprep.subr.mxu1 %v9436_v33  ;;  %887 = vmatpush1.msra.mxu0 %v9440_v40 }
  0xf9   :  { %958 = vmatpush1.msra.mxu1 %v9442_v45  ;;  %888 = vmatprep.subr.mxu0 %v9446_v46 }
  0xfa   :  { %959 = vmatprep.subr.mxu1 %v9448_v47  ;;  %889 = vmatpush1.msra.mxu0 %v9452_v48 }
  0xfb   :  { %960 = vmatpush1.msra.mxu1 %v9454_v57  ;;  %890 = vmatprep.subr.mxu0 %v9458_v58  ;;  %v13513_v58 = vld [vmem:[#allocation17_spill] sm:$0xff]  ;;  %v13514_v57 = vld [vmem:[#allocation16_spill] sm:$0xff] }
  0xfc   :  { %961 = vmatprep.subr.mxu1 %v9460_v7  ;;  %891 = vmatpush1.msra.mxu0 %v9464_v14 }
  0xfd   :  { %962 = vmatpush1.msra.mxu1 %v13510_v32  ;;  %892 = vmatprep.subr.mxu0 %v9470_v23  ;;  %v13511_v23 = vld [vmem:[#allocation15_spill] sm:$0xff]  ;;  %v13512_v32 = vld [vmem:[#allocation14_spill] sm:$0xff] }
  0xfe   :  { %963 = vmatprep.subr.mxu1 %v9472_v1  ;;  %893 = vmatpush1.msra.mxu0 %v9476_v37 }
  0xff   :  { %964 = vmatpush1.msra.mxu1 %v9478_v2  ;;  %894 = vmatprep.subr.mxu0 %v9482_v5  ;;  %v453_v5 = vld [vmem:[%s13047_s4] sm:$0xf] }
 0x100   :  { %965 = vmatprep.subr.mxu1 %v9484_v6  ;;  %895 = vmatpush1.msra.mxu0 %v9488_v3  ;;  %v458_v3 = vrot.slane %v453_v5, %v13511_v23  ;;  %v466_v14 = vrot.slane %v453_v5, %v13512_v32 }
 0x101   :  { %928 = vmatprep.mubr.f32.mxu0 %v13509_v20  ;;  %966 = vmatpush1.msra.mxu1 %v9492_v4 }
 0x102   :  { %999 = vmatprep.mubr.f32.mxu1 %v13509_v20  ;;  %1053 = vmatprep.subr.mxu0 %v9251_v35  ;;  %v462_v20 = vrot.slane %v453_v5, %v13513_v58  ;;  %v470_v35 = vrot.slane %v453_v5, %v13514_v57 }
 0x103   :  { %1124 = vmatprep.subr.mxu1 %v9253_v36 }
 0x17d   :  { %v541_v1 = vpop.f32.mrf.mxu0 }
 0x17e   :  { %v618_v37 = vpop.f32.mrf.mxu1  ;;  %v9585_v33 = vadd.f32 %v541_v1, %v458_v3 }
 0x17f   :  { %v543_v2 = vpop.f32.mrf.mxu0  ;;  %v9594_v1 = vadd.f32 %v618_v37, %v466_v14 }
 0x180   :  { %v620_v6 = vpop.f32.mrf.mxu1  ;;  %v9587_v32 = vadd.f32 %v543_v2, %v462_v20 }
 0x192   :  { %v547_v7 = vpop.f32.mrf.mxu0 }
 0x193   :  { %v624_v4 = vpop.f32.mrf.mxu1  ;;  %v9577_v48 = vadd.f32 %v547_v7, %v458_v3 }
 0x194   :  { %v9579_v36 = vadd.f32 %v624_v4, %v466_v14  ;;  %v549_v47 = vpop.f32.mrf.mxu0 }
 0x195   :  { %13515 = vst [vmem:[#allocation40_spill] sm:$0xff] %v9577_v48  ;;  %v626_v46 = vpop.f32.mrf.mxu1  ;;  %v9581_v45 = vadd.f32 %v549_v47, %v462_v20  ;;  %v9591_v47 = vadd.f32 %v620_v6, %v470_v35  ;;  %v13537_v48 = vld [vmem:[#allocation36_spill] sm:$0xff] }
 0x196   :  { %13516 = vst [vmem:[#allocation41_spill] sm:$0xff] %v9579_v36  ;;  %v9583_v40 = vadd.f32 %v626_v46, %v470_v35 }
 0x197   :  { %13517 = vst [vmem:[#allocation42_spill] sm:$0xff] %v9581_v45  ;;  %v13536_v45 = vld [vmem:[#allocation35_spill] sm:$0xff] }
 0x198   :  { %13518 = vst [vmem:[#allocation43_spill] sm:$0xff] %v9583_v40  ;;  %v13535_v40 = vld [vmem:[#allocation34_spill] sm:$0xff] }
 0x1a0   :  { %v759_v23 = vpop.f32.mrf.mxu0 }
 0x1a1   :  { %v835_v38 = vadd.f32 %v759_v23, %v9585_v33  ;;  %v830_v4 = vpop.f32.mrf.mxu1 }
 0x1a2   :  { %v761_v58 = vpop.f32.mrf.mxu0  ;;  %v837_v20 = vadd.f32 %v830_v4, %v9594_v1 }
 0x1a3   :  { %v8022_v29 = vmul.f32 -1.442695, %v835_v38  ;;  %v836_v5 = vadd.f32 %v761_v58, %v9587_v32  ;;  %v832_v57 = vpop.f32.mrf.mxu1 }
 0x1a4   :  { %v838_v46 = vadd.f32 %v832_v57, %v9591_v47 }
 0x1a5   :  { %8281 = vpow2.f32 %v8022_v29  ;;  %v8023_v7 = vmul.f32 -1.442695, %v836_v5 }
 0x1a6   :  { %v8024_v3 = vmul.f32 -1.442695, %v838_v46 }
 0x1a7   :  { %8283 = vpow2.f32 %v8023_v7 }
 0x1a8   :  { %8285 = vpow2.f32 %v8024_v3  ;;  %v13520_v3 = vld [vmem:[#allocation19_spill] sm:$0xff] }
 0x1b2   :  { %v8282_v2 = vpop.eup %8281 }
 0x1b3   :  { %v842_v23 = vadd.f32 1.0, %v8282_v2  ;;  %v13521_v2 = vld [vmem:[#allocation20_spill] sm:$0xff] }
 0x1b4   :  { %v8284_v36 = vpop.eup %8283 }
 0x1b5   :  { %8287 = vrcp.f32 %v842_v23  ;;  %v848_v38 = vadd.f32 1.0, %v8284_v36  ;;  %v8286_v29 = vpop.eup %8285  ;;  %v13519_v36 = vld [vmem:[#allocation18_spill] sm:$0xff] }
 0x1b6   :  { %8289 = vtanh.f32 %v837_v20  ;;  %v855_v35 = vadd.f32 1.0, %v8286_v29  ;;  %v13522_v20 = vld [vmem:[#allocation21_spill] sm:$0xff]  ;;  %v13523_v23 = vld [vmem:[#allocation22_spill] sm:$0xff]  ;;  %v13525_v29 = vld [vmem:[#allocation24_spill] sm:$0xff] }
 0x1b7   :  { %8291 = vrcp.f32 %v848_v38  ;;  %v13524_v38 = vld [vmem:[#allocation23_spill] sm:$0xff] }
 0x1b8   :  { %8293 = vrcp.f32 %v855_v35  ;;  %v13529_v35 = vld [vmem:[#allocation28_spill] sm:$0xff] }
 0x1c2   :  { %v8288_v58 = vpop.eup %8287 }
 0x1c3   :  { %v8290_v5 = vpop.eup %8289 }
 0x1c4   :  { %v8292_v6 = vpop.eup %8291  ;;  %v859_v57 = vmul.f32 %v8290_v5, %v8288_v58  ;;  %v13526_v58 = vld [vmem:[#allocation25_spill] sm:$0xff]  ;;  %v13527_v5 = vld [vmem:[#allocation26_spill] sm:$0xff] }
 0x1c5   :  { %v858_v7 = vmul.f32 0.0, %v8292_v6  ;;  %v8294_v14 = vpop.eup %8293  ;;  %v13528_v6 = vld [vmem:[#allocation27_spill] sm:$0xff] }
 0x1c7   :  { %v9597_v37 = vadd.f32 %v859_v57, %v858_v7  ;;  %v13530_v7 = vld [vmem:[#allocation29_spill] sm:$0xff]  ;;  %v13531_v57 = vld [vmem:[#allocation30_spill] sm:$0xff] }
 0x1c9   :  { %8295 = vtanh.f32 %v9597_v37 }
 0x1d6   :  { %v8296_v4 = vpop.eup %8295 }
 0x1d7   :  { %v862_v46 = vmul.f32 %v8296_v4, %v8294_v14  ;;  %v13532_v14 = vld [vmem:[#allocation31_spill] sm:$0xff]  ;;  %v13533_v4 = vld [vmem:[#allocation32_spill] sm:$0xff] }
 0x1d9   :  { %863 = vst [vmem:[#allocation2] sm:$0x3] %v862_v46  ;;  %929 = vmatmul.mubr.f32.vlgmr.msra.gmra.mxu0 %v862_v46  ;;  %1000 = vmatmul.mubr.f32.vlgmr.msra.gmra.mxu1 %v862_v46  ;;  %v13534_v46 = vld [vmem:[#allocation33_spill] sm:$0xff] }
 0x1da   :  { %1054 = vmatpush1.msra.mxu0 %v9298_v63  ;;  %1125 = vmatpush1.msra.mxu1 %v9300_v0 }
 0x1db   :  { %1055 = vmatprep.subr.mxu0 %v9303_v11  ;;  %1126 = vmatprep.subr.mxu1 %v9305_v12 }
 0x1dc   :  { %1056 = vmatpush1.msra.mxu0 %v9307_v17  ;;  %1127 = vmatpush1.msra.mxu1 %v9309_v18 }
 0x1dd   :  { %1057 = vmatprep.subr.mxu0 %v9311_v19  ;;  %1128 = vmatprep.subr.mxu1 %v9317_v24 }
 0x1de   :  { %1058 = vmatpush1.msra.mxu0 %v9319_v25  ;;  %1129 = vmatpush1.msra.mxu1 %v9321_v26 }
 0x1df   :  { %1059 = vmatprep.subr.mxu0 %v9328_v34  ;;  %1130 = vmatprep.subr.mxu1 %v9330_v39 }
 0x1e0   :  { %1060 = vmatpush1.msra.mxu0 %v9334_v43  ;;  %1131 = vmatpush1.msra.mxu1 %v9336_v44 }
 0x1e1   :  { %1061 = vmatprep.subr.mxu0 %v9342_v49  ;;  %1132 = vmatprep.subr.mxu1 %v9344_v50 }
 0x1e2   :  { %1062 = vmatpush1.msra.mxu0 %v9348_v55  ;;  %1133 = vmatpush1.msra.mxu1 %v9350_v56 }
 0x1e3   :  { %1063 = vmatprep.subr.mxu0 %v9354_v59  ;;  %1134 = vmatprep.subr.mxu1 %v9356_v60 }
 0x1e4   :  { %1064 = vmatpush1.msra.mxu0 %v9360_v9  ;;  %1135 = vmatpush1.msra.mxu1 %v9362_v10 }
 0x1e5   :  { %1065 = vmatprep.subr.mxu0 %v9367_v15  ;;  %1136 = vmatprep.subr.mxu1 %v9369_v16 }
 0x1e6   :  { %1066 = vmatpush1.msra.mxu0 %v9373_v27  ;;  %1137 = vmatpush1.msra.mxu1 %v9375_v28 }
 0x1e7   :  { %1067 = vmatprep.subr.mxu0 %v9379_v30  ;;  %1138 = vmatprep.subr.mxu1 %v9381_v31 }
 0x1e8   :  { %1068 = vmatpush1.msra.mxu0 %v9386_v41  ;;  %1139 = vmatpush1.msra.mxu1 %v9388_v42 }
 0x1e9   :  { %1069 = vmatprep.subr.mxu0 %v9395_v51  ;;  %1140 = vmatprep.subr.mxu1 %v9397_v52 }
 0x1ea   :  { %1070 = vmatpush1.msra.mxu0 %v9401_v53  ;;  %1141 = vmatpush1.msra.mxu1 %v9403_v54 }
 0x1eb   :  { %1071 = vmatprep.subr.mxu0 %v9407_v61  ;;  %1142 = vmatprep.subr.mxu1 %v9409_v62 }
 0x1ec   :  { %1072 = vmatpush1.msra.mxu0 %v9414_v8  ;;  %1143 = vmatpush1.msra.mxu1 %v9416_v13 }
 0x1ed   :  { %1073 = vmatprep.subr.mxu0 %v9423_v21  ;;  %1144 = vmatprep.subr.mxu1 %v9425_v22 }
 0x1ee   :  { %1074 = vmatpush1.msra.mxu0 %v13519_v36  ;;  %1145 = vmatpush1.msra.mxu1 %v13520_v3 }
 0x1ef   :  { %1075 = vmatprep.subr.mxu0 %v13521_v2  ;;  %1146 = vmatprep.subr.mxu1 %v13522_v20 }
 0x1f0   :  { %1076 = vmatpush1.msra.mxu0 %v13523_v23  ;;  %1147 = vmatpush1.msra.mxu1 %v13524_v38 }
 0x1f1   :  { %1077 = vmatprep.subr.mxu0 %v13525_v29  ;;  %1148 = vmatprep.subr.mxu1 %v13526_v58 }
 0x1f2   :  { %1078 = vmatpush1.msra.mxu0 %v13527_v5  ;;  %1149 = vmatpush1.msra.mxu1 %v13528_v6  ;;  %v13538_v5 = vld [vmem:[#allocation37_spill] sm:$0xff]  ;;  %v13539_v6 = vld [vmem:[#allocation38_spill] sm:$0xff] }
 0x1f3   :  { %1079 = vmatprep.subr.mxu0 %v13529_v35  ;;  %1150 = vmatprep.subr.mxu1 %v13530_v7  ;;  %v13540_v35 = vmov 0.0   ;;  %v13541_v7 = vld [vmem:[#allocation39_spill] sm:$0xff] }
 0x1f4   :  { %1080 = vmatpush1.msra.mxu0 %v13531_v57  ;;  %1151 = vmatpush1.msra.mxu1 %v13532_v14  ;;  %v9664_v14 = vld [vmem:[#allocation7 + $0x1e8] sm:$0xff] }
 0x1f5   :  { %1081 = vmatprep.subr.mxu0 %v13533_v4  ;;  %1152 = vmatprep.subr.mxu1 %v13534_v46  ;;  %13542 = vst [vmem:[#allocation18_spill] sm:$0xff] %v9664_v14  ;;  %v9667_v46 = vld [vmem:[#allocation7 + $0x1f8] sm:$0xff] }
 0x1f6   :  { %1082 = vmatpush1.msra.mxu0 %v13535_v40  ;;  %1153 = vmatpush1.msra.mxu1 %v13536_v45  ;;  %13543 = vst [vmem:[#allocation19_spill] sm:$0xff] %v9667_v46 }
 0x1f7   :  { %1083 = vmatprep.subr.mxu0 %v13537_v48  ;;  %1154 = vmatprep.subr.mxu1 %v13538_v5 }
 0x1f8   :  { %1084 = vmatpush1.msra.mxu0 %v13539_v6  ;;  %1117 = vmatprep.mubr.f32.mxu0 %v13540_v35 }
 0x1f9   :  { %1155 = vmatpush1.msra.mxu1 %v13541_v7  ;;  %1188 = vmatprep.mubr.f32.mxu1 %v13540_v35 }
 0x1fa   :  { %1242 = vmatprep.subr.mxu0 %v9664_v14  ;;  %1313 = vmatprep.subr.mxu1 %v9667_v46 }
 0x299   :  { %v930_v45 = vpop.f32.mrf.mxu0  ;;  %v1001_v6 = vpop.f32.mrf.mxu1 }
 0x29a   :  { %v1010_v48 = vrot.slane %v930_v45, 6  ;;  %v1012_v38 = vrot.slane %v1001_v6, 6 }
 0x29b   :  { %v932_v40 = vpop.f32.mrf.mxu0  ;;  %v1003_v58 = vpop.f32.mrf.mxu1 }
 0x29c   :  { %v1018_v5 = vadd.f32 %v1010_v48, %v9585_v33  ;;  %v1011_v4 = vrot.slane %v932_v40, 6  ;;  %v1013_v29 = vrot.slane %v1003_v58, 6  ;;  %v1020_v45 = vadd.f32 %v1012_v38, %v9594_v1 }
 0x29e   :  { %v8025_v57 = vmul.f32 -1.442695, %v1018_v5  ;;  %v1019_v7 = vadd.f32 %v1011_v4, %v9587_v32  ;;  %v1021_v14 = vadd.f32 %v1013_v29, %v9591_v47  ;;  %v13555_v4 = vld [vmem:[#allocation31_spill] sm:$0xff] }
 0x2a0   :  { %8297 = vpow2.f32 %v8025_v57  ;;  %v8026_v35 = vmul.f32 -1.442695, %v1019_v7  ;;  %v8027_v23 = vmul.f32 -1.442695, %v1021_v14 }
 0x2a2   :  { %8299 = vpow2.f32 %v8026_v35  ;;  %v1042_v35 = vrot.slane %v9597_v37, 6  ;;  %v13554_v37 = vld [vmem:[#allocation30_spill] sm:$0xff] }
 0x2a3   :  { %8301 = vpow2.f32 %v8027_v23 }
 0x2ad   :  { %v8298_v46 = vpop.eup %8297 }
 0x2ae   :  { %v1025_v20 = vadd.f32 1.0, %v8298_v46  ;;  %v13556_v46 = vld [vmem:[#allocation32_spill] sm:$0xff] }
 0x2af   :  { %v8300_v2 = vpop.eup %8299 }
 0x2b0   :  { %8303 = vrcp.f32 %v1025_v20  ;;  %v1031_v40 = vadd.f32 1.0, %v8300_v2  ;;  %v8302_v48 = vpop.eup %8301 }
 0x2b1   :  { %8305 = vtanh.f32 %v1020_v45  ;;  %v1038_v57 = vadd.f32 1.0, %v8302_v48  ;;  %v13557_v45 = vld [vmem:[#allocation33_spill] sm:$0xff]  ;;  %v13559_v48 = vld [vmem:[#allocation35_spill] sm:$0xff] }
 0x2b2   :  { %8307 = vrcp.f32 %v1031_v40  ;;  %v13558_v40 = vld [vmem:[#allocation34_spill] sm:$0xff] }
 0x2b3   :  { %8309 = vrcp.f32 %v1038_v57  ;;  %v13564_v57 = vld [vmem:[#allocation39_spill] sm:$0xff] }
 0x2bd   :  { %v8304_v5 = vpop.eup %8303 }
 0x2be   :  { %v8306_v7 = vpop.eup %8305 }
 0x2bf   :  { %v8308_v58 = vpop.eup %8307  ;;  %v1045_v29 = vmul.f32 %v8306_v7, %v8304_v5  ;;  %v13560_v5 = vld [vmem:[#allocation36_spill] sm:$0xff]  ;;  %v13561_v7 = vld [vmem:[#allocation37_spill] sm:$0xff] }
 0x2c0   :  { %v1044_v6 = vmul.f32 %v8308_v58, %v1042_v35  ;;  %v8310_v38 = vpop.eup %8309  ;;  %v13562_v35 = vld [vmem:[#allocation38_spill] sm:$0xff]  ;;  %v13563_v58 = vmov 0.0  }
 0x2c2   :  { %v9675_v14 = vadd.f32 %v1045_v29, %v1044_v6  ;;  %v13565_v29 = vld [vmem:[#allocation18_spill] sm:$0xff]  ;;  %v13566_v6 = vld [vmem:[#allocation19_spill] sm:$0xff] }
 0x2c4   :  { %8311 = vtanh.f32 %v9675_v14 }
 0x2d1   :  { %v8312_v23 = vpop.eup %8311 }
 0x2d2   :  { %v1048_v20 = vmul.f32 %v8312_v23, %v8310_v38 }
 0x2d4   :  { %1049 = vst [vmem:[#allocation2] sm:$0xc] %v1048_v20  ;;  %v1051_v2 = vrot.slane %v1048_v20, 2 }
 0x2d6   :  { %1118 = vmatmul.mubr.f32.vlgmr.msra.gmra.mxu0 %v1051_v2  ;;  %1189 = vmatmul.mubr.f32.vlgmr.msra.gmra.mxu1 %v1051_v2 }
 0x2d7   :  { %1243 = vmatpush1.msra.mxu0 %v9298_v63  ;;  %1314 = vmatpush1.msra.mxu1 %v9300_v0  ;;  %v13544_v63 = vld [vmem:[#allocation20_spill] sm:$0xff]  ;;  %v13545_v0 = vld [vmem:[#allocation21_spill] sm:$0xff] }
 0x2d8   :  { %1244 = vmatprep.subr.mxu0 %v9303_v11  ;;  %1315 = vmatprep.subr.mxu1 %v9305_v12  ;;  %v13546_v11 = vld [vmem:[#allocation22_spill] sm:$0xff]  ;;  %v13547_v12 = vld [vmem:[#allocation23_spill] sm:$0xff] }
 0x2d9   :  { %1245 = vmatpush1.msra.mxu0 %v9307_v17  ;;  %1316 = vmatpush1.msra.mxu1 %v9309_v18  ;;  %v13548_v17 = vld [vmem:[#allocation24_spill] sm:$0xff]  ;;  %v13549_v18 = vld [vmem:[#allocation25_spill] sm:$0xff] }
 0x2da   :  { %1246 = vmatprep.subr.mxu0 %v9311_v19  ;;  %1317 = vmatprep.subr.mxu1 %v9317_v24  ;;  %v13550_v19 = vld [vmem:[#allocation26_spill] sm:$0xff]  ;;  %v13551_v24 = vld [vmem:[#allocation27_spill] sm:$0xff] }
 0x2db   :  { %1247 = vmatpush1.msra.mxu0 %v9319_v25  ;;  %1318 = vmatpush1.msra.mxu1 %v9321_v26  ;;  %v13552_v25 = vld [vmem:[#allocation28_spill] sm:$0xff]  ;;  %v13553_v26 = vld [vmem:[#allocation29_spill] sm:$0xff] }
 0x2dc   :  { %1248 = vmatprep.subr.mxu0 %v9328_v34  ;;  %1319 = vmatprep.subr.mxu1 %v9330_v39 }
 0x2dd   :  { %1249 = vmatpush1.msra.mxu0 %v9334_v43  ;;  %1320 = vmatpush1.msra.mxu1 %v9336_v44 }
 0x2de   :  { %1250 = vmatprep.subr.mxu0 %v9342_v49  ;;  %1321 = vmatprep.subr.mxu1 %v9344_v50 }
 0x2df   :  { %1251 = vmatpush1.msra.mxu0 %v9348_v55  ;;  %1322 = vmatpush1.msra.mxu1 %v9350_v56 }
 0x2e0   :  { %1252 = vmatprep.subr.mxu0 %v9354_v59  ;;  %1323 = vmatprep.subr.mxu1 %v9356_v60 }
 0x2e1   :  { %1253 = vmatpush1.msra.mxu0 %v9360_v9  ;;  %1324 = vmatpush1.msra.mxu1 %v9362_v10 }
 0x2e2   :  { %1254 = vmatprep.subr.mxu0 %v9367_v15  ;;  %1325 = vmatprep.subr.mxu1 %v9369_v16 }
 0x2e3   :  { %1255 = vmatpush1.msra.mxu0 %v9373_v27  ;;  %1326 = vmatpush1.msra.mxu1 %v9375_v28 }
 0x2e4   :  { %1256 = vmatprep.subr.mxu0 %v9379_v30  ;;  %1327 = vmatprep.subr.mxu1 %v9381_v31 }
 0x2e5   :  { %1257 = vmatpush1.msra.mxu0 %v9386_v41  ;;  %1328 = vmatpush1.msra.mxu1 %v9388_v42 }
 0x2e6   :  { %1258 = vmatprep.subr.mxu0 %v9395_v51  ;;  %1329 = vmatprep.subr.mxu1 %v9397_v52 }
 0x2e7   :  { %1259 = vmatpush1.msra.mxu0 %v9401_v53  ;;  %1330 = vmatpush1.msra.mxu1 %v9403_v54 }
 0x2e8   :  { %1260 = vmatprep.subr.mxu0 %v9407_v61  ;;  %1331 = vmatprep.subr.mxu1 %v9409_v62 }
 0x2e9   :  { %1261 = vmatpush1.msra.mxu0 %v9414_v8  ;;  %1332 = vmatpush1.msra.mxu1 %v9416_v13 }
 0x2ea   :  { %1262 = vmatprep.subr.mxu0 %v9423_v21  ;;  %1333 = vmatprep.subr.mxu1 %v9425_v22 }
 0x2eb   :  { %1263 = vmatpush1.msra.mxu0 %v13519_v36  ;;  %1334 = vmatpush1.msra.mxu1 %v13520_v3 }
 0x2ec   :  { %1264 = vmatprep.subr.mxu0 %v13544_v63  ;;  %1335 = vmatprep.subr.mxu1 %v13545_v0 }
 0x2ed   :  { %1265 = vmatpush1.msra.mxu0 %v13546_v11  ;;  %1336 = vmatpush1.msra.mxu1 %v13547_v12 }
 0x2ee   :  { %1266 = vmatprep.subr.mxu0 %v13548_v17  ;;  %1337 = vmatprep.subr.mxu1 %v13549_v18 }
 0x2ef   :  { %1267 = vmatpush1.msra.mxu0 %v13550_v19  ;;  %1338 = vmatpush1.msra.mxu1 %v13551_v24 }
 0x2f0   :  { %1268 = vmatprep.subr.mxu0 %v13552_v25  ;;  %1339 = vmatprep.subr.mxu1 %v13553_v26 }
 0x2f1   :  { %1269 = vmatpush1.msra.mxu0 %v13554_v37  ;;  %1340 = vmatpush1.msra.mxu1 %v13555_v4 }
 0x2f2   :  { %1270 = vmatprep.subr.mxu0 %v13556_v46  ;;  %1341 = vmatprep.subr.mxu1 %v13557_v45 }
 0x2f3   :  { %1271 = vmatpush1.msra.mxu0 %v13558_v40  ;;  %1342 = vmatpush1.msra.mxu1 %v13559_v48 }
 0x2f4   :  { %1272 = vmatprep.subr.mxu0 %v13560_v5  ;;  %1343 = vmatprep.subr.mxu1 %v13561_v7 }
 0x2f5   :  { %1273 = vmatpush1.msra.mxu0 %v13562_v35  ;;  %1306 = vmatprep.mubr.f32.mxu0 %v13563_v58 }
 0x2f6   :  { %1344 = vmatpush1.msra.mxu1 %v13564_v57  ;;  %1377 = vmatprep.mubr.f32.mxu1 %v13563_v58 }
 0x2f7   :  { %1431 = vmatprep.subr.mxu0 %v13565_v29  ;;  %1502 = vmatprep.subr.mxu1 %v13566_v6 }
 0x396   :  { %v1119_v38 = vpop.f32.mrf.mxu0  ;;  %v1190_v5 = vpop.f32.mrf.mxu1 }
 0x397   :  { %v1199_v23 = vrot.slane %v1119_v38, 4  ;;  %v1201_v29 = vrot.slane %v1190_v5, 4 }
 0x398   :  { %v1121_v20 = vpop.f32.mrf.mxu0  ;;  %v1192_v45 = vpop.f32.mrf.mxu1 }
 0x399   :  { %v1207_v2 = vadd.f32 %v1199_v23, %v9585_v33  ;;  %v1200_v48 = vrot.slane %v1121_v20, 4  ;;  %v1202_v57 = vrot.slane %v1192_v45, 4  ;;  %v1209_v38 = vadd.f32 %v1201_v29, %v9594_v1 }
 0x39b   :  { %v8028_v7 = vmul.f32 -1.442695, %v1207_v2  ;;  %v1208_v35 = vadd.f32 %v1200_v48, %v9587_v32  ;;  %v1210_v58 = vadd.f32 %v1202_v57, %v9591_v47  ;;  %v9758_v2 = vld [vmem:[#allocation7 + $0x1c8] sm:$0xff] }
 0x39d   :  { %8313 = vpow2.f32 %v8028_v7  ;;  %v8029_v40 = vmul.f32 -1.442695, %v1208_v35  ;;  %v8030_v46 = vmul.f32 -1.442695, %v1210_v58 }
 0x39f   :  { %8315 = vpow2.f32 %v8029_v40  ;;  %v1231_v40 = vrot.slane %v9675_v14, 6  ;;  %v9755_v14 = vld [vmem:[#allocation7 + $0x1f0] sm:$0xff] }
 0x3a0   :  { %8317 = vpow2.f32 %v8030_v46 }
 0x3aa   :  { %v8314_v6 = vpop.eup %8313 }
 0x3ab   :  { %v1214_v4 = vadd.f32 1.0, %v8314_v6  ;;  %v9752_v6 = vld [vmem:[#allocation7 + $0x1e0] sm:$0xff] }
 0x3ac   :  { %v8316_v37 = vpop.eup %8315 }
 0x3ad   :  { %8319 = vrcp.f32 %v1214_v4  ;;  %v1220_v23 = vadd.f32 1.0, %v8316_v37  ;;  %v8318_v48 = vpop.eup %8317 }
 0x3ae   :  { %8321 = vtanh.f32 %v1209_v38  ;;  %v1227_v20 = vadd.f32 1.0, %v8318_v48  ;;  %v9761_v38 = vld [vmem:[#allocation7 + $0x1d8] sm:$0xff]  ;;  %v9767_v48 = vld [vmem:[#allocation7 + $0x1d0] sm:$0xff] }
 0x3af   :  { %8323 = vrcp.f32 %v1220_v23  ;;  %v9764_v23 = vld [vmem:[#allocation7 + $0x1c0] sm:$0xff] }
 0x3b0   :  { %8325 = vrcp.f32 %v1227_v20  ;;  %v9859_v20 = vld [vmem:[#allocation7 + $0x198] sm:$0xff] }
 0x3ba   :  { %v8320_v7 = vpop.eup %8319 }
 0x3bb   :  { %v8322_v35 = vpop.eup %8321 }
 0x3bc   :  { %v8324_v45 = vpop.eup %8323  ;;  %v1234_v57 = vmul.f32 %v8322_v35, %v8320_v7  ;;  %v9770_v7 = vld [vmem:[#allocation7 + $0x1a8] sm:$0xff]  ;;  %v9773_v35 = vld [vmem:[#allocation7 + $0x1b8] sm:$0xff] }
 0x3bd   :  { %v1233_v5 = vmul.f32 %v8324_v45, %v1231_v40  ;;  %v8326_v29 = vpop.eup %8325  ;;  %v9776_v40 = vld [vmem:[#allocation7 + $0x1a0] sm:$0xff]  ;;  %v9779_v45 = vld [vmem:[#allocation7 + $0x1b0] sm:$0xff] }
 0x3bf   :  { %v9749_v58 = vadd.f32 %v1234_v57, %v1233_v5  ;;  %v9862_v57 = vld [vmem:[#allocation7 + $0x180] sm:$0xff]  ;;  %v9865_v5 = vld [vmem:[#allocation7 + $0x190] sm:$0xff] }
 0x3c1   :  { %8327 = vtanh.f32 %v9749_v58 }
 0x3ce   :  { %v8328_v46 = vpop.eup %8327 }
 0x3cf   :  { %v1237_v4 = vmul.f32 %v8328_v46, %v8326_v29  ;;  %v9871_v29 = vld [vmem:[#allocation7 + $0x178] sm:$0xff]  ;;  %v9874_v46 = vld [vmem:[#allocation7 + $0x160] sm:$0xff] }
 0x3d1   :  { %1238 = vst [vmem:[#allocation2] sm:$0x30] %v1237_v4  ;;  %v1240_v37 = vrot.slane %v1237_v4, 4  ;;  %v9877_v4 = vld [vmem:[#allocation7 + $0x170] sm:$0xff] }
 0x3d3   :  { %1307 = vmatmul.mubr.f32.vlgmr.msra.gmra.mxu0 %v1240_v37  ;;  %1378 = vmatmul.mubr.f32.vlgmr.msra.gmra.mxu1 %v1240_v37  ;;  %v9880_v37 = vld [vmem:[#allocation7 + $0x148] sm:$0xff] }
 0x3d4   :  { %1432 = vmatpush1.msra.mxu0 %v9752_v6  ;;  %1503 = vmatpush1.msra.mxu1 %v9755_v14 }
 0x3d5   :  { %1433 = vmatprep.subr.mxu0 %v9758_v2  ;;  %1504 = vmatprep.subr.mxu1 %v9761_v38 }
 0x3d6   :  { %1434 = vmatpush1.msra.mxu0 %v9764_v23  ;;  %1505 = vmatpush1.msra.mxu1 %v9767_v48 }
 0x3d7   :  { %1435 = vmatprep.subr.mxu0 %v9770_v7  ;;  %1506 = vmatprep.subr.mxu1 %v9773_v35 }
 0x3d8   :  { %1436 = vmatpush1.msra.mxu0 %v9776_v40  ;;  %1507 = vmatpush1.msra.mxu1 %v9779_v45 }
 0x3d9   :  { %1437 = vmatprep.subr.mxu0 %v9328_v34  ;;  %1508 = vmatprep.subr.mxu1 %v9330_v39  ;;  %v13567_v34 = vld [vmem:[#allocation30_spill] sm:$0xff]  ;;  %v13568_v39 = vld [vmem:[#allocation31_spill] sm:$0xff] }
 0x3da   :  { %1438 = vmatpush1.msra.mxu0 %v9334_v43  ;;  %1509 = vmatpush1.msra.mxu1 %v9336_v44  ;;  %v13569_v43 = vld [vmem:[#allocation32_spill] sm:$0xff]  ;;  %v13570_v44 = vld [vmem:[#allocation33_spill] sm:$0xff] }
 0x3db   :  { %1439 = vmatprep.subr.mxu0 %v9342_v49  ;;  %1510 = vmatprep.subr.mxu1 %v9344_v50  ;;  %v13571_v49 = vld [vmem:[#allocation34_spill] sm:$0xff]  ;;  %v13572_v50 = vld [vmem:[#allocation35_spill] sm:$0xff] }
 0x3dc   :  { %1440 = vmatpush1.msra.mxu0 %v9348_v55  ;;  %1511 = vmatpush1.msra.mxu1 %v9350_v56  ;;  %v13573_v55 = vld [vmem:[#allocation36_spill] sm:$0xff]  ;;  %v13574_v56 = vld [vmem:[#allocation37_spill] sm:$0xff] }
 0x3dd   :  { %1441 = vmatprep.subr.mxu0 %v9354_v59  ;;  %1512 = vmatprep.subr.mxu1 %v9356_v60  ;;  %v13575_v59 = vld [vmem:[#allocation38_spill] sm:$0xff]  ;;  %v13576_v60 = vmov 0.0  }
 0x3de   :  { %1442 = vmatpush1.msra.mxu0 %v9360_v9  ;;  %1513 = vmatpush1.msra.mxu1 %v9362_v10  ;;  %v13577_v9 = vld [vmem:[#allocation39_spill] sm:$0xff]  ;;  %v13578_v10 = vld [vmem:[#allocation18_spill] sm:$0xff] }
 0x3df   :  { %1443 = vmatprep.subr.mxu0 %v9367_v15  ;;  %1514 = vmatprep.subr.mxu1 %v9369_v16  ;;  %v13579_v15 = vld [vmem:[#allocation19_spill] sm:$0xff] }
 0x3e0   :  { %1444 = vmatpush1.msra.mxu0 %v9373_v27  ;;  %1515 = vmatpush1.msra.mxu1 %v9375_v28 }
 0x3e1   :  { %1445 = vmatprep.subr.mxu0 %v9379_v30  ;;  %1516 = vmatprep.subr.mxu1 %v9381_v31 }
 0x3e2   :  { %1446 = vmatpush1.msra.mxu0 %v9386_v41  ;;  %1517 = vmatpush1.msra.mxu1 %v9388_v42 }
 0x3e3   :  { %1447 = vmatprep.subr.mxu0 %v9395_v51  ;;  %1518 = vmatprep.subr.mxu1 %v9397_v52 }
 0x3e4   :  { %1448 = vmatpush1.msra.mxu0 %v9401_v53  ;;  %1519 = vmatpush1.msra.mxu1 %v9403_v54 }
 0x3e5   :  { %1449 = vmatprep.subr.mxu0 %v9407_v61  ;;  %1520 = vmatprep.subr.mxu1 %v9409_v62 }
 0x3e6   :  { %1450 = vmatpush1.msra.mxu0 %v9414_v8  ;;  %1521 = vmatpush1.msra.mxu1 %v9416_v13 }
 0x3e7   :  { %1451 = vmatprep.subr.mxu0 %v9423_v21  ;;  %1522 = vmatprep.subr.mxu1 %v9425_v22 }
 0x3e8   :  { %1452 = vmatpush1.msra.mxu0 %v13519_v36  ;;  %1523 = vmatpush1.msra.mxu1 %v13520_v3 }
 0x3e9   :  { %1453 = vmatprep.subr.mxu0 %v13544_v63  ;;  %1524 = vmatprep.subr.mxu1 %v13545_v0  ;;  %v1420_v0 = vrot.slane %v9749_v58, 6  ;;  %v9868_v58 = vld [vmem:[#allocation7 + $0x168] sm:$0xff] }
 0x3ea   :  { %1454 = vmatpush1.msra.mxu0 %v13546_v11  ;;  %1525 = vmatpush1.msra.mxu1 %v13547_v12 }
 0x3eb   :  { %1455 = vmatprep.subr.mxu0 %v13548_v17  ;;  %1526 = vmatprep.subr.mxu1 %v13549_v18 }
 0x3ec   :  { %1456 = vmatpush1.msra.mxu0 %v13550_v19  ;;  %1527 = vmatpush1.msra.mxu1 %v13551_v24 }
 0x3ed   :  { %1457 = vmatprep.subr.mxu0 %v13552_v25  ;;  %1528 = vmatprep.subr.mxu1 %v13553_v26  ;;  %v9856_v26 = vld [vmem:[#allocation7 + $0x188] sm:$0xff] }
 0x3ee   :  { %1458 = vmatpush1.msra.mxu0 %v13567_v34  ;;  %1529 = vmatpush1.msra.mxu1 %v13568_v39  ;;  %v9883_v34 = vld [vmem:[#allocation7 + $0x158] sm:$0xff]  ;;  %v9886_v39 = vld [vmem:[#allocation7 + $0x140] sm:$0xff] }
 0x3ef   :  { %1459 = vmatprep.subr.mxu0 %v13569_v43  ;;  %1530 = vmatprep.subr.mxu1 %v13570_v44  ;;  %v9889_v43 = vld [vmem:[#allocation7 + $0x150] sm:$0xff]  ;;  %v9892_v44 = vld [vmem:[#allocation7 + $0x128] sm:$0xff] }
 0x3f0   :  { %1460 = vmatpush1.msra.mxu0 %v13571_v49  ;;  %1531 = vmatpush1.msra.mxu1 %v13572_v50  ;;  %v9895_v49 = vld [vmem:[#allocation7 + $0x138] sm:$0xff]  ;;  %v9898_v50 = vld [vmem:[#allocation7 + $0x120] sm:$0xff] }
 0x3f1   :  { %1461 = vmatprep.subr.mxu0 %v13573_v55  ;;  %1532 = vmatprep.subr.mxu1 %v13574_v56  ;;  %v9901_v55 = vld [vmem:[#allocation7 + $0x130] sm:$0xff]  ;;  %v9904_v56 = vld [vmem:[#allocation7 + $0x108] sm:$0xff] }
 0x3f2   :  { %1462 = vmatpush1.msra.mxu0 %v13575_v59  ;;  %1495 = vmatprep.mubr.f32.mxu0 %v13576_v60  ;;  %v9907_v59 = vld [vmem:[#allocation7 + $0x118] sm:$0xff] }
 0x3f3   :  { %1533 = vmatpush1.msra.mxu1 %v13577_v9  ;;  %1566 = vmatprep.mubr.f32.mxu1 %v13576_v60  ;;  %v9910_v9 = vld [vmem:[#allocation7 + $0x100] sm:$0xff] }
 0x3f4   :  { %1605 = vmatprep.subr.mxu0 %v13578_v10  ;;  %1676 = vmatprep.subr.mxu1 %v13579_v15 }
 0x493   :  { %v1308_v16 = vpop.f32.mrf.mxu0  ;;  %v1379_v31 = vpop.f32.mrf.mxu1 }
 0x494   :  { %v1388_v27 = vrot.slane %v1308_v16, 2  ;;  %v1390_v62 = vrot.slane %v1379_v31, 2  ;;  %v9913_v16 = vld [vmem:[#allocation7 + $0x110] sm:$0xff] }
 0x495   :  { %v1310_v28 = vpop.f32.mrf.mxu0  ;;  %v1381_v53 = vpop.f32.mrf.mxu1  ;;  %v9925_v31 = vld [vmem:[#allocation7 + $0xf0] sm:$0xff] }
 0x496   :  { %v1396_v30 = vadd.f32 %v1388_v27, %v9585_v33  ;;  %v1389_v41 = vrot.slane %v1310_v28, 2  ;;  %v1391_v54 = vrot.slane %v1381_v53, 2  ;;  %v1398_v21 = vadd.f32 %v1390_v62, %v9594_v1  ;;  %v9916_v27 = vld [vmem:[#allocation7 + $0xe8] sm:$0xff]  ;;  %v9919_v28 = vld [vmem:[#allocation7 + $0xf8] sm:$0xff]  ;;  %v9949_v62 = vld [vmem:[#allocation7 + $0xb0] sm:$0xff] }
 0x497   :  { %v9940_v53 = vld [vmem:[#allocation7 + $0xa8] sm:$0xff] }
 0x498   :  { %v8031_v42 = vmul.f32 -1.442695, %v1396_v30  ;;  %v1397_v51 = vadd.f32 %v1389_v41, %v9587_v32  ;;  %v1399_v61 = vadd.f32 %v1391_v54, %v9591_v47  ;;  %v9922_v30 = vld [vmem:[#allocation7 + $0xe0] sm:$0xff]  ;;  %v9928_v41 = vld [vmem:[#allocation7 + $0xc8] sm:$0xff]  ;;  %v9943_v54 = vld [vmem:[#allocation7 + $0xb8] sm:$0xff] }
 0x49a   :  { %8329 = vpow2.f32 %v8031_v42  ;;  %v8032_v52 = vmul.f32 -1.442695, %v1397_v51  ;;  %v8033_v8 = vmul.f32 -1.442695, %v1399_v61  ;;  %v9931_v42 = vld [vmem:[#allocation7 + $0xd8] sm:$0xff]  ;;  %v9934_v51 = vld [vmem:[#allocation7 + $0xc0] sm:$0xff] }
 0x49b   :  { %v9946_v61 = vld [vmem:[#allocation7 + $0xa0] sm:$0xff] }
 0x49c   :  { %8331 = vpow2.f32 %v8032_v52  ;;  %v9937_v52 = vld [vmem:[#allocation7 + $0xd0] sm:$0xff] }
 0x49d   :  { %8333 = vpow2.f32 %v8033_v8  ;;  %v9952_v8 = vld [vmem:[#allocation7 + $0x88] sm:$0xff] }
 0x49e   :  { %13580 = vst [vmem:[#allocation20_spill] sm:$0xff] %v9952_v8 }
 0x4a7   :  { %v8330_v13 = vpop.eup %8329 }
 0x4a8   :  { %v1403_v22 = vadd.f32 1.0, %v8330_v13  ;;  %v9955_v13 = vld [vmem:[#allocation7 + $0x98] sm:$0xff] }
 0x4a9   :  { %v8332_v36 = vpop.eup %8331  ;;  %13581 = vst [vmem:[#allocation21_spill] sm:$0xff] %v9955_v13 }
 0x4aa   :  { %8335 = vrcp.f32 %v1403_v22  ;;  %v1409_v33 = vadd.f32 1.0, %v8332_v36  ;;  %v8334_v32 = vpop.eup %8333  ;;  %v9961_v22 = vld [vmem:[#allocation7 + $0x90] sm:$0xff]  ;;  %v9964_v36 = vld [vmem:[#allocation7 + $0x68] sm:$0xff] }
 0x4ab   :  { %8337 = vtanh.f32 %v1398_v21  ;;  %v1416_v12 = vadd.f32 1.0, %v8334_v32  ;;  %v9958_v21 = vld [vmem:[#allocation7 + $0x80] sm:$0xff]  ;;  %13583 = vst [vmem:[#allocation23_spill] sm:$0xff] %v9961_v22  ;;  %13584 = vst [vmem:[#allocation24_spill] sm:$0xff] %v9964_v36 }
 0x4ac   :  { %8339 = vrcp.f32 %v1409_v33  ;;  %13582 = vst [vmem:[#allocation22_spill] sm:$0xff] %v9958_v21  ;;  %v9967_v33 = vld [vmem:[#allocation7 + $0x78] sm:$0xff]  ;;  %v9970_v32 = vld [vmem:[#allocation7 + $0x60] sm:$0xff] }
 0x4ad   :  { %8341 = vrcp.f32 %v1416_v12  ;;  %13585 = vst [vmem:[#allocation25_spill] sm:$0xff] %v9967_v33  ;;  %13586 = vst [vmem:[#allocation26_spill] sm:$0xff] %v9970_v32  ;;  %v9985_v12 = vld [vmem:[#allocation7 + $0x50] sm:$0xff] }
 0x4ae   :  { %13591 = vst [vmem:[#allocation31_spill] sm:$0xff] %v9985_v12 }
 0x4b7   :  { %v8336_v3 = vpop.eup %8335 }
 0x4b8   :  { %v8338_v63 = vpop.eup %8337 }
 0x4b9   :  { %v8340_v11 = vpop.eup %8339  ;;  %v1423_v47 = vmul.f32 %v8338_v63, %v8336_v3  ;;  %v9973_v3 = vld [vmem:[#allocation7 + $0x70] sm:$0xff]  ;;  %v9976_v63 = vld [vmem:[#allocation7 + $0x48] sm:$0xff] }
 0x4ba   :  { %v1422_v17 = vmul.f32 %v8340_v11, %v1420_v0  ;;  %v8342_v1 = vpop.eup %8341  ;;  %13587 = vst [vmem:[#allocation27_spill] sm:$0xff] %v9973_v3  ;;  %13588 = vst [vmem:[#allocation28_spill] sm:$0xff] %v9976_v63  ;;  %v9979_v0 = vld [vmem:[#allocation7 + $0x58] sm:$0xff]  ;;  %v9982_v11 = vld [vmem:[#allocation7 + $0x40] sm:$0xff] }
 0x4bb   :  { %13589 = vst [vmem:[#allocation29_spill] sm:$0xff] %v9979_v0  ;;  %13590 = vst [vmem:[#allocation30_spill] sm:$0xff] %v9982_v11 }
 0x4bc   :  { %v9843_v18 = vadd.f32 %v1423_v47, %v1422_v17  ;;  %v9988_v47 = vld [vmem:[#allocation7 + $0x28] sm:$0xff]  ;;  %v9991_v17 = vld [vmem:[#allocation7 + $0x38] sm:$0xff] }
 0x4bd   :  { %13592 = vst [vmem:[#allocation32_spill] sm:$0xff] %v9988_v47  ;;  %13593 = vst [vmem:[#allocation33_spill] sm:$0xff] %v9991_v17 }
 0x4be   :  { %8343 = vtanh.f32 %v9843_v18 }
 0x4cb   :  { %v8344_v19 = vpop.eup %8343 }
 0x4cc   :  { %v1426_v24 = vmul.f32 %v8344_v19, %v8342_v1  ;;  %v9994_v1 = vld [vmem:[#allocation7 + $0x20] sm:$0xff]  ;;  %v9997_v19 = vld [vmem:[#allocation7 + $0x30] sm:$0xff] }
 0x4cd   :  { %13594 = vst [vmem:[#allocation34_spill] sm:$0xff] %v9994_v1  ;;  %13595 = vst [vmem:[#allocation35_spill] sm:$0xff] %v9997_v19 }
 0x4ce   :  { %1427 = vst [vmem:[#allocation2] sm:$0xc0] %v1426_v24  ;;  %v1429_v25 = vrot.slane %v1426_v24, 6  ;;  %v10000_v24 = vld [vmem:[#allocation7 + $0x8] sm:$0xff] }
 0x4cf   :  { %13596 = vst [vmem:[#allocation36_spill] sm:$0xff] %v10000_v24 }
 0x4d0   :  { %1496 = vmatmul.mubr.f32.vlgmr.msra.gmra.mxu0 %v1429_v25  ;;  %1567 = vmatmul.mubr.f32.vlgmr.msra.gmra.mxu1 %v1429_v25  ;;  %v10003_v25 = vld [vmem:[#allocation7 + $0x18] sm:$0xff] }
 0x4d1   :  { %1606 = vmatpush1.msra.mxu0 %v9752_v6  ;;  %1677 = vmatpush1.msra.mxu1 %v9755_v14  ;;  %13597 = vst [vmem:[#allocation37_spill] sm:$0xff] %v10003_v25 }
 0x4d2   :  { %1607 = vmatprep.subr.mxu0 %v9758_v2  ;;  %1678 = vmatprep.subr.mxu1 %v9761_v38 }
 0x4d3   :  { %1608 = vmatpush1.msra.mxu0 %v9764_v23  ;;  %1679 = vmatpush1.msra.mxu1 %v9767_v48 }
 0x4d4   :  { %1609 = vmatprep.subr.mxu0 %v9770_v7  ;;  %1680 = vmatprep.subr.mxu1 %v9773_v35 }
 0x4d5   :  { %1610 = vmatpush1.msra.mxu0 %v9776_v40  ;;  %1681 = vmatpush1.msra.mxu1 %v9779_v45 }
 0x4d6   :  { %1611 = vmatprep.subr.mxu0 %v9856_v26  ;;  %1682 = vmatprep.subr.mxu1 %v9859_v20 }
 0x4d7   :  { %1612 = vmatpush1.msra.mxu0 %v9862_v57  ;;  %1683 = vmatpush1.msra.mxu1 %v9865_v5 }
 0x4d8   :  { %1613 = vmatprep.subr.mxu0 %v9868_v58  ;;  %1684 = vmatprep.subr.mxu1 %v9871_v29 }
 0x4d9   :  { %1614 = vmatpush1.msra.mxu0 %v9874_v46  ;;  %1685 = vmatpush1.msra.mxu1 %v9877_v4 }
 0x4da   :  { %1615 = vmatprep.subr.mxu0 %v9880_v37  ;;  %1686 = vmatprep.subr.mxu1 %v9883_v34 }
 0x4db   :  { %1616 = vmatpush1.msra.mxu0 %v9886_v39  ;;  %1687 = vmatpush1.msra.mxu1 %v9889_v43 }
 0x4dc   :  { %1617 = vmatprep.subr.mxu0 %v9892_v44  ;;  %1688 = vmatprep.subr.mxu1 %v9895_v49 }
 0x4dd   :  { %1618 = vmatpush1.msra.mxu0 %v9898_v50  ;;  %1689 = vmatpush1.msra.mxu1 %v9901_v55 }
 0x4de   :  { %1619 = vmatprep.subr.mxu0 %v9904_v56  ;;  %1690 = vmatprep.subr.mxu1 %v9907_v59 }
 0x4df   :  { %1620 = vmatpush1.msra.mxu0 %v9910_v9  ;;  %1691 = vmatpush1.msra.mxu1 %v9913_v16 }
 0x4e0   :  { %1621 = vmatprep.subr.mxu0 %v9916_v27  ;;  %1692 = vmatprep.subr.mxu1 %v9919_v28 }
 0x4e1   :  { %1622 = vmatpush1.msra.mxu0 %v9922_v30  ;;  %1693 = vmatpush1.msra.mxu1 %v9925_v31 }
 0x4e2   :  { %1623 = vmatprep.subr.mxu0 %v9928_v41  ;;  %1694 = vmatprep.subr.mxu1 %v9931_v42 }
 0x4e3   :  { %1624 = vmatpush1.msra.mxu0 %v9934_v51  ;;  %1695 = vmatpush1.msra.mxu1 %v9937_v52 }
 0x4e4   :  { %1625 = vmatprep.subr.mxu0 %v9940_v53  ;;  %1696 = vmatprep.subr.mxu1 %v9943_v54 }
 0x4e5   :  { %1626 = vmatpush1.msra.mxu0 %v9946_v61  ;;  %1697 = vmatpush1.msra.mxu1 %v9949_v62 }
 0x4e6   :  { %1627 = vmatprep.subr.mxu0 %v9952_v8  ;;  %1698 = vmatprep.subr.mxu1 %v9955_v13 }
 0x4e7   :  { %1628 = vmatpush1.msra.mxu0 %v9958_v21  ;;  %1699 = vmatpush1.msra.mxu1 %v9961_v22 }
 0x4e8   :  { %1629 = vmatprep.subr.mxu0 %v9964_v36  ;;  %1700 = vmatprep.subr.mxu1 %v9967_v33  ;;  %v13603_v36 = vld [vmem:[#allocation41_spill] sm:$0xff] }
 0x4e9   :  { %1630 = vmatpush1.msra.mxu0 %v9970_v32  ;;  %1701 = vmatpush1.msra.mxu1 %v9973_v3  ;;  %v13602_v32 = vld [vmem:[#allocation43_spill] sm:$0xff] }
 0x4ea   :  { %1631 = vmatprep.subr.mxu0 %v9976_v63  ;;  %1702 = vmatprep.subr.mxu1 %v9979_v0 }
 0x4eb   :  { %1632 = vmatpush1.msra.mxu0 %v9982_v11  ;;  %1703 = vmatpush1.msra.mxu1 %v9985_v12  ;;  %v13601_v11 = vld [vmem:[#allocation42_spill] sm:$0xff] }
 0x4ec   :  { %1633 = vmatprep.subr.mxu0 %v9988_v47  ;;  %1704 = vmatprep.subr.mxu1 %v9991_v17  ;;  %v10006_v47 = vld [vmem:[#allocation7] sm:$0xff]  ;;  %v10010_v17 = vld [vmem:[#allocation7 + $0x10] sm:$0xff] }
 0x4ed   :  { %1634 = vmatpush1.msra.mxu0 %v9994_v1  ;;  %1705 = vmatpush1.msra.mxu1 %v9997_v19  ;;  %13598 = vst [vmem:[#allocation38_spill] sm:$0xff] %v10006_v47  ;;  %13599 = vst [vmem:[#allocation39_spill] sm:$0xff] %v10010_v17  ;;  %v13600_v19 = vld [vmem:[#allocation40_spill] sm:$0xff] }
 0x4ee   :  { %1635 = vmatprep.subr.mxu0 %v10000_v24  ;;  %1706 = vmatprep.subr.mxu1 %v10003_v25 }
 0x4ef   :  { %1636 = vmatpush1.msra.mxu0 %v10006_v47  ;;  %1669 = vmatprep.mubr.f32.mxu0 %v13576_v60 }
 0x4f0   :  { %1707 = vmatpush1.msra.mxu1 %v10010_v17  ;;  %1740 = vmatprep.mubr.f32.mxu1 %v13576_v60 }
 0x4f1   :  { %1794 = vmatprep.subr.mxu0 %v13578_v10  ;;  %1865 = vmatprep.subr.mxu1 %v13579_v15 }
 0x590   :  { %v1497_v24 = vpop.f32.mrf.mxu0  ;;  %v1568_v47 = vpop.f32.mrf.mxu1 }
 0x591   :  { %v1573_v1 = vadd.f32 %v1497_v24, %v13600_v19  ;;  %v1575_v10 = vadd.f32 %v1568_v47, %v13603_v36  ;;  %v13608_v47 = vld [vmem:[#allocation27_spill] sm:$0xff] }
 0x592   :  { %v1499_v25 = vpop.f32.mrf.mxu0  ;;  %v1570_v3 = vpop.f32.mrf.mxu1 }
 0x593   :  { %v8034_v12 = vmul.f32 -1.442695, %v1573_v1  ;;  %v1574_v0 = vadd.f32 %v1499_v25, %v13601_v11  ;;  %v1576_v17 = vadd.f32 %v1570_v3, %v13602_v32 }
 0x595   :  { %8345 = vpow2.f32 %v8034_v12  ;;  %v8035_v63 = vmul.f32 -1.442695, %v1574_v0  ;;  %v8036_v33 = vmul.f32 -1.442695, %v1576_v17  ;;  %v1597_v0 = vrot.slane %v9843_v18, 6  ;;  %v13606_v18 = vld [vmem:[#allocation25_spill] sm:$0xff] }
 0x597   :  { %8347 = vpow2.f32 %v8035_v63 }
 0x598   :  { %8349 = vpow2.f32 %v8036_v33 }
 0x5a2   :  { %v8346_v60 = vpop.eup %8345 }
 0x5a3   :  { %v1580_v22 = vadd.f32 1.0, %v8346_v60 }
 0x5a4   :  { %v8348_v15 = vpop.eup %8347 }
 0x5a5   :  { %8351 = vrcp.f32 %v1580_v22  ;;  %v1586_v24 = vadd.f32 1.0, %v8348_v15  ;;  %v8350_v1 = vpop.eup %8349  ;;  %v13605_v15 = vld [vmem:[#allocation24_spill] sm:$0xff] }
 0x5a6   :  { %8353 = vtanh.f32 %v1575_v10  ;;  %v1593_v11 = vadd.f32 1.0, %v8350_v1  ;;  %v13604_v10 = vld [vmem:[#allocation23_spill] sm:$0xff]  ;;  %v13611_v1 = vld [vmem:[#allocation30_spill] sm:$0xff] }
 0x5a7   :  { %8355 = vrcp.f32 %v1586_v24  ;;  %v13610_v24 = vld [vmem:[#allocation29_spill] sm:$0xff] }
 0x5a8   :  { %8357 = vrcp.f32 %v1593_v11  ;;  %v13607_v11 = vld [vmem:[#allocation26_spill] sm:$0xff] }
 0x5b2   :  { %v8352_v25 = vpop.eup %8351 }
 0x5b3   :  { %v8354_v12 = vpop.eup %8353 }
 0x5b4   :  { %v8356_v63 = vpop.eup %8355  ;;  %v1600_v19 = vmul.f32 %v8354_v12, %v8352_v25  ;;  %v13612_v25 = vld [vmem:[#allocation31_spill] sm:$0xff]  ;;  %v13613_v12 = vld [vmem:[#allocation32_spill] sm:$0xff] }
 0x5b5   :  { %v1599_v3 = vmul.f32 %v8356_v63, %v1597_v0  ;;  %v8358_v60 = vpop.eup %8357  ;;  %v13614_v0 = vld [vmem:[#allocation33_spill] sm:$0xff]  ;;  %v13615_v63 = vld [vmem:[#allocation34_spill] sm:$0xff] }
 0x5b7   :  { %v10021_v17 = vadd.f32 %v1600_v19, %v1599_v3  ;;  %v13609_v19 = vld [vmem:[#allocation28_spill] sm:$0xff]  ;;  %v13616_v3 = vld [vmem:[#allocation35_spill] sm:$0xff] }
 0x5b9   :  { %8359 = vtanh.f32 %v10021_v17 }
 0x5c6   :  { %v8360_v33 = vpop.eup %8359 }
 0x5c7   :  { %v1603_v22 = vmul.f32 %v8360_v33, %v8358_v60  ;;  %v13617_v60 = vld [vmem:[#allocation36_spill] sm:$0xff]  ;;  %v13618_v33 = vld [vmem:[#allocation37_spill] sm:$0xff] }
 0x5c9   :  { %1604 = vst [vmem:[#allocation2 + $0x8] sm:$0x3] %v1603_v22  ;;  %1670 = vmatmul.mubr.f32.vlgmr.msra.gmra.mxu0 %v1603_v22  ;;  %1741 = vmatmul.mubr.f32.vlgmr.msra.gmra.mxu1 %v1603_v22  ;;  %v13619_v22 = vld [vmem:[#allocation38_spill] sm:$0xff] }
 0x5ca   :  { %1795 = vmatpush1.msra.mxu0 %v9752_v6  ;;  %1866 = vmatpush1.msra.mxu1 %v9755_v14 }
 0x5cb   :  { %1796 = vmatprep.subr.mxu0 %v9758_v2  ;;  %1867 = vmatprep.subr.mxu1 %v9761_v38 }
 0x5cc   :  { %1797 = vmatpush1.msra.mxu0 %v9764_v23  ;;  %1868 = vmatpush1.msra.mxu1 %v9767_v48 }
 0x5cd   :  { %1798 = vmatprep.subr.mxu0 %v9770_v7  ;;  %1869 = vmatprep.subr.mxu1 %v9773_v35 }
 0x5ce   :  { %1799 = vmatpush1.msra.mxu0 %v9776_v40  ;;  %1870 = vmatpush1.msra.mxu1 %v9779_v45 }
 0x5cf   :  { %1800 = vmatprep.subr.mxu0 %v9856_v26  ;;  %1871 = vmatprep.subr.mxu1 %v9859_v20 }
 0x5d0   :  { %1801 = vmatpush1.msra.mxu0 %v9862_v57  ;;  %1872 = vmatpush1.msra.mxu1 %v9865_v5 }
 0x5d1   :  { %1802 = vmatprep.subr.mxu0 %v9868_v58  ;;  %1873 = vmatprep.subr.mxu1 %v9871_v29 }
 0x5d2   :  { %1803 = vmatpush1.msra.mxu0 %v9874_v46  ;;  %1874 = vmatpush1.msra.mxu1 %v9877_v4 }
 0x5d3   :  { %1804 = vmatprep.subr.mxu0 %v9880_v37  ;;  %1875 = vmatprep.subr.mxu1 %v9883_v34 }
 0x5d4   :  { %1805 = vmatpush1.msra.mxu0 %v9886_v39  ;;  %1876 = vmatpush1.msra.mxu1 %v9889_v43 }
 0x5d5   :  { %1806 = vmatprep.subr.mxu0 %v9892_v44  ;;  %1877 = vmatprep.subr.mxu1 %v9895_v49 }
 0x5d6   :  { %1807 = vmatpush1.msra.mxu0 %v9898_v50  ;;  %1878 = vmatpush1.msra.mxu1 %v9901_v55 }
 0x5d7   :  { %1808 = vmatprep.subr.mxu0 %v9904_v56  ;;  %1879 = vmatprep.subr.mxu1 %v9907_v59 }
 0x5d8   :  { %1809 = vmatpush1.msra.mxu0 %v9910_v9  ;;  %1880 = vmatpush1.msra.mxu1 %v9913_v16 }
 0x5d9   :  { %1810 = vmatprep.subr.mxu0 %v9916_v27  ;;  %1881 = vmatprep.subr.mxu1 %v9919_v28 }
 0x5da   :  { %1811 = vmatpush1.msra.mxu0 %v9922_v30  ;;  %1882 = vmatpush1.msra.mxu1 %v9925_v31 }
 0x5db   :  { %1812 = vmatprep.subr.mxu0 %v9928_v41  ;;  %1883 = vmatprep.subr.mxu1 %v9931_v42 }
 0x5dc   :  { %1813 = vmatpush1.msra.mxu0 %v9934_v51  ;;  %1884 = vmatpush1.msra.mxu1 %v9937_v52 }
 0x5dd   :  { %1814 = vmatprep.subr.mxu0 %v9940_v53  ;;  %1885 = vmatprep.subr.mxu1 %v9943_v54 }
 0x5de   :  { %1815 = vmatpush1.msra.mxu0 %v9946_v61  ;;  %1886 = vmatpush1.msra.mxu1 %v9949_v62 }
 0x5df   :  { %1816 = vmatprep.subr.mxu0 %v9952_v8  ;;  %1887 = vmatprep.subr.mxu1 %v9955_v13 }
 0x5e0   :  { %1817 = vmatpush1.msra.mxu0 %v9958_v21  ;;  %1888 = vmatpush1.msra.mxu1 %v13604_v10 }
 0x5e1   :  { %1818 = vmatprep.subr.mxu0 %v13605_v15  ;;  %1889 = vmatprep.subr.mxu1 %v13606_v18  ;;  %v13625_v18 = vld [vmem:[#allocation42_spill] sm:$0xff] }
 0x5e2   :  { %1819 = vmatpush1.msra.mxu0 %v13607_v11  ;;  %1890 = vmatpush1.msra.mxu1 %v13608_v47 }
 0x5e3   :  { %1820 = vmatprep.subr.mxu0 %v13609_v19  ;;  %1891 = vmatprep.subr.mxu1 %v13610_v24  ;;  %v13620_v19 = vmov 0.0   ;;  %v13621_v24 = vld [vmem:[#allocation39_spill] sm:$0xff] }
 0x5e4   :  { %1821 = vmatpush1.msra.mxu0 %v13611_v1  ;;  %1892 = vmatpush1.msra.mxu1 %v13612_v25  ;;  %v13622_v25 = vld [vmem:[#allocation18_spill] sm:$0xff] }
 0x5e5   :  { %1822 = vmatprep.subr.mxu0 %v13613_v12  ;;  %1893 = vmatprep.subr.mxu1 %v13614_v0  ;;  %v13623_v12 = vld [vmem:[#allocation19_spill] sm:$0xff] }
 0x5e6   :  { %1823 = vmatpush1.msra.mxu0 %v13615_v63  ;;  %1894 = vmatpush1.msra.mxu1 %v13616_v3  ;;  %v13624_v3 = vld [vmem:[#allocation40_spill] sm:$0xff] }
 0x5e7   :  { %1824 = vmatprep.subr.mxu0 %v13617_v60  ;;  %1895 = vmatprep.subr.mxu1 %v13618_v33 }
 0x5e8   :  { %1825 = vmatpush1.msra.mxu0 %v13619_v22  ;;  %1858 = vmatprep.mubr.f32.mxu0 %v13620_v19 }
 0x5e9   :  { %1896 = vmatpush1.msra.mxu1 %v13621_v24  ;;  %1929 = vmatprep.mubr.f32.mxu1 %v13620_v19 }
 0x5ea   :  { %1983 = vmatprep.subr.mxu0 %v13622_v25  ;;  %2054 = vmatprep.subr.mxu1 %v13623_v12 }
 0x689   :  { %v1671_v0 = vpop.f32.mrf.mxu0  ;;  %v1742_v60 = vpop.f32.mrf.mxu1 }
 0x68a   :  { %v1751_v63 = vrot.slane %v1671_v0, 6  ;;  %v1753_v25 = vrot.slane %v1742_v60, 6 }
 0x68b   :  { %v1673_v1 = vpop.f32.mrf.mxu0  ;;  %v1744_v10 = vpop.f32.mrf.mxu1 }
 0x68c   :  { %v1759_v47 = vadd.f32 %v1751_v63, %v13624_v3  ;;  %v1752_v11 = vrot.slane %v1673_v1, 6  ;;  %v1754_v24 = vrot.slane %v1744_v10, 6  ;;  %v1761_v0 = vadd.f32 %v1753_v25, %v13603_v36 }
 0x68e   :  { %v8037_v33 = vmul.f32 -1.442695, %v1759_v47  ;;  %v1760_v22 = vadd.f32 %v1752_v11, %v13625_v18  ;;  %v1762_v19 = vadd.f32 %v1754_v24, %v13602_v32 }
 0x690   :  { %8361 = vpow2.f32 %v8037_v33  ;;  %v8038_v15 = vmul.f32 -1.442695, %v1760_v22  ;;  %v8039_v21 = vmul.f32 -1.442695, %v1762_v19 }
 0x692   :  { %8363 = vpow2.f32 %v8038_v15  ;;  %v1783_v15 = vrot.slane %v10021_v17, 6 }
 0x693   :  { %8365 = vpow2.f32 %v8039_v21 }
 0x69d   :  { %v8362_v12 = vpop.eup %8361 }
 0x69e   :  { %v1766_v13 = vadd.f32 1.0, %v8362_v12 }
 0x69f   :  { %v8364_v8 = vpop.eup %8363 }
 0x6a0   :  { %8367 = vrcp.f32 %v1766_v13  ;;  %v1772_v1 = vadd.f32 1.0, %v8364_v8  ;;  %v8366_v11 = vpop.eup %8365 }
 0x6a1   :  { %8369 = vtanh.f32 %v1761_v0  ;;  %v1779_v33 = vadd.f32 1.0, %v8366_v11 }
 0x6a2   :  { %8371 = vrcp.f32 %v1772_v1 }
 0x6a3   :  { %8373 = vrcp.f32 %v1779_v33 }
 0x6ad   :  { %v8368_v47 = vpop.eup %8367 }
 0x6ae   :  { %v8370_v63 = vpop.eup %8369 }
 0x6af   :  { %v8372_v10 = vpop.eup %8371  ;;  %v1786_v24 = vmul.f32 %v8370_v63, %v8368_v47 }
 0x6b0   :  { %v1785_v60 = vmul.f32 %v8372_v10, %v1783_v15  ;;  %v8374_v22 = vpop.eup %8373 }
 0x6b2   :  { %v10095_v19 = vadd.f32 %v1786_v24, %v1785_v60 }
 0x6b4   :  { %8375 = vtanh.f32 %v10095_v19  ;;  %v1972_v0 = vrot.slane %v10095_v19, 6  ;;  %v2228_v19 = vld [vmem:[#allocation4 + $0x3c0] sm:$0xff] }
 0x6c1   :  { %v8376_v21 = vpop.eup %8375 }
 0x6c2   :  { %v1789_v13 = vmul.f32 %v8376_v21, %v8374_v22  ;;  %v2232_v22 = vld [vmem:[#allocation4 + $0x3e0] sm:$0xff]  ;;  %v2234_v21 = vld [vmem:[#allocation4 + $0x3f0] sm:$0xff] }
 0x6c4   :  { %1790 = vst [vmem:[#allocation2 + $0x8] sm:$0xc] %v1789_v13  ;;  %v1792_v8 = vrot.slane %v1789_v13, 2  ;;  %v2229_v13 = vld [vmem:[#allocation4 + $0x3c8] sm:$0xff] }
 0x6c6   :  { %1859 = vmatmul.mubr.f32.vlgmr.msra.gmra.mxu0 %v1792_v8  ;;  %1930 = vmatmul.mubr.f32.vlgmr.msra.gmra.mxu1 %v1792_v8  ;;  %v2231_v8 = vld [vmem:[#allocation4 + $0x3d8] sm:$0xff] }
 0x6c7   :  { %1984 = vmatpush1.msra.mxu0 %v9752_v6  ;;  %2055 = vmatpush1.msra.mxu1 %v9755_v14  ;;  %v13626_v6 = vld [vmem:[#allocation20_spill] sm:$0xff]  ;;  %v13627_v14 = vld [vmem:[#allocation21_spill] sm:$0xff] }
 0x6c8   :  { %1985 = vmatprep.subr.mxu0 %v9758_v2  ;;  %2056 = vmatprep.subr.mxu1 %v9761_v38  ;;  %v13628_v2 = vld [vmem:[#allocation22_spill] sm:$0xff]  ;;  %v13629_v38 = vld [vmem:[#allocation23_spill] sm:$0xff] }
 0x6c9   :  { %1986 = vmatpush1.msra.mxu0 %v9764_v23  ;;  %2057 = vmatpush1.msra.mxu1 %v9767_v48  ;;  %v13630_v23 = vld [vmem:[#allocation24_spill] sm:$0xff]  ;;  %v13631_v48 = vld [vmem:[#allocation25_spill] sm:$0xff] }
 0x6ca   :  { %1987 = vmatprep.subr.mxu0 %v9770_v7  ;;  %2058 = vmatprep.subr.mxu1 %v9773_v35  ;;  %v13632_v7 = vld [vmem:[#allocation26_spill] sm:$0xff]  ;;  %v13633_v35 = vld [vmem:[#allocation27_spill] sm:$0xff] }
 0x6cb   :  { %1988 = vmatpush1.msra.mxu0 %v9776_v40  ;;  %2059 = vmatpush1.msra.mxu1 %v9779_v45  ;;  %v13634_v40 = vld [vmem:[#allocation28_spill] sm:$0xff]  ;;  %v13635_v45 = vld [vmem:[#allocation29_spill] sm:$0xff] }
 0x6cc   :  { %1989 = vmatprep.subr.mxu0 %v9856_v26  ;;  %2060 = vmatprep.subr.mxu1 %v9859_v20  ;;  %v13636_v26 = vld [vmem:[#allocation30_spill] sm:$0xff]  ;;  %v13637_v20 = vld [vmem:[#allocation31_spill] sm:$0xff] }
 0x6cd   :  { %1990 = vmatpush1.msra.mxu0 %v9862_v57  ;;  %2061 = vmatpush1.msra.mxu1 %v9865_v5  ;;  %v13638_v57 = vld [vmem:[#allocation32_spill] sm:$0xff]  ;;  %v13639_v5 = vld [vmem:[#allocation33_spill] sm:$0xff] }
 0x6ce   :  { %1991 = vmatprep.subr.mxu0 %v9868_v58  ;;  %2062 = vmatprep.subr.mxu1 %v9871_v29  ;;  %v13640_v58 = vld [vmem:[#allocation34_spill] sm:$0xff]  ;;  %v13641_v29 = vld [vmem:[#allocation35_spill] sm:$0xff] }
 0x6cf   :  { %1992 = vmatpush1.msra.mxu0 %v9874_v46  ;;  %2063 = vmatpush1.msra.mxu1 %v9877_v4  ;;  %v13642_v46 = vld [vmem:[#allocation36_spill] sm:$0xff]  ;;  %v13643_v4 = vld [vmem:[#allocation37_spill] sm:$0xff] }
 0x6d0   :  { %1993 = vmatprep.subr.mxu0 %v9880_v37  ;;  %2064 = vmatprep.subr.mxu1 %v9883_v34  ;;  %v13644_v37 = vld [vmem:[#allocation38_spill] sm:$0xff]  ;;  %v13645_v34 = vld [vmem:[#allocation39_spill] sm:$0xff] }
 0x6d1   :  { %1994 = vmatpush1.msra.mxu0 %v9886_v39  ;;  %2065 = vmatpush1.msra.mxu1 %v9889_v43  ;;  %v13646_v39 = vmov 0.0   ;;  %v2233_v43 = vld [vmem:[#allocation4 + $0x3e8] sm:$0xff] }
 0x6d2   :  { %1995 = vmatprep.subr.mxu0 %v9892_v44  ;;  %2066 = vmatprep.subr.mxu1 %v9895_v49  ;;  %v2235_v44 = vld [vmem:[#allocation4 + $0x3f8] sm:$0xff] }
 0x6d3   :  { %1996 = vmatpush1.msra.mxu0 %v9898_v50  ;;  %2067 = vmatpush1.msra.mxu1 %v9901_v55 }
 0x6d4   :  { %1997 = vmatprep.subr.mxu0 %v9904_v56  ;;  %2068 = vmatprep.subr.mxu1 %v9907_v59 }
 0x6d5   :  { %1998 = vmatpush1.msra.mxu0 %v9910_v9  ;;  %2069 = vmatpush1.msra.mxu1 %v9913_v16 }
 0x6d6   :  { %1999 = vmatprep.subr.mxu0 %v9916_v27  ;;  %2070 = vmatprep.subr.mxu1 %v9919_v28 }
 0x6d7   :  { %2000 = vmatpush1.msra.mxu0 %v9922_v30  ;;  %2071 = vmatpush1.msra.mxu1 %v9925_v31 }
 0x6d8   :  { %2001 = vmatprep.subr.mxu0 %v9928_v41  ;;  %2072 = vmatprep.subr.mxu1 %v9931_v42 }
 0x6d9   :  { %2002 = vmatpush1.msra.mxu0 %v9934_v51  ;;  %2073 = vmatpush1.msra.mxu1 %v9937_v52 }
 0x6da   :  { %2003 = vmatprep.subr.mxu0 %v9940_v53  ;;  %2074 = vmatprep.subr.mxu1 %v9943_v54 }
 0x6db   :  { %2004 = vmatpush1.msra.mxu0 %v9946_v61  ;;  %2075 = vmatpush1.msra.mxu1 %v9949_v62 }
 0x6dc   :  { %2005 = vmatprep.subr.mxu0 %v13626_v6  ;;  %2076 = vmatprep.subr.mxu1 %v13627_v14  ;;  %v2230_v6 = vld [vmem:[#allocation4 + $0x3d0] sm:$0xff]  ;;  %v2225_v14 = vld [vmem:[#allocation4 + $0x3a8] sm:$0xff] }
 0x6dd   :  { %2006 = vmatpush1.msra.mxu0 %v13628_v2  ;;  %2077 = vmatpush1.msra.mxu1 %v13629_v38  ;;  %v2227_v2 = vld [vmem:[#allocation4 + $0x3b8] sm:$0xff]  ;;  %v2224_v38 = vld [vmem:[#allocation4 + $0x3a0] sm:$0xff] }
 0x6de   :  { %2007 = vmatprep.subr.mxu0 %v13630_v23  ;;  %2078 = vmatprep.subr.mxu1 %v13631_v48  ;;  %v2226_v23 = vld [vmem:[#allocation4 + $0x3b0] sm:$0xff]  ;;  %v2221_v48 = vld [vmem:[#allocation4 + $0x388] sm:$0xff] }
 0x6df   :  { %2008 = vmatpush1.msra.mxu0 %v13632_v7  ;;  %2079 = vmatpush1.msra.mxu1 %v13633_v35  ;;  %v2223_v7 = vld [vmem:[#allocation4 + $0x398] sm:$0xff]  ;;  %v2220_v35 = vld [vmem:[#allocation4 + $0x380] sm:$0xff] }
 0x6e0   :  { %2009 = vmatprep.subr.mxu0 %v13634_v40  ;;  %2080 = vmatprep.subr.mxu1 %v13635_v45  ;;  %v2222_v40 = vld [vmem:[#allocation4 + $0x390] sm:$0xff]  ;;  %v2217_v45 = vld [vmem:[#allocation4 + $0x368] sm:$0xff] }
 0x6e1   :  { %2010 = vmatpush1.msra.mxu0 %v13636_v26  ;;  %2081 = vmatpush1.msra.mxu1 %v13637_v20  ;;  %v2219_v26 = vld [vmem:[#allocation4 + $0x378] sm:$0xff]  ;;  %v2216_v20 = vld [vmem:[#allocation4 + $0x360] sm:$0xff] }
 0x6e2   :  { %2011 = vmatprep.subr.mxu0 %v13638_v57  ;;  %2082 = vmatprep.subr.mxu1 %v13639_v5  ;;  %v2218_v57 = vld [vmem:[#allocation4 + $0x370] sm:$0xff]  ;;  %v2213_v5 = vld [vmem:[#allocation4 + $0x348] sm:$0xff] }
 0x6e3   :  { %2012 = vmatpush1.msra.mxu0 %v13640_v58  ;;  %2083 = vmatpush1.msra.mxu1 %v13641_v29  ;;  %v2215_v58 = vld [vmem:[#allocation4 + $0x358] sm:$0xff]  ;;  %v2212_v29 = vld [vmem:[#allocation4 + $0x340] sm:$0xff] }
 0x6e4   :  { %2013 = vmatprep.subr.mxu0 %v13642_v46  ;;  %2084 = vmatprep.subr.mxu1 %v13643_v4  ;;  %v2214_v46 = vld [vmem:[#allocation4 + $0x350] sm:$0xff]  ;;  %v2209_v4 = vld [vmem:[#allocation4 + $0x328] sm:$0xff] }
 0x6e5   :  { %2014 = vmatpush1.msra.mxu0 %v13644_v37  ;;  %2085 = vmatpush1.msra.mxu1 %v13645_v34  ;;  %v2211_v37 = vld [vmem:[#allocation4 + $0x338] sm:$0xff]  ;;  %v2208_v34 = vld [vmem:[#allocation4 + $0x320] sm:$0xff] }
 0x6e6   :  { %2047 = vmatprep.mubr.f32.mxu0 %v13646_v39  ;;  %2118 = vmatprep.mubr.f32.mxu1 %v13646_v39 }
 0x6e7   :  { %2259 = vmatprep.subr.mxu0 %v2233_v43  ;;  %2336 = vmatprep.subr.mxu1 %v2235_v44  ;;  %v2210_v43 = vld [vmem:[#allocation4 + $0x330] sm:$0xff]  ;;  %v2205_v44 = vld [vmem:[#allocation4 + $0x308] sm:$0xff] }
 0x786   :  { %v1860_v49 = vpop.f32.mrf.mxu0  ;;  %v1931_v59 = vpop.f32.mrf.mxu1 }
 0x787   :  { %v1940_v50 = vrot.slane %v1860_v49, 4  ;;  %v1942_v42 = vrot.slane %v1931_v59, 4  ;;  %v2207_v49 = vld [vmem:[#allocation4 + $0x318] sm:$0xff] }
 0x788   :  { %v1862_v55 = vpop.f32.mrf.mxu0  ;;  %v1933_v30 = vpop.f32.mrf.mxu1  ;;  %v2203_v59 = vld [vmem:[#allocation4 + $0x2f8] sm:$0xff] }
 0x789   :  { %v1948_v56 = vadd.f32 %v1940_v50, %v13624_v3  ;;  %v1941_v9 = vrot.slane %v1862_v55, 4  ;;  %v1943_v31 = vrot.slane %v1933_v30, 4  ;;  %v1950_v53 = vadd.f32 %v1942_v42, %v13603_v36  ;;  %v2204_v50 = vld [vmem:[#allocation4 + $0x300] sm:$0xff]  ;;  %v2206_v55 = vld [vmem:[#allocation4 + $0x310] sm:$0xff]  ;;  %v2195_v42 = vld [vmem:[#allocation4 + $0x2b8] sm:$0xff] }
 0x78a   :  { %v2196_v30 = vld [vmem:[#allocation4 + $0x2c0] sm:$0xff] }
 0x78b   :  { %v8040_v16 = vmul.f32 -1.442695, %v1948_v56  ;;  %v1949_v27 = vadd.f32 %v1941_v9, %v13625_v18  ;;  %v1951_v41 = vadd.f32 %v1943_v31, %v13602_v32  ;;  %v2201_v56 = vld [vmem:[#allocation4 + $0x2e8] sm:$0xff]  ;;  %v2200_v9 = vld [vmem:[#allocation4 + $0x2e0] sm:$0xff]  ;;  %v2198_v31 = vld [vmem:[#allocation4 + $0x2d0] sm:$0xff] }
 0x78d   :  { %8377 = vpow2.f32 %v8040_v16  ;;  %v8041_v28 = vmul.f32 -1.442695, %v1949_v27  ;;  %v8042_v51 = vmul.f32 -1.442695, %v1951_v41  ;;  %v2202_v16 = vld [vmem:[#allocation4 + $0x2f0] sm:$0xff]  ;;  %v2197_v27 = vld [vmem:[#allocation4 + $0x2c8] sm:$0xff] }
 0x78e   :  { %v2193_v41 = vld [vmem:[#allocation4 + $0x2a8] sm:$0xff] }
 0x78f   :  { %8379 = vpow2.f32 %v8041_v28  ;;  %v2199_v28 = vld [vmem:[#allocation4 + $0x2d8] sm:$0xff] }
 0x790   :  { %8381 = vpow2.f32 %v8042_v51  ;;  %v2192_v51 = vld [vmem:[#allocation4 + $0x2a0] sm:$0xff] }
 0x79a   :  { %v8378_v52 = vpop.eup %8377 }
 0x79b   :  { %v1955_v54 = vadd.f32 1.0, %v8378_v52  ;;  %v2194_v52 = vld [vmem:[#allocation4 + $0x2b0] sm:$0xff] }
 0x79c   :  { %v8380_v61 = vpop.eup %8379 }
 0x79d   :  { %8383 = vrcp.f32 %v1955_v54  ;;  %v1961_v62 = vadd.f32 1.0, %v8380_v61  ;;  %v8382_v17 = vpop.eup %8381  ;;  %v2191_v54 = vld [vmem:[#allocation4 + $0x298] sm:$0xff]  ;;  %v2188_v61 = vld [vmem:[#allocation4 + $0x280] sm:$0xff] }
 0x79e   :  { %8385 = vtanh.f32 %v1950_v53  ;;  %v1968_v11 = vadd.f32 1.0, %v8382_v17  ;;  %v2189_v53 = vld [vmem:[#allocation4 + $0x288] sm:$0xff] }
 0x79f   :  { %8387 = vrcp.f32 %v1961_v62  ;;  %v2190_v62 = vld [vmem:[#allocation4 + $0x290] sm:$0xff]  ;;  %v2185_v17 = vld [vmem:[#allocation4 + $0x268] sm:$0xff] }
 0x7a0   :  { %8389 = vrcp.f32 %v1968_v11  ;;  %v2183_v11 = vld [vmem:[#allocation4 + $0x258] sm:$0xff] }
 0x7aa   :  { %v8384_v25 = vpop.eup %8383 }
 0x7ab   :  { %v8386_v12 = vpop.eup %8385 }
 0x7ac   :  { %v8388_v1 = vpop.eup %8387  ;;  %v1975_v47 = vmul.f32 %v8386_v12, %v8384_v25  ;;  %v2187_v25 = vld [vmem:[#allocation4 + $0x278] sm:$0xff]  ;;  %v2184_v12 = vld [vmem:[#allocation4 + $0x260] sm:$0xff] }
 0x7ad   :  { %v1974_v63 = vmul.f32 %v8388_v1, %v1972_v0  ;;  %v8390_v10 = vpop.eup %8389  ;;  %v2186_v0 = vld [vmem:[#allocation4 + $0x270] sm:$0xff]  ;;  %v2181_v1 = vld [vmem:[#allocation4 + $0x248] sm:$0xff] }
 0x7af   :  { %v10167_v15 = vadd.f32 %v1975_v47, %v1974_v63  ;;  %v2180_v47 = vld [vmem:[#allocation4 + $0x240] sm:$0xff]  ;;  %v2182_v63 = vld [vmem:[#allocation4 + $0x250] sm:$0xff] }
 0x7b1   :  { %8391 = vtanh.f32 %v10167_v15 }
 0x7be   :  { %v8392_v33 = vpop.eup %8391 }
 0x7bf   :  { %v1978_v24 = vmul.f32 %v8392_v33, %v8390_v10  ;;  %v2177_v10 = vld [vmem:[#allocation4 + $0x228] sm:$0xff]  ;;  %v2179_v33 = vld [vmem:[#allocation4 + $0x238] sm:$0xff] }
 0x7c1   :  { %1979 = vst [vmem:[#allocation2 + $0x8] sm:$0x30] %v1978_v24  ;;  %v1981_v60 = vrot.slane %v1978_v24, 4  ;;  %v2176_v24 = vld [vmem:[#allocation4 + $0x220] sm:$0xff] }
 0x7c3   :  { %2048 = vmatmul.mubr.f32.vlgmr.msra.gmra.mxu0 %v1981_v60  ;;  %2119 = vmatmul.mubr.f32.vlgmr.msra.gmra.mxu1 %v1981_v60  ;;  %v2178_v60 = vld [vmem:[#allocation4 + $0x230] sm:$0xff] }
 0x7c4   :  { %2260 = vmatpush1.msra.mxu0 %v2232_v22  ;;  %2337 = vmatpush1.msra.mxu1 %v2234_v21  ;;  %v2173_v22 = vld [vmem:[#allocation4 + $0x208] sm:$0xff]  ;;  %v2175_v21 = vld [vmem:[#allocation4 + $0x218] sm:$0xff] }
 0x7c5   :  { %2261 = vmatprep.subr.mxu0 %v2229_v13  ;;  %2338 = vmatprep.subr.mxu1 %v2231_v8  ;;  %v2172_v13 = vld [vmem:[#allocation4 + $0x200] sm:$0xff]  ;;  %v2174_v8 = vld [vmem:[#allocation4 + $0x210] sm:$0xff] }
 0x7c6   :  { %2262 = vmatpush1.msra.mxu0 %v2228_v19  ;;  %2339 = vmatpush1.msra.mxu1 %v2230_v6  ;;  %v2169_v19 = vld [vmem:[#allocation2] sm:$0xff] }
 0x7c7   :  { %2263 = vmatprep.subr.mxu0 %v2225_v14  ;;  %2340 = vmatprep.subr.mxu1 %v2227_v2  ;;  %v10174_v6 = vld [vmem:[#allocation7 + $0x3e8] sm:$0xff]  ;;  %v10176_v14 = vld [vmem:[#allocation7 + $0x3f8] sm:$0xff]  ;;  %v10180_v2 = vld [vmem:[#allocation7 + $0x3e0] sm:$0xff] }
 0x7c8   :  { %2264 = vmatpush1.msra.mxu0 %v2224_v38  ;;  %2341 = vmatpush1.msra.mxu1 %v2226_v23  ;;  %13647 = vst [vmem:[#allocation43_spill] sm:$0xff] %v10174_v6  ;;  %13648 = vst [vmem:[#allocation41_spill] sm:$0xff] %v10176_v14  ;;  %v10182_v38 = vld [vmem:[#allocation7 + $0x3f0] sm:$0xff]  ;;  %v10186_v23 = vld [vmem:[#allocation7 + $0x3c8] sm:$0xff] }
 0x7c9   :  { %2265 = vmatprep.subr.mxu0 %v2221_v48  ;;  %2342 = vmatprep.subr.mxu1 %v2223_v7  ;;  %v10188_v48 = vld [vmem:[#allocation7 + $0x3d8] sm:$0xff]  ;;  %v10192_v7 = vld [vmem:[#allocation7 + $0x3c0] sm:$0xff] }
 0x7ca   :  { %2266 = vmatpush1.msra.mxu0 %v2220_v35  ;;  %2343 = vmatpush1.msra.mxu1 %v2222_v40  ;;  %v10194_v35 = vld [vmem:[#allocation7 + $0x3d0] sm:$0xff]  ;;  %v10198_v40 = vld [vmem:[#allocation7 + $0x3a8] sm:$0xff] }
 0x7cb   :  { %2267 = vmatprep.subr.mxu0 %v2217_v45  ;;  %2344 = vmatprep.subr.mxu1 %v2219_v26  ;;  %v10200_v45 = vld [vmem:[#allocation7 + $0x3b8] sm:$0xff]  ;;  %v10204_v26 = vld [vmem:[#allocation7 + $0x3a0] sm:$0xff] }
 0x7cc   :  { %2268 = vmatpush1.msra.mxu0 %v2216_v20  ;;  %2345 = vmatpush1.msra.mxu1 %v2218_v57  ;;  %v10206_v20 = vld [vmem:[#allocation7 + $0x3b0] sm:$0xff]  ;;  %v10210_v57 = vld [vmem:[#allocation7 + $0x388] sm:$0xff] }
 0x7cd   :  { %2269 = vmatprep.subr.mxu0 %v2213_v5  ;;  %2346 = vmatprep.subr.mxu1 %v2215_v58  ;;  %v10212_v5 = vld [vmem:[#allocation7 + $0x398] sm:$0xff]  ;;  %v10216_v58 = vld [vmem:[#allocation7 + $0x380] sm:$0xff] }
 0x7ce   :  { %2270 = vmatpush1.msra.mxu0 %v2212_v29  ;;  %2347 = vmatpush1.msra.mxu1 %v2214_v46  ;;  %v10218_v29 = vld [vmem:[#allocation7 + $0x390] sm:$0xff]  ;;  %v10222_v46 = vld [vmem:[#allocation7 + $0x368] sm:$0xff] }
 0x7cf   :  { %2271 = vmatprep.subr.mxu0 %v2209_v4  ;;  %2348 = vmatprep.subr.mxu1 %v2211_v37  ;;  %v10224_v4 = vld [vmem:[#allocation7 + $0x378] sm:$0xff]  ;;  %v10228_v37 = vld [vmem:[#allocation7 + $0x360] sm:$0xff] }
 0x7d0   :  { %2272 = vmatpush1.msra.mxu0 %v2208_v34  ;;  %2349 = vmatpush1.msra.mxu1 %v2210_v43  ;;  %v10230_v34 = vld [vmem:[#allocation7 + $0x370] sm:$0xff]  ;;  %v10234_v43 = vld [vmem:[#allocation7 + $0x348] sm:$0xff] }
 0x7d1   :  { %2273 = vmatprep.subr.mxu0 %v2205_v44  ;;  %2350 = vmatprep.subr.mxu1 %v2207_v49  ;;  %v10236_v44 = vld [vmem:[#allocation7 + $0x358] sm:$0xff]  ;;  %v10240_v49 = vld [vmem:[#allocation7 + $0x340] sm:$0xff] }
 0x7d2   :  { %2274 = vmatpush1.msra.mxu0 %v2204_v50  ;;  %2351 = vmatpush1.msra.mxu1 %v2206_v55  ;;  %v10242_v50 = vld [vmem:[#allocation7 + $0x350] sm:$0xff]  ;;  %v10246_v55 = vld [vmem:[#allocation7 + $0x328] sm:$0xff] }
 0x7d3   :  { %2275 = vmatprep.subr.mxu0 %v2201_v56  ;;  %2352 = vmatprep.subr.mxu1 %v2203_v59  ;;  %v10248_v56 = vld [vmem:[#allocation7 + $0x338] sm:$0xff]  ;;  %v10252_v59 = vld [vmem:[#allocation7 + $0x320] sm:$0xff] }
 0x7d4   :  { %2276 = vmatpush1.msra.mxu0 %v2200_v9  ;;  %2353 = vmatpush1.msra.mxu1 %v2202_v16  ;;  %v10254_v9 = vld [vmem:[#allocation7 + $0x330] sm:$0xff]  ;;  %v10258_v16 = vld [vmem:[#allocation7 + $0x308] sm:$0xff] }
 0x7d5   :  { %2277 = vmatprep.subr.mxu0 %v2197_v27  ;;  %2354 = vmatprep.subr.mxu1 %v2199_v28  ;;  %v10260_v27 = vld [vmem:[#allocation7 + $0x318] sm:$0xff]  ;;  %v10264_v28 = vld [vmem:[#allocation7 + $0x300] sm:$0xff] }
 0x7d6   :  { %2278 = vmatpush1.msra.mxu0 %v2196_v30  ;;  %2355 = vmatpush1.msra.mxu1 %v2198_v31  ;;  %v10266_v30 = vld [vmem:[#allocation7 + $0x310] sm:$0xff]  ;;  %v10270_v31 = vld [vmem:[#allocation7 + $0x2e8] sm:$0xff] }
 0x7d7   :  { %2279 = vmatprep.subr.mxu0 %v2193_v41  ;;  %2356 = vmatprep.subr.mxu1 %v2195_v42  ;;  %v10272_v41 = vld [vmem:[#allocation7 + $0x2f8] sm:$0xff]  ;;  %v10276_v42 = vld [vmem:[#allocation7 + $0x2e0] sm:$0xff] }
 0x7d8   :  { %2280 = vmatpush1.msra.mxu0 %v2192_v51  ;;  %2357 = vmatpush1.msra.mxu1 %v2194_v52  ;;  %v10278_v51 = vld [vmem:[#allocation7 + $0x2f0] sm:$0xff]  ;;  %v10282_v52 = vld [vmem:[#allocation7 + $0x2c8] sm:$0xff] }
 0x7d9   :  { %2281 = vmatprep.subr.mxu0 %v2189_v53  ;;  %2358 = vmatprep.subr.mxu1 %v2191_v54  ;;  %v10284_v53 = vld [vmem:[#allocation7 + $0x2d8] sm:$0xff]  ;;  %v10288_v54 = vld [vmem:[#allocation7 + $0x2c0] sm:$0xff] }
 0x7da   :  { %2282 = vmatpush1.msra.mxu0 %v2188_v61  ;;  %2359 = vmatpush1.msra.mxu1 %v2190_v62  ;;  %v10290_v61 = vld [vmem:[#allocation7 + $0x2d0] sm:$0xff]  ;;  %v10292_v62 = vld [vmem:[#allocation7 + $0x2a8] sm:$0xff] }
 0x7db   :  { %2283 = vmatprep.subr.mxu0 %v2185_v17  ;;  %2360 = vmatprep.subr.mxu1 %v2187_v25  ;;  %v10296_v17 = vld [vmem:[#allocation7 + $0x2b8] sm:$0xff]  ;;  %v10298_v25 = vld [vmem:[#allocation7 + $0x2a0] sm:$0xff] }
 0x7dc   :  { %2284 = vmatpush1.msra.mxu0 %v2184_v12  ;;  %2361 = vmatpush1.msra.mxu1 %v2186_v0  ;;  %v10300_v12 = vld [vmem:[#allocation7 + $0x2b0] sm:$0xff]  ;;  %v10304_v0 = vld [vmem:[#allocation7 + $0x288] sm:$0xff] }
 0x7dd   :  { %2285 = vmatprep.subr.mxu0 %v2181_v1  ;;  %2362 = vmatprep.subr.mxu1 %v2183_v11  ;;  %13649 = vst [vmem:[#allocation18_spill] sm:$0xff] %v10300_v12  ;;  %13650 = vst [vmem:[#allocation19_spill] sm:$0xff] %v10304_v0  ;;  %v10306_v1 = vld [vmem:[#allocation7 + $0x298] sm:$0xff]  ;;  %v10308_v11 = vld [vmem:[#allocation7 + $0x280] sm:$0xff] }
 0x7de   :  { %2286 = vmatpush1.msra.mxu0 %v2180_v47  ;;  %2363 = vmatpush1.msra.mxu1 %v2182_v63  ;;  %13651 = vst [vmem:[#allocation40_spill] sm:$0xff] %v10306_v1  ;;  %13652 = vst [vmem:[#allocation42_spill] sm:$0xff] %v10308_v11  ;;  %v10312_v47 = vld [vmem:[#allocation7 + $0x290] sm:$0xff]  ;;  %v10314_v63 = vld [vmem:[#allocation7 + $0x268] sm:$0xff] }
 0x7df   :  { %2287 = vmatprep.subr.mxu0 %v2177_v10  ;;  %2364 = vmatprep.subr.mxu1 %v2179_v33  ;;  %13653 = vst [vmem:[#allocation20_spill] sm:$0xff] %v10312_v47  ;;  %13654 = vst [vmem:[#allocation21_spill] sm:$0xff] %v10314_v63  ;;  %v10316_v10 = vld [vmem:[#allocation7 + $0x278] sm:$0xff]  ;;  %v10320_v33 = vld [vmem:[#allocation7 + $0x260] sm:$0xff] }
 0x7e0   :  { %2288 = vmatpush1.msra.mxu0 %v2176_v24  ;;  %2365 = vmatpush1.msra.mxu1 %v2178_v60  ;;  %13655 = vst [vmem:[#allocation22_spill] sm:$0xff] %v10316_v10  ;;  %13656 = vst [vmem:[#allocation23_spill] sm:$0xff] %v10320_v33  ;;  %v10322_v24 = vld [vmem:[#allocation7 + $0x270] sm:$0xff]  ;;  %v10326_v60 = vld [vmem:[#allocation7 + $0x248] sm:$0xff] }
 0x7e1   :  { %2289 = vmatprep.subr.mxu0 %v2173_v22  ;;  %2366 = vmatprep.subr.mxu1 %v2175_v21  ;;  %13657 = vst [vmem:[#allocation24_spill] sm:$0xff] %v10322_v24  ;;  %13658 = vst [vmem:[#allocation25_spill] sm:$0xff] %v10326_v60  ;;  %v10328_v22 = vld [vmem:[#allocation7 + $0x258] sm:$0xff]  ;;  %v10332_v21 = vld [vmem:[#allocation7 + $0x240] sm:$0xff] }
 0x7e2   :  { %2290 = vmatpush1.msra.mxu0 %v2172_v13  ;;  %2323 = vmatprep.mubr.f32.mxu0 %v13646_v39  ;;  %13659 = vst [vmem:[#allocation26_spill] sm:$0xff] %v10328_v22  ;;  %13660 = vst [vmem:[#allocation27_spill] sm:$0xff] %v10332_v21  ;;  %v10334_v13 = vld [vmem:[#allocation7 + $0x250] sm:$0xff] }
 0x7e3   :  { %2367 = vmatpush1.msra.mxu1 %v2174_v8  ;;  %2400 = vmatprep.mubr.f32.mxu1 %v13646_v39  ;;  %13661 = vst [vmem:[#allocation28_spill] sm:$0xff] %v10334_v13  ;;  %v10340_v8 = vld [vmem:[#allocation7 + $0x228] sm:$0xff] }
 0x7e4   :  { %2324 = vmatmul.mubr.f32.vlgmr.msra.gmra.mxu0 %v2169_v19  ;;  %2401 = vmatmul.mubr.f32.vlgmr.msra.gmra.mxu1 %v2169_v19  ;;  %13662 = vst [vmem:[#allocation29_spill] sm:$0xff] %v10340_v8  ;;  %v10342_v19 = vld [vmem:[#allocation7 + $0x238] sm:$0xff] }
 0x7e5   :  { %2329 = vmatprep.mubr.f32.mxu0 %v13646_v39  ;;  %2406 = vmatprep.mubr.f32.mxu1 %v13646_v39  ;;  %13663 = vst [vmem:[#allocation30_spill] sm:$0xff] %v10342_v19 }
 0x7e6   :  { %2478 = vmatprep.subr.mxu0 %v10174_v6  ;;  %2549 = vmatprep.subr.mxu1 %v10176_v14 }
 0x7e7   :  { %2479 = vmatpush1.msra.mxu0 %v10180_v2  ;;  %2550 = vmatpush1.msra.mxu1 %v10182_v38 }
 0x7e8   :  { %2480 = vmatprep.subr.mxu0 %v10186_v23  ;;  %2551 = vmatprep.subr.mxu1 %v10188_v48 }
 0x7e9   :  { %2481 = vmatpush1.msra.mxu0 %v10192_v7  ;;  %2552 = vmatpush1.msra.mxu1 %v10194_v35 }
 0x7ea   :  { %2482 = vmatprep.subr.mxu0 %v10198_v40  ;;  %2553 = vmatprep.subr.mxu1 %v10200_v45 }
 0x7eb   :  { %2483 = vmatpush1.msra.mxu0 %v10204_v26  ;;  %2554 = vmatpush1.msra.mxu1 %v10206_v20 }
 0x7ec   :  { %2484 = vmatprep.subr.mxu0 %v10210_v57  ;;  %2555 = vmatprep.subr.mxu1 %v10212_v5 }
 0x7ed   :  { %2485 = vmatpush1.msra.mxu0 %v10216_v58  ;;  %2556 = vmatpush1.msra.mxu1 %v10218_v29 }
 0x7ee   :  { %2486 = vmatprep.subr.mxu0 %v10222_v46  ;;  %2557 = vmatprep.subr.mxu1 %v10224_v4 }
 0x7ef   :  { %2487 = vmatpush1.msra.mxu0 %v10228_v37  ;;  %2558 = vmatpush1.msra.mxu1 %v10230_v34 }
 0x7f0   :  { %2488 = vmatprep.subr.mxu0 %v10234_v43  ;;  %2559 = vmatprep.subr.mxu1 %v10236_v44 }
 0x7f1   :  { %2489 = vmatpush1.msra.mxu0 %v10240_v49  ;;  %2560 = vmatpush1.msra.mxu1 %v10242_v50 }
 0x7f2   :  { %2490 = vmatprep.subr.mxu0 %v10246_v55  ;;  %2561 = vmatprep.subr.mxu1 %v10248_v56 }
 0x7f3   :  { %2491 = vmatpush1.msra.mxu0 %v10252_v59  ;;  %2562 = vmatpush1.msra.mxu1 %v10254_v9 }
 0x7f4   :  { %2492 = vmatprep.subr.mxu0 %v10258_v16  ;;  %2563 = vmatprep.subr.mxu1 %v10260_v27 }
 0x7f5   :  { %2493 = vmatpush1.msra.mxu0 %v10264_v28  ;;  %2564 = vmatpush1.msra.mxu1 %v10266_v30 }
 0x7f6   :  { %2494 = vmatprep.subr.mxu0 %v10270_v31  ;;  %2565 = vmatprep.subr.mxu1 %v10272_v41 }
 0x7f7   :  { %2495 = vmatpush1.msra.mxu0 %v10276_v42  ;;  %2566 = vmatpush1.msra.mxu1 %v10278_v51 }
 0x7f8   :  { %2496 = vmatprep.subr.mxu0 %v10282_v52  ;;  %2567 = vmatprep.subr.mxu1 %v10284_v53 }
 0x7f9   :  { %2497 = vmatpush1.msra.mxu0 %v10288_v54  ;;  %2568 = vmatpush1.msra.mxu1 %v10290_v61 }
 0x7fa   :  { %2498 = vmatprep.subr.mxu0 %v10292_v62  ;;  %2569 = vmatprep.subr.mxu1 %v10296_v17 }
 0x7fb   :  { %2499 = vmatpush1.msra.mxu0 %v10298_v25  ;;  %2570 = vmatpush1.msra.mxu1 %v10300_v12 }
 0x7fc   :  { %2500 = vmatprep.subr.mxu0 %v10304_v0  ;;  %2571 = vmatprep.subr.mxu1 %v10306_v1 }
 0x7fd   :  { %2501 = vmatpush1.msra.mxu0 %v10308_v11  ;;  %2572 = vmatpush1.msra.mxu1 %v10312_v47  ;;  %v10344_v47 = vld [vmem:[#allocation7 + $0x220] sm:$0xff] }
 0x7fe   :  { %2502 = vmatprep.subr.mxu0 %v10314_v63  ;;  %2573 = vmatprep.subr.mxu1 %v10316_v10  ;;  %13664 = vst [vmem:[#allocation31_spill] sm:$0xff] %v10344_v47  ;;  %v10348_v10 = vld [vmem:[#allocation7 + $0x230] sm:$0xff]  ;;  %v10350_v63 = vld [vmem:[#allocation7 + $0x208] sm:$0xff] }
 0x7ff   :  { %2503 = vmatpush1.msra.mxu0 %v10320_v33  ;;  %2574 = vmatpush1.msra.mxu1 %v10322_v24  ;;  %13665 = vst [vmem:[#allocation32_spill] sm:$0xff] %v10348_v10  ;;  %13666 = vst [vmem:[#allocation33_spill] sm:$0xff] %v10350_v63  ;;  %v10352_v33 = vld [vmem:[#allocation7 + $0x218] sm:$0xff] }
 0x800   :  { %2504 = vmatprep.subr.mxu0 %v10326_v60  ;;  %2575 = vmatprep.subr.mxu1 %v10328_v22  ;;  %13667 = vst [vmem:[#allocation34_spill] sm:$0xff] %v10352_v33  ;;  %v10356_v22 = vld [vmem:[#allocation7 + $0x200] sm:$0xff]  ;;  %v10358_v60 = vld [vmem:[#allocation7 + $0x210] sm:$0xff] }
 0x801   :  { %2505 = vmatpush1.msra.mxu0 %v10332_v21  ;;  %2576 = vmatpush1.msra.mxu1 %v10334_v13  ;;  %13668 = vst [vmem:[#allocation35_spill] sm:$0xff] %v10356_v22  ;;  %13669 = vst [vmem:[#allocation36_spill] sm:$0xff] %v10358_v60 }
 0x802   :  { %2506 = vmatprep.subr.mxu0 %v10340_v8  ;;  %2577 = vmatprep.subr.mxu1 %v10342_v19 }
 0x803   :  { %2507 = vmatpush1.msra.mxu0 %v10344_v47  ;;  %2578 = vmatpush1.msra.mxu1 %v10348_v10 }
 0x804   :  { %2508 = vmatprep.subr.mxu0 %v10350_v63  ;;  %2579 = vmatprep.subr.mxu1 %v10352_v33 }
 0x805   :  { %2509 = vmatpush1.msra.mxu0 %v10356_v22  ;;  %2580 = vmatpush1.msra.mxu1 %v10358_v60 }
 0x806   :  { %2649 = vmatprep.subr.mxu0 %v10174_v6  ;;  %2720 = vmatprep.subr.mxu1 %v10176_v14 }
 0x883   :  { %v2049_v19 = vpop.f32.mrf.mxu0  ;;  %v2120_v47 = vpop.f32.mrf.mxu1 }
 0x884   :  { %v2129_v8 = vrot.slane %v2049_v19, 2  ;;  %v2131_v6 = vrot.slane %v2120_v47, 2 }
 0x885   :  { %v2051_v13 = vpop.f32.mrf.mxu0  ;;  %v2122_v11 = vpop.f32.mrf.mxu1 }
 0x886   :  { %v2137_v21 = vadd.f32 %v2129_v8, %v13624_v3  ;;  %v2130_v24 = vrot.slane %v2051_v13, 2  ;;  %v2132_v22 = vrot.slane %v2122_v11, 2  ;;  %v2139_v19 = vadd.f32 %v2131_v6, %v13603_v36  ;;  %v13675_v13 = vld [vmem:[#allocation21_spill] sm:$0xff]  ;;  %v13676_v8 = vld [vmem:[#allocation22_spill] sm:$0xff] }
 0x888   :  { %v8043_v10 = vmul.f32 -1.442695, %v2137_v21  ;;  %v2138_v63 = vadd.f32 %v2130_v24, %v13625_v18  ;;  %v2140_v60 = vadd.f32 %v2132_v22, %v13602_v32  ;;  %v13673_v22 = vld [vmem:[#allocation42_spill] sm:$0xff]  ;;  %v13674_v21 = vld [vmem:[#allocation20_spill] sm:$0xff] }
 0x88a   :  { %8393 = vpow2.f32 %v8043_v10  ;;  %v8044_v33 = vmul.f32 -1.442695, %v2138_v63  ;;  %v8045_v1 = vmul.f32 -1.442695, %v2140_v60 }
 0x88c   :  { %8395 = vpow2.f32 %v8044_v33  ;;  %v2161_v33 = vrot.slane %v10167_v15, 6  ;;  %v13670_v15 = vld [vmem:[#allocation18_spill] sm:$0xff] }
 0x88d   :  { %8397 = vpow2.f32 %v8045_v1  ;;  %v13672_v1 = vld [vmem:[#allocation40_spill] sm:$0xff] }
 0x897   :  { %v8394_v14 = vpop.eup %8393 }
 0x898   :  { %v2144_v0 = vadd.f32 1.0, %v8394_v14 }
 0x899   :  { %v8396_v12 = vpop.eup %8395 }
 0x89a   :  { %8399 = vrcp.f32 %v2144_v0  ;;  %v2150_v3 = vadd.f32 1.0, %v8396_v12  ;;  %v8398_v18 = vpop.eup %8397  ;;  %v13671_v12 = vld [vmem:[#allocation19_spill] sm:$0xff] }
 0x89b   :  { %8401 = vtanh.f32 %v2139_v19  ;;  %v2157_v24 = vadd.f32 1.0, %v8398_v18  ;;  %v13677_v19 = vld [vmem:[#allocation23_spill] sm:$0xff]  ;;  %v13679_v18 = vld [vmem:[#allocation25_spill] sm:$0xff] }
 0x89c   :  { %8403 = vrcp.f32 %v2150_v3  ;;  %v13678_v3 = vld [vmem:[#allocation24_spill] sm:$0xff] }
 0x89d   :  { %8405 = vrcp.f32 %v2157_v24  ;;  %v13684_v24 = vld [vmem:[#allocation30_spill] sm:$0xff] }
 0x8a7   :  { %v8400_v10 = vpop.eup %8399 }
 0x8a8   :  { %v8402_v63 = vpop.eup %8401 }
 0x8a9   :  { %v8404_v11 = vpop.eup %8403  ;;  %v2164_v32 = vmul.f32 %v8402_v63, %v8400_v10  ;;  %v13680_v10 = vld [vmem:[#allocation26_spill] sm:$0xff]  ;;  %v13681_v63 = vld [vmem:[#allocation27_spill] sm:$0xff] }
 0x8aa   :  { %v2163_v47 = vmul.f32 %v8404_v11, %v2161_v33  ;;  %v8406_v36 = vpop.eup %8405  ;;  %v13682_v33 = vld [vmem:[#allocation28_spill] sm:$0xff]  ;;  %v13683_v11 = vld [vmem:[#allocation29_spill] sm:$0xff] }
 0x8ac   :  { %v2165_v60 = vadd.f32 %v2164_v32, %v2163_v47  ;;  %v13685_v32 = vld [vmem:[#allocation31_spill] sm:$0xff]  ;;  %v13686_v47 = vld [vmem:[#allocation32_spill] sm:$0xff] }
 0x8ae   :  { %8407 = vtanh.f32 %v2165_v60  ;;  %v13687_v60 = vld [vmem:[#allocation33_spill] sm:$0xff] }
 0x8bb   :  { %v8408_v6 = vpop.eup %8407 }
 0x8bc   :  { %v2167_v14 = vmul.f32 %v8408_v6, %v8406_v36  ;;  %v13688_v36 = vld [vmem:[#allocation34_spill] sm:$0xff]  ;;  %v13689_v6 = vld [vmem:[#allocation35_spill] sm:$0xff] }
 0x8be   :  { %2168 = vst [vmem:[#allocation2 + $0x8] sm:$0xc0] %v2167_v14  ;;  %v13690_v14 = vld [vmem:[#allocation36_spill] sm:$0xff] }
 0x8c5   :  { %v2170_v0 = vld [vmem:[#allocation2 + $0x8] sm:$0xff] }
 0x8c6   :  { %2330 = vmatmul.mubr.f32.gmra.mxu0 %v2170_v0  ;;  %2407 = vmatmul.mubr.f32.gmra.mxu1 %v2170_v0  ;;  %v13691_v0 = vld [vmem:[#allocation43_spill] sm:$0xff] }
 0x8c7   :  { %2542 = vmatprep.mubr.f32.mxu0 %v13646_v39  ;;  %2613 = vmatprep.mubr.f32.mxu1 %v13646_v39 }
 0x8ca   :  { %2543 = vmatmul.mubr.f32.vlgmr.msra.gmra.mxu0 %v13646_v39  ;;  %2614 = vmatmul.mubr.f32.vlgmr.msra.gmra.mxu1 %v13646_v39 }
 0x8cb   :  { %2650 = vmatpush1.msra.mxu0 %v10180_v2  ;;  %2721 = vmatpush1.msra.mxu1 %v10182_v38 }
 0x8cc   :  { %2651 = vmatprep.subr.mxu0 %v10186_v23  ;;  %2722 = vmatprep.subr.mxu1 %v10188_v48 }
 0x8cd   :  { %2652 = vmatpush1.msra.mxu0 %v10192_v7  ;;  %2723 = vmatpush1.msra.mxu1 %v10194_v35 }
 0x8ce   :  { %2653 = vmatprep.subr.mxu0 %v10198_v40  ;;  %2724 = vmatprep.subr.mxu1 %v10200_v45 }
 0x8cf   :  { %2654 = vmatpush1.msra.mxu0 %v10204_v26  ;;  %2725 = vmatpush1.msra.mxu1 %v10206_v20 }
 0x8d0   :  { %2655 = vmatprep.subr.mxu0 %v10210_v57  ;;  %2726 = vmatprep.subr.mxu1 %v10212_v5 }
 0x8d1   :  { %2656 = vmatpush1.msra.mxu0 %v10216_v58  ;;  %2727 = vmatpush1.msra.mxu1 %v10218_v29 }
 0x8d2   :  { %2657 = vmatprep.subr.mxu0 %v10222_v46  ;;  %2728 = vmatprep.subr.mxu1 %v10224_v4 }
 0x8d3   :  { %2658 = vmatpush1.msra.mxu0 %v10228_v37  ;;  %2729 = vmatpush1.msra.mxu1 %v10230_v34 }
 0x8d4   :  { %2659 = vmatprep.subr.mxu0 %v10234_v43  ;;  %2730 = vmatprep.subr.mxu1 %v10236_v44 }
 0x8d5   :  { %2660 = vmatpush1.msra.mxu0 %v10240_v49  ;;  %2731 = vmatpush1.msra.mxu1 %v10242_v50 }
 0x8d6   :  { %2661 = vmatprep.subr.mxu0 %v10246_v55  ;;  %2732 = vmatprep.subr.mxu1 %v10248_v56 }
 0x8d7   :  { %2662 = vmatpush1.msra.mxu0 %v10252_v59  ;;  %2733 = vmatpush1.msra.mxu1 %v10254_v9 }
 0x8d8   :  { %2663 = vmatprep.subr.mxu0 %v10258_v16  ;;  %2734 = vmatprep.subr.mxu1 %v10260_v27 }
 0x8d9   :  { %2664 = vmatpush1.msra.mxu0 %v10264_v28  ;;  %2735 = vmatpush1.msra.mxu1 %v10266_v30 }
 0x8da   :  { %2665 = vmatprep.subr.mxu0 %v10270_v31  ;;  %2736 = vmatprep.subr.mxu1 %v10272_v41 }
 0x8db   :  { %2666 = vmatpush1.msra.mxu0 %v10276_v42  ;;  %2737 = vmatpush1.msra.mxu1 %v10278_v51 }
 0x8dc   :  { %2667 = vmatprep.subr.mxu0 %v10282_v52  ;;  %2738 = vmatprep.subr.mxu1 %v10284_v53 }
 0x8dd   :  { %2668 = vmatpush1.msra.mxu0 %v10288_v54  ;;  %2739 = vmatpush1.msra.mxu1 %v10290_v61 }
 0x8de   :  { %2669 = vmatprep.subr.mxu0 %v10292_v62  ;;  %2740 = vmatprep.subr.mxu1 %v10296_v17 }
 0x8df   :  { %2670 = vmatpush1.msra.mxu0 %v10298_v25  ;;  %2741 = vmatpush1.msra.mxu1 %v13670_v15 }
 0x8e0   :  { %2671 = vmatprep.subr.mxu0 %v13671_v12  ;;  %2742 = vmatprep.subr.mxu1 %v13672_v1 }
 0x8e1   :  { %2672 = vmatpush1.msra.mxu0 %v13673_v22  ;;  %2743 = vmatpush1.msra.mxu1 %v13674_v21  ;;  %v13702_v21 = vld [vmem:[#allocation16_spill] sm:$0xff] }
 0x8e2   :  { %2673 = vmatprep.subr.mxu0 %v13675_v13  ;;  %2744 = vmatprep.subr.mxu1 %v13676_v8 }
 0x8e3   :  { %2674 = vmatpush1.msra.mxu0 %v13677_v19  ;;  %2745 = vmatpush1.msra.mxu1 %v13678_v3 }
 0x8e4   :  { %2675 = vmatprep.subr.mxu0 %v13679_v18  ;;  %2746 = vmatprep.subr.mxu1 %v13680_v10 }
 0x8e5   :  { %2676 = vmatpush1.msra.mxu0 %v13681_v63  ;;  %2747 = vmatpush1.msra.mxu1 %v13682_v33 }
 0x8e6   :  { %2677 = vmatprep.subr.mxu0 %v13683_v11  ;;  %2748 = vmatprep.subr.mxu1 %v13684_v24  ;;  %v13692_v11 = vld [vmem:[#allocation41_spill] sm:$0xff]  ;;  %v2325_v24 = vpop.f32.mrf.mxu0 }
 0x8e7   :  { %2678 = vmatpush1.msra.mxu0 %v13685_v32  ;;  %2749 = vmatpush1.msra.mxu1 %v13686_v47  ;;  %v2402_v32 = vpop.f32.mrf.mxu1 }
 0x8e8   :  { %2679 = vmatprep.subr.mxu0 %v13687_v60  ;;  %2750 = vmatprep.subr.mxu1 %v13688_v36  ;;  %v8046_v60 = vld [vmem:[%s13047_s4 + $0x4] sm:$0xf]  ;;  %v2327_v47 = vpop.f32.mrf.mxu0 }
 0x8e9   :  { %2680 = vmatpush1.msra.mxu0 %v13689_v6  ;;  %2713 = vmatprep.mubr.f32.mxu0 %v13646_v39  ;;  %v13693_v36 = vld [vmem:[#allocation15_spill] sm:$0xff]  ;;  %v2404_v6 = vpop.f32.mrf.mxu1 }
 0x8ea   :  { %2751 = vmatpush1.msra.mxu1 %v13690_v14  ;;  %2784 = vmatprep.mubr.f32.mxu1 %v13646_v39  ;;  %v10447_v33 = vrot.slane %v8046_v60, %v13693_v36  ;;  %v13696_v14 = vld [vmem:[#allocation17_spill] sm:$0xff] }
 0x8eb   :  { %2838 = vmatprep.subr.mxu0 %v13691_v0  ;;  %2909 = vmatprep.subr.mxu1 %v13692_v11  ;;  %v10452_v10 = vrot.slane %v8046_v60, %v13696_v14 }
 0x8ec   :  { %13694 = vst [vmem:[#allocation37_spill] sm:$0xff] %v10447_v33  ;;  %v10459_v11 = vadd.f32 %v2325_v24, %v10447_v33 }
 0x8ed   :  { %13697 = vst [vmem:[#allocation39_spill] sm:$0xff] %v10452_v10  ;;  %v10462_v3 = vadd.f32 %v2327_v47, %v10452_v10  ;;  %v13705_v47 = vld [vmem:[#allocation14_spill] sm:$0xff] }
 0x8ee   :  { %v10475_v10 = vrot.slane %v8046_v60, %v13705_v47 }
 0x8ef   :  { %13700 = vst [vmem:[#allocation45_spill] sm:$0xff] %v10462_v3 }
 0x8f0   :  { %13706 = vst [vmem:[#allocation49_spill] sm:$0xff] %v10475_v10 }
 0x986   :  { %v10449_v63 = vpop.f32.mrf.mxu0  ;;  %v10454_v39 = vpop.f32.mrf.mxu1 }
 0x987   :  { %13695 = vst [vmem:[#allocation38_spill] sm:$0xff] %v10449_v63  ;;  %13698 = vst [vmem:[#allocation18_spill] sm:$0xff] %v10454_v39 }
 0x988   :  { %v10456_v0 = vpop.f32.mrf.mxu0  ;;  %v10464_v19 = vpop.f32.mrf.mxu1 }
 0x989   :  { %13699 = vst [vmem:[#allocation44_spill] sm:$0xff] %v10456_v0  ;;  %13701 = vst [vmem:[#allocation46_spill] sm:$0xff] %v10464_v19  ;;  %v10469_v0 = vrot.slane %v8046_v60, %v13702_v21 }
 0x98a   :  { %v2544_v18 = vpop.f32.mrf.mxu0  ;;  %v2615_v13 = vpop.f32.mrf.mxu1 }
 0x98b   :  { %v2620_v36 = vadd.f32 %v2544_v18, %v10459_v11  ;;  %13703 = vst [vmem:[#allocation47_spill] sm:$0xff] %v10469_v0  ;;  %v10472_v33 = vadd.f32 %v2404_v6, %v10469_v0 }
 0x98c   :  { %v2546_v8 = vpop.f32.mrf.mxu0  ;;  %v2617_v24 = vpop.f32.mrf.mxu1 }
 0x98d   :  { %v8047_v63 = vmul.f32 -1.442695, %v2620_v36  ;;  %v2621_v14 = vadd.f32 %v2546_v8, %v10462_v3  ;;  %13704 = vst [vmem:[#allocation48_spill] sm:$0xff] %v10472_v33  ;;  %v2623_v18 = vadd.f32 %v2617_v24, %v10472_v33  ;;  %v10479_v36 = vadd.f32 %v2402_v32, %v10475_v10  ;;  %v13722_v10 = vld [vmem:[#allocation35_spill] sm:$0xff] }
 0x98f   :  { %8409 = vpow2.f32 %v8047_v63  ;;  %v8048_v39 = vmul.f32 -1.442695, %v2621_v14  ;;  %v8049_v8 = vmul.f32 -1.442695, %v2623_v18  ;;  %v2622_v14 = vadd.f32 %v2615_v13, %v10479_v36 }
 0x991   :  { %8411 = vpow2.f32 %v8048_v39 }
 0x992   :  { %8413 = vpow2.f32 %v8049_v8  ;;  %v13713_v8 = vld [vmem:[#allocation26_spill] sm:$0xff] }
 0x99c   :  { %v8410_v63 = vpop.eup %8409 }
 0x99d   :  { %v2627_v19 = vadd.f32 1.0, %v8410_v63 }
 0x99e   :  { %v8412_v21 = vpop.eup %8411 }
 0x99f   :  { %8415 = vrcp.f32 %v2627_v19  ;;  %v2633_v39 = vadd.f32 1.0, %v8412_v21  ;;  %v8414_v6 = vpop.eup %8413  ;;  %v13707_v21 = vld [vmem:[#allocation20_spill] sm:$0xff]  ;;  %v13708_v19 = vld [vmem:[#allocation21_spill] sm:$0xff] }
 0x9a0   :  { %8417 = vtanh.f32 %v2622_v14  ;;  %v2640_v3 = vadd.f32 1.0, %v8414_v6  ;;  %v13714_v14 = vld [vmem:[#allocation27_spill] sm:$0xff]  ;;  %v13716_v6 = vld [vmem:[#allocation29_spill] sm:$0xff] }
 0x9a1   :  { %8419 = vrcp.f32 %v2633_v39  ;;  %v13715_v39 = vld [vmem:[#allocation28_spill] sm:$0xff] }
 0x9a2   :  { %8421 = vrcp.f32 %v2640_v3  ;;  %v13709_v3 = vld [vmem:[#allocation22_spill] sm:$0xff] }
 0x9ac   :  { %v8416_v0 = vpop.eup %8415 }
 0x9ad   :  { %v8418_v60 = vpop.eup %8417 }
 0x9ae   :  { %v8420_v47 = vpop.eup %8419  ;;  %v2644_v33 = vmul.f32 %v8418_v60, %v8416_v0  ;;  %v13711_v0 = vld [vmem:[#allocation24_spill] sm:$0xff]  ;;  %v13717_v60 = vld [vmem:[#allocation30_spill] sm:$0xff] }
 0x9af   :  { %v2643_v24 = vmul.f32 0.0, %v8420_v47  ;;  %v8422_v13 = vpop.eup %8421  ;;  %v13712_v47 = vld [vmem:[#allocation25_spill] sm:$0xff] }
 0x9b1   :  { %v10482_v32 = vadd.f32 %v2644_v33, %v2643_v24  ;;  %v13710_v33 = vld [vmem:[#allocation23_spill] sm:$0xff] }
 0x9b2   :  { %v13718_v24 = vld [vmem:[#allocation31_spill] sm:$0xff] }
 0x9b3   :  { %8423 = vtanh.f32 %v10482_v32 }
 0x9c0   :  { %v8424_v18 = vpop.eup %8423 }
 0x9c1   :  { %v2647_v63 = vmul.f32 %v8424_v18, %v8422_v13  ;;  %v13719_v13 = vld [vmem:[#allocation32_spill] sm:$0xff]  ;;  %v13720_v18 = vld [vmem:[#allocation33_spill] sm:$0xff] }
 0x9c3   :  { %2648 = vst [vmem:[#allocation2] sm:$0x3] %v2647_v63  ;;  %2714 = vmatmul.mubr.f32.vlgmr.msra.gmra.mxu0 %v2647_v63  ;;  %2785 = vmatmul.mubr.f32.vlgmr.msra.gmra.mxu1 %v2647_v63  ;;  %v13721_v63 = vld [vmem:[#allocation34_spill] sm:$0xff] }
 0x9c4   :  { %2839 = vmatpush1.msra.mxu0 %v10180_v2  ;;  %2910 = vmatpush1.msra.mxu1 %v10182_v38 }
 0x9c5   :  { %2840 = vmatprep.subr.mxu0 %v10186_v23  ;;  %2911 = vmatprep.subr.mxu1 %v10188_v48 }
 0x9c6   :  { %2841 = vmatpush1.msra.mxu0 %v10192_v7  ;;  %2912 = vmatpush1.msra.mxu1 %v10194_v35 }
 0x9c7   :  { %2842 = vmatprep.subr.mxu0 %v10198_v40  ;;  %2913 = vmatprep.subr.mxu1 %v10200_v45 }
 0x9c8   :  { %2843 = vmatpush1.msra.mxu0 %v10204_v26  ;;  %2914 = vmatpush1.msra.mxu1 %v10206_v20 }
 0x9c9   :  { %2844 = vmatprep.subr.mxu0 %v10210_v57  ;;  %2915 = vmatprep.subr.mxu1 %v10212_v5 }
 0x9ca   :  { %2845 = vmatpush1.msra.mxu0 %v10216_v58  ;;  %2916 = vmatpush1.msra.mxu1 %v10218_v29 }
 0x9cb   :  { %2846 = vmatprep.subr.mxu0 %v10222_v46  ;;  %2917 = vmatprep.subr.mxu1 %v10224_v4 }
 0x9cc   :  { %2847 = vmatpush1.msra.mxu0 %v10228_v37  ;;  %2918 = vmatpush1.msra.mxu1 %v10230_v34 }
 0x9cd   :  { %2848 = vmatprep.subr.mxu0 %v10234_v43  ;;  %2919 = vmatprep.subr.mxu1 %v10236_v44 }
 0x9ce   :  { %2849 = vmatpush1.msra.mxu0 %v10240_v49  ;;  %2920 = vmatpush1.msra.mxu1 %v10242_v50 }
 0x9cf   :  { %2850 = vmatprep.subr.mxu0 %v10246_v55  ;;  %2921 = vmatprep.subr.mxu1 %v10248_v56 }
 0x9d0   :  { %2851 = vmatpush1.msra.mxu0 %v10252_v59  ;;  %2922 = vmatpush1.msra.mxu1 %v10254_v9 }
 0x9d1   :  { %2852 = vmatprep.subr.mxu0 %v10258_v16  ;;  %2923 = vmatprep.subr.mxu1 %v10260_v27 }
 0x9d2   :  { %2853 = vmatpush1.msra.mxu0 %v10264_v28  ;;  %2924 = vmatpush1.msra.mxu1 %v10266_v30 }
 0x9d3   :  { %2854 = vmatprep.subr.mxu0 %v10270_v31  ;;  %2925 = vmatprep.subr.mxu1 %v10272_v41 }
 0x9d4   :  { %2855 = vmatpush1.msra.mxu0 %v10276_v42  ;;  %2926 = vmatpush1.msra.mxu1 %v10278_v51 }
 0x9d5   :  { %2856 = vmatprep.subr.mxu0 %v10282_v52  ;;  %2927 = vmatprep.subr.mxu1 %v10284_v53 }
 0x9d6   :  { %2857 = vmatpush1.msra.mxu0 %v10288_v54  ;;  %2928 = vmatpush1.msra.mxu1 %v10290_v61 }
 0x9d7   :  { %2858 = vmatprep.subr.mxu0 %v10292_v62  ;;  %2929 = vmatprep.subr.mxu1 %v10296_v17 }
 0x9d8   :  { %2859 = vmatpush1.msra.mxu0 %v10298_v25  ;;  %2930 = vmatpush1.msra.mxu1 %v13670_v15 }
 0x9d9   :  { %2860 = vmatprep.subr.mxu0 %v13671_v12  ;;  %2931 = vmatprep.subr.mxu1 %v13672_v1 }
 0x9da   :  { %2861 = vmatpush1.msra.mxu0 %v13673_v22  ;;  %2932 = vmatpush1.msra.mxu1 %v13707_v21 }
 0x9db   :  { %2862 = vmatprep.subr.mxu0 %v13708_v19  ;;  %2933 = vmatprep.subr.mxu1 %v13709_v3 }
 0x9dc   :  { %2863 = vmatpush1.msra.mxu0 %v13710_v33  ;;  %2934 = vmatpush1.msra.mxu1 %v13711_v0  ;;  %v13727_v33 = vld [vmem:[#allocation45_spill] sm:$0xff] }
 0x9dd   :  { %2864 = vmatprep.subr.mxu0 %v13712_v47  ;;  %2935 = vmatprep.subr.mxu1 %v13713_v8  ;;  %v13723_v47 = vmov 0.0   ;;  %v13724_v8 = vld [vmem:[#allocation36_spill] sm:$0xff] }
 0x9de   :  { %2865 = vmatpush1.msra.mxu0 %v13714_v14  ;;  %2936 = vmatpush1.msra.mxu1 %v13715_v39  ;;  %v13725_v39 = vld [vmem:[#allocation43_spill] sm:$0xff] }
 0x9df   :  { %2866 = vmatprep.subr.mxu0 %v13716_v6  ;;  %2937 = vmatprep.subr.mxu1 %v13717_v60  ;;  %v13726_v6 = vld [vmem:[#allocation41_spill] sm:$0xff] }
 0x9e0   :  { %2867 = vmatpush1.msra.mxu0 %v13718_v24  ;;  %2938 = vmatpush1.msra.mxu1 %v13719_v13 }
 0x9e1   :  { %2868 = vmatprep.subr.mxu0 %v13720_v18  ;;  %2939 = vmatprep.subr.mxu1 %v13721_v63 }
 0x9e2   :  { %2869 = vmatpush1.msra.mxu0 %v13722_v10  ;;  %2902 = vmatprep.mubr.f32.mxu0 %v13723_v47 }
 0x9e3   :  { %2940 = vmatpush1.msra.mxu1 %v13724_v8  ;;  %2973 = vmatprep.mubr.f32.mxu1 %v13723_v47  ;;  %v13728_v47 = vld [vmem:[#allocation48_spill] sm:$0xff] }
 0x9e4   :  { %3027 = vmatprep.subr.mxu0 %v13725_v39  ;;  %3098 = vmatprep.subr.mxu1 %v13726_v6 }
 0xa83   :  { %v2715_v60 = vpop.f32.mrf.mxu0  ;;  %v2786_v18 = vpop.f32.mrf.mxu1 }
 0xa84   :  { %v2795_v24 = vrot.slane %v2715_v60, 6  ;;  %v2797_v39 = vrot.slane %v2786_v18, 6 }
 0xa85   :  { %v2717_v14 = vpop.f32.mrf.mxu0  ;;  %v2788_v19 = vpop.f32.mrf.mxu1 }
 0xa86   :  { %v2803_v13 = vadd.f32 %v2795_v24, %v10459_v11  ;;  %v2796_v0 = vrot.slane %v2717_v14, 6  ;;  %v2798_v8 = vrot.slane %v2788_v19, 6  ;;  %v2805_v60 = vadd.f32 %v2797_v39, %v10479_v36 }
 0xa88   :  { %v8050_v63 = vmul.f32 -1.442695, %v2803_v13  ;;  %v2804_v10 = vadd.f32 %v2796_v0, %v13727_v33  ;;  %v2806_v21 = vadd.f32 %v2798_v8, %v13728_v47 }
 0xa8a   :  { %8425 = vpow2.f32 %v8050_v63  ;;  %v8051_v3 = vmul.f32 -1.442695, %v2804_v10  ;;  %v8052_v22 = vmul.f32 -1.442695, %v2806_v21  ;;  %v13731_v63 = vld [vmem:[#allocation42_spill] sm:$0xff] }
 0xa8c   :  { %8427 = vpow2.f32 %v8051_v3  ;;  %v2827_v3 = vrot.slane %v10482_v32, 6  ;;  %v13729_v32 = vld [vmem:[#allocation19_spill] sm:$0xff] }
 0xa8d   :  { %8429 = vpow2.f32 %v8052_v22 }
 0xa97   :  { %v8426_v6 = vpop.eup %8425 }
 0xa98   :  { %v2810_v1 = vadd.f32 1.0, %v8426_v6  ;;  %v13730_v6 = vld [vmem:[#allocation40_spill] sm:$0xff] }
 0xa99   :  { %v8428_v12 = vpop.eup %8427 }
 0xa9a   :  { %8431 = vrcp.f32 %v2810_v1  ;;  %v2816_v14 = vadd.f32 1.0, %v8428_v12  ;;  %v8430_v0 = vpop.eup %8429 }
 0xa9b   :  { %8433 = vtanh.f32 %v2805_v60  ;;  %v2823_v13 = vadd.f32 1.0, %v8430_v0  ;;  %v13732_v60 = vld [vmem:[#allocation20_spill] sm:$0xff]  ;;  %v13734_v0 = vld [vmem:[#allocation22_spill] sm:$0xff] }
 0xa9c   :  { %8435 = vrcp.f32 %v2816_v14  ;;  %v13733_v14 = vld [vmem:[#allocation21_spill] sm:$0xff] }
 0xa9d   :  { %8437 = vrcp.f32 %v2823_v13  ;;  %v13739_v13 = vld [vmem:[#allocation27_spill] sm:$0xff] }
 0xaa7   :  { %v8432_v24 = vpop.eup %8431 }
 0xaa8   :  { %v8434_v10 = vpop.eup %8433 }
 0xaa9   :  { %v8436_v19 = vpop.eup %8435  ;;  %v2830_v8 = vmul.f32 %v8434_v10, %v8432_v24  ;;  %v13735_v24 = vld [vmem:[#allocation23_spill] sm:$0xff]  ;;  %v13736_v10 = vld [vmem:[#allocation24_spill] sm:$0xff] }
 0xaaa   :  { %v2829_v18 = vmul.f32 %v8436_v19, %v2827_v3  ;;  %v8438_v39 = vpop.eup %8437  ;;  %v13737_v3 = vld [vmem:[#allocation25_spill] sm:$0xff]  ;;  %v13738_v19 = vld [vmem:[#allocation26_spill] sm:$0xff] }
 0xaac   :  { %v10556_v21 = vadd.f32 %v2830_v8, %v2829_v18  ;;  %v13740_v8 = vld [vmem:[#allocation28_spill] sm:$0xff]  ;;  %v13741_v18 = vld [vmem:[#allocation29_spill] sm:$0xff] }
 0xaae   :  { %8439 = vtanh.f32 %v10556_v21 }
 0xabb   :  { %v8440_v22 = vpop.eup %8439 }
 0xabc   :  { %v2833_v1 = vmul.f32 %v8440_v22, %v8438_v39  ;;  %v13742_v39 = vld [vmem:[#allocation30_spill] sm:$0xff]  ;;  %v13743_v22 = vld [vmem:[#allocation31_spill] sm:$0xff] }
 0xabe   :  { %2834 = vst [vmem:[#allocation2] sm:$0xc] %v2833_v1  ;;  %v2836_v12 = vrot.slane %v2833_v1, 2  ;;  %v13744_v1 = vld [vmem:[#allocation32_spill] sm:$0xff] }
 0xac0   :  { %2903 = vmatmul.mubr.f32.vlgmr.msra.gmra.mxu0 %v2836_v12  ;;  %2974 = vmatmul.mubr.f32.vlgmr.msra.gmra.mxu1 %v2836_v12  ;;  %v13745_v12 = vld [vmem:[#allocation33_spill] sm:$0xff] }
 0xac1   :  { %3028 = vmatpush1.msra.mxu0 %v10180_v2  ;;  %3099 = vmatpush1.msra.mxu1 %v10182_v38 }
 0xac2   :  { %3029 = vmatprep.subr.mxu0 %v10186_v23  ;;  %3100 = vmatprep.subr.mxu1 %v10188_v48 }
 0xac3   :  { %3030 = vmatpush1.msra.mxu0 %v10192_v7  ;;  %3101 = vmatpush1.msra.mxu1 %v10194_v35 }
 0xac4   :  { %3031 = vmatprep.subr.mxu0 %v10198_v40  ;;  %3102 = vmatprep.subr.mxu1 %v10200_v45 }
 0xac5   :  { %3032 = vmatpush1.msra.mxu0 %v10204_v26  ;;  %3103 = vmatpush1.msra.mxu1 %v10206_v20 }
 0xac6   :  { %3033 = vmatprep.subr.mxu0 %v10210_v57  ;;  %3104 = vmatprep.subr.mxu1 %v10212_v5 }
 0xac7   :  { %3034 = vmatpush1.msra.mxu0 %v10216_v58  ;;  %3105 = vmatpush1.msra.mxu1 %v10218_v29 }
 0xac8   :  { %3035 = vmatprep.subr.mxu0 %v10222_v46  ;;  %3106 = vmatprep.subr.mxu1 %v10224_v4 }
 0xac9   :  { %3036 = vmatpush1.msra.mxu0 %v10228_v37  ;;  %3107 = vmatpush1.msra.mxu1 %v10230_v34 }
 0xaca   :  { %3037 = vmatprep.subr.mxu0 %v10234_v43  ;;  %3108 = vmatprep.subr.mxu1 %v10236_v44 }
 0xacb   :  { %3038 = vmatpush1.msra.mxu0 %v10240_v49  ;;  %3109 = vmatpush1.msra.mxu1 %v10242_v50 }
 0xacc   :  { %3039 = vmatprep.subr.mxu0 %v10246_v55  ;;  %3110 = vmatprep.subr.mxu1 %v10248_v56 }
 0xacd   :  { %3040 = vmatpush1.msra.mxu0 %v10252_v59  ;;  %3111 = vmatpush1.msra.mxu1 %v10254_v9 }
 0xace   :  { %3041 = vmatprep.subr.mxu0 %v10258_v16  ;;  %3112 = vmatprep.subr.mxu1 %v10260_v27 }
 0xacf   :  { %3042 = vmatpush1.msra.mxu0 %v10264_v28  ;;  %3113 = vmatpush1.msra.mxu1 %v10266_v30 }
 0xad0   :  { %3043 = vmatprep.subr.mxu0 %v10270_v31  ;;  %3114 = vmatprep.subr.mxu1 %v10272_v41 }
 0xad1   :  { %3044 = vmatpush1.msra.mxu0 %v10276_v42  ;;  %3115 = vmatpush1.msra.mxu1 %v10278_v51 }
 0xad2   :  { %3045 = vmatprep.subr.mxu0 %v10282_v52  ;;  %3116 = vmatprep.subr.mxu1 %v10284_v53 }
 0xad3   :  { %3046 = vmatpush1.msra.mxu0 %v10288_v54  ;;  %3117 = vmatpush1.msra.mxu1 %v10290_v61 }
 0xad4   :  { %3047 = vmatprep.subr.mxu0 %v10292_v62  ;;  %3118 = vmatprep.subr.mxu1 %v10296_v17 }
 0xad5   :  { %3048 = vmatpush1.msra.mxu0 %v10298_v25  ;;  %3119 = vmatpush1.msra.mxu1 %v13670_v15 }
 0xad6   :  { %3049 = vmatprep.subr.mxu0 %v13729_v32  ;;  %3120 = vmatprep.subr.mxu1 %v13730_v6 }
 0xad7   :  { %3050 = vmatpush1.msra.mxu0 %v13731_v63  ;;  %3121 = vmatpush1.msra.mxu1 %v13732_v60 }
 0xad8   :  { %3051 = vmatprep.subr.mxu0 %v13733_v14  ;;  %3122 = vmatprep.subr.mxu1 %v13734_v0 }
 0xad9   :  { %3052 = vmatpush1.msra.mxu0 %v13735_v24  ;;  %3123 = vmatpush1.msra.mxu1 %v13736_v10  ;;  %v13746_v24 = vld [vmem:[#allocation34_spill] sm:$0xff]  ;;  %v13747_v10 = vld [vmem:[#allocation35_spill] sm:$0xff] }
 0xada   :  { %3053 = vmatprep.subr.mxu0 %v13737_v3  ;;  %3124 = vmatprep.subr.mxu1 %v13738_v19  ;;  %v13748_v3 = vmov 0.0   ;;  %v13749_v19 = vld [vmem:[#allocation36_spill] sm:$0xff] }
 0xadb   :  { %3054 = vmatpush1.msra.mxu0 %v13739_v13  ;;  %3125 = vmatpush1.msra.mxu1 %v13740_v8  ;;  %v13750_v8 = vld [vmem:[#allocation43_spill] sm:$0xff] }
 0xadc   :  { %3055 = vmatprep.subr.mxu0 %v13741_v18  ;;  %3126 = vmatprep.subr.mxu1 %v13742_v39  ;;  %v13751_v18 = vld [vmem:[#allocation41_spill] sm:$0xff] }
 0xadd   :  { %3056 = vmatpush1.msra.mxu0 %v13743_v22  ;;  %3127 = vmatpush1.msra.mxu1 %v13744_v1 }
 0xade   :  { %3057 = vmatprep.subr.mxu0 %v13745_v12  ;;  %3128 = vmatprep.subr.mxu1 %v13746_v24 }
 0xadf   :  { %3058 = vmatpush1.msra.mxu0 %v13747_v10  ;;  %3091 = vmatprep.mubr.f32.mxu0 %v13748_v3 }
 0xae0   :  { %3129 = vmatpush1.msra.mxu1 %v13749_v19  ;;  %3162 = vmatprep.mubr.f32.mxu1 %v13748_v3 }
 0xae1   :  { %3216 = vmatprep.subr.mxu0 %v13750_v8  ;;  %3287 = vmatprep.subr.mxu1 %v13751_v18 }
 0xb80   :  { %v2904_v39 = vpop.f32.mrf.mxu0  ;;  %v2975_v12 = vpop.f32.mrf.mxu1 }
 0xb81   :  { %v2984_v22 = vrot.slane %v2904_v39, 4  ;;  %v2986_v8 = vrot.slane %v2975_v12, 4 }
 0xb82   :  { %v2906_v13 = vpop.f32.mrf.mxu0  ;;  %v2977_v60 = vpop.f32.mrf.mxu1 }
 0xb83   :  { %v2992_v1 = vadd.f32 %v2984_v22, %v10459_v11  ;;  %v2985_v0 = vrot.slane %v2906_v13, 4  ;;  %v2987_v19 = vrot.slane %v2977_v60, 4  ;;  %v2994_v39 = vadd.f32 %v2986_v8, %v10479_v36 }
 0xb85   :  { %v8053_v24 = vmul.f32 -1.442695, %v2992_v1  ;;  %v2993_v10 = vadd.f32 %v2985_v0, %v13727_v33  ;;  %v2995_v3 = vadd.f32 %v2987_v19, %v13728_v47 }
 0xb87   :  { %8441 = vpow2.f32 %v8053_v24  ;;  %v8054_v14 = vmul.f32 -1.442695, %v2993_v10  ;;  %v8055_v63 = vmul.f32 -1.442695, %v2995_v3 }
 0xb89   :  { %8443 = vpow2.f32 %v8054_v14  ;;  %v3016_v14 = vrot.slane %v10556_v21, 6 }
 0xb8a   :  { %8445 = vpow2.f32 %v8055_v63 }
 0xb94   :  { %v8442_v18 = vpop.eup %8441 }
 0xb95   :  { %v2999_v6 = vadd.f32 1.0, %v8442_v18 }
 0xb96   :  { %v8444_v32 = vpop.eup %8443 }
 0xb97   :  { %8447 = vrcp.f32 %v2999_v6  ;;  %v3005_v13 = vadd.f32 1.0, %v8444_v32  ;;  %v8446_v0 = vpop.eup %8445 }
 0xb98   :  { %8449 = vtanh.f32 %v2994_v39  ;;  %v3012_v22 = vadd.f32 1.0, %v8446_v0 }
 0xb99   :  { %8451 = vrcp.f32 %v3005_v13 }
 0xb9a   :  { %8453 = vrcp.f32 %v3012_v22  ;;  %v10714_v22 = vld [vmem:[#allocation7 + $0x3f0] sm:$0xff] }
 0xba4   :  { %v8448_v24 = vpop.eup %8447 }
 0xba5   :  { %v8450_v10 = vpop.eup %8449 }
 0xba6   :  { %v8452_v60 = vpop.eup %8451  ;;  %v3019_v19 = vmul.f32 %v8450_v10, %v8448_v24 }
 0xba7   :  { %v3018_v1 = vmul.f32 %v8452_v60, %v3016_v14  ;;  %v8454_v12 = vpop.eup %8453  ;;  %v10711_v60 = vld [vmem:[#allocation7 + $0x3e0] sm:$0xff] }
 0xba9   :  { %v10630_v3 = vadd.f32 %v3019_v19, %v3018_v1  ;;  %v10717_v19 = vld [vmem:[#allocation7 + $0x3c8] sm:$0xff]  ;;  %v10720_v1 = vld [vmem:[#allocation7 + $0x3d8] sm:$0xff] }
 0xbab   :  { %8455 = vtanh.f32 %v10630_v3  ;;  %v3205_v8 = vrot.slane %v10630_v3, 6  ;;  %v10723_v3 = vld [vmem:[#allocation7 + $0x3c0] sm:$0xff] }
 0xbb8   :  { %v8456_v63 = vpop.eup %8455 }
 0xbb9   :  { %v3022_v6 = vmul.f32 %v8456_v63, %v8454_v12  ;;  %v10726_v12 = vld [vmem:[#allocation7 + $0x3d0] sm:$0xff]  ;;  %v10729_v63 = vld [vmem:[#allocation7 + $0x3a8] sm:$0xff] }
 0xbbb   :  { %3023 = vst [vmem:[#allocation2] sm:$0x30] %v3022_v6  ;;  %v3025_v32 = vrot.slane %v3022_v6, 4  ;;  %v10732_v6 = vld [vmem:[#allocation7 + $0x3b8] sm:$0xff] }
 0xbbd   :  { %3092 = vmatmul.mubr.f32.vlgmr.msra.gmra.mxu0 %v3025_v32  ;;  %3163 = vmatmul.mubr.f32.vlgmr.msra.gmra.mxu1 %v3025_v32  ;;  %v10735_v32 = vld [vmem:[#allocation7 + $0x3a0] sm:$0xff] }
 0xbbe   :  { %3217 = vmatpush1.msra.mxu0 %v10180_v2  ;;  %3288 = vmatpush1.msra.mxu1 %v10182_v38  ;;  %v13752_v2 = vld [vmem:[#allocation19_spill] sm:$0xff]  ;;  %v13753_v38 = vld [vmem:[#allocation40_spill] sm:$0xff] }
 0xbbf   :  { %3218 = vmatprep.subr.mxu0 %v10186_v23  ;;  %3289 = vmatprep.subr.mxu1 %v10188_v48  ;;  %v13754_v23 = vld [vmem:[#allocation42_spill] sm:$0xff]  ;;  %v13755_v48 = vld [vmem:[#allocation20_spill] sm:$0xff] }
 0xbc0   :  { %3219 = vmatpush1.msra.mxu0 %v10192_v7  ;;  %3290 = vmatpush1.msra.mxu1 %v10194_v35  ;;  %v13756_v7 = vld [vmem:[#allocation21_spill] sm:$0xff]  ;;  %v13757_v35 = vld [vmem:[#allocation22_spill] sm:$0xff] }
 0xbc1   :  { %3220 = vmatprep.subr.mxu0 %v10198_v40  ;;  %3291 = vmatprep.subr.mxu1 %v10200_v45  ;;  %v13758_v40 = vld [vmem:[#allocation23_spill] sm:$0xff]  ;;  %v13759_v45 = vld [vmem:[#allocation24_spill] sm:$0xff] }
 0xbc2   :  { %3221 = vmatpush1.msra.mxu0 %v10204_v26  ;;  %3292 = vmatpush1.msra.mxu1 %v10206_v20  ;;  %v13760_v26 = vld [vmem:[#allocation25_spill] sm:$0xff]  ;;  %v13761_v20 = vld [vmem:[#allocation26_spill] sm:$0xff] }
 0xbc3   :  { %3222 = vmatprep.subr.mxu0 %v10210_v57  ;;  %3293 = vmatprep.subr.mxu1 %v10212_v5  ;;  %v13762_v57 = vld [vmem:[#allocation27_spill] sm:$0xff]  ;;  %v13763_v5 = vld [vmem:[#allocation28_spill] sm:$0xff] }
 0xbc4   :  { %3223 = vmatpush1.msra.mxu0 %v10216_v58  ;;  %3294 = vmatpush1.msra.mxu1 %v10218_v29  ;;  %v13764_v58 = vld [vmem:[#allocation29_spill] sm:$0xff]  ;;  %v13765_v29 = vld [vmem:[#allocation30_spill] sm:$0xff] }
 0xbc5   :  { %3224 = vmatprep.subr.mxu0 %v10222_v46  ;;  %3295 = vmatprep.subr.mxu1 %v10224_v4  ;;  %v13766_v46 = vld [vmem:[#allocation31_spill] sm:$0xff]  ;;  %v13767_v4 = vld [vmem:[#allocation32_spill] sm:$0xff] }
 0xbc6   :  { %3225 = vmatpush1.msra.mxu0 %v10228_v37  ;;  %3296 = vmatpush1.msra.mxu1 %v10230_v34  ;;  %v13768_v37 = vld [vmem:[#allocation33_spill] sm:$0xff]  ;;  %v13769_v34 = vld [vmem:[#allocation34_spill] sm:$0xff] }
 0xbc7   :  { %3226 = vmatprep.subr.mxu0 %v10234_v43  ;;  %3297 = vmatprep.subr.mxu1 %v10236_v44  ;;  %v13770_v43 = vld [vmem:[#allocation35_spill] sm:$0xff]  ;;  %v13771_v44 = vmov 0.0  }
 0xbc8   :  { %3227 = vmatpush1.msra.mxu0 %v10240_v49  ;;  %3298 = vmatpush1.msra.mxu1 %v10242_v50  ;;  %v13772_v49 = vld [vmem:[#allocation36_spill] sm:$0xff]  ;;  %v10697_v50 = vld [vmem:[#allocation7 + $0x3e8] sm:$0xff] }
 0xbc9   :  { %3228 = vmatprep.subr.mxu0 %v10246_v55  ;;  %3299 = vmatprep.subr.mxu1 %v10248_v56  ;;  %13773 = vst [vmem:[#allocation45_spill] sm:$0xff] %v10697_v50  ;;  %v10700_v55 = vld [vmem:[#allocation7 + $0x3f8] sm:$0xff] }
 0xbca   :  { %3229 = vmatpush1.msra.mxu0 %v10252_v59  ;;  %3300 = vmatpush1.msra.mxu1 %v10254_v9  ;;  %13774 = vst [vmem:[#allocation48_spill] sm:$0xff] %v10700_v55 }
 0xbcb   :  { %3230 = vmatprep.subr.mxu0 %v10258_v16  ;;  %3301 = vmatprep.subr.mxu1 %v10260_v27 }
 0xbcc   :  { %3231 = vmatpush1.msra.mxu0 %v10264_v28  ;;  %3302 = vmatpush1.msra.mxu1 %v10266_v30 }
 0xbcd   :  { %3232 = vmatprep.subr.mxu0 %v10270_v31  ;;  %3303 = vmatprep.subr.mxu1 %v10272_v41 }
 0xbce   :  { %3233 = vmatpush1.msra.mxu0 %v10276_v42  ;;  %3304 = vmatpush1.msra.mxu1 %v10278_v51 }
 0xbcf   :  { %3234 = vmatprep.subr.mxu0 %v10282_v52  ;;  %3305 = vmatprep.subr.mxu1 %v10284_v53 }
 0xbd0   :  { %3235 = vmatpush1.msra.mxu0 %v10288_v54  ;;  %3306 = vmatpush1.msra.mxu1 %v10290_v61 }
 0xbd1   :  { %3236 = vmatprep.subr.mxu0 %v10292_v62  ;;  %3307 = vmatprep.subr.mxu1 %v10296_v17 }
 0xbd2   :  { %3237 = vmatpush1.msra.mxu0 %v10298_v25  ;;  %3308 = vmatpush1.msra.mxu1 %v13670_v15 }
 0xbd3   :  { %3238 = vmatprep.subr.mxu0 %v13752_v2  ;;  %3309 = vmatprep.subr.mxu1 %v13753_v38  ;;  %v10738_v2 = vld [vmem:[#allocation7 + $0x3b0] sm:$0xff]  ;;  %v10741_v38 = vld [vmem:[#allocation7 + $0x388] sm:$0xff] }
 0xbd4   :  { %3239 = vmatpush1.msra.mxu0 %v13754_v23  ;;  %3310 = vmatpush1.msra.mxu1 %v13755_v48  ;;  %v10744_v23 = vld [vmem:[#allocation7 + $0x398] sm:$0xff]  ;;  %v10747_v48 = vld [vmem:[#allocation7 + $0x380] sm:$0xff] }
 0xbd5   :  { %3240 = vmatprep.subr.mxu0 %v13756_v7  ;;  %3311 = vmatprep.subr.mxu1 %v13757_v35  ;;  %v10750_v7 = vld [vmem:[#allocation7 + $0x390] sm:$0xff]  ;;  %v10753_v35 = vld [vmem:[#allocation7 + $0x368] sm:$0xff] }
 0xbd6   :  { %3241 = vmatpush1.msra.mxu0 %v13758_v40  ;;  %3312 = vmatpush1.msra.mxu1 %v13759_v45  ;;  %v10756_v40 = vld [vmem:[#allocation7 + $0x378] sm:$0xff]  ;;  %v10759_v45 = vld [vmem:[#allocation7 + $0x360] sm:$0xff] }
 0xbd7   :  { %3242 = vmatprep.subr.mxu0 %v13760_v26  ;;  %3313 = vmatprep.subr.mxu1 %v13761_v20  ;;  %v10762_v26 = vld [vmem:[#allocation7 + $0x370] sm:$0xff]  ;;  %v10765_v20 = vld [vmem:[#allocation7 + $0x348] sm:$0xff] }
 0xbd8   :  { %3243 = vmatpush1.msra.mxu0 %v13762_v57  ;;  %3314 = vmatpush1.msra.mxu1 %v13763_v5  ;;  %v10768_v57 = vld [vmem:[#allocation7 + $0x358] sm:$0xff]  ;;  %v10771_v5 = vld [vmem:[#allocation7 + $0x340] sm:$0xff] }
 0xbd9   :  { %3244 = vmatprep.subr.mxu0 %v13764_v58  ;;  %3315 = vmatprep.subr.mxu1 %v13765_v29  ;;  %v10774_v58 = vld [vmem:[#allocation7 + $0x350] sm:$0xff]  ;;  %v10777_v29 = vld [vmem:[#allocation7 + $0x328] sm:$0xff] }
 0xbda   :  { %3245 = vmatpush1.msra.mxu0 %v13766_v46  ;;  %3316 = vmatpush1.msra.mxu1 %v13767_v4  ;;  %v10780_v46 = vld [vmem:[#allocation7 + $0x338] sm:$0xff]  ;;  %v10783_v4 = vld [vmem:[#allocation7 + $0x320] sm:$0xff] }
 0xbdb   :  { %3246 = vmatprep.subr.mxu0 %v13768_v37  ;;  %3317 = vmatprep.subr.mxu1 %v13769_v34  ;;  %v10786_v37 = vld [vmem:[#allocation7 + $0x330] sm:$0xff]  ;;  %v10789_v34 = vld [vmem:[#allocation7 + $0x308] sm:$0xff] }
 0xbdc   :  { %3247 = vmatpush1.msra.mxu0 %v13770_v43  ;;  %3280 = vmatprep.mubr.f32.mxu0 %v13771_v44  ;;  %v10792_v43 = vld [vmem:[#allocation7 + $0x318] sm:$0xff] }
 0xbdd   :  { %3318 = vmatpush1.msra.mxu1 %v13772_v49  ;;  %3351 = vmatprep.mubr.f32.mxu1 %v13771_v44  ;;  %v10795_v49 = vld [vmem:[#allocation7 + $0x300] sm:$0xff] }
 0xbde   :  { %3390 = vmatprep.subr.mxu0 %v10697_v50  ;;  %3461 = vmatprep.subr.mxu1 %v10700_v55 }
 0xc7d   :  { %v3093_v56 = vpop.f32.mrf.mxu0  ;;  %v3164_v27 = vpop.f32.mrf.mxu1 }
 0xc7e   :  { %v3173_v59 = vrot.slane %v3093_v56, 2  ;;  %v3175_v53 = vrot.slane %v3164_v27, 2  ;;  %v10798_v56 = vld [vmem:[#allocation7 + $0x310] sm:$0xff] }
 0xc7f   :  { %v3095_v9 = vpop.f32.mrf.mxu0  ;;  %v3166_v42 = vpop.f32.mrf.mxu1  ;;  %v10810_v27 = vld [vmem:[#allocation7 + $0x2f0] sm:$0xff] }
 0xc80   :  { %v3181_v16 = vadd.f32 %v3173_v59, %v10459_v11  ;;  %v3174_v28 = vrot.slane %v3095_v9, 2  ;;  %v3176_v51 = vrot.slane %v3166_v42, 2  ;;  %v3183_v62 = vadd.f32 %v3175_v53, %v10479_v36  ;;  %v10801_v59 = vld [vmem:[#allocation7 + $0x2e8] sm:$0xff]  ;;  %v10804_v9 = vld [vmem:[#allocation7 + $0x2f8] sm:$0xff]  ;;  %v10834_v53 = vld [vmem:[#allocation7 + $0x2b0] sm:$0xff] }
 0xc81   :  { %v10825_v42 = vld [vmem:[#allocation7 + $0x2a8] sm:$0xff] }
 0xc82   :  { %v8056_v30 = vmul.f32 -1.442695, %v3181_v16  ;;  %v3182_v31 = vadd.f32 %v3174_v28, %v13727_v33  ;;  %v3184_v52 = vadd.f32 %v3176_v51, %v13728_v47  ;;  %v10807_v16 = vld [vmem:[#allocation7 + $0x2e0] sm:$0xff]  ;;  %v10813_v28 = vld [vmem:[#allocation7 + $0x2c8] sm:$0xff]  ;;  %v10828_v51 = vld [vmem:[#allocation7 + $0x2b8] sm:$0xff] }
 0xc84   :  { %8457 = vpow2.f32 %v8056_v30  ;;  %v8057_v41 = vmul.f32 -1.442695, %v3182_v31  ;;  %v8058_v54 = vmul.f32 -1.442695, %v3184_v52  ;;  %v10816_v30 = vld [vmem:[#allocation7 + $0x2d8] sm:$0xff]  ;;  %v10819_v31 = vld [vmem:[#allocation7 + $0x2c0] sm:$0xff] }
 0xc85   :  { %v10831_v52 = vld [vmem:[#allocation7 + $0x2a0] sm:$0xff] }
 0xc86   :  { %8459 = vpow2.f32 %v8057_v41  ;;  %v10822_v41 = vld [vmem:[#allocation7 + $0x2d0] sm:$0xff] }
 0xc87   :  { %8461 = vpow2.f32 %v8058_v54  ;;  %v10837_v54 = vld [vmem:[#allocation7 + $0x288] sm:$0xff] }
 0xc88   :  { %13775 = vst [vmem:[#allocation43_spill] sm:$0xff] %v10837_v54 }
 0xc91   :  { %v8458_v61 = vpop.eup %8457 }
 0xc92   :  { %v3188_v17 = vadd.f32 1.0, %v8458_v61  ;;  %v10840_v61 = vld [vmem:[#allocation7 + $0x298] sm:$0xff] }
 0xc93   :  { %v8460_v25 = vpop.eup %8459  ;;  %13776 = vst [vmem:[#allocation41_spill] sm:$0xff] %v10840_v61 }
 0xc94   :  { %8463 = vrcp.f32 %v3188_v17  ;;  %v3194_v15 = vadd.f32 1.0, %v8460_v25  ;;  %v8462_v11 = vpop.eup %8461  ;;  %v10846_v17 = vld [vmem:[#allocation7 + $0x290] sm:$0xff]  ;;  %v10849_v25 = vld [vmem:[#allocation7 + $0x268] sm:$0xff] }
 0xc95   :  { %8465 = vtanh.f32 %v3183_v62  ;;  %v3201_v39 = vadd.f32 1.0, %v8462_v11  ;;  %v10843_v62 = vld [vmem:[#allocation7 + $0x280] sm:$0xff]  ;;  %13778 = vst [vmem:[#allocation40_spill] sm:$0xff] %v10846_v17  ;;  %13779 = vst [vmem:[#allocation42_spill] sm:$0xff] %v10849_v25 }
 0xc96   :  { %8467 = vrcp.f32 %v3194_v15  ;;  %13777 = vst [vmem:[#allocation19_spill] sm:$0xff] %v10843_v62  ;;  %v10852_v15 = vld [vmem:[#allocation7 + $0x278] sm:$0xff]  ;;  %v10855_v11 = vld [vmem:[#allocation7 + $0x260] sm:$0xff] }
 0xc97   :  { %8469 = vrcp.f32 %v3201_v39  ;;  %13780 = vst [vmem:[#allocation20_spill] sm:$0xff] %v10852_v15  ;;  %13781 = vst [vmem:[#allocation21_spill] sm:$0xff] %v10855_v11  ;;  %v10870_v39 = vld [vmem:[#allocation7 + $0x250] sm:$0xff] }
 0xc98   :  { %13786 = vst [vmem:[#allocation26_spill] sm:$0xff] %v10870_v39 }
 0xca1   :  { %v8464_v33 = vpop.eup %8463 }
 0xca2   :  { %v8466_v21 = vpop.eup %8465 }
 0xca3   :  { %v8468_v18 = vpop.eup %8467  ;;  %v3208_v47 = vmul.f32 %v8466_v21, %v8464_v33  ;;  %v10858_v33 = vld [vmem:[#allocation7 + $0x270] sm:$0xff]  ;;  %v10861_v21 = vld [vmem:[#allocation7 + $0x248] sm:$0xff] }
 0xca4   :  { %v3207_v13 = vmul.f32 %v8468_v18, %v3205_v8  ;;  %v8470_v36 = vpop.eup %8469  ;;  %13782 = vst [vmem:[#allocation22_spill] sm:$0xff] %v10858_v33  ;;  %13783 = vst [vmem:[#allocation23_spill] sm:$0xff] %v10861_v21  ;;  %v10864_v8 = vld [vmem:[#allocation7 + $0x258] sm:$0xff]  ;;  %v10867_v18 = vld [vmem:[#allocation7 + $0x240] sm:$0xff] }
 0xca5   :  { %13784 = vst [vmem:[#allocation24_spill] sm:$0xff] %v10864_v8  ;;  %13785 = vst [vmem:[#allocation25_spill] sm:$0xff] %v10867_v18 }
 0xca6   :  { %v10708_v0 = vadd.f32 %v3208_v47, %v3207_v13  ;;  %v10873_v47 = vld [vmem:[#allocation7 + $0x228] sm:$0xff]  ;;  %v10876_v13 = vld [vmem:[#allocation7 + $0x238] sm:$0xff] }
 0xca7   :  { %13787 = vst [vmem:[#allocation27_spill] sm:$0xff] %v10873_v47  ;;  %13788 = vst [vmem:[#allocation28_spill] sm:$0xff] %v10876_v13 }
 0xca8   :  { %8471 = vtanh.f32 %v10708_v0 }
 0xcb5   :  { %v8472_v24 = vpop.eup %8471 }
 0xcb6   :  { %v3211_v10 = vmul.f32 %v8472_v24, %v8470_v36  ;;  %v10879_v36 = vld [vmem:[#allocation7 + $0x220] sm:$0xff]  ;;  %v10882_v24 = vld [vmem:[#allocation7 + $0x230] sm:$0xff] }
 0xcb7   :  { %13789 = vst [vmem:[#allocation29_spill] sm:$0xff] %v10879_v36  ;;  %13790 = vst [vmem:[#allocation30_spill] sm:$0xff] %v10882_v24 }
 0xcb8   :  { %3212 = vst [vmem:[#allocation2] sm:$0xc0] %v3211_v10  ;;  %v3214_v14 = vrot.slane %v3211_v10, 6  ;;  %v10885_v10 = vld [vmem:[#allocation7 + $0x208] sm:$0xff] }
 0xcb9   :  { %13791 = vst [vmem:[#allocation31_spill] sm:$0xff] %v10885_v10 }
 0xcba   :  { %3281 = vmatmul.mubr.f32.vlgmr.msra.gmra.mxu0 %v3214_v14  ;;  %3352 = vmatmul.mubr.f32.vlgmr.msra.gmra.mxu1 %v3214_v14  ;;  %v10888_v14 = vld [vmem:[#allocation7 + $0x218] sm:$0xff] }
 0xcbb   :  { %3391 = vmatpush1.msra.mxu0 %v10711_v60  ;;  %3462 = vmatpush1.msra.mxu1 %v10714_v22  ;;  %13792 = vst [vmem:[#allocation32_spill] sm:$0xff] %v10888_v14 }
 0xcbc   :  { %3392 = vmatprep.subr.mxu0 %v10717_v19  ;;  %3463 = vmatprep.subr.mxu1 %v10720_v1 }
 0xcbd   :  { %3393 = vmatpush1.msra.mxu0 %v10723_v3  ;;  %3464 = vmatpush1.msra.mxu1 %v10726_v12 }
 0xcbe   :  { %3394 = vmatprep.subr.mxu0 %v10729_v63  ;;  %3465 = vmatprep.subr.mxu1 %v10732_v6 }
 0xcbf   :  { %3395 = vmatpush1.msra.mxu0 %v10735_v32  ;;  %3466 = vmatpush1.msra.mxu1 %v10738_v2 }
 0xcc0   :  { %3396 = vmatprep.subr.mxu0 %v10741_v38  ;;  %3467 = vmatprep.subr.mxu1 %v10744_v23 }
 0xcc1   :  { %3397 = vmatpush1.msra.mxu0 %v10747_v48  ;;  %3468 = vmatpush1.msra.mxu1 %v10750_v7 }
 0xcc2   :  { %3398 = vmatprep.subr.mxu0 %v10753_v35  ;;  %3469 = vmatprep.subr.mxu1 %v10756_v40 }
 0xcc3   :  { %3399 = vmatpush1.msra.mxu0 %v10759_v45  ;;  %3470 = vmatpush1.msra.mxu1 %v10762_v26 }
 0xcc4   :  { %3400 = vmatprep.subr.mxu0 %v10765_v20  ;;  %3471 = vmatprep.subr.mxu1 %v10768_v57 }
 0xcc5   :  { %3401 = vmatpush1.msra.mxu0 %v10771_v5  ;;  %3472 = vmatpush1.msra.mxu1 %v10774_v58 }
 0xcc6   :  { %3402 = vmatprep.subr.mxu0 %v10777_v29  ;;  %3473 = vmatprep.subr.mxu1 %v10780_v46 }
 0xcc7   :  { %3403 = vmatpush1.msra.mxu0 %v10783_v4  ;;  %3474 = vmatpush1.msra.mxu1 %v10786_v37 }
 0xcc8   :  { %3404 = vmatprep.subr.mxu0 %v10789_v34  ;;  %3475 = vmatprep.subr.mxu1 %v10792_v43 }
 0xcc9   :  { %3405 = vmatpush1.msra.mxu0 %v10795_v49  ;;  %3476 = vmatpush1.msra.mxu1 %v10798_v56 }
 0xcca   :  { %3406 = vmatprep.subr.mxu0 %v10801_v59  ;;  %3477 = vmatprep.subr.mxu1 %v10804_v9 }
 0xccb   :  { %3407 = vmatpush1.msra.mxu0 %v10807_v16  ;;  %3478 = vmatpush1.msra.mxu1 %v10810_v27 }
 0xccc   :  { %3408 = vmatprep.subr.mxu0 %v10813_v28  ;;  %3479 = vmatprep.subr.mxu1 %v10816_v30 }
 0xccd   :  { %3409 = vmatpush1.msra.mxu0 %v10819_v31  ;;  %3480 = vmatpush1.msra.mxu1 %v10822_v41 }
 0xcce   :  { %3410 = vmatprep.subr.mxu0 %v10825_v42  ;;  %3481 = vmatprep.subr.mxu1 %v10828_v51 }
 0xccf   :  { %3411 = vmatpush1.msra.mxu0 %v10831_v52  ;;  %3482 = vmatpush1.msra.mxu1 %v10834_v53 }
 0xcd0   :  { %3412 = vmatprep.subr.mxu0 %v10837_v54  ;;  %3483 = vmatprep.subr.mxu1 %v10840_v61 }
 0xcd1   :  { %3413 = vmatpush1.msra.mxu0 %v10843_v62  ;;  %3484 = vmatpush1.msra.mxu1 %v10846_v17 }
 0xcd2   :  { %3414 = vmatprep.subr.mxu0 %v10849_v25  ;;  %3485 = vmatprep.subr.mxu1 %v10852_v15  ;;  %v13802_v15 = vld [vmem:[#allocation46_spill] sm:$0xff]  ;;  %v13804_v25 = vld [vmem:[#allocation49_spill] sm:$0xff] }
 0xcd3   :  { %3415 = vmatpush1.msra.mxu0 %v10855_v11  ;;  %3486 = vmatpush1.msra.mxu1 %v10858_v33  ;;  %v13801_v11 = vld [vmem:[#allocation47_spill] sm:$0xff] }
 0xcd4   :  { %3416 = vmatprep.subr.mxu0 %v10861_v21  ;;  %3487 = vmatprep.subr.mxu1 %v10864_v8 }
 0xcd5   :  { %3417 = vmatpush1.msra.mxu0 %v10867_v18  ;;  %3488 = vmatpush1.msra.mxu1 %v10870_v39  ;;  %v13798_v39 = vld [vmem:[#allocation39_spill] sm:$0xff]  ;;  %v13799_v18 = vld [vmem:[#allocation44_spill] sm:$0xff] }
 0xcd6   :  { %3418 = vmatprep.subr.mxu0 %v10873_v47  ;;  %3489 = vmatprep.subr.mxu1 %v10876_v13  ;;  %v10891_v47 = vld [vmem:[#allocation7 + $0x200] sm:$0xff]  ;;  %v10895_v13 = vld [vmem:[#allocation7 + $0x210] sm:$0xff] }
 0xcd7   :  { %3419 = vmatpush1.msra.mxu0 %v10879_v36  ;;  %3490 = vmatpush1.msra.mxu1 %v10882_v24  ;;  %13793 = vst [vmem:[#allocation33_spill] sm:$0xff] %v10891_v47  ;;  %13794 = vst [vmem:[#allocation34_spill] sm:$0xff] %v10895_v13  ;;  %v13796_v24 = vld [vmem:[#allocation38_spill] sm:$0xff] }
 0xcd8   :  { %3420 = vmatprep.subr.mxu0 %v10885_v10  ;;  %3491 = vmatprep.subr.mxu1 %v10888_v14  ;;  %v13795_v10 = vld [vmem:[#allocation37_spill] sm:$0xff] }
 0xcd9   :  { %3421 = vmatpush1.msra.mxu0 %v10891_v47  ;;  %3454 = vmatprep.mubr.f32.mxu0 %v13771_v44  ;;  %v10903_v36 = vadd.f32 %v13796_v24, %v13795_v10  ;;  %v10907_v47 = vadd.f32 %v13799_v18, %v13798_v39  ;;  %v10913_v24 = vadd.f32 %v13802_v15, %v13801_v11  ;;  %v13805_v18 = vld [vmem:[#allocation18_spill] sm:$0xff] }
 0xcda   :  { %3492 = vmatpush1.msra.mxu1 %v10895_v13  ;;  %3525 = vmatprep.mubr.f32.mxu1 %v13771_v44  ;;  %v10918_v39 = vadd.f32 %v13805_v18, %v13804_v25 }
 0xcdb   :  { %3579 = vmatprep.subr.mxu0 %v10697_v50  ;;  %3650 = vmatprep.subr.mxu1 %v10700_v55  ;;  %13797 = vst [vmem:[#allocation35_spill] sm:$0xff] %v10903_v36  ;;  %13800 = vst [vmem:[#allocation36_spill] sm:$0xff] %v10907_v47 }
 0xcdc   :  { %13803 = vst [vmem:[#allocation37_spill] sm:$0xff] %v10913_v24 }
 0xd7a   :  { %v3282_v14 = vpop.f32.mrf.mxu0  ;;  %v3353_v44 = vpop.f32.mrf.mxu1 }
 0xd7b   :  { %v3358_v8 = vadd.f32 %v3282_v14, %v10903_v36 }
 0xd7c   :  { %v3284_v21 = vpop.f32.mrf.mxu0  ;;  %v3355_v55 = vpop.f32.mrf.mxu1 }
 0xd7d   :  { %v8059_v33 = vmul.f32 -1.442695, %v3358_v8  ;;  %v3359_v13 = vadd.f32 %v3284_v21, %v10907_v47  ;;  %v3361_v10 = vadd.f32 %v3355_v55, %v10913_v24  ;;  %v3360_v8 = vadd.f32 %v3353_v44, %v10918_v39 }
 0xd7e   :  { %v3382_v55 = vrot.slane %v10708_v0, 6  ;;  %v13806_v0 = vld [vmem:[#allocation42_spill] sm:$0xff] }
 0xd7f   :  { %8473 = vpow2.f32 %v8059_v33  ;;  %v8060_v50 = vmul.f32 -1.442695, %v3359_v13  ;;  %v8061_v14 = vmul.f32 -1.442695, %v3361_v10 }
 0xd81   :  { %8475 = vpow2.f32 %v8060_v50 }
 0xd82   :  { %8477 = vpow2.f32 %v8061_v14 }
 0xd8c   :  { %v8474_v36 = vpop.eup %8473 }
 0xd8d   :  { %v3365_v21 = vadd.f32 1.0, %v8474_v36 }
 0xd8e   :  { %v8476_v33 = vpop.eup %8475 }
 0xd8f   :  { %8479 = vrcp.f32 %v3365_v21  ;;  %v3371_v50 = vadd.f32 1.0, %v8476_v33  ;;  %v8478_v13 = vpop.eup %8477  ;;  %v13810_v21 = vld [vmem:[#allocation23_spill] sm:$0xff]  ;;  %v13811_v33 = vld [vmem:[#allocation24_spill] sm:$0xff] }
 0xd90   :  { %8481 = vtanh.f32 %v3360_v8  ;;  %v3378_v47 = vadd.f32 1.0, %v8478_v13  ;;  %v13809_v8 = vld [vmem:[#allocation22_spill] sm:$0xff] }
 0xd91   :  { %8483 = vrcp.f32 %v3371_v50  ;;  %v13812_v50 = vld [vmem:[#allocation25_spill] sm:$0xff]  ;;  %v13813_v13 = vld [vmem:[#allocation26_spill] sm:$0xff] }
 0xd92   :  { %8485 = vrcp.f32 %v3378_v47  ;;  %v13807_v47 = vld [vmem:[#allocation20_spill] sm:$0xff] }
 0xd9c   :  { %v8480_v15 = vpop.eup %8479 }
 0xd9d   :  { %v8482_v11 = vpop.eup %8481 }
 0xd9e   :  { %v8484_v24 = vpop.eup %8483  ;;  %v3385_v25 = vmul.f32 %v8482_v11, %v8480_v15  ;;  %v13814_v15 = vld [vmem:[#allocation27_spill] sm:$0xff]  ;;  %v13815_v11 = vld [vmem:[#allocation28_spill] sm:$0xff] }
 0xd9f   :  { %v3384_v18 = vmul.f32 %v8484_v24, %v3382_v55  ;;  %v8486_v44 = vpop.eup %8485  ;;  %v13808_v24 = vld [vmem:[#allocation21_spill] sm:$0xff] }
 0xda0   :  { %v13816_v55 = vld [vmem:[#allocation29_spill] sm:$0xff] }
 0xda1   :  { %v10922_v10 = vadd.f32 %v3385_v25, %v3384_v18  ;;  %v13817_v25 = vld [vmem:[#allocation30_spill] sm:$0xff]  ;;  %v13818_v18 = vld [vmem:[#allocation31_spill] sm:$0xff] }
 0xda3   :  { %8487 = vtanh.f32 %v10922_v10 }
 0xdb0   :  { %v8488_v36 = vpop.eup %8487 }
 0xdb1   :  { %v3388_v14 = vmul.f32 %v8488_v36, %v8486_v44  ;;  %v13819_v44 = vld [vmem:[#allocation32_spill] sm:$0xff]  ;;  %v13820_v36 = vld [vmem:[#allocation33_spill] sm:$0xff] }
 0xdb3   :  { %3389 = vst [vmem:[#allocation2 + $0x8] sm:$0x3] %v3388_v14  ;;  %3455 = vmatmul.mubr.f32.vlgmr.msra.gmra.mxu0 %v3388_v14  ;;  %3526 = vmatmul.mubr.f32.vlgmr.msra.gmra.mxu1 %v3388_v14  ;;  %v13821_v14 = vmov 0.0  }
 0xdb4   :  { %3580 = vmatpush1.msra.mxu0 %v10711_v60  ;;  %3651 = vmatpush1.msra.mxu1 %v10714_v22 }
 0xdb5   :  { %3581 = vmatprep.subr.mxu0 %v10717_v19  ;;  %3652 = vmatprep.subr.mxu1 %v10720_v1 }
 0xdb6   :  { %3582 = vmatpush1.msra.mxu0 %v10723_v3  ;;  %3653 = vmatpush1.msra.mxu1 %v10726_v12 }
 0xdb7   :  { %3583 = vmatprep.subr.mxu0 %v10729_v63  ;;  %3654 = vmatprep.subr.mxu1 %v10732_v6 }
 0xdb8   :  { %3584 = vmatpush1.msra.mxu0 %v10735_v32  ;;  %3655 = vmatpush1.msra.mxu1 %v10738_v2 }
 0xdb9   :  { %3585 = vmatprep.subr.mxu0 %v10741_v38  ;;  %3656 = vmatprep.subr.mxu1 %v10744_v23 }
 0xdba   :  { %3586 = vmatpush1.msra.mxu0 %v10747_v48  ;;  %3657 = vmatpush1.msra.mxu1 %v10750_v7 }
 0xdbb   :  { %3587 = vmatprep.subr.mxu0 %v10753_v35  ;;  %3658 = vmatprep.subr.mxu1 %v10756_v40 }
 0xdbc   :  { %3588 = vmatpush1.msra.mxu0 %v10759_v45  ;;  %3659 = vmatpush1.msra.mxu1 %v10762_v26 }
 0xdbd   :  { %3589 = vmatprep.subr.mxu0 %v10765_v20  ;;  %3660 = vmatprep.subr.mxu1 %v10768_v57 }
 0xdbe   :  { %3590 = vmatpush1.msra.mxu0 %v10771_v5  ;;  %3661 = vmatpush1.msra.mxu1 %v10774_v58 }
 0xdbf   :  { %3591 = vmatprep.subr.mxu0 %v10777_v29  ;;  %3662 = vmatprep.subr.mxu1 %v10780_v46 }
 0xdc0   :  { %3592 = vmatpush1.msra.mxu0 %v10783_v4  ;;  %3663 = vmatpush1.msra.mxu1 %v10786_v37 }
 0xdc1   :  { %3593 = vmatprep.subr.mxu0 %v10789_v34  ;;  %3664 = vmatprep.subr.mxu1 %v10792_v43 }
 0xdc2   :  { %3594 = vmatpush1.msra.mxu0 %v10795_v49  ;;  %3665 = vmatpush1.msra.mxu1 %v10798_v56 }
 0xdc3   :  { %3595 = vmatprep.subr.mxu0 %v10801_v59  ;;  %3666 = vmatprep.subr.mxu1 %v10804_v9 }
 0xdc4   :  { %3596 = vmatpush1.msra.mxu0 %v10807_v16  ;;  %3667 = vmatpush1.msra.mxu1 %v10810_v27 }
 0xdc5   :  { %3597 = vmatprep.subr.mxu0 %v10813_v28  ;;  %3668 = vmatprep.subr.mxu1 %v10816_v30 }
 0xdc6   :  { %3598 = vmatpush1.msra.mxu0 %v10819_v31  ;;  %3669 = vmatpush1.msra.mxu1 %v10822_v41 }
 0xdc7   :  { %3599 = vmatprep.subr.mxu0 %v10825_v42  ;;  %3670 = vmatprep.subr.mxu1 %v10828_v51 }
 0xdc8   :  { %3600 = vmatpush1.msra.mxu0 %v10831_v52  ;;  %3671 = vmatpush1.msra.mxu1 %v10834_v53 }
 0xdc9   :  { %3601 = vmatprep.subr.mxu0 %v10837_v54  ;;  %3672 = vmatprep.subr.mxu1 %v10840_v61 }
 0xdca   :  { %3602 = vmatpush1.msra.mxu0 %v10843_v62  ;;  %3673 = vmatpush1.msra.mxu1 %v10846_v17 }
 0xdcb   :  { %3603 = vmatprep.subr.mxu0 %v13806_v0  ;;  %3674 = vmatprep.subr.mxu1 %v13807_v47 }
 0xdcc   :  { %3604 = vmatpush1.msra.mxu0 %v13808_v24  ;;  %3675 = vmatpush1.msra.mxu1 %v13809_v8  ;;  %v13826_v24 = vld [vmem:[#allocation36_spill] sm:$0xff] }
 0xdcd   :  { %3605 = vmatprep.subr.mxu0 %v13810_v21  ;;  %3676 = vmatprep.subr.mxu1 %v13811_v33  ;;  %v13822_v33 = vld [vmem:[#allocation34_spill] sm:$0xff] }
 0xdce   :  { %3606 = vmatpush1.msra.mxu0 %v13812_v50  ;;  %3677 = vmatpush1.msra.mxu1 %v13813_v13  ;;  %v13823_v13 = vld [vmem:[#allocation45_spill] sm:$0xff] }
 0xdcf   :  { %3607 = vmatprep.subr.mxu0 %v13814_v15  ;;  %3678 = vmatprep.subr.mxu1 %v13815_v11  ;;  %v13824_v15 = vld [vmem:[#allocation48_spill] sm:$0xff] }
 0xdd0   :  { %3608 = vmatpush1.msra.mxu0 %v13816_v55  ;;  %3679 = vmatpush1.msra.mxu1 %v13817_v25  ;;  %v13825_v25 = vld [vmem:[#allocation35_spill] sm:$0xff] }
 0xdd1   :  { %3609 = vmatprep.subr.mxu0 %v13818_v18  ;;  %3680 = vmatprep.subr.mxu1 %v13819_v44 }
 0xdd2   :  { %3610 = vmatpush1.msra.mxu0 %v13820_v36  ;;  %3643 = vmatprep.mubr.f32.mxu0 %v13821_v14 }
 0xdd3   :  { %3681 = vmatpush1.msra.mxu1 %v13822_v33  ;;  %3714 = vmatprep.mubr.f32.mxu1 %v13821_v14  ;;  %v13827_v14 = vld [vmem:[#allocation37_spill] sm:$0xff] }
 0xdd4   :  { %3768 = vmatprep.subr.mxu0 %v13823_v13  ;;  %3839 = vmatprep.subr.mxu1 %v13824_v15 }
 0xe73   :  { %v3456_v11 = vpop.f32.mrf.mxu0  ;;  %v3527_v18 = vpop.f32.mrf.mxu1 }
 0xe74   :  { %v3536_v55 = vrot.slane %v3456_v11, 6  ;;  %v3538_v13 = vrot.slane %v3527_v18, 6 }
 0xe75   :  { %v3458_v50 = vpop.f32.mrf.mxu0  ;;  %v3529_v0 = vpop.f32.mrf.mxu1 }
 0xe76   :  { %v3544_v21 = vadd.f32 %v3536_v55, %v13825_v25  ;;  %v3537_v8 = vrot.slane %v3458_v50, 6  ;;  %v3539_v33 = vrot.slane %v3529_v0, 6  ;;  %v3546_v11 = vadd.f32 %v3538_v13, %v10918_v39 }
 0xe78   :  { %v8062_v44 = vmul.f32 -1.442695, %v3544_v21  ;;  %v3545_v36 = vadd.f32 %v3537_v8, %v13826_v24  ;;  %v3547_v17 = vadd.f32 %v3539_v33, %v13827_v14 }
 0xe7a   :  { %8489 = vpow2.f32 %v8062_v44  ;;  %v8063_v47 = vmul.f32 -1.442695, %v3545_v36  ;;  %v8064_v62 = vmul.f32 -1.442695, %v3547_v17 }
 0xe7c   :  { %8491 = vpow2.f32 %v8063_v47  ;;  %v3568_v47 = vrot.slane %v10922_v10, 6 }
 0xe7d   :  { %8493 = vpow2.f32 %v8064_v62 }
 0xe87   :  { %v8490_v15 = vpop.eup %8489 }
 0xe88   :  { %v3551_v61 = vadd.f32 1.0, %v8490_v15 }
 0xe89   :  { %v8492_v54 = vpop.eup %8491 }
 0xe8a   :  { %8495 = vrcp.f32 %v3551_v61  ;;  %v3557_v50 = vadd.f32 1.0, %v8492_v54  ;;  %v8494_v8 = vpop.eup %8493 }
 0xe8b   :  { %8497 = vtanh.f32 %v3546_v11  ;;  %v3564_v44 = vadd.f32 1.0, %v8494_v8 }
 0xe8c   :  { %8499 = vrcp.f32 %v3557_v50 }
 0xe8d   :  { %8501 = vrcp.f32 %v3564_v44 }
 0xe97   :  { %v8496_v21 = vpop.eup %8495 }
 0xe98   :  { %v8498_v55 = vpop.eup %8497 }
 0xe99   :  { %v8500_v0 = vpop.eup %8499  ;;  %v3571_v33 = vmul.f32 %v8498_v55, %v8496_v21 }
 0xe9a   :  { %v3570_v18 = vmul.f32 %v8500_v0, %v3568_v47  ;;  %v8502_v36 = vpop.eup %8501 }
 0xe9c   :  { %v10996_v17 = vadd.f32 %v3571_v33, %v3570_v18 }
 0xe9e   :  { %8503 = vtanh.f32 %v10996_v17  ;;  %v3757_v11 = vrot.slane %v10996_v17, 6  ;;  %v4013_v17 = vld [vmem:[#allocation4 + $0x5c0] sm:$0xff] }
 0xeab   :  { %v8504_v62 = vpop.eup %8503 }
 0xeac   :  { %v3574_v61 = vmul.f32 %v8504_v62, %v8502_v36  ;;  %v4017_v36 = vld [vmem:[#allocation4 + $0x5e0] sm:$0xff]  ;;  %v4019_v62 = vld [vmem:[#allocation4 + $0x5f0] sm:$0xff] }
 0xeae   :  { %3575 = vst [vmem:[#allocation2 + $0x8] sm:$0xc] %v3574_v61  ;;  %v3577_v54 = vrot.slane %v3574_v61, 2  ;;  %v4014_v61 = vld [vmem:[#allocation4 + $0x5c8] sm:$0xff] }
 0xeb0   :  { %3644 = vmatmul.mubr.f32.vlgmr.msra.gmra.mxu0 %v3577_v54  ;;  %3715 = vmatmul.mubr.f32.vlgmr.msra.gmra.mxu1 %v3577_v54  ;;  %v4016_v54 = vld [vmem:[#allocation4 + $0x5d8] sm:$0xff] }
 0xeb1   :  { %3769 = vmatpush1.msra.mxu0 %v10711_v60  ;;  %3840 = vmatpush1.msra.mxu1 %v10714_v22  ;;  %v13828_v60 = vld [vmem:[#allocation43_spill] sm:$0xff]  ;;  %v13829_v22 = vld [vmem:[#allocation41_spill] sm:$0xff] }
 0xeb2   :  { %3770 = vmatprep.subr.mxu0 %v10717_v19  ;;  %3841 = vmatprep.subr.mxu1 %v10720_v1  ;;  %v13830_v19 = vld [vmem:[#allocation19_spill] sm:$0xff]  ;;  %v13831_v1 = vld [vmem:[#allocation40_spill] sm:$0xff] }
 0xeb3   :  { %3771 = vmatpush1.msra.mxu0 %v10723_v3  ;;  %3842 = vmatpush1.msra.mxu1 %v10726_v12  ;;  %v13832_v3 = vld [vmem:[#allocation42_spill] sm:$0xff]  ;;  %v13833_v12 = vld [vmem:[#allocation20_spill] sm:$0xff] }
 0xeb4   :  { %3772 = vmatprep.subr.mxu0 %v10729_v63  ;;  %3843 = vmatprep.subr.mxu1 %v10732_v6  ;;  %v13834_v63 = vld [vmem:[#allocation21_spill] sm:$0xff]  ;;  %v13835_v6 = vld [vmem:[#allocation22_spill] sm:$0xff] }
 0xeb5   :  { %3773 = vmatpush1.msra.mxu0 %v10735_v32  ;;  %3844 = vmatpush1.msra.mxu1 %v10738_v2  ;;  %v13836_v32 = vld [vmem:[#allocation23_spill] sm:$0xff]  ;;  %v13837_v2 = vld [vmem:[#allocation24_spill] sm:$0xff] }
 0xeb6   :  { %3774 = vmatprep.subr.mxu0 %v10741_v38  ;;  %3845 = vmatprep.subr.mxu1 %v10744_v23  ;;  %v13838_v38 = vld [vmem:[#allocation25_spill] sm:$0xff]  ;;  %v13839_v23 = vld [vmem:[#allocation26_spill] sm:$0xff] }
 0xeb7   :  { %3775 = vmatpush1.msra.mxu0 %v10747_v48  ;;  %3846 = vmatpush1.msra.mxu1 %v10750_v7  ;;  %v13840_v48 = vld [vmem:[#allocation27_spill] sm:$0xff]  ;;  %v13841_v7 = vld [vmem:[#allocation28_spill] sm:$0xff] }
 0xeb8   :  { %3776 = vmatprep.subr.mxu0 %v10753_v35  ;;  %3847 = vmatprep.subr.mxu1 %v10756_v40  ;;  %v13842_v35 = vld [vmem:[#allocation29_spill] sm:$0xff]  ;;  %v13843_v40 = vld [vmem:[#allocation30_spill] sm:$0xff] }
 0xeb9   :  { %3777 = vmatpush1.msra.mxu0 %v10759_v45  ;;  %3848 = vmatpush1.msra.mxu1 %v10762_v26  ;;  %v13844_v45 = vld [vmem:[#allocation31_spill] sm:$0xff]  ;;  %v13845_v26 = vld [vmem:[#allocation32_spill] sm:$0xff] }
 0xeba   :  { %3778 = vmatprep.subr.mxu0 %v10765_v20  ;;  %3849 = vmatprep.subr.mxu1 %v10768_v57  ;;  %v13846_v20 = vld [vmem:[#allocation33_spill] sm:$0xff]  ;;  %v13847_v57 = vld [vmem:[#allocation34_spill] sm:$0xff] }
 0xebb   :  { %3779 = vmatpush1.msra.mxu0 %v10771_v5  ;;  %3850 = vmatpush1.msra.mxu1 %v10774_v58  ;;  %v13848_v5 = vmov 0.0   ;;  %v4018_v58 = vld [vmem:[#allocation4 + $0x5e8] sm:$0xff] }
 0xebc   :  { %3780 = vmatprep.subr.mxu0 %v10777_v29  ;;  %3851 = vmatprep.subr.mxu1 %v10780_v46  ;;  %v4020_v29 = vld [vmem:[#allocation4 + $0x5f8] sm:$0xff] }
 0xebd   :  { %3781 = vmatpush1.msra.mxu0 %v10783_v4  ;;  %3852 = vmatpush1.msra.mxu1 %v10786_v37 }
 0xebe   :  { %3782 = vmatprep.subr.mxu0 %v10789_v34  ;;  %3853 = vmatprep.subr.mxu1 %v10792_v43 }
 0xebf   :  { %3783 = vmatpush1.msra.mxu0 %v10795_v49  ;;  %3854 = vmatpush1.msra.mxu1 %v10798_v56 }
 0xec0   :  { %3784 = vmatprep.subr.mxu0 %v10801_v59  ;;  %3855 = vmatprep.subr.mxu1 %v10804_v9 }
 0xec1   :  { %3785 = vmatpush1.msra.mxu0 %v10807_v16  ;;  %3856 = vmatpush1.msra.mxu1 %v10810_v27 }
 0xec2   :  { %3786 = vmatprep.subr.mxu0 %v10813_v28  ;;  %3857 = vmatprep.subr.mxu1 %v10816_v30 }
 0xec3   :  { %3787 = vmatpush1.msra.mxu0 %v10819_v31  ;;  %3858 = vmatpush1.msra.mxu1 %v10822_v41 }
 0xec4   :  { %3788 = vmatprep.subr.mxu0 %v10825_v42  ;;  %3859 = vmatprep.subr.mxu1 %v10828_v51 }
 0xec5   :  { %3789 = vmatpush1.msra.mxu0 %v10831_v52  ;;  %3860 = vmatpush1.msra.mxu1 %v10834_v53 }
 0xec6   :  { %3790 = vmatprep.subr.mxu0 %v13828_v60  ;;  %3861 = vmatprep.subr.mxu1 %v13829_v22  ;;  %v4015_v60 = vld [vmem:[#allocation4 + $0x5d0] sm:$0xff]  ;;  %v4010_v22 = vld [vmem:[#allocation4 + $0x5a8] sm:$0xff] }
 0xec7   :  { %3791 = vmatpush1.msra.mxu0 %v13830_v19  ;;  %3862 = vmatpush1.msra.mxu1 %v13831_v1  ;;  %v4012_v19 = vld [vmem:[#allocation4 + $0x5b8] sm:$0xff]  ;;  %v4009_v1 = vld [vmem:[#allocation4 + $0x5a0] sm:$0xff] }
 0xec8   :  { %3792 = vmatprep.subr.mxu0 %v13832_v3  ;;  %3863 = vmatprep.subr.mxu1 %v13833_v12  ;;  %v4011_v3 = vld [vmem:[#allocation4 + $0x5b0] sm:$0xff]  ;;  %v4006_v12 = vld [vmem:[#allocation4 + $0x588] sm:$0xff] }
 0xec9   :  { %3793 = vmatpush1.msra.mxu0 %v13834_v63  ;;  %3864 = vmatpush1.msra.mxu1 %v13835_v6  ;;  %v4008_v63 = vld [vmem:[#allocation4 + $0x598] sm:$0xff]  ;;  %v4005_v6 = vld [vmem:[#allocation4 + $0x580] sm:$0xff] }
 0xeca   :  { %3794 = vmatprep.subr.mxu0 %v13836_v32  ;;  %3865 = vmatprep.subr.mxu1 %v13837_v2  ;;  %v4007_v32 = vld [vmem:[#allocation4 + $0x590] sm:$0xff]  ;;  %v4002_v2 = vld [vmem:[#allocation4 + $0x568] sm:$0xff] }
 0xecb   :  { %3795 = vmatpush1.msra.mxu0 %v13838_v38  ;;  %3866 = vmatpush1.msra.mxu1 %v13839_v23  ;;  %v4004_v38 = vld [vmem:[#allocation4 + $0x578] sm:$0xff]  ;;  %v4001_v23 = vld [vmem:[#allocation4 + $0x560] sm:$0xff] }
 0xecc   :  { %3796 = vmatprep.subr.mxu0 %v13840_v48  ;;  %3867 = vmatprep.subr.mxu1 %v13841_v7  ;;  %v4003_v48 = vld [vmem:[#allocation4 + $0x570] sm:$0xff]  ;;  %v3998_v7 = vld [vmem:[#allocation4 + $0x548] sm:$0xff] }
 0xecd   :  { %3797 = vmatpush1.msra.mxu0 %v13842_v35  ;;  %3868 = vmatpush1.msra.mxu1 %v13843_v40  ;;  %v4000_v35 = vld [vmem:[#allocation4 + $0x558] sm:$0xff]  ;;  %v3997_v40 = vld [vmem:[#allocation4 + $0x540] sm:$0xff] }
 0xece   :  { %3798 = vmatprep.subr.mxu0 %v13844_v45  ;;  %3869 = vmatprep.subr.mxu1 %v13845_v26  ;;  %v3999_v45 = vld [vmem:[#allocation4 + $0x550] sm:$0xff]  ;;  %v3994_v26 = vld [vmem:[#allocation4 + $0x528] sm:$0xff] }
 0xecf   :  { %3799 = vmatpush1.msra.mxu0 %v13846_v20  ;;  %3870 = vmatpush1.msra.mxu1 %v13847_v57  ;;  %v3996_v20 = vld [vmem:[#allocation4 + $0x538] sm:$0xff]  ;;  %v3993_v57 = vld [vmem:[#allocation4 + $0x520] sm:$0xff] }
 0xed0   :  { %3832 = vmatprep.mubr.f32.mxu0 %v13848_v5  ;;  %3903 = vmatprep.mubr.f32.mxu1 %v13848_v5 }
 0xed1   :  { %4044 = vmatprep.subr.mxu0 %v4018_v58  ;;  %4121 = vmatprep.subr.mxu1 %v4020_v29  ;;  %v3995_v58 = vld [vmem:[#allocation4 + $0x530] sm:$0xff]  ;;  %v3990_v29 = vld [vmem:[#allocation4 + $0x508] sm:$0xff] }
 0xf70   :  { %v3645_v46 = vpop.f32.mrf.mxu0  ;;  %v3716_v43 = vpop.f32.mrf.mxu1 }
 0xf71   :  { %v3725_v4 = vrot.slane %v3645_v46, 4  ;;  %v3727_v30 = vrot.slane %v3716_v43, 4  ;;  %v3992_v46 = vld [vmem:[#allocation4 + $0x518] sm:$0xff] }
 0xf72   :  { %v3647_v37 = vpop.f32.mrf.mxu0  ;;  %v3718_v16 = vpop.f32.mrf.mxu1  ;;  %v3988_v43 = vld [vmem:[#allocation4 + $0x4f8] sm:$0xff] }
 0xf73   :  { %v3733_v34 = vadd.f32 %v3725_v4, %v13825_v25  ;;  %v3726_v49 = vrot.slane %v3647_v37, 4  ;;  %v3728_v27 = vrot.slane %v3718_v16, 4  ;;  %v3735_v42 = vadd.f32 %v3727_v30, %v10918_v39  ;;  %v3989_v4 = vld [vmem:[#allocation4 + $0x500] sm:$0xff]  ;;  %v3991_v37 = vld [vmem:[#allocation4 + $0x510] sm:$0xff]  ;;  %v3980_v30 = vld [vmem:[#allocation4 + $0x4b8] sm:$0xff] }
 0xf74   :  { %v3981_v16 = vld [vmem:[#allocation4 + $0x4c0] sm:$0xff] }
 0xf75   :  { %v8065_v56 = vmul.f32 -1.442695, %v3733_v34  ;;  %v3734_v59 = vadd.f32 %v3726_v49, %v13826_v24  ;;  %v3736_v28 = vadd.f32 %v3728_v27, %v13827_v14  ;;  %v3986_v34 = vld [vmem:[#allocation4 + $0x4e8] sm:$0xff]  ;;  %v3985_v49 = vld [vmem:[#allocation4 + $0x4e0] sm:$0xff]  ;;  %v3983_v27 = vld [vmem:[#allocation4 + $0x4d0] sm:$0xff] }
 0xf77   :  { %8505 = vpow2.f32 %v8065_v56  ;;  %v8066_v9 = vmul.f32 -1.442695, %v3734_v59  ;;  %v8067_v31 = vmul.f32 -1.442695, %v3736_v28  ;;  %v3987_v56 = vld [vmem:[#allocation4 + $0x4f0] sm:$0xff]  ;;  %v3982_v59 = vld [vmem:[#allocation4 + $0x4c8] sm:$0xff] }
 0xf78   :  { %v3978_v28 = vld [vmem:[#allocation4 + $0x4a8] sm:$0xff] }
 0xf79   :  { %8507 = vpow2.f32 %v8066_v9  ;;  %v3984_v9 = vld [vmem:[#allocation4 + $0x4d8] sm:$0xff] }
 0xf7a   :  { %8509 = vpow2.f32 %v8067_v31  ;;  %v3977_v31 = vld [vmem:[#allocation4 + $0x4a0] sm:$0xff] }
 0xf84   :  { %v8506_v41 = vpop.eup %8505 }
 0xf85   :  { %v3740_v51 = vadd.f32 1.0, %v8506_v41  ;;  %v3979_v41 = vld [vmem:[#allocation4 + $0x4b0] sm:$0xff] }
 0xf86   :  { %v8508_v52 = vpop.eup %8507 }
 0xf87   :  { %8511 = vrcp.f32 %v3740_v51  ;;  %v3746_v53 = vadd.f32 1.0, %v8508_v52  ;;  %v8510_v10 = vpop.eup %8509  ;;  %v3976_v51 = vld [vmem:[#allocation4 + $0x498] sm:$0xff]  ;;  %v3973_v52 = vld [vmem:[#allocation4 + $0x480] sm:$0xff] }
 0xf88   :  { %8513 = vtanh.f32 %v3735_v42  ;;  %v3753_v8 = vadd.f32 1.0, %v8510_v10  ;;  %v3974_v42 = vld [vmem:[#allocation4 + $0x488] sm:$0xff] }
 0xf89   :  { %8515 = vrcp.f32 %v3746_v53  ;;  %v3975_v53 = vld [vmem:[#allocation4 + $0x490] sm:$0xff]  ;;  %v3970_v10 = vld [vmem:[#allocation4 + $0x468] sm:$0xff] }
 0xf8a   :  { %8517 = vrcp.f32 %v3753_v8  ;;  %v3968_v8 = vld [vmem:[#allocation4 + $0x458] sm:$0xff] }
 0xf94   :  { %v8512_v13 = vpop.eup %8511 }
 0xf95   :  { %v8514_v15 = vpop.eup %8513 }
 0xf96   :  { %v8516_v50 = vpop.eup %8515  ;;  %v3760_v21 = vmul.f32 %v8514_v15, %v8512_v13  ;;  %v3972_v13 = vld [vmem:[#allocation4 + $0x478] sm:$0xff]  ;;  %v3969_v15 = vld [vmem:[#allocation4 + $0x460] sm:$0xff] }
 0xf97   :  { %v3759_v55 = vmul.f32 %v8516_v50, %v3757_v11  ;;  %v8518_v0 = vpop.eup %8517  ;;  %v3971_v11 = vld [vmem:[#allocation4 + $0x470] sm:$0xff]  ;;  %v3966_v50 = vld [vmem:[#allocation4 + $0x448] sm:$0xff] }
 0xf99   :  { %v11068_v47 = vadd.f32 %v3760_v21, %v3759_v55  ;;  %v3965_v21 = vld [vmem:[#allocation4 + $0x440] sm:$0xff]  ;;  %v3967_v55 = vld [vmem:[#allocation4 + $0x450] sm:$0xff] }
 0xf9b   :  { %8519 = vtanh.f32 %v11068_v47 }
 0xfa8   :  { %v8520_v44 = vpop.eup %8519 }
 0xfa9   :  { %v3763_v33 = vmul.f32 %v8520_v44, %v8518_v0  ;;  %v3962_v0 = vld [vmem:[#allocation4 + $0x428] sm:$0xff]  ;;  %v3964_v44 = vld [vmem:[#allocation4 + $0x438] sm:$0xff] }
 0xfab   :  { %3764 = vst [vmem:[#allocation2 + $0x8] sm:$0x30] %v3763_v33  ;;  %v3766_v18 = vrot.slane %v3763_v33, 4  ;;  %v3961_v33 = vld [vmem:[#allocation4 + $0x420] sm:$0xff] }
 0xfad   :  { %3833 = vmatmul.mubr.f32.vlgmr.msra.gmra.mxu0 %v3766_v18  ;;  %3904 = vmatmul.mubr.f32.vlgmr.msra.gmra.mxu1 %v3766_v18  ;;  %v3963_v18 = vld [vmem:[#allocation4 + $0x430] sm:$0xff] }
 0xfae   :  { %4045 = vmatpush1.msra.mxu0 %v4017_v36  ;;  %4122 = vmatpush1.msra.mxu1 %v4019_v62  ;;  %v3958_v36 = vld [vmem:[#allocation4 + $0x408] sm:$0xff]  ;;  %v3960_v62 = vld [vmem:[#allocation4 + $0x418] sm:$0xff] }
 0xfaf   :  { %4046 = vmatprep.subr.mxu0 %v4014_v61  ;;  %4123 = vmatprep.subr.mxu1 %v4016_v54  ;;  %v3957_v61 = vld [vmem:[#allocation4 + $0x400] sm:$0xff]  ;;  %v3959_v54 = vld [vmem:[#allocation4 + $0x410] sm:$0xff] }
 0xfb0   :  { %4047 = vmatpush1.msra.mxu0 %v4013_v17  ;;  %4124 = vmatpush1.msra.mxu1 %v4015_v60  ;;  %v3954_v17 = vld [vmem:[#allocation2] sm:$0xff] }
 0xfb1   :  { %4048 = vmatprep.subr.mxu0 %v4010_v22  ;;  %4125 = vmatprep.subr.mxu1 %v4012_v19  ;;  %v11075_v60 = vld [vmem:[#allocation7 + $0x5e8] sm:$0xff]  ;;  %v11077_v22 = vld [vmem:[#allocation7 + $0x5f8] sm:$0xff]  ;;  %v11081_v19 = vld [vmem:[#allocation7 + $0x5e0] sm:$0xff] }
 0xfb2   :  { %4049 = vmatpush1.msra.mxu0 %v4009_v1  ;;  %4126 = vmatpush1.msra.mxu1 %v4011_v3  ;;  %13849 = vst [vmem:[#allocation38_spill] sm:$0xff] %v11075_v60  ;;  %13850 = vst [vmem:[#allocation39_spill] sm:$0xff] %v11077_v22  ;;  %v11083_v1 = vld [vmem:[#allocation7 + $0x5f0] sm:$0xff]  ;;  %v11087_v3 = vld [vmem:[#allocation7 + $0x5c8] sm:$0xff] }
 0xfb3   :  { %4050 = vmatprep.subr.mxu0 %v4006_v12  ;;  %4127 = vmatprep.subr.mxu1 %v4008_v63  ;;  %v11089_v12 = vld [vmem:[#allocation7 + $0x5d8] sm:$0xff]  ;;  %v11093_v63 = vld [vmem:[#allocation7 + $0x5c0] sm:$0xff] }
 0xfb4   :  { %4051 = vmatpush1.msra.mxu0 %v4005_v6  ;;  %4128 = vmatpush1.msra.mxu1 %v4007_v32  ;;  %v11095_v6 = vld [vmem:[#allocation7 + $0x5d0] sm:$0xff]  ;;  %v11099_v32 = vld [vmem:[#allocation7 + $0x5a8] sm:$0xff] }
 0xfb5   :  { %4052 = vmatprep.subr.mxu0 %v4002_v2  ;;  %4129 = vmatprep.subr.mxu1 %v4004_v38  ;;  %v11101_v2 = vld [vmem:[#allocation7 + $0x5b8] sm:$0xff]  ;;  %v11105_v38 = vld [vmem:[#allocation7 + $0x5a0] sm:$0xff] }
 0xfb6   :  { %4053 = vmatpush1.msra.mxu0 %v4001_v23  ;;  %4130 = vmatpush1.msra.mxu1 %v4003_v48  ;;  %v11107_v23 = vld [vmem:[#allocation7 + $0x5b0] sm:$0xff]  ;;  %v11111_v48 = vld [vmem:[#allocation7 + $0x588] sm:$0xff] }
 0xfb7   :  { %4054 = vmatprep.subr.mxu0 %v3998_v7  ;;  %4131 = vmatprep.subr.mxu1 %v4000_v35  ;;  %v11113_v7 = vld [vmem:[#allocation7 + $0x598] sm:$0xff]  ;;  %v11117_v35 = vld [vmem:[#allocation7 + $0x580] sm:$0xff] }
 0xfb8   :  { %4055 = vmatpush1.msra.mxu0 %v3997_v40  ;;  %4132 = vmatpush1.msra.mxu1 %v3999_v45  ;;  %v11119_v40 = vld [vmem:[#allocation7 + $0x590] sm:$0xff]  ;;  %v11123_v45 = vld [vmem:[#allocation7 + $0x568] sm:$0xff] }
 0xfb9   :  { %4056 = vmatprep.subr.mxu0 %v3994_v26  ;;  %4133 = vmatprep.subr.mxu1 %v3996_v20  ;;  %v11125_v26 = vld [vmem:[#allocation7 + $0x578] sm:$0xff]  ;;  %v11129_v20 = vld [vmem:[#allocation7 + $0x560] sm:$0xff] }
 0xfba   :  { %4057 = vmatpush1.msra.mxu0 %v3993_v57  ;;  %4134 = vmatpush1.msra.mxu1 %v3995_v58  ;;  %v11131_v57 = vld [vmem:[#allocation7 + $0x570] sm:$0xff]  ;;  %v11135_v58 = vld [vmem:[#allocation7 + $0x548] sm:$0xff] }
 0xfbb   :  { %4058 = vmatprep.subr.mxu0 %v3990_v29  ;;  %4135 = vmatprep.subr.mxu1 %v3992_v46  ;;  %v11137_v29 = vld [vmem:[#allocation7 + $0x558] sm:$0xff]  ;;  %v11141_v46 = vld [vmem:[#allocation7 + $0x540] sm:$0xff] }
 0xfbc   :  { %4059 = vmatpush1.msra.mxu0 %v3989_v4  ;;  %4136 = vmatpush1.msra.mxu1 %v3991_v37  ;;  %v11143_v4 = vld [vmem:[#allocation7 + $0x550] sm:$0xff]  ;;  %v11147_v37 = vld [vmem:[#allocation7 + $0x528] sm:$0xff] }
 0xfbd   :  { %4060 = vmatprep.subr.mxu0 %v3986_v34  ;;  %4137 = vmatprep.subr.mxu1 %v3988_v43  ;;  %v11149_v34 = vld [vmem:[#allocation7 + $0x538] sm:$0xff]  ;;  %v11153_v43 = vld [vmem:[#allocation7 + $0x520] sm:$0xff] }
 0xfbe   :  { %4061 = vmatpush1.msra.mxu0 %v3985_v49  ;;  %4138 = vmatpush1.msra.mxu1 %v3987_v56  ;;  %v11155_v49 = vld [vmem:[#allocation7 + $0x530] sm:$0xff]  ;;  %v11159_v56 = vld [vmem:[#allocation7 + $0x508] sm:$0xff] }
 0xfbf   :  { %4062 = vmatprep.subr.mxu0 %v3982_v59  ;;  %4139 = vmatprep.subr.mxu1 %v3984_v9  ;;  %v11161_v59 = vld [vmem:[#allocation7 + $0x518] sm:$0xff]  ;;  %v11165_v9 = vld [vmem:[#allocation7 + $0x500] sm:$0xff] }
 0xfc0   :  { %4063 = vmatpush1.msra.mxu0 %v3981_v16  ;;  %4140 = vmatpush1.msra.mxu1 %v3983_v27  ;;  %v11167_v16 = vld [vmem:[#allocation7 + $0x510] sm:$0xff]  ;;  %v11171_v27 = vld [vmem:[#allocation7 + $0x4e8] sm:$0xff] }
 0xfc1   :  { %4064 = vmatprep.subr.mxu0 %v3978_v28  ;;  %4141 = vmatprep.subr.mxu1 %v3980_v30  ;;  %v11173_v28 = vld [vmem:[#allocation7 + $0x4f8] sm:$0xff]  ;;  %v11177_v30 = vld [vmem:[#allocation7 + $0x4e0] sm:$0xff] }
 0xfc2   :  { %4065 = vmatpush1.msra.mxu0 %v3977_v31  ;;  %4142 = vmatpush1.msra.mxu1 %v3979_v41  ;;  %v11179_v31 = vld [vmem:[#allocation7 + $0x4f0] sm:$0xff]  ;;  %v11183_v41 = vld [vmem:[#allocation7 + $0x4c8] sm:$0xff] }
 0xfc3   :  { %4066 = vmatprep.subr.mxu0 %v3974_v42  ;;  %4143 = vmatprep.subr.mxu1 %v3976_v51  ;;  %v11185_v42 = vld [vmem:[#allocation7 + $0x4d8] sm:$0xff]  ;;  %v11189_v51 = vld [vmem:[#allocation7 + $0x4c0] sm:$0xff] }
 0xfc4   :  { %4067 = vmatpush1.msra.mxu0 %v3973_v52  ;;  %4144 = vmatpush1.msra.mxu1 %v3975_v53  ;;  %v11191_v52 = vld [vmem:[#allocation7 + $0x4d0] sm:$0xff]  ;;  %v11193_v53 = vld [vmem:[#allocation7 + $0x4a8] sm:$0xff] }
 0xfc5   :  { %4068 = vmatprep.subr.mxu0 %v3970_v10  ;;  %4145 = vmatprep.subr.mxu1 %v3972_v13  ;;  %v11197_v10 = vld [vmem:[#allocation7 + $0x4b8] sm:$0xff]  ;;  %v11199_v13 = vld [vmem:[#allocation7 + $0x4a0] sm:$0xff] }
 0xfc6   :  { %4069 = vmatpush1.msra.mxu0 %v3969_v15  ;;  %4146 = vmatpush1.msra.mxu1 %v3971_v11  ;;  %v11201_v15 = vld [vmem:[#allocation7 + $0x4b0] sm:$0xff]  ;;  %v11205_v11 = vld [vmem:[#allocation7 + $0x488] sm:$0xff] }
 0xfc7   :  { %4070 = vmatprep.subr.mxu0 %v3966_v50  ;;  %4147 = vmatprep.subr.mxu1 %v3968_v8  ;;  %13851 = vst [vmem:[#allocation44_spill] sm:$0xff] %v11201_v15  ;;  %13852 = vst [vmem:[#allocation47_spill] sm:$0xff] %v11205_v11  ;;  %v11207_v50 = vld [vmem:[#allocation7 + $0x498] sm:$0xff]  ;;  %v11209_v8 = vld [vmem:[#allocation7 + $0x480] sm:$0xff] }
 0xfc8   :  { %4071 = vmatpush1.msra.mxu0 %v3965_v21  ;;  %4148 = vmatpush1.msra.mxu1 %v3967_v55  ;;  %13853 = vst [vmem:[#allocation46_spill] sm:$0xff] %v11207_v50  ;;  %13854 = vst [vmem:[#allocation49_spill] sm:$0xff] %v11209_v8  ;;  %v11213_v21 = vld [vmem:[#allocation7 + $0x490] sm:$0xff]  ;;  %v11215_v55 = vld [vmem:[#allocation7 + $0x468] sm:$0xff] }
 0xfc9   :  { %4072 = vmatprep.subr.mxu0 %v3962_v0  ;;  %4149 = vmatprep.subr.mxu1 %v3964_v44  ;;  %13855 = vst [vmem:[#allocation18_spill] sm:$0xff] %v11213_v21  ;;  %13856 = vst [vmem:[#allocation45_spill] sm:$0xff] %v11215_v55  ;;  %v11217_v0 = vld [vmem:[#allocation7 + $0x478] sm:$0xff]  ;;  %v11221_v44 = vld [vmem:[#allocation7 + $0x460] sm:$0xff] }
 0xfca   :  { %4073 = vmatpush1.msra.mxu0 %v3961_v33  ;;  %4150 = vmatpush1.msra.mxu1 %v3963_v18  ;;  %13857 = vst [vmem:[#allocation48_spill] sm:$0xff] %v11217_v0  ;;  %13858 = vst [vmem:[#allocation35_spill] sm:$0xff] %v11221_v44  ;;  %v11223_v33 = vld [vmem:[#allocation7 + $0x470] sm:$0xff]  ;;  %v11227_v18 = vld [vmem:[#allocation7 + $0x448] sm:$0xff] }
 0xfcb   :  { %4074 = vmatprep.subr.mxu0 %v3958_v36  ;;  %4151 = vmatprep.subr.mxu1 %v3960_v62  ;;  %13859 = vst [vmem:[#allocation36_spill] sm:$0xff] %v11223_v33  ;;  %13860 = vst [vmem:[#allocation37_spill] sm:$0xff] %v11227_v18  ;;  %v11229_v36 = vld [vmem:[#allocation7 + $0x458] sm:$0xff]  ;;  %v11233_v62 = vld [vmem:[#allocation7 + $0x440] sm:$0xff] }
 0xfcc   :  { %4075 = vmatpush1.msra.mxu0 %v3957_v61  ;;  %4108 = vmatprep.mubr.f32.mxu0 %v13848_v5  ;;  %13861 = vst [vmem:[#allocation43_spill] sm:$0xff] %v11229_v36  ;;  %13862 = vst [vmem:[#allocation41_spill] sm:$0xff] %v11233_v62  ;;  %v11235_v61 = vld [vmem:[#allocation7 + $0x450] sm:$0xff] }
 0xfcd   :  { %4152 = vmatpush1.msra.mxu1 %v3959_v54  ;;  %4185 = vmatprep.mubr.f32.mxu1 %v13848_v5  ;;  %13863 = vst [vmem:[#allocation19_spill] sm:$0xff] %v11235_v61  ;;  %v11241_v54 = vld [vmem:[#allocation7 + $0x428] sm:$0xff] }
 0xfce   :  { %4109 = vmatmul.mubr.f32.vlgmr.msra.gmra.mxu0 %v3954_v17  ;;  %4186 = vmatmul.mubr.f32.vlgmr.msra.gmra.mxu1 %v3954_v17  ;;  %13864 = vst [vmem:[#allocation40_spill] sm:$0xff] %v11241_v54  ;;  %v11243_v17 = vld [vmem:[#allocation7 + $0x438] sm:$0xff] }
 0xfcf   :  { %4114 = vmatprep.mubr.f32.mxu0 %v13848_v5  ;;  %4191 = vmatprep.mubr.f32.mxu1 %v13848_v5  ;;  %13865 = vst [vmem:[#allocation42_spill] sm:$0xff] %v11243_v17 }
 0xfd0   :  { %4263 = vmatprep.subr.mxu0 %v11075_v60  ;;  %4334 = vmatprep.subr.mxu1 %v11077_v22 }
 0xfd1   :  { %4264 = vmatpush1.msra.mxu0 %v11081_v19  ;;  %4335 = vmatpush1.msra.mxu1 %v11083_v1 }
 0xfd2   :  { %4265 = vmatprep.subr.mxu0 %v11087_v3  ;;  %4336 = vmatprep.subr.mxu1 %v11089_v12 }
 0xfd3   :  { %4266 = vmatpush1.msra.mxu0 %v11093_v63  ;;  %4337 = vmatpush1.msra.mxu1 %v11095_v6 }
 0xfd4   :  { %4267 = vmatprep.subr.mxu0 %v11099_v32  ;;  %4338 = vmatprep.subr.mxu1 %v11101_v2 }
 0xfd5   :  { %4268 = vmatpush1.msra.mxu0 %v11105_v38  ;;  %4339 = vmatpush1.msra.mxu1 %v11107_v23 }
 0xfd6   :  { %4269 = vmatprep.subr.mxu0 %v11111_v48  ;;  %4340 = vmatprep.subr.mxu1 %v11113_v7 }
 0xfd7   :  { %4270 = vmatpush1.msra.mxu0 %v11117_v35  ;;  %4341 = vmatpush1.msra.mxu1 %v11119_v40 }
 0xfd8   :  { %4271 = vmatprep.subr.mxu0 %v11123_v45  ;;  %4342 = vmatprep.subr.mxu1 %v11125_v26 }
 0xfd9   :  { %4272 = vmatpush1.msra.mxu0 %v11129_v20  ;;  %4343 = vmatpush1.msra.mxu1 %v11131_v57 }
 0xfda   :  { %4273 = vmatprep.subr.mxu0 %v11135_v58  ;;  %4344 = vmatprep.subr.mxu1 %v11137_v29 }
 0xfdb   :  { %4274 = vmatpush1.msra.mxu0 %v11141_v46  ;;  %4345 = vmatpush1.msra.mxu1 %v11143_v4 }
 0xfdc   :  { %4275 = vmatprep.subr.mxu0 %v11147_v37  ;;  %4346 = vmatprep.subr.mxu1 %v11149_v34 }
 0xfdd   :  { %4276 = vmatpush1.msra.mxu0 %v11153_v43  ;;  %4347 = vmatpush1.msra.mxu1 %v11155_v49 }
 0xfde   :  { %4277 = vmatprep.subr.mxu0 %v11159_v56  ;;  %4348 = vmatprep.subr.mxu1 %v11161_v59 }
 0xfdf   :  { %4278 = vmatpush1.msra.mxu0 %v11165_v9  ;;  %4349 = vmatpush1.msra.mxu1 %v11167_v16 }
 0xfe0   :  { %4279 = vmatprep.subr.mxu0 %v11171_v27  ;;  %4350 = vmatprep.subr.mxu1 %v11173_v28 }
 0xfe1   :  { %4280 = vmatpush1.msra.mxu0 %v11177_v30  ;;  %4351 = vmatpush1.msra.mxu1 %v11179_v31 }
 0xfe2   :  { %4281 = vmatprep.subr.mxu0 %v11183_v41  ;;  %4352 = vmatprep.subr.mxu1 %v11185_v42 }
 0xfe3   :  { %4282 = vmatpush1.msra.mxu0 %v11189_v51  ;;  %4353 = vmatpush1.msra.mxu1 %v11191_v52 }
 0xfe4   :  { %4283 = vmatprep.subr.mxu0 %v11193_v53  ;;  %4354 = vmatprep.subr.mxu1 %v11197_v10 }
 0xfe5   :  { %4284 = vmatpush1.msra.mxu0 %v11199_v13  ;;  %4355 = vmatpush1.msra.mxu1 %v11201_v15 }
 0xfe6   :  { %4285 = vmatprep.subr.mxu0 %v11205_v11  ;;  %4356 = vmatprep.subr.mxu1 %v11207_v50 }
 0xfe7   :  { %4286 = vmatpush1.msra.mxu0 %v11209_v8  ;;  %4357 = vmatpush1.msra.mxu1 %v11213_v21  ;;  %v11245_v21 = vld [vmem:[#allocation7 + $0x420] sm:$0xff] }
 0xfe8   :  { %4287 = vmatprep.subr.mxu0 %v11215_v55  ;;  %4358 = vmatprep.subr.mxu1 %v11217_v0  ;;  %13866 = vst [vmem:[#allocation20_spill] sm:$0xff] %v11245_v21  ;;  %v11249_v0 = vld [vmem:[#allocation7 + $0x430] sm:$0xff]  ;;  %v11251_v55 = vld [vmem:[#allocation7 + $0x408] sm:$0xff] }
 0xfe9   :  { %4288 = vmatpush1.msra.mxu0 %v11221_v44  ;;  %4359 = vmatpush1.msra.mxu1 %v11223_v33  ;;  %13867 = vst [vmem:[#allocation21_spill] sm:$0xff] %v11249_v0  ;;  %13868 = vst [vmem:[#allocation22_spill] sm:$0xff] %v11251_v55  ;;  %v11253_v44 = vld [vmem:[#allocation7 + $0x418] sm:$0xff] }
 0xfea   :  { %4289 = vmatprep.subr.mxu0 %v11227_v18  ;;  %4360 = vmatprep.subr.mxu1 %v11229_v36  ;;  %13869 = vst [vmem:[#allocation23_spill] sm:$0xff] %v11253_v44  ;;  %v11257_v36 = vld [vmem:[#allocation7 + $0x400] sm:$0xff]  ;;  %v11259_v18 = vld [vmem:[#allocation7 + $0x410] sm:$0xff] }
 0xfeb   :  { %4290 = vmatpush1.msra.mxu0 %v11233_v62  ;;  %4361 = vmatpush1.msra.mxu1 %v11235_v61  ;;  %13870 = vst [vmem:[#allocation24_spill] sm:$0xff] %v11257_v36  ;;  %13871 = vst [vmem:[#allocation25_spill] sm:$0xff] %v11259_v18 }
 0xfec   :  { %4291 = vmatprep.subr.mxu0 %v11241_v54  ;;  %4362 = vmatprep.subr.mxu1 %v11243_v17 }
 0xfed   :  { %4292 = vmatpush1.msra.mxu0 %v11245_v21  ;;  %4363 = vmatpush1.msra.mxu1 %v11249_v0 }
 0xfee   :  { %4293 = vmatprep.subr.mxu0 %v11251_v55  ;;  %4364 = vmatprep.subr.mxu1 %v11253_v44 }
 0xfef   :  { %4294 = vmatpush1.msra.mxu0 %v11257_v36  ;;  %4365 = vmatpush1.msra.mxu1 %v11259_v18 }
 0xff0   :  { %4434 = vmatprep.subr.mxu0 %v11075_v60  ;;  %4505 = vmatprep.subr.mxu1 %v11077_v22 }
0x106d   :  { %v3834_v17 = vpop.f32.mrf.mxu0  ;;  %v3905_v21 = vpop.f32.mrf.mxu1 }
0x106e   :  { %v3914_v54 = vrot.slane %v3834_v17, 2  ;;  %v3916_v60 = vrot.slane %v3905_v21, 2 }
0x106f   :  { %v3836_v61 = vpop.f32.mrf.mxu0  ;;  %v3907_v8 = vpop.f32.mrf.mxu1 }
0x1070   :  { %v3922_v62 = vadd.f32 %v3914_v54, %v13825_v25  ;;  %v3915_v33 = vrot.slane %v3836_v61, 2  ;;  %v3917_v36 = vrot.slane %v3907_v8, 2  ;;  %v3924_v17 = vadd.f32 %v3916_v60, %v10918_v39  ;;  %v13877_v61 = vld [vmem:[#allocation45_spill] sm:$0xff]  ;;  %v13878_v54 = vld [vmem:[#allocation48_spill] sm:$0xff] }
0x1072   :  { %v8068_v0 = vmul.f32 -1.442695, %v3922_v62  ;;  %v3923_v55 = vadd.f32 %v3915_v33, %v13826_v24  ;;  %v3925_v18 = vadd.f32 %v3917_v36, %v13827_v14  ;;  %v13875_v36 = vld [vmem:[#allocation49_spill] sm:$0xff]  ;;  %v13876_v62 = vld [vmem:[#allocation18_spill] sm:$0xff] }
0x1074   :  { %8521 = vpow2.f32 %v8068_v0  ;;  %v8069_v44 = vmul.f32 -1.442695, %v3923_v55  ;;  %v8070_v50 = vmul.f32 -1.442695, %v3925_v18 }
0x1076   :  { %8523 = vpow2.f32 %v8069_v44  ;;  %v3946_v44 = vrot.slane %v11068_v47, 6  ;;  %v13872_v47 = vld [vmem:[#allocation44_spill] sm:$0xff] }
0x1077   :  { %8525 = vpow2.f32 %v8070_v50  ;;  %v13874_v50 = vld [vmem:[#allocation46_spill] sm:$0xff] }
0x1081   :  { %v8522_v22 = vpop.eup %8521 }
0x1082   :  { %v3929_v11 = vadd.f32 1.0, %v8522_v22 }
0x1083   :  { %v8524_v15 = vpop.eup %8523 }
0x1084   :  { %8527 = vrcp.f32 %v3929_v11  ;;  %v3935_v25 = vadd.f32 1.0, %v8524_v15  ;;  %v8526_v24 = vpop.eup %8525  ;;  %v13873_v15 = vld [vmem:[#allocation47_spill] sm:$0xff] }
0x1085   :  { %8529 = vtanh.f32 %v3924_v17  ;;  %v3942_v33 = vadd.f32 1.0, %v8526_v24  ;;  %v13879_v17 = vld [vmem:[#allocation35_spill] sm:$0xff]  ;;  %v13881_v24 = vld [vmem:[#allocation37_spill] sm:$0xff] }
0x1086   :  { %8531 = vrcp.f32 %v3935_v25  ;;  %v13880_v25 = vld [vmem:[#allocation36_spill] sm:$0xff] }
0x1087   :  { %8533 = vrcp.f32 %v3942_v33  ;;  %v13886_v33 = vld [vmem:[#allocation42_spill] sm:$0xff] }
0x1091   :  { %v8528_v0 = vpop.eup %8527 }
0x1092   :  { %v8530_v55 = vpop.eup %8529 }
0x1093   :  { %v8532_v8 = vpop.eup %8531  ;;  %v3949_v14 = vmul.f32 %v8530_v55, %v8528_v0  ;;  %v13882_v0 = vld [vmem:[#allocation43_spill] sm:$0xff]  ;;  %v13883_v55 = vld [vmem:[#allocation41_spill] sm:$0xff] }
0x1094   :  { %v3948_v21 = vmul.f32 %v8532_v8, %v3946_v44  ;;  %v8534_v39 = vpop.eup %8533  ;;  %v13884_v44 = vld [vmem:[#allocation19_spill] sm:$0xff]  ;;  %v13885_v8 = vld [vmem:[#allocation40_spill] sm:$0xff] }
0x1096   :  { %v3950_v18 = vadd.f32 %v3949_v14, %v3948_v21  ;;  %v13887_v14 = vld [vmem:[#allocation20_spill] sm:$0xff]  ;;  %v13888_v21 = vld [vmem:[#allocation21_spill] sm:$0xff] }
0x1098   :  { %8535 = vtanh.f32 %v3950_v18  ;;  %v13889_v18 = vld [vmem:[#allocation22_spill] sm:$0xff] }
0x10a5   :  { %v8536_v60 = vpop.eup %8535 }
0x10a6   :  { %v3952_v22 = vmul.f32 %v8536_v60, %v8534_v39  ;;  %v13890_v39 = vld [vmem:[#allocation23_spill] sm:$0xff]  ;;  %v13891_v60 = vld [vmem:[#allocation24_spill] sm:$0xff] }
0x10a8   :  { %3953 = vst [vmem:[#allocation2 + $0x8] sm:$0xc0] %v3952_v22  ;;  %v13892_v22 = vld [vmem:[#allocation25_spill] sm:$0xff] }
0x10af   :  { %v3955_v11 = vld [vmem:[#allocation2 + $0x8] sm:$0xff] }
0x10b0   :  { %4115 = vmatmul.mubr.f32.gmra.mxu0 %v3955_v11  ;;  %4192 = vmatmul.mubr.f32.gmra.mxu1 %v3955_v11  ;;  %v13893_v11 = vld [vmem:[#allocation38_spill] sm:$0xff] }
0x10b1   :  { %4327 = vmatprep.mubr.f32.mxu0 %v13848_v5  ;;  %4398 = vmatprep.mubr.f32.mxu1 %v13848_v5 }
0x10b4   :  { %4328 = vmatmul.mubr.f32.vlgmr.msra.gmra.mxu0 %v13848_v5  ;;  %4399 = vmatmul.mubr.f32.vlgmr.msra.gmra.mxu1 %v13848_v5 }
0x10b5   :  { %4435 = vmatpush1.msra.mxu0 %v11081_v19  ;;  %4506 = vmatpush1.msra.mxu1 %v11083_v1 }
0x10b6   :  { %4436 = vmatprep.subr.mxu0 %v11087_v3  ;;  %4507 = vmatprep.subr.mxu1 %v11089_v12 }
0x10b7   :  { %4437 = vmatpush1.msra.mxu0 %v11093_v63  ;;  %4508 = vmatpush1.msra.mxu1 %v11095_v6 }
0x10b8   :  { %4438 = vmatprep.subr.mxu0 %v11099_v32  ;;  %4509 = vmatprep.subr.mxu1 %v11101_v2 }
0x10b9   :  { %4439 = vmatpush1.msra.mxu0 %v11105_v38  ;;  %4510 = vmatpush1.msra.mxu1 %v11107_v23 }
0x10ba   :  { %4440 = vmatprep.subr.mxu0 %v11111_v48  ;;  %4511 = vmatprep.subr.mxu1 %v11113_v7 }
0x10bb   :  { %4441 = vmatpush1.msra.mxu0 %v11117_v35  ;;  %4512 = vmatpush1.msra.mxu1 %v11119_v40 }
0x10bc   :  { %4442 = vmatprep.subr.mxu0 %v11123_v45  ;;  %4513 = vmatprep.subr.mxu1 %v11125_v26 }
0x10bd   :  { %4443 = vmatpush1.msra.mxu0 %v11129_v20  ;;  %4514 = vmatpush1.msra.mxu1 %v11131_v57 }
0x10be   :  { %4444 = vmatprep.subr.mxu0 %v11135_v58  ;;  %4515 = vmatprep.subr.mxu1 %v11137_v29 }
0x10bf   :  { %4445 = vmatpush1.msra.mxu0 %v11141_v46  ;;  %4516 = vmatpush1.msra.mxu1 %v11143_v4 }
0x10c0   :  { %4446 = vmatprep.subr.mxu0 %v11147_v37  ;;  %4517 = vmatprep.subr.mxu1 %v11149_v34 }
0x10c1   :  { %4447 = vmatpush1.msra.mxu0 %v11153_v43  ;;  %4518 = vmatpush1.msra.mxu1 %v11155_v49 }
0x10c2   :  { %4448 = vmatprep.subr.mxu0 %v11159_v56  ;;  %4519 = vmatprep.subr.mxu1 %v11161_v59 }
0x10c3   :  { %4449 = vmatpush1.msra.mxu0 %v11165_v9  ;;  %4520 = vmatpush1.msra.mxu1 %v11167_v16 }
0x10c4   :  { %4450 = vmatprep.subr.mxu0 %v11171_v27  ;;  %4521 = vmatprep.subr.mxu1 %v11173_v28 }
0x10c5   :  { %4451 = vmatpush1.msra.mxu0 %v11177_v30  ;;  %4522 = vmatpush1.msra.mxu1 %v11179_v31 }
0x10c6   :  { %4452 = vmatprep.subr.mxu0 %v11183_v41  ;;  %4523 = vmatprep.subr.mxu1 %v11185_v42 }
0x10c7   :  { %4453 = vmatpush1.msra.mxu0 %v11189_v51  ;;  %4524 = vmatpush1.msra.mxu1 %v11191_v52 }
0x10c8   :  { %4454 = vmatprep.subr.mxu0 %v11193_v53  ;;  %4525 = vmatprep.subr.mxu1 %v11197_v10 }
0x10c9   :  { %4455 = vmatpush1.msra.mxu0 %v11199_v13  ;;  %4526 = vmatpush1.msra.mxu1 %v13872_v47 }
0x10ca   :  { %4456 = vmatprep.subr.mxu0 %v13873_v15  ;;  %4527 = vmatprep.subr.mxu1 %v13874_v50 }
0x10cb   :  { %4457 = vmatpush1.msra.mxu0 %v13875_v36  ;;  %4528 = vmatpush1.msra.mxu1 %v13876_v62  ;;  %v13904_v62 = vld [vmem:[#allocation16_spill] sm:$0xff] }
0x10cc   :  { %4458 = vmatprep.subr.mxu0 %v13877_v61  ;;  %4529 = vmatprep.subr.mxu1 %v13878_v54 }
0x10cd   :  { %4459 = vmatpush1.msra.mxu0 %v13879_v17  ;;  %4530 = vmatpush1.msra.mxu1 %v13880_v25 }
0x10ce   :  { %4460 = vmatprep.subr.mxu0 %v13881_v24  ;;  %4531 = vmatprep.subr.mxu1 %v13882_v0 }
0x10cf   :  { %4461 = vmatpush1.msra.mxu0 %v13883_v55  ;;  %4532 = vmatpush1.msra.mxu1 %v13884_v44 }
0x10d0   :  { %4462 = vmatprep.subr.mxu0 %v13885_v8  ;;  %4533 = vmatprep.subr.mxu1 %v13886_v33  ;;  %v13894_v8 = vld [vmem:[#allocation39_spill] sm:$0xff]  ;;  %v4110_v33 = vpop.f32.mrf.mxu0 }
0x10d1   :  { %4463 = vmatpush1.msra.mxu0 %v13887_v14  ;;  %4534 = vmatpush1.msra.mxu1 %v13888_v21  ;;  %v4187_v14 = vpop.f32.mrf.mxu1 }
0x10d2   :  { %4464 = vmatprep.subr.mxu0 %v13889_v18  ;;  %4535 = vmatprep.subr.mxu1 %v13890_v39  ;;  %v8071_v18 = vld [vmem:[%s13047_s4 + $0x8] sm:$0xf]  ;;  %v4112_v21 = vpop.f32.mrf.mxu0 }
0x10d3   :  { %4465 = vmatpush1.msra.mxu0 %v13891_v60  ;;  %4498 = vmatprep.mubr.f32.mxu0 %v13848_v5  ;;  %v13895_v39 = vld [vmem:[#allocation15_spill] sm:$0xff]  ;;  %v4189_v60 = vpop.f32.mrf.mxu1 }
0x10d4   :  { %4536 = vmatpush1.msra.mxu1 %v13892_v22  ;;  %4569 = vmatprep.mubr.f32.mxu1 %v13848_v5  ;;  %v11348_v44 = vrot.slane %v8071_v18, %v13895_v39  ;;  %v13898_v22 = vld [vmem:[#allocation17_spill] sm:$0xff] }
0x10d5   :  { %4623 = vmatprep.subr.mxu0 %v13893_v11  ;;  %4694 = vmatprep.subr.mxu1 %v13894_v8  ;;  %v11353_v0 = vrot.slane %v8071_v18, %v13898_v22 }
0x10d6   :  { %13896 = vst [vmem:[#allocation26_spill] sm:$0xff] %v11348_v44  ;;  %v11360_v8 = vadd.f32 %v4110_v33, %v11348_v44 }
0x10d7   :  { %13899 = vst [vmem:[#allocation28_spill] sm:$0xff] %v11353_v0  ;;  %v11363_v25 = vadd.f32 %v4112_v21, %v11353_v0  ;;  %v13907_v21 = vld [vmem:[#allocation14_spill] sm:$0xff] }
0x10d8   :  { %v11376_v0 = vrot.slane %v8071_v18, %v13907_v21 }
0x10d9   :  { %13902 = vst [vmem:[#allocation31_spill] sm:$0xff] %v11363_v25 }
0x10da   :  { %13908 = vst [vmem:[#allocation44_spill] sm:$0xff] %v11376_v0 }
0x1170   :  { %v11350_v55 = vpop.f32.mrf.mxu0  ;;  %v11355_v5 = vpop.f32.mrf.mxu1 }
0x1171   :  { %13897 = vst [vmem:[#allocation27_spill] sm:$0xff] %v11350_v55  ;;  %13900 = vst [vmem:[#allocation29_spill] sm:$0xff] %v11355_v5 }
0x1172   :  { %v11357_v11 = vpop.f32.mrf.mxu0  ;;  %v11365_v17 = vpop.f32.mrf.mxu1 }
0x1173   :  { %13901 = vst [vmem:[#allocation30_spill] sm:$0xff] %v11357_v11  ;;  %13903 = vst [vmem:[#allocation32_spill] sm:$0xff] %v11365_v17  ;;  %v11370_v11 = vrot.slane %v8071_v18, %v13904_v62 }
0x1174   :  { %v4329_v24 = vpop.f32.mrf.mxu0  ;;  %v4400_v61 = vpop.f32.mrf.mxu1 }
0x1175   :  { %v4405_v39 = vadd.f32 %v4329_v24, %v11360_v8  ;;  %13905 = vst [vmem:[#allocation33_spill] sm:$0xff] %v11370_v11  ;;  %v11373_v44 = vadd.f32 %v4189_v60, %v11370_v11 }
0x1176   :  { %v4331_v54 = vpop.f32.mrf.mxu0  ;;  %v4402_v33 = vpop.f32.mrf.mxu1 }
0x1177   :  { %v8072_v55 = vmul.f32 -1.442695, %v4405_v39  ;;  %v4406_v22 = vadd.f32 %v4331_v54, %v11363_v25  ;;  %13906 = vst [vmem:[#allocation34_spill] sm:$0xff] %v11373_v44  ;;  %v4408_v24 = vadd.f32 %v4402_v33, %v11373_v44  ;;  %v11380_v39 = vadd.f32 %v4187_v14, %v11376_v0  ;;  %v13924_v0 = vld [vmem:[#allocation24_spill] sm:$0xff] }
0x1179   :  { %8537 = vpow2.f32 %v8072_v55  ;;  %v8073_v5 = vmul.f32 -1.442695, %v4406_v22  ;;  %v8074_v54 = vmul.f32 -1.442695, %v4408_v24  ;;  %v4407_v22 = vadd.f32 %v4400_v61, %v11380_v39 }
0x117b   :  { %8539 = vpow2.f32 %v8073_v5 }
0x117c   :  { %8541 = vpow2.f32 %v8074_v54  ;;  %v13915_v54 = vld [vmem:[#allocation43_spill] sm:$0xff] }
0x1186   :  { %v8538_v55 = vpop.eup %8537 }
0x1187   :  { %v4412_v17 = vadd.f32 1.0, %v8538_v55 }
0x1188   :  { %v8540_v62 = vpop.eup %8539 }
0x1189   :  { %8543 = vrcp.f32 %v4412_v17  ;;  %v4418_v5 = vadd.f32 1.0, %v8540_v62  ;;  %v8542_v60 = vpop.eup %8541  ;;  %v13909_v62 = vld [vmem:[#allocation18_spill] sm:$0xff]  ;;  %v13910_v17 = vld [vmem:[#allocation45_spill] sm:$0xff] }
0x118a   :  { %8545 = vtanh.f32 %v4407_v22  ;;  %v4425_v25 = vadd.f32 1.0, %v8542_v60  ;;  %v13916_v22 = vld [vmem:[#allocation41_spill] sm:$0xff]  ;;  %v13918_v60 = vld [vmem:[#allocation40_spill] sm:$0xff] }
0x118b   :  { %8547 = vrcp.f32 %v4418_v5  ;;  %v13917_v5 = vld [vmem:[#allocation19_spill] sm:$0xff] }
0x118c   :  { %8549 = vrcp.f32 %v4425_v25  ;;  %v13911_v25 = vld [vmem:[#allocation48_spill] sm:$0xff] }
0x1196   :  { %v8544_v11 = vpop.eup %8543 }
0x1197   :  { %v8546_v18 = vpop.eup %8545 }
0x1198   :  { %v8548_v21 = vpop.eup %8547  ;;  %v4429_v44 = vmul.f32 %v8546_v18, %v8544_v11  ;;  %v13913_v11 = vld [vmem:[#allocation36_spill] sm:$0xff]  ;;  %v13919_v18 = vld [vmem:[#allocation42_spill] sm:$0xff] }
0x1199   :  { %v4428_v33 = vmul.f32 0.0, %v8548_v21  ;;  %v8550_v61 = vpop.eup %8549  ;;  %v13914_v21 = vld [vmem:[#allocation37_spill] sm:$0xff] }
0x119b   :  { %v11383_v14 = vadd.f32 %v4429_v44, %v4428_v33  ;;  %v13912_v44 = vld [vmem:[#allocation35_spill] sm:$0xff]  ;;  %v13920_v33 = vld [vmem:[#allocation20_spill] sm:$0xff] }
0x119d   :  { %8551 = vtanh.f32 %v11383_v14 }
0x11aa   :  { %v8552_v24 = vpop.eup %8551 }
0x11ab   :  { %v4432_v55 = vmul.f32 %v8552_v24, %v8550_v61  ;;  %v13921_v61 = vld [vmem:[#allocation21_spill] sm:$0xff]  ;;  %v13922_v24 = vld [vmem:[#allocation22_spill] sm:$0xff] }
0x11ad   :  { %4433 = vst [vmem:[#allocation2] sm:$0x3] %v4432_v55  ;;  %4499 = vmatmul.mubr.f32.vlgmr.msra.gmra.mxu0 %v4432_v55  ;;  %4570 = vmatmul.mubr.f32.vlgmr.msra.gmra.mxu1 %v4432_v55  ;;  %v13923_v55 = vld [vmem:[#allocation23_spill] sm:$0xff] }
0x11ae   :  { %4624 = vmatpush1.msra.mxu0 %v11081_v19  ;;  %4695 = vmatpush1.msra.mxu1 %v11083_v1 }
0x11af   :  { %4625 = vmatprep.subr.mxu0 %v11087_v3  ;;  %4696 = vmatprep.subr.mxu1 %v11089_v12 }
0x11b0   :  { %4626 = vmatpush1.msra.mxu0 %v11093_v63  ;;  %4697 = vmatpush1.msra.mxu1 %v11095_v6 }
0x11b1   :  { %4627 = vmatprep.subr.mxu0 %v11099_v32  ;;  %4698 = vmatprep.subr.mxu1 %v11101_v2 }
0x11b2   :  { %4628 = vmatpush1.msra.mxu0 %v11105_v38  ;;  %4699 = vmatpush1.msra.mxu1 %v11107_v23 }
0x11b3   :  { %4629 = vmatprep.subr.mxu0 %v11111_v48  ;;  %4700 = vmatprep.subr.mxu1 %v11113_v7 }
0x11b4   :  { %4630 = vmatpush1.msra.mxu0 %v11117_v35  ;;  %4701 = vmatpush1.msra.mxu1 %v11119_v40 }
0x11b5   :  { %4631 = vmatprep.subr.mxu0 %v11123_v45  ;;  %4702 = vmatprep.subr.mxu1 %v11125_v26 }
0x11b6   :  { %4632 = vmatpush1.msra.mxu0 %v11129_v20  ;;  %4703 = vmatpush1.msra.mxu1 %v11131_v57 }
0x11b7   :  { %4633 = vmatprep.subr.mxu0 %v11135_v58  ;;  %4704 = vmatprep.subr.mxu1 %v11137_v29 }
0x11b8   :  { %4634 = vmatpush1.msra.mxu0 %v11141_v46  ;;  %4705 = vmatpush1.msra.mxu1 %v11143_v4 }
0x11b9   :  { %4635 = vmatprep.subr.mxu0 %v11147_v37  ;;  %4706 = vmatprep.subr.mxu1 %v11149_v34 }
0x11ba   :  { %4636 = vmatpush1.msra.mxu0 %v11153_v43  ;;  %4707 = vmatpush1.msra.mxu1 %v11155_v49 }
0x11bb   :  { %4637 = vmatprep.subr.mxu0 %v11159_v56  ;;  %4708 = vmatprep.subr.mxu1 %v11161_v59 }
0x11bc   :  { %4638 = vmatpush1.msra.mxu0 %v11165_v9  ;;  %4709 = vmatpush1.msra.mxu1 %v11167_v16 }
0x11bd   :  { %4639 = vmatprep.subr.mxu0 %v11171_v27  ;;  %4710 = vmatprep.subr.mxu1 %v11173_v28 }
0x11be   :  { %4640 = vmatpush1.msra.mxu0 %v11177_v30  ;;  %4711 = vmatpush1.msra.mxu1 %v11179_v31 }
0x11bf   :  { %4641 = vmatprep.subr.mxu0 %v11183_v41  ;;  %4712 = vmatprep.subr.mxu1 %v11185_v42 }
0x11c0   :  { %4642 = vmatpush1.msra.mxu0 %v11189_v51  ;;  %4713 = vmatpush1.msra.mxu1 %v11191_v52 }
0x11c1   :  { %4643 = vmatprep.subr.mxu0 %v11193_v53  ;;  %4714 = vmatprep.subr.mxu1 %v11197_v10 }
0x11c2   :  { %4644 = vmatpush1.msra.mxu0 %v11199_v13  ;;  %4715 = vmatpush1.msra.mxu1 %v13872_v47 }
0x11c3   :  { %4645 = vmatprep.subr.mxu0 %v13873_v15  ;;  %4716 = vmatprep.subr.mxu1 %v13874_v50 }
0x11c4   :  { %4646 = vmatpush1.msra.mxu0 %v13875_v36  ;;  %4717 = vmatpush1.msra.mxu1 %v13909_v62 }
0x11c5   :  { %4647 = vmatprep.subr.mxu0 %v13910_v17  ;;  %4718 = vmatprep.subr.mxu1 %v13911_v25 }
0x11c6   :  { %4648 = vmatpush1.msra.mxu0 %v13912_v44  ;;  %4719 = vmatpush1.msra.mxu1 %v13913_v11  ;;  %v13929_v44 = vld [vmem:[#allocation31_spill] sm:$0xff] }
0x11c7   :  { %4649 = vmatprep.subr.mxu0 %v13914_v21  ;;  %4720 = vmatprep.subr.mxu1 %v13915_v54  ;;  %v13925_v21 = vmov 0.0   ;;  %v13926_v54 = vld [vmem:[#allocation25_spill] sm:$0xff] }
0x11c8   :  { %4650 = vmatpush1.msra.mxu0 %v13916_v22  ;;  %4721 = vmatpush1.msra.mxu1 %v13917_v5  ;;  %v13927_v5 = vld [vmem:[#allocation38_spill] sm:$0xff] }
0x11c9   :  { %4651 = vmatprep.subr.mxu0 %v13918_v60  ;;  %4722 = vmatprep.subr.mxu1 %v13919_v18  ;;  %v13928_v60 = vld [vmem:[#allocation39_spill] sm:$0xff] }
0x11ca   :  { %4652 = vmatpush1.msra.mxu0 %v13920_v33  ;;  %4723 = vmatpush1.msra.mxu1 %v13921_v61 }
0x11cb   :  { %4653 = vmatprep.subr.mxu0 %v13922_v24  ;;  %4724 = vmatprep.subr.mxu1 %v13923_v55 }
0x11cc   :  { %4654 = vmatpush1.msra.mxu0 %v13924_v0  ;;  %4687 = vmatprep.mubr.f32.mxu0 %v13925_v21 }
0x11cd   :  { %4725 = vmatpush1.msra.mxu1 %v13926_v54  ;;  %4758 = vmatprep.mubr.f32.mxu1 %v13925_v21  ;;  %v13930_v21 = vld [vmem:[#allocation34_spill] sm:$0xff] }
0x11ce   :  { %4812 = vmatprep.subr.mxu0 %v13927_v5  ;;  %4883 = vmatprep.subr.mxu1 %v13928_v60 }
0x126d   :  { %v4500_v18 = vpop.f32.mrf.mxu0  ;;  %v4571_v24 = vpop.f32.mrf.mxu1 }
0x126e   :  { %v4580_v33 = vrot.slane %v4500_v18, 6  ;;  %v4582_v5 = vrot.slane %v4571_v24, 6 }
0x126f   :  { %v4502_v22 = vpop.f32.mrf.mxu0  ;;  %v4573_v17 = vpop.f32.mrf.mxu1 }
0x1270   :  { %v4588_v61 = vadd.f32 %v4580_v33, %v11360_v8  ;;  %v4581_v11 = vrot.slane %v4502_v22, 6  ;;  %v4583_v54 = vrot.slane %v4573_v17, 6  ;;  %v4590_v18 = vadd.f32 %v4582_v5, %v11380_v39 }
0x1272   :  { %v8075_v55 = vmul.f32 -1.442695, %v4588_v61  ;;  %v4589_v0 = vadd.f32 %v4581_v11, %v13929_v44  ;;  %v4591_v62 = vadd.f32 %v4583_v54, %v13930_v21 }
0x1274   :  { %8553 = vpow2.f32 %v8075_v55  ;;  %v8076_v25 = vmul.f32 -1.442695, %v4589_v0  ;;  %v8077_v36 = vmul.f32 -1.442695, %v4591_v62  ;;  %v13933_v55 = vld [vmem:[#allocation49_spill] sm:$0xff] }
0x1276   :  { %8555 = vpow2.f32 %v8076_v25  ;;  %v4612_v25 = vrot.slane %v11383_v14, 6  ;;  %v13931_v14 = vld [vmem:[#allocation47_spill] sm:$0xff] }
0x1277   :  { %8557 = vpow2.f32 %v8077_v36 }
0x1281   :  { %v8554_v60 = vpop.eup %8553 }
0x1282   :  { %v4595_v50 = vadd.f32 1.0, %v8554_v60  ;;  %v13932_v60 = vld [vmem:[#allocation46_spill] sm:$0xff] }
0x1283   :  { %v8556_v15 = vpop.eup %8555 }
0x1284   :  { %8559 = vrcp.f32 %v4595_v50  ;;  %v4601_v22 = vadd.f32 1.0, %v8556_v15  ;;  %v8558_v11 = vpop.eup %8557 }
0x1285   :  { %8561 = vtanh.f32 %v4590_v18  ;;  %v4608_v61 = vadd.f32 1.0, %v8558_v11  ;;  %v13934_v18 = vld [vmem:[#allocation18_spill] sm:$0xff]  ;;  %v13936_v11 = vld [vmem:[#allocation48_spill] sm:$0xff] }
0x1286   :  { %8563 = vrcp.f32 %v4601_v22  ;;  %v13935_v22 = vld [vmem:[#allocation45_spill] sm:$0xff] }
0x1287   :  { %8565 = vrcp.f32 %v4608_v61  ;;  %v13941_v61 = vld [vmem:[#allocation41_spill] sm:$0xff] }
0x1291   :  { %v8560_v33 = vpop.eup %8559 }
0x1292   :  { %v8562_v0 = vpop.eup %8561 }
0x1293   :  { %v8564_v17 = vpop.eup %8563  ;;  %v4615_v54 = vmul.f32 %v8562_v0, %v8560_v33  ;;  %v13937_v33 = vld [vmem:[#allocation35_spill] sm:$0xff]  ;;  %v13938_v0 = vld [vmem:[#allocation36_spill] sm:$0xff] }
0x1294   :  { %v4614_v24 = vmul.f32 %v8564_v17, %v4612_v25  ;;  %v8566_v5 = vpop.eup %8565  ;;  %v13939_v25 = vld [vmem:[#allocation37_spill] sm:$0xff]  ;;  %v13940_v17 = vld [vmem:[#allocation43_spill] sm:$0xff] }
0x1296   :  { %v11457_v62 = vadd.f32 %v4615_v54, %v4614_v24  ;;  %v13942_v54 = vld [vmem:[#allocation19_spill] sm:$0xff]  ;;  %v13943_v24 = vld [vmem:[#allocation40_spill] sm:$0xff] }
0x1298   :  { %8567 = vtanh.f32 %v11457_v62 }
0x12a5   :  { %v8568_v36 = vpop.eup %8567 }
0x12a6   :  { %v4618_v50 = vmul.f32 %v8568_v36, %v8566_v5  ;;  %v13944_v5 = vld [vmem:[#allocation42_spill] sm:$0xff]  ;;  %v13945_v36 = vld [vmem:[#allocation20_spill] sm:$0xff] }
0x12a8   :  { %4619 = vst [vmem:[#allocation2] sm:$0xc] %v4618_v50  ;;  %v4621_v15 = vrot.slane %v4618_v50, 2  ;;  %v13946_v50 = vld [vmem:[#allocation21_spill] sm:$0xff] }
0x12aa   :  { %4688 = vmatmul.mubr.f32.vlgmr.msra.gmra.mxu0 %v4621_v15  ;;  %4759 = vmatmul.mubr.f32.vlgmr.msra.gmra.mxu1 %v4621_v15  ;;  %v13947_v15 = vld [vmem:[#allocation22_spill] sm:$0xff] }
0x12ab   :  { %4813 = vmatpush1.msra.mxu0 %v11081_v19  ;;  %4884 = vmatpush1.msra.mxu1 %v11083_v1 }
0x12ac   :  { %4814 = vmatprep.subr.mxu0 %v11087_v3  ;;  %4885 = vmatprep.subr.mxu1 %v11089_v12 }
0x12ad   :  { %4815 = vmatpush1.msra.mxu0 %v11093_v63  ;;  %4886 = vmatpush1.msra.mxu1 %v11095_v6 }
0x12ae   :  { %4816 = vmatprep.subr.mxu0 %v11099_v32  ;;  %4887 = vmatprep.subr.mxu1 %v11101_v2 }
0x12af   :  { %4817 = vmatpush1.msra.mxu0 %v11105_v38  ;;  %4888 = vmatpush1.msra.mxu1 %v11107_v23 }
0x12b0   :  { %4818 = vmatprep.subr.mxu0 %v11111_v48  ;;  %4889 = vmatprep.subr.mxu1 %v11113_v7 }
0x12b1   :  { %4819 = vmatpush1.msra.mxu0 %v11117_v35  ;;  %4890 = vmatpush1.msra.mxu1 %v11119_v40 }
0x12b2   :  { %4820 = vmatprep.subr.mxu0 %v11123_v45  ;;  %4891 = vmatprep.subr.mxu1 %v11125_v26 }
0x12b3   :  { %4821 = vmatpush1.msra.mxu0 %v11129_v20  ;;  %4892 = vmatpush1.msra.mxu1 %v11131_v57 }
0x12b4   :  { %4822 = vmatprep.subr.mxu0 %v11135_v58  ;;  %4893 = vmatprep.subr.mxu1 %v11137_v29 }
0x12b5   :  { %4823 = vmatpush1.msra.mxu0 %v11141_v46  ;;  %4894 = vmatpush1.msra.mxu1 %v11143_v4 }
0x12b6   :  { %4824 = vmatprep.subr.mxu0 %v11147_v37  ;;  %4895 = vmatprep.subr.mxu1 %v11149_v34 }
0x12b7   :  { %4825 = vmatpush1.msra.mxu0 %v11153_v43  ;;  %4896 = vmatpush1.msra.mxu1 %v11155_v49 }
0x12b8   :  { %4826 = vmatprep.subr.mxu0 %v11159_v56  ;;  %4897 = vmatprep.subr.mxu1 %v11161_v59 }
0x12b9   :  { %4827 = vmatpush1.msra.mxu0 %v11165_v9  ;;  %4898 = vmatpush1.msra.mxu1 %v11167_v16 }
0x12ba   :  { %4828 = vmatprep.subr.mxu0 %v11171_v27  ;;  %4899 = vmatprep.subr.mxu1 %v11173_v28 }
0x12bb   :  { %4829 = vmatpush1.msra.mxu0 %v11177_v30  ;;  %4900 = vmatpush1.msra.mxu1 %v11179_v31 }
0x12bc   :  { %4830 = vmatprep.subr.mxu0 %v11183_v41  ;;  %4901 = vmatprep.subr.mxu1 %v11185_v42 }
0x12bd   :  { %4831 = vmatpush1.msra.mxu0 %v11189_v51  ;;  %4902 = vmatpush1.msra.mxu1 %v11191_v52 }
0x12be   :  { %4832 = vmatprep.subr.mxu0 %v11193_v53  ;;  %4903 = vmatprep.subr.mxu1 %v11197_v10 }
0x12bf   :  { %4833 = vmatpush1.msra.mxu0 %v11199_v13  ;;  %4904 = vmatpush1.msra.mxu1 %v13872_v47 }
0x12c0   :  { %4834 = vmatprep.subr.mxu0 %v13931_v14  ;;  %4905 = vmatprep.subr.mxu1 %v13932_v60 }
0x12c1   :  { %4835 = vmatpush1.msra.mxu0 %v13933_v55  ;;  %4906 = vmatpush1.msra.mxu1 %v13934_v18 }
0x12c2   :  { %4836 = vmatprep.subr.mxu0 %v13935_v22  ;;  %4907 = vmatprep.subr.mxu1 %v13936_v11 }
0x12c3   :  { %4837 = vmatpush1.msra.mxu0 %v13937_v33  ;;  %4908 = vmatpush1.msra.mxu1 %v13938_v0  ;;  %v13948_v33 = vld [vmem:[#allocation23_spill] sm:$0xff]  ;;  %v13949_v0 = vld [vmem:[#allocation24_spill] sm:$0xff] }
0x12c4   :  { %4838 = vmatprep.subr.mxu0 %v13939_v25  ;;  %4909 = vmatprep.subr.mxu1 %v13940_v17  ;;  %v13950_v25 = vmov 0.0   ;;  %v13951_v17 = vld [vmem:[#allocation25_spill] sm:$0xff] }
0x12c5   :  { %4839 = vmatpush1.msra.mxu0 %v13941_v61  ;;  %4910 = vmatpush1.msra.mxu1 %v13942_v54  ;;  %v13952_v54 = vld [vmem:[#allocation38_spill] sm:$0xff] }
0x12c6   :  { %4840 = vmatprep.subr.mxu0 %v13943_v24  ;;  %4911 = vmatprep.subr.mxu1 %v13944_v5  ;;  %v13953_v24 = vld [vmem:[#allocation39_spill] sm:$0xff] }
0x12c7   :  { %4841 = vmatpush1.msra.mxu0 %v13945_v36  ;;  %4912 = vmatpush1.msra.mxu1 %v13946_v50 }
0x12c8   :  { %4842 = vmatprep.subr.mxu0 %v13947_v15  ;;  %4913 = vmatprep.subr.mxu1 %v13948_v33 }
0x12c9   :  { %4843 = vmatpush1.msra.mxu0 %v13949_v0  ;;  %4876 = vmatprep.mubr.f32.mxu0 %v13950_v25 }
0x12ca   :  { %4914 = vmatpush1.msra.mxu1 %v13951_v17  ;;  %4947 = vmatprep.mubr.f32.mxu1 %v13950_v25 }
0x12cb   :  { %5001 = vmatprep.subr.mxu0 %v13952_v54  ;;  %5072 = vmatprep.subr.mxu1 %v13953_v24 }
0x136a   :  { %v4689_v5 = vpop.f32.mrf.mxu0  ;;  %v4760_v15 = vpop.f32.mrf.mxu1 }
0x136b   :  { %v4769_v36 = vrot.slane %v4689_v5, 4  ;;  %v4771_v54 = vrot.slane %v4760_v15, 4 }
0x136c   :  { %v4691_v61 = vpop.f32.mrf.mxu0  ;;  %v4762_v18 = vpop.f32.mrf.mxu1 }
0x136d   :  { %v4777_v50 = vadd.f32 %v4769_v36, %v11360_v8  ;;  %v4770_v11 = vrot.slane %v4691_v61, 4  ;;  %v4772_v17 = vrot.slane %v4762_v18, 4  ;;  %v4779_v5 = vadd.f32 %v4771_v54, %v11380_v39 }
0x136f   :  { %v8078_v33 = vmul.f32 -1.442695, %v4777_v50  ;;  %v4778_v0 = vadd.f32 %v4770_v11, %v13929_v44  ;;  %v4780_v25 = vadd.f32 %v4772_v17, %v13930_v21 }
0x1371   :  { %8569 = vpow2.f32 %v8078_v33  ;;  %v8079_v22 = vmul.f32 -1.442695, %v4778_v0  ;;  %v8080_v55 = vmul.f32 -1.442695, %v4780_v25 }
0x1373   :  { %8571 = vpow2.f32 %v8079_v22  ;;  %v4801_v22 = vrot.slane %v11457_v62, 6 }
0x1374   :  { %8573 = vpow2.f32 %v8080_v55 }
0x137e   :  { %v8570_v24 = vpop.eup %8569 }
0x137f   :  { %v4784_v60 = vadd.f32 1.0, %v8570_v24 }
0x1380   :  { %v8572_v14 = vpop.eup %8571 }
0x1381   :  { %8575 = vrcp.f32 %v4784_v60  ;;  %v4790_v61 = vadd.f32 1.0, %v8572_v14  ;;  %v8574_v11 = vpop.eup %8573 }
0x1382   :  { %8577 = vtanh.f32 %v4779_v5  ;;  %v4797_v36 = vadd.f32 1.0, %v8574_v11 }
0x1383   :  { %8579 = vrcp.f32 %v4790_v61 }
0x1384   :  { %8581 = vrcp.f32 %v4797_v36  ;;  %v11615_v36 = vld [vmem:[#allocation7 + $0x5f0] sm:$0xff] }
0x138e   :  { %v8576_v33 = vpop.eup %8575 }
0x138f   :  { %v8578_v0 = vpop.eup %8577 }
0x1390   :  { %v8580_v18 = vpop.eup %8579  ;;  %v4804_v17 = vmul.f32 %v8578_v0, %v8576_v33 }
0x1391   :  { %v4803_v50 = vmul.f32 %v8580_v18, %v4801_v22  ;;  %v8582_v15 = vpop.eup %8581  ;;  %v11612_v18 = vld [vmem:[#allocation7 + $0x5e0] sm:$0xff] }
0x1393   :  { %v11531_v25 = vadd.f32 %v4804_v17, %v4803_v50  ;;  %v11618_v17 = vld [vmem:[#allocation7 + $0x5c8] sm:$0xff]  ;;  %v11621_v50 = vld [vmem:[#allocation7 + $0x5d8] sm:$0xff] }
0x1395   :  { %8583 = vtanh.f32 %v11531_v25  ;;  %v4990_v54 = vrot.slane %v11531_v25, 6  ;;  %v11624_v25 = vld [vmem:[#allocation7 + $0x5c0] sm:$0xff] }
0x13a2   :  { %v8584_v55 = vpop.eup %8583 }
0x13a3   :  { %v4807_v60 = vmul.f32 %v8584_v55, %v8582_v15  ;;  %v11627_v15 = vld [vmem:[#allocation7 + $0x5d0] sm:$0xff]  ;;  %v11630_v55 = vld [vmem:[#allocation7 + $0x5a8] sm:$0xff] }
0x13a5   :  { %4808 = vst [vmem:[#allocation2] sm:$0x30] %v4807_v60  ;;  %v4810_v14 = vrot.slane %v4807_v60, 4  ;;  %v11633_v60 = vld [vmem:[#allocation7 + $0x5b8] sm:$0xff] }
0x13a7   :  { %4877 = vmatmul.mubr.f32.vlgmr.msra.gmra.mxu0 %v4810_v14  ;;  %4948 = vmatmul.mubr.f32.vlgmr.msra.gmra.mxu1 %v4810_v14  ;;  %v11636_v14 = vld [vmem:[#allocation7 + $0x5a0] sm:$0xff] }
0x13a8   :  { %5002 = vmatpush1.msra.mxu0 %v11081_v19  ;;  %5073 = vmatpush1.msra.mxu1 %v11083_v1  ;;  %v13954_v19 = vld [vmem:[#allocation47_spill] sm:$0xff]  ;;  %v13955_v1 = vld [vmem:[#allocation46_spill] sm:$0xff] }
0x13a9   :  { %5003 = vmatprep.subr.mxu0 %v11087_v3  ;;  %5074 = vmatprep.subr.mxu1 %v11089_v12  ;;  %v13956_v3 = vld [vmem:[#allocation49_spill] sm:$0xff]  ;;  %v13957_v12 = vld [vmem:[#allocation18_spill] sm:$0xff] }
0x13aa   :  { %5004 = vmatpush1.msra.mxu0 %v11093_v63  ;;  %5075 = vmatpush1.msra.mxu1 %v11095_v6  ;;  %v13958_v63 = vld [vmem:[#allocation45_spill] sm:$0xff]  ;;  %v13959_v6 = vld [vmem:[#allocation48_spill] sm:$0xff] }
0x13ab   :  { %5005 = vmatprep.subr.mxu0 %v11099_v32  ;;  %5076 = vmatprep.subr.mxu1 %v11101_v2  ;;  %v13960_v32 = vld [vmem:[#allocation35_spill] sm:$0xff]  ;;  %v13961_v2 = vld [vmem:[#allocation36_spill] sm:$0xff] }
0x13ac   :  { %5006 = vmatpush1.msra.mxu0 %v11105_v38  ;;  %5077 = vmatpush1.msra.mxu1 %v11107_v23  ;;  %v13962_v38 = vld [vmem:[#allocation37_spill] sm:$0xff]  ;;  %v13963_v23 = vld [vmem:[#allocation43_spill] sm:$0xff] }
0x13ad   :  { %5007 = vmatprep.subr.mxu0 %v11111_v48  ;;  %5078 = vmatprep.subr.mxu1 %v11113_v7  ;;  %v13964_v48 = vld [vmem:[#allocation41_spill] sm:$0xff]  ;;  %v13965_v7 = vld [vmem:[#allocation19_spill] sm:$0xff] }
0x13ae   :  { %5008 = vmatpush1.msra.mxu0 %v11117_v35  ;;  %5079 = vmatpush1.msra.mxu1 %v11119_v40  ;;  %v13966_v35 = vld [vmem:[#allocation40_spill] sm:$0xff]  ;;  %v13967_v40 = vld [vmem:[#allocation42_spill] sm:$0xff] }
0x13af   :  { %5009 = vmatprep.subr.mxu0 %v11123_v45  ;;  %5080 = vmatprep.subr.mxu1 %v11125_v26  ;;  %v13968_v45 = vld [vmem:[#allocation20_spill] sm:$0xff]  ;;  %v13969_v26 = vld [vmem:[#allocation21_spill] sm:$0xff] }
0x13b0   :  { %5010 = vmatpush1.msra.mxu0 %v11129_v20  ;;  %5081 = vmatpush1.msra.mxu1 %v11131_v57  ;;  %v13970_v20 = vld [vmem:[#allocation22_spill] sm:$0xff]  ;;  %v13971_v57 = vld [vmem:[#allocation23_spill] sm:$0xff] }
0x13b1   :  { %5011 = vmatprep.subr.mxu0 %v11135_v58  ;;  %5082 = vmatprep.subr.mxu1 %v11137_v29  ;;  %v13972_v58 = vld [vmem:[#allocation24_spill] sm:$0xff]  ;;  %v13973_v29 = vmov 0.0  }
0x13b2   :  { %5012 = vmatpush1.msra.mxu0 %v11141_v46  ;;  %5083 = vmatpush1.msra.mxu1 %v11143_v4  ;;  %v13974_v46 = vld [vmem:[#allocation25_spill] sm:$0xff] }
0x13b3   :  { %5013 = vmatprep.subr.mxu0 %v11147_v37  ;;  %5084 = vmatprep.subr.mxu1 %v11149_v34  ;;  %v11598_v4 = vld [vmem:[#allocation7 + $0x5e8] sm:$0xff]  ;;  %v11601_v37 = vld [vmem:[#allocation7 + $0x5f8] sm:$0xff] }
0x13b4   :  { %5014 = vmatpush1.msra.mxu0 %v11153_v43  ;;  %5085 = vmatpush1.msra.mxu1 %v11155_v49  ;;  %13975 = vst [vmem:[#allocation31_spill] sm:$0xff] %v11598_v4  ;;  %13976 = vst [vmem:[#allocation34_spill] sm:$0xff] %v11601_v37 }
0x13b5   :  { %5015 = vmatprep.subr.mxu0 %v11159_v56  ;;  %5086 = vmatprep.subr.mxu1 %v11161_v59 }
0x13b6   :  { %5016 = vmatpush1.msra.mxu0 %v11165_v9  ;;  %5087 = vmatpush1.msra.mxu1 %v11167_v16 }
0x13b7   :  { %5017 = vmatprep.subr.mxu0 %v11171_v27  ;;  %5088 = vmatprep.subr.mxu1 %v11173_v28 }
0x13b8   :  { %5018 = vmatpush1.msra.mxu0 %v11177_v30  ;;  %5089 = vmatpush1.msra.mxu1 %v11179_v31 }
0x13b9   :  { %5019 = vmatprep.subr.mxu0 %v11183_v41  ;;  %5090 = vmatprep.subr.mxu1 %v11185_v42 }
0x13ba   :  { %5020 = vmatpush1.msra.mxu0 %v11189_v51  ;;  %5091 = vmatpush1.msra.mxu1 %v11191_v52 }
0x13bb   :  { %5021 = vmatprep.subr.mxu0 %v11193_v53  ;;  %5092 = vmatprep.subr.mxu1 %v11197_v10 }
0x13bc   :  { %5022 = vmatpush1.msra.mxu0 %v11199_v13  ;;  %5093 = vmatpush1.msra.mxu1 %v13872_v47 }
0x13bd   :  { %5023 = vmatprep.subr.mxu0 %v13954_v19  ;;  %5094 = vmatprep.subr.mxu1 %v13955_v1  ;;  %v11639_v19 = vld [vmem:[#allocation7 + $0x5b0] sm:$0xff]  ;;  %v11642_v1 = vld [vmem:[#allocation7 + $0x588] sm:$0xff] }
0x13be   :  { %5024 = vmatpush1.msra.mxu0 %v13956_v3  ;;  %5095 = vmatpush1.msra.mxu1 %v13957_v12  ;;  %v11645_v3 = vld [vmem:[#allocation7 + $0x598] sm:$0xff]  ;;  %v11648_v12 = vld [vmem:[#allocation7 + $0x580] sm:$0xff] }
0x13bf   :  { %5025 = vmatprep.subr.mxu0 %v13958_v63  ;;  %5096 = vmatprep.subr.mxu1 %v13959_v6  ;;  %v11651_v63 = vld [vmem:[#allocation7 + $0x590] sm:$0xff]  ;;  %v11654_v6 = vld [vmem:[#allocation7 + $0x568] sm:$0xff] }
0x13c0   :  { %5026 = vmatpush1.msra.mxu0 %v13960_v32  ;;  %5097 = vmatpush1.msra.mxu1 %v13961_v2  ;;  %v11657_v32 = vld [vmem:[#allocation7 + $0x578] sm:$0xff]  ;;  %v11660_v2 = vld [vmem:[#allocation7 + $0x560] sm:$0xff] }
0x13c1   :  { %5027 = vmatprep.subr.mxu0 %v13962_v38  ;;  %5098 = vmatprep.subr.mxu1 %v13963_v23  ;;  %v11663_v38 = vld [vmem:[#allocation7 + $0x570] sm:$0xff]  ;;  %v11666_v23 = vld [vmem:[#allocation7 + $0x548] sm:$0xff] }
0x13c2   :  { %5028 = vmatpush1.msra.mxu0 %v13964_v48  ;;  %5099 = vmatpush1.msra.mxu1 %v13965_v7  ;;  %v11669_v48 = vld [vmem:[#allocation7 + $0x558] sm:$0xff]  ;;  %v11672_v7 = vld [vmem:[#allocation7 + $0x540] sm:$0xff] }
0x13c3   :  { %5029 = vmatprep.subr.mxu0 %v13966_v35  ;;  %5100 = vmatprep.subr.mxu1 %v13967_v40  ;;  %v11675_v35 = vld [vmem:[#allocation7 + $0x550] sm:$0xff]  ;;  %v11678_v40 = vld [vmem:[#allocation7 + $0x528] sm:$0xff] }
0x13c4   :  { %5030 = vmatpush1.msra.mxu0 %v13968_v45  ;;  %5101 = vmatpush1.msra.mxu1 %v13969_v26  ;;  %v11681_v45 = vld [vmem:[#allocation7 + $0x538] sm:$0xff]  ;;  %v11684_v26 = vld [vmem:[#allocation7 + $0x520] sm:$0xff] }
0x13c5   :  { %5031 = vmatprep.subr.mxu0 %v13970_v20  ;;  %5102 = vmatprep.subr.mxu1 %v13971_v57  ;;  %v11687_v20 = vld [vmem:[#allocation7 + $0x530] sm:$0xff]  ;;  %v11690_v57 = vld [vmem:[#allocation7 + $0x508] sm:$0xff] }
0x13c6   :  { %5032 = vmatpush1.msra.mxu0 %v13972_v58  ;;  %5065 = vmatprep.mubr.f32.mxu0 %v13973_v29  ;;  %v11693_v58 = vld [vmem:[#allocation7 + $0x518] sm:$0xff] }
0x13c7   :  { %5103 = vmatpush1.msra.mxu1 %v13974_v46  ;;  %5136 = vmatprep.mubr.f32.mxu1 %v13973_v29  ;;  %v11696_v46 = vld [vmem:[#allocation7 + $0x500] sm:$0xff] }
0x13c8   :  { %5175 = vmatprep.subr.mxu0 %v11598_v4  ;;  %5246 = vmatprep.subr.mxu1 %v11601_v37 }
0x1467   :  { %v4878_v34 = vpop.f32.mrf.mxu0  ;;  %v4949_v59 = vpop.f32.mrf.mxu1 }
0x1468   :  { %v4958_v43 = vrot.slane %v4878_v34, 2  ;;  %v4960_v42 = vrot.slane %v4949_v59, 2  ;;  %v11699_v34 = vld [vmem:[#allocation7 + $0x510] sm:$0xff] }
0x1469   :  { %v4880_v49 = vpop.f32.mrf.mxu0  ;;  %v4951_v30 = vpop.f32.mrf.mxu1  ;;  %v11711_v59 = vld [vmem:[#allocation7 + $0x4f0] sm:$0xff] }
0x146a   :  { %v4966_v56 = vadd.f32 %v4958_v43, %v11360_v8  ;;  %v4959_v9 = vrot.slane %v4880_v49, 2  ;;  %v4961_v31 = vrot.slane %v4951_v30, 2  ;;  %v4968_v53 = vadd.f32 %v4960_v42, %v11380_v39  ;;  %v11702_v43 = vld [vmem:[#allocation7 + $0x4e8] sm:$0xff]  ;;  %v11705_v49 = vld [vmem:[#allocation7 + $0x4f8] sm:$0xff]  ;;  %v11735_v42 = vld [vmem:[#allocation7 + $0x4b0] sm:$0xff] }
0x146b   :  { %v11726_v30 = vld [vmem:[#allocation7 + $0x4a8] sm:$0xff] }
0x146c   :  { %v8081_v16 = vmul.f32 -1.442695, %v4966_v56  ;;  %v4967_v27 = vadd.f32 %v4959_v9, %v13929_v44  ;;  %v4969_v41 = vadd.f32 %v4961_v31, %v13930_v21  ;;  %v11708_v56 = vld [vmem:[#allocation7 + $0x4e0] sm:$0xff]  ;;  %v11714_v9 = vld [vmem:[#allocation7 + $0x4c8] sm:$0xff]  ;;  %v11729_v31 = vld [vmem:[#allocation7 + $0x4b8] sm:$0xff] }
0x146e   :  { %8585 = vpow2.f32 %v8081_v16  ;;  %v8082_v28 = vmul.f32 -1.442695, %v4967_v27  ;;  %v8083_v51 = vmul.f32 -1.442695, %v4969_v41  ;;  %v11717_v16 = vld [vmem:[#allocation7 + $0x4d8] sm:$0xff]  ;;  %v11720_v27 = vld [vmem:[#allocation7 + $0x4c0] sm:$0xff] }
0x146f   :  { %v11732_v41 = vld [vmem:[#allocation7 + $0x4a0] sm:$0xff] }
0x1470   :  { %8587 = vpow2.f32 %v8082_v28  ;;  %v11723_v28 = vld [vmem:[#allocation7 + $0x4d0] sm:$0xff] }
0x1471   :  { %8589 = vpow2.f32 %v8083_v51  ;;  %v11738_v51 = vld [vmem:[#allocation7 + $0x488] sm:$0xff] }
0x1472   :  { %13977 = vst [vmem:[#allocation38_spill] sm:$0xff] %v11738_v51 }
0x147b   :  { %v8586_v52 = vpop.eup %8585 }
0x147c   :  { %v4973_v10 = vadd.f32 1.0, %v8586_v52  ;;  %v11741_v52 = vld [vmem:[#allocation7 + $0x498] sm:$0xff] }
0x147d   :  { %v8588_v13 = vpop.eup %8587  ;;  %13978 = vst [vmem:[#allocation39_spill] sm:$0xff] %v11741_v52 }
0x147e   :  { %8591 = vrcp.f32 %v4973_v10  ;;  %v4979_v47 = vadd.f32 1.0, %v8588_v13  ;;  %v8590_v8 = vpop.eup %8589  ;;  %v11747_v10 = vld [vmem:[#allocation7 + $0x490] sm:$0xff]  ;;  %v11750_v13 = vld [vmem:[#allocation7 + $0x468] sm:$0xff] }
0x147f   :  { %8593 = vtanh.f32 %v4968_v53  ;;  %v4986_v5 = vadd.f32 1.0, %v8590_v8  ;;  %v11744_v53 = vld [vmem:[#allocation7 + $0x480] sm:$0xff]  ;;  %13980 = vst [vmem:[#allocation46_spill] sm:$0xff] %v11747_v10  ;;  %13981 = vst [vmem:[#allocation49_spill] sm:$0xff] %v11750_v13 }
0x1480   :  { %8595 = vrcp.f32 %v4979_v47  ;;  %13979 = vst [vmem:[#allocation47_spill] sm:$0xff] %v11744_v53  ;;  %v11753_v47 = vld [vmem:[#allocation7 + $0x478] sm:$0xff]  ;;  %v11756_v8 = vld [vmem:[#allocation7 + $0x460] sm:$0xff] }
0x1481   :  { %8597 = vrcp.f32 %v4986_v5  ;;  %13982 = vst [vmem:[#allocation18_spill] sm:$0xff] %v11753_v47  ;;  %13983 = vst [vmem:[#allocation45_spill] sm:$0xff] %v11756_v8  ;;  %v11771_v5 = vld [vmem:[#allocation7 + $0x450] sm:$0xff] }
0x1482   :  { %13988 = vst [vmem:[#allocation43_spill] sm:$0xff] %v11771_v5 }
0x148b   :  { %v8592_v44 = vpop.eup %8591 }
0x148c   :  { %v8594_v62 = vpop.eup %8593 }
0x148d   :  { %v8596_v24 = vpop.eup %8595  ;;  %v4993_v21 = vmul.f32 %v8594_v62, %v8592_v44  ;;  %v11759_v44 = vld [vmem:[#allocation7 + $0x470] sm:$0xff]  ;;  %v11762_v62 = vld [vmem:[#allocation7 + $0x448] sm:$0xff] }
0x148e   :  { %v4992_v61 = vmul.f32 %v8596_v24, %v4990_v54  ;;  %v8598_v39 = vpop.eup %8597  ;;  %13984 = vst [vmem:[#allocation48_spill] sm:$0xff] %v11759_v44  ;;  %13985 = vst [vmem:[#allocation35_spill] sm:$0xff] %v11762_v62  ;;  %v11765_v54 = vld [vmem:[#allocation7 + $0x458] sm:$0xff]  ;;  %v11768_v24 = vld [vmem:[#allocation7 + $0x440] sm:$0xff] }
0x148f   :  { %13986 = vst [vmem:[#allocation36_spill] sm:$0xff] %v11765_v54  ;;  %13987 = vst [vmem:[#allocation37_spill] sm:$0xff] %v11768_v24 }
0x1490   :  { %v11609_v11 = vadd.f32 %v4993_v21, %v4992_v61  ;;  %v11774_v21 = vld [vmem:[#allocation7 + $0x428] sm:$0xff]  ;;  %v11777_v61 = vld [vmem:[#allocation7 + $0x438] sm:$0xff] }
0x1491   :  { %13989 = vst [vmem:[#allocation41_spill] sm:$0xff] %v11774_v21  ;;  %13990 = vst [vmem:[#allocation19_spill] sm:$0xff] %v11777_v61 }
0x1492   :  { %8599 = vtanh.f32 %v11609_v11 }
0x149f   :  { %v8600_v33 = vpop.eup %8599 }
0x14a0   :  { %v4996_v0 = vmul.f32 %v8600_v33, %v8598_v39  ;;  %v11780_v39 = vld [vmem:[#allocation7 + $0x420] sm:$0xff]  ;;  %v11783_v33 = vld [vmem:[#allocation7 + $0x430] sm:$0xff] }
0x14a1   :  { %13991 = vst [vmem:[#allocation40_spill] sm:$0xff] %v11780_v39  ;;  %13992 = vst [vmem:[#allocation42_spill] sm:$0xff] %v11783_v33 }
0x14a2   :  { %4997 = vst [vmem:[#allocation2] sm:$0xc0] %v4996_v0  ;;  %v4999_v22 = vrot.slane %v4996_v0, 6  ;;  %v11786_v0 = vld [vmem:[#allocation7 + $0x408] sm:$0xff] }
0x14a3   :  { %13993 = vst [vmem:[#allocation20_spill] sm:$0xff] %v11786_v0 }
0x14a4   :  { %5066 = vmatmul.mubr.f32.vlgmr.msra.gmra.mxu0 %v4999_v22  ;;  %5137 = vmatmul.mubr.f32.vlgmr.msra.gmra.mxu1 %v4999_v22  ;;  %v11789_v22 = vld [vmem:[#allocation7 + $0x418] sm:$0xff] }
0x14a5   :  { %5176 = vmatpush1.msra.mxu0 %v11612_v18  ;;  %5247 = vmatpush1.msra.mxu1 %v11615_v36  ;;  %13994 = vst [vmem:[#allocation21_spill] sm:$0xff] %v11789_v22 }
0x14a6   :  { %5177 = vmatprep.subr.mxu0 %v11618_v17  ;;  %5248 = vmatprep.subr.mxu1 %v11621_v50 }
0x14a7   :  { %5178 = vmatpush1.msra.mxu0 %v11624_v25  ;;  %5249 = vmatpush1.msra.mxu1 %v11627_v15 }
0x14a8   :  { %5179 = vmatprep.subr.mxu0 %v11630_v55  ;;  %5250 = vmatprep.subr.mxu1 %v11633_v60 }
0x14a9   :  { %5180 = vmatpush1.msra.mxu0 %v11636_v14  ;;  %5251 = vmatpush1.msra.mxu1 %v11639_v19 }
0x14aa   :  { %5181 = vmatprep.subr.mxu0 %v11642_v1  ;;  %5252 = vmatprep.subr.mxu1 %v11645_v3 }
0x14ab   :  { %5182 = vmatpush1.msra.mxu0 %v11648_v12  ;;  %5253 = vmatpush1.msra.mxu1 %v11651_v63 }
0x14ac   :  { %5183 = vmatprep.subr.mxu0 %v11654_v6  ;;  %5254 = vmatprep.subr.mxu1 %v11657_v32 }
0x14ad   :  { %5184 = vmatpush1.msra.mxu0 %v11660_v2  ;;  %5255 = vmatpush1.msra.mxu1 %v11663_v38 }
0x14ae   :  { %5185 = vmatprep.subr.mxu0 %v11666_v23  ;;  %5256 = vmatprep.subr.mxu1 %v11669_v48 }
0x14af   :  { %5186 = vmatpush1.msra.mxu0 %v11672_v7  ;;  %5257 = vmatpush1.msra.mxu1 %v11675_v35 }
0x14b0   :  { %5187 = vmatprep.subr.mxu0 %v11678_v40  ;;  %5258 = vmatprep.subr.mxu1 %v11681_v45 }
0x14b1   :  { %5188 = vmatpush1.msra.mxu0 %v11684_v26  ;;  %5259 = vmatpush1.msra.mxu1 %v11687_v20 }
0x14b2   :  { %5189 = vmatprep.subr.mxu0 %v11690_v57  ;;  %5260 = vmatprep.subr.mxu1 %v11693_v58 }
0x14b3   :  { %5190 = vmatpush1.msra.mxu0 %v11696_v46  ;;  %5261 = vmatpush1.msra.mxu1 %v11699_v34 }
0x14b4   :  { %5191 = vmatprep.subr.mxu0 %v11702_v43  ;;  %5262 = vmatprep.subr.mxu1 %v11705_v49 }
0x14b5   :  { %5192 = vmatpush1.msra.mxu0 %v11708_v56  ;;  %5263 = vmatpush1.msra.mxu1 %v11711_v59 }
0x14b6   :  { %5193 = vmatprep.subr.mxu0 %v11714_v9  ;;  %5264 = vmatprep.subr.mxu1 %v11717_v16 }
0x14b7   :  { %5194 = vmatpush1.msra.mxu0 %v11720_v27  ;;  %5265 = vmatpush1.msra.mxu1 %v11723_v28 }
0x14b8   :  { %5195 = vmatprep.subr.mxu0 %v11726_v30  ;;  %5266 = vmatprep.subr.mxu1 %v11729_v31 }
0x14b9   :  { %5196 = vmatpush1.msra.mxu0 %v11732_v41  ;;  %5267 = vmatpush1.msra.mxu1 %v11735_v42 }
0x14ba   :  { %5197 = vmatprep.subr.mxu0 %v11738_v51  ;;  %5268 = vmatprep.subr.mxu1 %v11741_v52 }
0x14bb   :  { %5198 = vmatpush1.msra.mxu0 %v11744_v53  ;;  %5269 = vmatpush1.msra.mxu1 %v11747_v10 }
0x14bc   :  { %5199 = vmatprep.subr.mxu0 %v11750_v13  ;;  %5270 = vmatprep.subr.mxu1 %v11753_v47  ;;  %v14004_v47 = vld [vmem:[#allocation32_spill] sm:$0xff] }
0x14bd   :  { %5200 = vmatpush1.msra.mxu0 %v11756_v8  ;;  %5271 = vmatpush1.msra.mxu1 %v11759_v44  ;;  %v14003_v8 = vld [vmem:[#allocation33_spill] sm:$0xff]  ;;  %v14006_v13 = vld [vmem:[#allocation44_spill] sm:$0xff] }
0x14be   :  { %5201 = vmatprep.subr.mxu0 %v11762_v62  ;;  %5272 = vmatprep.subr.mxu1 %v11765_v54 }
0x14bf   :  { %5202 = vmatpush1.msra.mxu0 %v11768_v24  ;;  %5273 = vmatpush1.msra.mxu1 %v11771_v5  ;;  %v14000_v5 = vld [vmem:[#allocation28_spill] sm:$0xff]  ;;  %v14001_v24 = vld [vmem:[#allocation30_spill] sm:$0xff] }
0x14c0   :  { %5203 = vmatprep.subr.mxu0 %v11774_v21  ;;  %5274 = vmatprep.subr.mxu1 %v11777_v61  ;;  %v11792_v21 = vld [vmem:[#allocation7 + $0x400] sm:$0xff]  ;;  %v11796_v61 = vld [vmem:[#allocation7 + $0x410] sm:$0xff] }
0x14c1   :  { %5204 = vmatpush1.msra.mxu0 %v11780_v39  ;;  %5275 = vmatpush1.msra.mxu1 %v11783_v33  ;;  %13995 = vst [vmem:[#allocation22_spill] sm:$0xff] %v11792_v21  ;;  %13996 = vst [vmem:[#allocation23_spill] sm:$0xff] %v11796_v61  ;;  %v13998_v33 = vld [vmem:[#allocation27_spill] sm:$0xff] }
0x14c2   :  { %5205 = vmatprep.subr.mxu0 %v11786_v0  ;;  %5276 = vmatprep.subr.mxu1 %v11789_v22  ;;  %v13997_v0 = vld [vmem:[#allocation26_spill] sm:$0xff] }
0x14c3   :  { %5206 = vmatpush1.msra.mxu0 %v11792_v21  ;;  %5239 = vmatprep.mubr.f32.mxu0 %v13973_v29  ;;  %v11804_v39 = vadd.f32 %v13998_v33, %v13997_v0  ;;  %v11808_v21 = vadd.f32 %v14001_v24, %v14000_v5  ;;  %v11814_v33 = vadd.f32 %v14004_v47, %v14003_v8  ;;  %v14007_v24 = vld [vmem:[#allocation29_spill] sm:$0xff] }
0x14c4   :  { %5277 = vmatpush1.msra.mxu1 %v11796_v61  ;;  %5310 = vmatprep.mubr.f32.mxu1 %v13973_v29  ;;  %v11819_v5 = vadd.f32 %v14007_v24, %v14006_v13 }
0x14c5   :  { %5364 = vmatprep.subr.mxu0 %v11598_v4  ;;  %5435 = vmatprep.subr.mxu1 %v11601_v37  ;;  %13999 = vst [vmem:[#allocation24_spill] sm:$0xff] %v11804_v39  ;;  %14002 = vst [vmem:[#allocation25_spill] sm:$0xff] %v11808_v21 }
0x14c6   :  { %14005 = vst [vmem:[#allocation26_spill] sm:$0xff] %v11814_v33 }
0x1564   :  { %v5067_v22 = vpop.f32.mrf.mxu0  ;;  %v5138_v29 = vpop.f32.mrf.mxu1 }
0x1565   :  { %v5143_v54 = vadd.f32 %v5067_v22, %v11804_v39 }
0x1566   :  { %v5069_v62 = vpop.f32.mrf.mxu0  ;;  %v5140_v37 = vpop.f32.mrf.mxu1 }
0x1567   :  { %v8084_v44 = vmul.f32 -1.442695, %v5143_v54  ;;  %v5144_v61 = vadd.f32 %v5069_v62, %v11808_v21  ;;  %v5146_v0 = vadd.f32 %v5140_v37, %v11814_v33  ;;  %v5145_v54 = vadd.f32 %v5138_v29, %v11819_v5 }
0x1568   :  { %v5167_v37 = vrot.slane %v11609_v11, 6  ;;  %v14008_v11 = vld [vmem:[#allocation49_spill] sm:$0xff] }
0x1569   :  { %8601 = vpow2.f32 %v8084_v44  ;;  %v8085_v4 = vmul.f32 -1.442695, %v5144_v61  ;;  %v8086_v22 = vmul.f32 -1.442695, %v5146_v0 }
0x156b   :  { %8603 = vpow2.f32 %v8085_v4 }
0x156c   :  { %8605 = vpow2.f32 %v8086_v22 }
0x1576   :  { %v8602_v39 = vpop.eup %8601 }
0x1577   :  { %v5150_v62 = vadd.f32 1.0, %v8602_v39 }
0x1578   :  { %v8604_v44 = vpop.eup %8603 }
0x1579   :  { %8607 = vrcp.f32 %v5150_v62  ;;  %v5156_v4 = vadd.f32 1.0, %v8604_v44  ;;  %v8606_v61 = vpop.eup %8605  ;;  %v14012_v62 = vld [vmem:[#allocation35_spill] sm:$0xff]  ;;  %v14013_v44 = vld [vmem:[#allocation36_spill] sm:$0xff] }
0x157a   :  { %8609 = vtanh.f32 %v5145_v54  ;;  %v5163_v21 = vadd.f32 1.0, %v8606_v61  ;;  %v14011_v54 = vld [vmem:[#allocation48_spill] sm:$0xff]  ;;  %v14015_v61 = vld [vmem:[#allocation43_spill] sm:$0xff] }
0x157b   :  { %8611 = vrcp.f32 %v5156_v4  ;;  %v14014_v4 = vld [vmem:[#allocation37_spill] sm:$0xff] }
0x157c   :  { %8613 = vrcp.f32 %v5163_v21  ;;  %v14009_v21 = vld [vmem:[#allocation18_spill] sm:$0xff] }
0x1586   :  { %v8608_v47 = vpop.eup %8607 }
0x1587   :  { %v8610_v8 = vpop.eup %8609 }
0x1588   :  { %v8612_v33 = vpop.eup %8611  ;;  %v5170_v13 = vmul.f32 %v8610_v8, %v8608_v47  ;;  %v14016_v47 = vld [vmem:[#allocation41_spill] sm:$0xff]  ;;  %v14017_v8 = vld [vmem:[#allocation19_spill] sm:$0xff] }
0x1589   :  { %v5169_v24 = vmul.f32 %v8612_v33, %v5167_v37  ;;  %v8614_v29 = vpop.eup %8613  ;;  %v14010_v33 = vld [vmem:[#allocation45_spill] sm:$0xff]  ;;  %v14018_v37 = vld [vmem:[#allocation40_spill] sm:$0xff] }
0x158b   :  { %v11823_v0 = vadd.f32 %v5170_v13, %v5169_v24  ;;  %v14019_v13 = vld [vmem:[#allocation42_spill] sm:$0xff]  ;;  %v14020_v24 = vld [vmem:[#allocation20_spill] sm:$0xff] }
0x158d   :  { %8615 = vtanh.f32 %v11823_v0 }
0x159a   :  { %v8616_v39 = vpop.eup %8615 }
0x159b   :  { %v5173_v22 = vmul.f32 %v8616_v39, %v8614_v29  ;;  %v14021_v29 = vld [vmem:[#allocation21_spill] sm:$0xff]  ;;  %v14022_v39 = vld [vmem:[#allocation22_spill] sm:$0xff] }
0x159d   :  { %5174 = vst [vmem:[#allocation2 + $0x8] sm:$0x3] %v5173_v22  ;;  %5240 = vmatmul.mubr.f32.vlgmr.msra.gmra.mxu0 %v5173_v22  ;;  %5311 = vmatmul.mubr.f32.vlgmr.msra.gmra.mxu1 %v5173_v22  ;;  %v14023_v22 = vmov 0.0  }
0x159e   :  { %5365 = vmatpush1.msra.mxu0 %v11612_v18  ;;  %5436 = vmatpush1.msra.mxu1 %v11615_v36 }
0x159f   :  { %5366 = vmatprep.subr.mxu0 %v11618_v17  ;;  %5437 = vmatprep.subr.mxu1 %v11621_v50 }
0x15a0   :  { %5367 = vmatpush1.msra.mxu0 %v11624_v25  ;;  %5438 = vmatpush1.msra.mxu1 %v11627_v15 }
0x15a1   :  { %5368 = vmatprep.subr.mxu0 %v11630_v55  ;;  %5439 = vmatprep.subr.mxu1 %v11633_v60 }
0x15a2   :  { %5369 = vmatpush1.msra.mxu0 %v11636_v14  ;;  %5440 = vmatpush1.msra.mxu1 %v11639_v19 }
0x15a3   :  { %5370 = vmatprep.subr.mxu0 %v11642_v1  ;;  %5441 = vmatprep.subr.mxu1 %v11645_v3 }
0x15a4   :  { %5371 = vmatpush1.msra.mxu0 %v11648_v12  ;;  %5442 = vmatpush1.msra.mxu1 %v11651_v63 }
0x15a5   :  { %5372 = vmatprep.subr.mxu0 %v11654_v6  ;;  %5443 = vmatprep.subr.mxu1 %v11657_v32 }
0x15a6   :  { %5373 = vmatpush1.msra.mxu0 %v11660_v2  ;;  %5444 = vmatpush1.msra.mxu1 %v11663_v38 }
0x15a7   :  { %5374 = vmatprep.subr.mxu0 %v11666_v23  ;;  %5445 = vmatprep.subr.mxu1 %v11669_v48 }
0x15a8   :  { %5375 = vmatpush1.msra.mxu0 %v11672_v7  ;;  %5446 = vmatpush1.msra.mxu1 %v11675_v35 }
0x15a9   :  { %5376 = vmatprep.subr.mxu0 %v11678_v40  ;;  %5447 = vmatprep.subr.mxu1 %v11681_v45 }
0x15aa   :  { %5377 = vmatpush1.msra.mxu0 %v11684_v26  ;;  %5448 = vmatpush1.msra.mxu1 %v11687_v20 }
0x15ab   :  { %5378 = vmatprep.subr.mxu0 %v11690_v57  ;;  %5449 = vmatprep.subr.mxu1 %v11693_v58 }
0x15ac   :  { %5379 = vmatpush1.msra.mxu0 %v11696_v46  ;;  %5450 = vmatpush1.msra.mxu1 %v11699_v34 }
0x15ad   :  { %5380 = vmatprep.subr.mxu0 %v11702_v43  ;;  %5451 = vmatprep.subr.mxu1 %v11705_v49 }
0x15ae   :  { %5381 = vmatpush1.msra.mxu0 %v11708_v56  ;;  %5452 = vmatpush1.msra.mxu1 %v11711_v59 }
0x15af   :  { %5382 = vmatprep.subr.mxu0 %v11714_v9  ;;  %5453 = vmatprep.subr.mxu1 %v11717_v16 }
0x15b0   :  { %5383 = vmatpush1.msra.mxu0 %v11720_v27  ;;  %5454 = vmatpush1.msra.mxu1 %v11723_v28 }
0x15b1   :  { %5384 = vmatprep.subr.mxu0 %v11726_v30  ;;  %5455 = vmatprep.subr.mxu1 %v11729_v31 }
0x15b2   :  { %5385 = vmatpush1.msra.mxu0 %v11732_v41  ;;  %5456 = vmatpush1.msra.mxu1 %v11735_v42 }
0x15b3   :  { %5386 = vmatprep.subr.mxu0 %v11738_v51  ;;  %5457 = vmatprep.subr.mxu1 %v11741_v52 }
0x15b4   :  { %5387 = vmatpush1.msra.mxu0 %v11744_v53  ;;  %5458 = vmatpush1.msra.mxu1 %v11747_v10 }
0x15b5   :  { %5388 = vmatprep.subr.mxu0 %v14008_v11  ;;  %5459 = vmatprep.subr.mxu1 %v14009_v21 }
0x15b6   :  { %5389 = vmatpush1.msra.mxu0 %v14010_v33  ;;  %5460 = vmatpush1.msra.mxu1 %v14011_v54  ;;  %v14028_v33 = vld [vmem:[#allocation25_spill] sm:$0xff] }
0x15b7   :  { %5390 = vmatprep.subr.mxu0 %v14012_v62  ;;  %5461 = vmatprep.subr.mxu1 %v14013_v44  ;;  %v14024_v44 = vld [vmem:[#allocation23_spill] sm:$0xff] }
0x15b8   :  { %5391 = vmatpush1.msra.mxu0 %v14014_v4  ;;  %5462 = vmatpush1.msra.mxu1 %v14015_v61  ;;  %v14025_v61 = vld [vmem:[#allocation31_spill] sm:$0xff] }
0x15b9   :  { %5392 = vmatprep.subr.mxu0 %v14016_v47  ;;  %5463 = vmatprep.subr.mxu1 %v14017_v8  ;;  %v14026_v47 = vld [vmem:[#allocation34_spill] sm:$0xff] }
0x15ba   :  { %5393 = vmatpush1.msra.mxu0 %v14018_v37  ;;  %5464 = vmatpush1.msra.mxu1 %v14019_v13  ;;  %v14027_v13 = vld [vmem:[#allocation24_spill] sm:$0xff] }
0x15bb   :  { %5394 = vmatprep.subr.mxu0 %v14020_v24  ;;  %5465 = vmatprep.subr.mxu1 %v14021_v29 }
0x15bc   :  { %5395 = vmatpush1.msra.mxu0 %v14022_v39  ;;  %5428 = vmatprep.mubr.f32.mxu0 %v14023_v22 }
0x15bd   :  { %5466 = vmatpush1.msra.mxu1 %v14024_v44  ;;  %5499 = vmatprep.mubr.f32.mxu1 %v14023_v22  ;;  %v14029_v22 = vld [vmem:[#allocation26_spill] sm:$0xff] }
0x15be   :  { %5553 = vmatprep.subr.mxu0 %v14025_v61  ;;  %5624 = vmatprep.subr.mxu1 %v14026_v47 }
0x165d   :  { %v5241_v8 = vpop.f32.mrf.mxu0  ;;  %v5312_v24 = vpop.f32.mrf.mxu1 }
0x165e   :  { %v5321_v37 = vrot.slane %v5241_v8, 6  ;;  %v5323_v61 = vrot.slane %v5312_v24, 6 }
0x165f   :  { %v5243_v4 = vpop.f32.mrf.mxu0  ;;  %v5314_v11 = vpop.f32.mrf.mxu1 }
0x1660   :  { %v5329_v62 = vadd.f32 %v5321_v37, %v14027_v13  ;;  %v5322_v54 = vrot.slane %v5243_v4, 6  ;;  %v5324_v44 = vrot.slane %v5314_v11, 6  ;;  %v5331_v8 = vadd.f32 %v5323_v61, %v11819_v5 }
0x1662   :  { %v8087_v29 = vmul.f32 -1.442695, %v5329_v62  ;;  %v5330_v39 = vadd.f32 %v5322_v54, %v14028_v33  ;;  %v5332_v10 = vadd.f32 %v5324_v44, %v14029_v22 }
0x1664   :  { %8617 = vpow2.f32 %v8087_v29  ;;  %v8088_v21 = vmul.f32 -1.442695, %v5330_v39  ;;  %v8089_v53 = vmul.f32 -1.442695, %v5332_v10 }
0x1666   :  { %8619 = vpow2.f32 %v8088_v21  ;;  %v5353_v21 = vrot.slane %v11823_v0, 6 }
0x1667   :  { %8621 = vpow2.f32 %v8089_v53 }
0x1671   :  { %v8618_v47 = vpop.eup %8617 }
0x1672   :  { %v5336_v52 = vadd.f32 1.0, %v8618_v47 }
0x1673   :  { %v8620_v51 = vpop.eup %8619 }
0x1674   :  { %8623 = vrcp.f32 %v5336_v52  ;;  %v5342_v4 = vadd.f32 1.0, %v8620_v51  ;;  %v8622_v54 = vpop.eup %8621 }
0x1675   :  { %8625 = vtanh.f32 %v5331_v8  ;;  %v5349_v29 = vadd.f32 1.0, %v8622_v54 }
0x1676   :  { %8627 = vrcp.f32 %v5342_v4 }
0x1677   :  { %8629 = vrcp.f32 %v5349_v29 }
0x1681   :  { %v8624_v62 = vpop.eup %8623 }
0x1682   :  { %v8626_v37 = vpop.eup %8625 }
0x1683   :  { %v8628_v11 = vpop.eup %8627  ;;  %v5356_v44 = vmul.f32 %v8626_v37, %v8624_v62 }
0x1684   :  { %v5355_v24 = vmul.f32 %v8628_v11, %v5353_v21  ;;  %v8630_v39 = vpop.eup %8629 }
0x1686   :  { %v11897_v10 = vadd.f32 %v5356_v44, %v5355_v24 }
0x1688   :  { %8631 = vtanh.f32 %v11897_v10  ;;  %v5542_v8 = vrot.slane %v11897_v10, 6  ;;  %v5798_v10 = vld [vmem:[#allocation4 + $0x7c0] sm:$0xff] }
0x1695   :  { %v8632_v53 = vpop.eup %8631 }
0x1696   :  { %v5359_v52 = vmul.f32 %v8632_v53, %v8630_v39  ;;  %v5802_v39 = vld [vmem:[#allocation4 + $0x7e0] sm:$0xff]  ;;  %v5804_v53 = vld [vmem:[#allocation4 + $0x7f0] sm:$0xff] }
0x1698   :  { %5360 = vst [vmem:[#allocation2 + $0x8] sm:$0xc] %v5359_v52  ;;  %v5362_v51 = vrot.slane %v5359_v52, 2  ;;  %v5799_v52 = vld [vmem:[#allocation4 + $0x7c8] sm:$0xff] }
0x169a   :  { %5429 = vmatmul.mubr.f32.vlgmr.msra.gmra.mxu0 %v5362_v51  ;;  %5500 = vmatmul.mubr.f32.vlgmr.msra.gmra.mxu1 %v5362_v51  ;;  %v5801_v51 = vld [vmem:[#allocation4 + $0x7d8] sm:$0xff] }
0x169b   :  { %5554 = vmatpush1.msra.mxu0 %v11612_v18  ;;  %5625 = vmatpush1.msra.mxu1 %v11615_v36  ;;  %v14030_v18 = vld [vmem:[#allocation38_spill] sm:$0xff]  ;;  %v14031_v36 = vld [vmem:[#allocation39_spill] sm:$0xff] }
0x169c   :  { %5555 = vmatprep.subr.mxu0 %v11618_v17  ;;  %5626 = vmatprep.subr.mxu1 %v11621_v50  ;;  %v14032_v17 = vld [vmem:[#allocation47_spill] sm:$0xff]  ;;  %v14033_v50 = vld [vmem:[#allocation46_spill] sm:$0xff] }
0x169d   :  { %5556 = vmatpush1.msra.mxu0 %v11624_v25  ;;  %5627 = vmatpush1.msra.mxu1 %v11627_v15  ;;  %v14034_v25 = vld [vmem:[#allocation49_spill] sm:$0xff]  ;;  %v14035_v15 = vld [vmem:[#allocation18_spill] sm:$0xff] }
0x169e   :  { %5557 = vmatprep.subr.mxu0 %v11630_v55  ;;  %5628 = vmatprep.subr.mxu1 %v11633_v60  ;;  %v14036_v55 = vld [vmem:[#allocation45_spill] sm:$0xff]  ;;  %v14037_v60 = vld [vmem:[#allocation48_spill] sm:$0xff] }
0x169f   :  { %5558 = vmatpush1.msra.mxu0 %v11636_v14  ;;  %5629 = vmatpush1.msra.mxu1 %v11639_v19  ;;  %v14038_v14 = vld [vmem:[#allocation35_spill] sm:$0xff]  ;;  %v14039_v19 = vld [vmem:[#allocation36_spill] sm:$0xff] }
0x16a0   :  { %5559 = vmatprep.subr.mxu0 %v11642_v1  ;;  %5630 = vmatprep.subr.mxu1 %v11645_v3  ;;  %v14040_v1 = vld [vmem:[#allocation37_spill] sm:$0xff]  ;;  %v14041_v3 = vld [vmem:[#allocation43_spill] sm:$0xff] }
0x16a1   :  { %5560 = vmatpush1.msra.mxu0 %v11648_v12  ;;  %5631 = vmatpush1.msra.mxu1 %v11651_v63  ;;  %v14042_v12 = vld [vmem:[#allocation41_spill] sm:$0xff]  ;;  %v14043_v63 = vld [vmem:[#allocation19_spill] sm:$0xff] }
0x16a2   :  { %5561 = vmatprep.subr.mxu0 %v11654_v6  ;;  %5632 = vmatprep.subr.mxu1 %v11657_v32  ;;  %v14044_v6 = vld [vmem:[#allocation40_spill] sm:$0xff]  ;;  %v14045_v32 = vld [vmem:[#allocation42_spill] sm:$0xff] }
0x16a3   :  { %5562 = vmatpush1.msra.mxu0 %v11660_v2  ;;  %5633 = vmatpush1.msra.mxu1 %v11663_v38  ;;  %v14046_v2 = vld [vmem:[#allocation20_spill] sm:$0xff]  ;;  %v14047_v38 = vld [vmem:[#allocation21_spill] sm:$0xff] }
0x16a4   :  { %5563 = vmatprep.subr.mxu0 %v11666_v23  ;;  %5634 = vmatprep.subr.mxu1 %v11669_v48  ;;  %v14048_v23 = vld [vmem:[#allocation22_spill] sm:$0xff]  ;;  %v14049_v48 = vld [vmem:[#allocation23_spill] sm:$0xff] }
0x16a5   :  { %5564 = vmatpush1.msra.mxu0 %v11672_v7  ;;  %5635 = vmatpush1.msra.mxu1 %v11675_v35  ;;  %v14050_v7 = vmov 0.0   ;;  %v5803_v35 = vld [vmem:[#allocation4 + $0x7e8] sm:$0xff] }
0x16a6   :  { %5565 = vmatprep.subr.mxu0 %v11678_v40  ;;  %5636 = vmatprep.subr.mxu1 %v11681_v45  ;;  %v5805_v40 = vld [vmem:[#allocation4 + $0x7f8] sm:$0xff] }
0x16a7   :  { %5566 = vmatpush1.msra.mxu0 %v11684_v26  ;;  %5637 = vmatpush1.msra.mxu1 %v11687_v20 }
0x16a8   :  { %5567 = vmatprep.subr.mxu0 %v11690_v57  ;;  %5638 = vmatprep.subr.mxu1 %v11693_v58 }
0x16a9   :  { %5568 = vmatpush1.msra.mxu0 %v11696_v46  ;;  %5639 = vmatpush1.msra.mxu1 %v11699_v34 }
0x16aa   :  { %5569 = vmatprep.subr.mxu0 %v11702_v43  ;;  %5640 = vmatprep.subr.mxu1 %v11705_v49 }
0x16ab   :  { %5570 = vmatpush1.msra.mxu0 %v11708_v56  ;;  %5641 = vmatpush1.msra.mxu1 %v11711_v59 }
0x16ac   :  { %5571 = vmatprep.subr.mxu0 %v11714_v9  ;;  %5642 = vmatprep.subr.mxu1 %v11717_v16 }
0x16ad   :  { %5572 = vmatpush1.msra.mxu0 %v11720_v27  ;;  %5643 = vmatpush1.msra.mxu1 %v11723_v28 }
0x16ae   :  { %5573 = vmatprep.subr.mxu0 %v11726_v30  ;;  %5644 = vmatprep.subr.mxu1 %v11729_v31 }
0x16af   :  { %5574 = vmatpush1.msra.mxu0 %v11732_v41  ;;  %5645 = vmatpush1.msra.mxu1 %v11735_v42 }
0x16b0   :  { %5575 = vmatprep.subr.mxu0 %v14030_v18  ;;  %5646 = vmatprep.subr.mxu1 %v14031_v36  ;;  %v5800_v18 = vld [vmem:[#allocation4 + $0x7d0] sm:$0xff]  ;;  %v5795_v36 = vld [vmem:[#allocation4 + $0x7a8] sm:$0xff] }
0x16b1   :  { %5576 = vmatpush1.msra.mxu0 %v14032_v17  ;;  %5647 = vmatpush1.msra.mxu1 %v14033_v50  ;;  %v5797_v17 = vld [vmem:[#allocation4 + $0x7b8] sm:$0xff]  ;;  %v5794_v50 = vld [vmem:[#allocation4 + $0x7a0] sm:$0xff] }
0x16b2   :  { %5577 = vmatprep.subr.mxu0 %v14034_v25  ;;  %5648 = vmatprep.subr.mxu1 %v14035_v15  ;;  %v5796_v25 = vld [vmem:[#allocation4 + $0x7b0] sm:$0xff]  ;;  %v5791_v15 = vld [vmem:[#allocation4 + $0x788] sm:$0xff] }
0x16b3   :  { %5578 = vmatpush1.msra.mxu0 %v14036_v55  ;;  %5649 = vmatpush1.msra.mxu1 %v14037_v60  ;;  %v5793_v55 = vld [vmem:[#allocation4 + $0x798] sm:$0xff]  ;;  %v5790_v60 = vld [vmem:[#allocation4 + $0x780] sm:$0xff] }
0x16b4   :  { %5579 = vmatprep.subr.mxu0 %v14038_v14  ;;  %5650 = vmatprep.subr.mxu1 %v14039_v19  ;;  %v5792_v14 = vld [vmem:[#allocation4 + $0x790] sm:$0xff]  ;;  %v5787_v19 = vld [vmem:[#allocation4 + $0x768] sm:$0xff] }
0x16b5   :  { %5580 = vmatpush1.msra.mxu0 %v14040_v1  ;;  %5651 = vmatpush1.msra.mxu1 %v14041_v3  ;;  %v5789_v1 = vld [vmem:[#allocation4 + $0x778] sm:$0xff]  ;;  %v5786_v3 = vld [vmem:[#allocation4 + $0x760] sm:$0xff] }
0x16b6   :  { %5581 = vmatprep.subr.mxu0 %v14042_v12  ;;  %5652 = vmatprep.subr.mxu1 %v14043_v63  ;;  %v5788_v12 = vld [vmem:[#allocation4 + $0x770] sm:$0xff]  ;;  %v5783_v63 = vld [vmem:[#allocation4 + $0x748] sm:$0xff] }
0x16b7   :  { %5582 = vmatpush1.msra.mxu0 %v14044_v6  ;;  %5653 = vmatpush1.msra.mxu1 %v14045_v32  ;;  %v5785_v6 = vld [vmem:[#allocation4 + $0x758] sm:$0xff]  ;;  %v5782_v32 = vld [vmem:[#allocation4 + $0x740] sm:$0xff] }
0x16b8   :  { %5583 = vmatprep.subr.mxu0 %v14046_v2  ;;  %5654 = vmatprep.subr.mxu1 %v14047_v38  ;;  %v5784_v2 = vld [vmem:[#allocation4 + $0x750] sm:$0xff]  ;;  %v5779_v38 = vld [vmem:[#allocation4 + $0x728] sm:$0xff] }
0x16b9   :  { %5584 = vmatpush1.msra.mxu0 %v14048_v23  ;;  %5655 = vmatpush1.msra.mxu1 %v14049_v48  ;;  %v5781_v23 = vld [vmem:[#allocation4 + $0x738] sm:$0xff]  ;;  %v5778_v48 = vld [vmem:[#allocation4 + $0x720] sm:$0xff] }
0x16ba   :  { %5617 = vmatprep.mubr.f32.mxu0 %v14050_v7  ;;  %5688 = vmatprep.mubr.f32.mxu1 %v14050_v7 }
0x16bb   :  { %5829 = vmatprep.subr.mxu0 %v5803_v35  ;;  %5906 = vmatprep.subr.mxu1 %v5805_v40  ;;  %v5780_v35 = vld [vmem:[#allocation4 + $0x730] sm:$0xff]  ;;  %v5775_v40 = vld [vmem:[#allocation4 + $0x708] sm:$0xff] }
0x175a   :  { %v5430_v45 = vpop.f32.mrf.mxu0  ;;  %v5501_v58 = vpop.f32.mrf.mxu1 }
0x175b   :  { %v5510_v26 = vrot.slane %v5430_v45, 4  ;;  %v5512_v16 = vrot.slane %v5501_v58, 4  ;;  %v5777_v45 = vld [vmem:[#allocation4 + $0x718] sm:$0xff] }
0x175c   :  { %v5432_v20 = vpop.f32.mrf.mxu0  ;;  %v5503_v56 = vpop.f32.mrf.mxu1  ;;  %v5773_v58 = vld [vmem:[#allocation4 + $0x6f8] sm:$0xff] }
0x175d   :  { %v5518_v57 = vadd.f32 %v5510_v26, %v14027_v13  ;;  %v5511_v46 = vrot.slane %v5432_v20, 4  ;;  %v5513_v59 = vrot.slane %v5503_v56, 4  ;;  %v5520_v30 = vadd.f32 %v5512_v16, %v11819_v5  ;;  %v5774_v26 = vld [vmem:[#allocation4 + $0x700] sm:$0xff]  ;;  %v5776_v20 = vld [vmem:[#allocation4 + $0x710] sm:$0xff]  ;;  %v5765_v16 = vld [vmem:[#allocation4 + $0x6b8] sm:$0xff] }
0x175e   :  { %v5766_v56 = vld [vmem:[#allocation4 + $0x6c0] sm:$0xff] }
0x175f   :  { %v8090_v34 = vmul.f32 -1.442695, %v5518_v57  ;;  %v5519_v43 = vadd.f32 %v5511_v46, %v14028_v33  ;;  %v5521_v9 = vadd.f32 %v5513_v59, %v14029_v22  ;;  %v5771_v57 = vld [vmem:[#allocation4 + $0x6e8] sm:$0xff]  ;;  %v5770_v46 = vld [vmem:[#allocation4 + $0x6e0] sm:$0xff]  ;;  %v5768_v59 = vld [vmem:[#allocation4 + $0x6d0] sm:$0xff] }
0x1761   :  { %8633 = vpow2.f32 %v8090_v34  ;;  %v8091_v49 = vmul.f32 -1.442695, %v5519_v43  ;;  %v8092_v27 = vmul.f32 -1.442695, %v5521_v9  ;;  %v5772_v34 = vld [vmem:[#allocation4 + $0x6f0] sm:$0xff]  ;;  %v5767_v43 = vld [vmem:[#allocation4 + $0x6c8] sm:$0xff] }
0x1762   :  { %v5763_v9 = vld [vmem:[#allocation4 + $0x6a8] sm:$0xff] }
0x1763   :  { %8635 = vpow2.f32 %v8091_v49  ;;  %v5769_v49 = vld [vmem:[#allocation4 + $0x6d8] sm:$0xff] }
0x1764   :  { %8637 = vpow2.f32 %v8092_v27  ;;  %v5762_v27 = vld [vmem:[#allocation4 + $0x6a0] sm:$0xff] }
0x176e   :  { %v8634_v28 = vpop.eup %8633 }
0x176f   :  { %v5525_v31 = vadd.f32 1.0, %v8634_v28  ;;  %v5764_v28 = vld [vmem:[#allocation4 + $0x6b0] sm:$0xff] }
0x1770   :  { %v8636_v41 = vpop.eup %8635 }
0x1771   :  { %8639 = vrcp.f32 %v5525_v31  ;;  %v5531_v42 = vadd.f32 1.0, %v8636_v41  ;;  %v8638_v0 = vpop.eup %8637  ;;  %v5761_v31 = vld [vmem:[#allocation4 + $0x698] sm:$0xff]  ;;  %v5758_v41 = vld [vmem:[#allocation4 + $0x680] sm:$0xff] }
0x1772   :  { %8641 = vtanh.f32 %v5520_v30  ;;  %v5538_v54 = vadd.f32 1.0, %v8638_v0  ;;  %v5759_v30 = vld [vmem:[#allocation4 + $0x688] sm:$0xff] }
0x1773   :  { %8643 = vrcp.f32 %v5531_v42  ;;  %v5760_v42 = vld [vmem:[#allocation4 + $0x690] sm:$0xff]  ;;  %v5755_v0 = vld [vmem:[#allocation4 + $0x668] sm:$0xff] }
0x1774   :  { %8645 = vrcp.f32 %v5538_v54  ;;  %v5753_v54 = vld [vmem:[#allocation4 + $0x658] sm:$0xff] }
0x177e   :  { %v8640_v61 = vpop.eup %8639 }
0x177f   :  { %v8642_v47 = vpop.eup %8641 }
0x1780   :  { %v8644_v4 = vpop.eup %8643  ;;  %v5545_v62 = vmul.f32 %v8642_v47, %v8640_v61  ;;  %v5757_v61 = vld [vmem:[#allocation4 + $0x678] sm:$0xff]  ;;  %v5754_v47 = vld [vmem:[#allocation4 + $0x660] sm:$0xff] }
0x1781   :  { %v5544_v37 = vmul.f32 %v8644_v4, %v5542_v8  ;;  %v8646_v11 = vpop.eup %8645  ;;  %v5756_v8 = vld [vmem:[#allocation4 + $0x670] sm:$0xff]  ;;  %v5751_v4 = vld [vmem:[#allocation4 + $0x648] sm:$0xff] }
0x1783   :  { %v11969_v21 = vadd.f32 %v5545_v62, %v5544_v37  ;;  %v5750_v62 = vld [vmem:[#allocation4 + $0x640] sm:$0xff]  ;;  %v5752_v37 = vld [vmem:[#allocation4 + $0x650] sm:$0xff] }
0x1785   :  { %8647 = vtanh.f32 %v11969_v21 }
0x1792   :  { %v8648_v29 = vpop.eup %8647 }
0x1793   :  { %v5548_v44 = vmul.f32 %v8648_v29, %v8646_v11  ;;  %v5747_v11 = vld [vmem:[#allocation4 + $0x628] sm:$0xff]  ;;  %v5749_v29 = vld [vmem:[#allocation4 + $0x638] sm:$0xff] }
0x1795   :  { %5549 = vst [vmem:[#allocation2 + $0x8] sm:$0x30] %v5548_v44  ;;  %v5551_v24 = vrot.slane %v5548_v44, 4  ;;  %v5746_v44 = vld [vmem:[#allocation4 + $0x620] sm:$0xff] }
0x1797   :  { %5618 = vmatmul.mubr.f32.vlgmr.msra.gmra.mxu0 %v5551_v24  ;;  %5689 = vmatmul.mubr.f32.vlgmr.msra.gmra.mxu1 %v5551_v24  ;;  %v5748_v24 = vld [vmem:[#allocation4 + $0x630] sm:$0xff] }
0x1798   :  { %5830 = vmatpush1.msra.mxu0 %v5802_v39  ;;  %5907 = vmatpush1.msra.mxu1 %v5804_v53  ;;  %v5743_v39 = vld [vmem:[#allocation4 + $0x608] sm:$0xff]  ;;  %v5745_v53 = vld [vmem:[#allocation4 + $0x618] sm:$0xff] }
0x1799   :  { %5831 = vmatprep.subr.mxu0 %v5799_v52  ;;  %5908 = vmatprep.subr.mxu1 %v5801_v51  ;;  %v5742_v52 = vld [vmem:[#allocation4 + $0x600] sm:$0xff]  ;;  %v5744_v51 = vld [vmem:[#allocation4 + $0x610] sm:$0xff] }
0x179a   :  { %5832 = vmatpush1.msra.mxu0 %v5798_v10  ;;  %5909 = vmatpush1.msra.mxu1 %v5800_v18  ;;  %v5739_v10 = vld [vmem:[#allocation2] sm:$0xff] }
0x179b   :  { %5833 = vmatprep.subr.mxu0 %v5795_v36  ;;  %5910 = vmatprep.subr.mxu1 %v5797_v17  ;;  %v11976_v18 = vld [vmem:[#allocation7 + $0x7e8] sm:$0xff]  ;;  %v11978_v36 = vld [vmem:[#allocation7 + $0x7f8] sm:$0xff]  ;;  %v11982_v17 = vld [vmem:[#allocation7 + $0x7e0] sm:$0xff] }
0x179c   :  { %5834 = vmatpush1.msra.mxu0 %v5794_v50  ;;  %5911 = vmatpush1.msra.mxu1 %v5796_v25  ;;  %14051 = vst [vmem:[#allocation27_spill] sm:$0xff] %v11976_v18  ;;  %14052 = vst [vmem:[#allocation28_spill] sm:$0xff] %v11978_v36  ;;  %v11984_v50 = vld [vmem:[#allocation7 + $0x7f0] sm:$0xff]  ;;  %v11988_v25 = vld [vmem:[#allocation7 + $0x7c8] sm:$0xff] }
0x179d   :  { %5835 = vmatprep.subr.mxu0 %v5791_v15  ;;  %5912 = vmatprep.subr.mxu1 %v5793_v55  ;;  %v11990_v15 = vld [vmem:[#allocation7 + $0x7d8] sm:$0xff]  ;;  %v11994_v55 = vld [vmem:[#allocation7 + $0x7c0] sm:$0xff] }
0x179e   :  { %5836 = vmatpush1.msra.mxu0 %v5790_v60  ;;  %5913 = vmatpush1.msra.mxu1 %v5792_v14  ;;  %v11996_v60 = vld [vmem:[#allocation7 + $0x7d0] sm:$0xff]  ;;  %v12000_v14 = vld [vmem:[#allocation7 + $0x7a8] sm:$0xff] }
0x179f   :  { %5837 = vmatprep.subr.mxu0 %v5787_v19  ;;  %5914 = vmatprep.subr.mxu1 %v5789_v1  ;;  %v12002_v19 = vld [vmem:[#allocation7 + $0x7b8] sm:$0xff]  ;;  %v12006_v1 = vld [vmem:[#allocation7 + $0x7a0] sm:$0xff] }
0x17a0   :  { %5838 = vmatpush1.msra.mxu0 %v5786_v3  ;;  %5915 = vmatpush1.msra.mxu1 %v5788_v12  ;;  %v12008_v3 = vld [vmem:[#allocation7 + $0x7b0] sm:$0xff]  ;;  %v12012_v12 = vld [vmem:[#allocation7 + $0x788] sm:$0xff] }
0x17a1   :  { %5839 = vmatprep.subr.mxu0 %v5783_v63  ;;  %5916 = vmatprep.subr.mxu1 %v5785_v6  ;;  %v12014_v63 = vld [vmem:[#allocation7 + $0x798] sm:$0xff]  ;;  %v12018_v6 = vld [vmem:[#allocation7 + $0x780] sm:$0xff] }
0x17a2   :  { %5840 = vmatpush1.msra.mxu0 %v5782_v32  ;;  %5917 = vmatpush1.msra.mxu1 %v5784_v2  ;;  %v12020_v32 = vld [vmem:[#allocation7 + $0x790] sm:$0xff]  ;;  %v12024_v2 = vld [vmem:[#allocation7 + $0x768] sm:$0xff] }
0x17a3   :  { %5841 = vmatprep.subr.mxu0 %v5779_v38  ;;  %5918 = vmatprep.subr.mxu1 %v5781_v23  ;;  %v12026_v38 = vld [vmem:[#allocation7 + $0x778] sm:$0xff]  ;;  %v12030_v23 = vld [vmem:[#allocation7 + $0x760] sm:$0xff] }
0x17a4   :  { %5842 = vmatpush1.msra.mxu0 %v5778_v48  ;;  %5919 = vmatpush1.msra.mxu1 %v5780_v35  ;;  %v12032_v48 = vld [vmem:[#allocation7 + $0x770] sm:$0xff]  ;;  %v12036_v35 = vld [vmem:[#allocation7 + $0x748] sm:$0xff] }
0x17a5   :  { %5843 = vmatprep.subr.mxu0 %v5775_v40  ;;  %5920 = vmatprep.subr.mxu1 %v5777_v45  ;;  %v12038_v40 = vld [vmem:[#allocation7 + $0x758] sm:$0xff]  ;;  %v12042_v45 = vld [vmem:[#allocation7 + $0x740] sm:$0xff] }
0x17a6   :  { %5844 = vmatpush1.msra.mxu0 %v5774_v26  ;;  %5921 = vmatpush1.msra.mxu1 %v5776_v20  ;;  %v12044_v26 = vld [vmem:[#allocation7 + $0x750] sm:$0xff]  ;;  %v12048_v20 = vld [vmem:[#allocation7 + $0x728] sm:$0xff] }
0x17a7   :  { %5845 = vmatprep.subr.mxu0 %v5771_v57  ;;  %5922 = vmatprep.subr.mxu1 %v5773_v58  ;;  %v12050_v57 = vld [vmem:[#allocation7 + $0x738] sm:$0xff]  ;;  %v12054_v58 = vld [vmem:[#allocation7 + $0x720] sm:$0xff] }
0x17a8   :  { %5846 = vmatpush1.msra.mxu0 %v5770_v46  ;;  %5923 = vmatpush1.msra.mxu1 %v5772_v34  ;;  %v12056_v46 = vld [vmem:[#allocation7 + $0x730] sm:$0xff]  ;;  %v12060_v34 = vld [vmem:[#allocation7 + $0x708] sm:$0xff] }
0x17a9   :  { %5847 = vmatprep.subr.mxu0 %v5767_v43  ;;  %5924 = vmatprep.subr.mxu1 %v5769_v49  ;;  %v12062_v43 = vld [vmem:[#allocation7 + $0x718] sm:$0xff]  ;;  %v12066_v49 = vld [vmem:[#allocation7 + $0x700] sm:$0xff] }
0x17aa   :  { %5848 = vmatpush1.msra.mxu0 %v5766_v56  ;;  %5925 = vmatpush1.msra.mxu1 %v5768_v59  ;;  %v12068_v56 = vld [vmem:[#allocation7 + $0x710] sm:$0xff]  ;;  %v12072_v59 = vld [vmem:[#allocation7 + $0x6e8] sm:$0xff] }
0x17ab   :  { %5849 = vmatprep.subr.mxu0 %v5763_v9  ;;  %5926 = vmatprep.subr.mxu1 %v5765_v16  ;;  %v12074_v9 = vld [vmem:[#allocation7 + $0x6f8] sm:$0xff]  ;;  %v12078_v16 = vld [vmem:[#allocation7 + $0x6e0] sm:$0xff] }
0x17ac   :  { %5850 = vmatpush1.msra.mxu0 %v5762_v27  ;;  %5927 = vmatpush1.msra.mxu1 %v5764_v28  ;;  %v12080_v27 = vld [vmem:[#allocation7 + $0x6f0] sm:$0xff]  ;;  %v12084_v28 = vld [vmem:[#allocation7 + $0x6c8] sm:$0xff] }
0x17ad   :  { %5851 = vmatprep.subr.mxu0 %v5759_v30  ;;  %5928 = vmatprep.subr.mxu1 %v5761_v31  ;;  %v12086_v30 = vld [vmem:[#allocation7 + $0x6d8] sm:$0xff]  ;;  %v12090_v31 = vld [vmem:[#allocation7 + $0x6c0] sm:$0xff] }
0x17ae   :  { %5852 = vmatpush1.msra.mxu0 %v5758_v41  ;;  %5929 = vmatpush1.msra.mxu1 %v5760_v42  ;;  %v12092_v41 = vld [vmem:[#allocation7 + $0x6d0] sm:$0xff]  ;;  %v12094_v42 = vld [vmem:[#allocation7 + $0x6a8] sm:$0xff] }
0x17af   :  { %5853 = vmatprep.subr.mxu0 %v5755_v0  ;;  %5930 = vmatprep.subr.mxu1 %v5757_v61  ;;  %v12098_v0 = vld [vmem:[#allocation7 + $0x6b8] sm:$0xff]  ;;  %v12100_v61 = vld [vmem:[#allocation7 + $0x6a0] sm:$0xff] }
0x17b0   :  { %5854 = vmatpush1.msra.mxu0 %v5754_v47  ;;  %5931 = vmatpush1.msra.mxu1 %v5756_v8  ;;  %v12102_v47 = vld [vmem:[#allocation7 + $0x6b0] sm:$0xff]  ;;  %v12106_v8 = vld [vmem:[#allocation7 + $0x688] sm:$0xff] }
0x17b1   :  { %5855 = vmatprep.subr.mxu0 %v5751_v4  ;;  %5932 = vmatprep.subr.mxu1 %v5753_v54  ;;  %14053 = vst [vmem:[#allocation30_spill] sm:$0xff] %v12102_v47  ;;  %14054 = vst [vmem:[#allocation33_spill] sm:$0xff] %v12106_v8  ;;  %v12108_v4 = vld [vmem:[#allocation7 + $0x698] sm:$0xff]  ;;  %v12110_v54 = vld [vmem:[#allocation7 + $0x680] sm:$0xff] }
0x17b2   :  { %5856 = vmatpush1.msra.mxu0 %v5750_v62  ;;  %5933 = vmatpush1.msra.mxu1 %v5752_v37  ;;  %14055 = vst [vmem:[#allocation32_spill] sm:$0xff] %v12108_v4  ;;  %14056 = vst [vmem:[#allocation44_spill] sm:$0xff] %v12110_v54  ;;  %v12114_v62 = vld [vmem:[#allocation7 + $0x690] sm:$0xff]  ;;  %v12116_v37 = vld [vmem:[#allocation7 + $0x668] sm:$0xff] }
0x17b3   :  { %5857 = vmatprep.subr.mxu0 %v5747_v11  ;;  %5934 = vmatprep.subr.mxu1 %v5749_v29  ;;  %14057 = vst [vmem:[#allocation29_spill] sm:$0xff] %v12114_v62  ;;  %14058 = vst [vmem:[#allocation31_spill] sm:$0xff] %v12116_v37  ;;  %v12118_v11 = vld [vmem:[#allocation7 + $0x678] sm:$0xff]  ;;  %v12122_v29 = vld [vmem:[#allocation7 + $0x660] sm:$0xff] }
0x17b4   :  { %5858 = vmatpush1.msra.mxu0 %v5746_v44  ;;  %5935 = vmatpush1.msra.mxu1 %v5748_v24  ;;  %14059 = vst [vmem:[#allocation34_spill] sm:$0xff] %v12118_v11  ;;  %14060 = vst [vmem:[#allocation24_spill] sm:$0xff] %v12122_v29  ;;  %v12124_v44 = vld [vmem:[#allocation7 + $0x670] sm:$0xff]  ;;  %v12128_v24 = vld [vmem:[#allocation7 + $0x648] sm:$0xff] }
0x17b5   :  { %5859 = vmatprep.subr.mxu0 %v5743_v39  ;;  %5936 = vmatprep.subr.mxu1 %v5745_v53  ;;  %14061 = vst [vmem:[#allocation25_spill] sm:$0xff] %v12124_v44  ;;  %14062 = vst [vmem:[#allocation26_spill] sm:$0xff] %v12128_v24  ;;  %v12130_v39 = vld [vmem:[#allocation7 + $0x658] sm:$0xff]  ;;  %v12134_v53 = vld [vmem:[#allocation7 + $0x640] sm:$0xff] }
0x17b6   :  { %5860 = vmatpush1.msra.mxu0 %v5742_v52  ;;  %5893 = vmatprep.mubr.f32.mxu0 %v14050_v7  ;;  %14063 = vst [vmem:[#allocation38_spill] sm:$0xff] %v12130_v39  ;;  %14064 = vst [vmem:[#allocation39_spill] sm:$0xff] %v12134_v53  ;;  %v12136_v52 = vld [vmem:[#allocation7 + $0x650] sm:$0xff] }
0x17b7   :  { %5937 = vmatpush1.msra.mxu1 %v5744_v51  ;;  %5970 = vmatprep.mubr.f32.mxu1 %v14050_v7  ;;  %14065 = vst [vmem:[#allocation47_spill] sm:$0xff] %v12136_v52  ;;  %v12142_v51 = vld [vmem:[#allocation7 + $0x628] sm:$0xff] }
0x17b8   :  { %5894 = vmatmul.mubr.f32.vlgmr.msra.gmra.mxu0 %v5739_v10  ;;  %5971 = vmatmul.mubr.f32.vlgmr.msra.gmra.mxu1 %v5739_v10  ;;  %14066 = vst [vmem:[#allocation46_spill] sm:$0xff] %v12142_v51  ;;  %v12144_v10 = vld [vmem:[#allocation7 + $0x638] sm:$0xff] }
0x17b9   :  { %5899 = vmatprep.mubr.f32.mxu0 %v14050_v7  ;;  %5976 = vmatprep.mubr.f32.mxu1 %v14050_v7  ;;  %14067 = vst [vmem:[#allocation49_spill] sm:$0xff] %v12144_v10 }
0x17ba   :  { %6048 = vmatprep.subr.mxu0 %v11976_v18  ;;  %6119 = vmatprep.subr.mxu1 %v11978_v36 }
0x17bb   :  { %6049 = vmatpush1.msra.mxu0 %v11982_v17  ;;  %6120 = vmatpush1.msra.mxu1 %v11984_v50 }
0x17bc   :  { %6050 = vmatprep.subr.mxu0 %v11988_v25  ;;  %6121 = vmatprep.subr.mxu1 %v11990_v15 }
0x17bd   :  { %6051 = vmatpush1.msra.mxu0 %v11994_v55  ;;  %6122 = vmatpush1.msra.mxu1 %v11996_v60 }
0x17be   :  { %6052 = vmatprep.subr.mxu0 %v12000_v14  ;;  %6123 = vmatprep.subr.mxu1 %v12002_v19 }
0x17bf   :  { %6053 = vmatpush1.msra.mxu0 %v12006_v1  ;;  %6124 = vmatpush1.msra.mxu1 %v12008_v3 }
0x17c0   :  { %6054 = vmatprep.subr.mxu0 %v12012_v12  ;;  %6125 = vmatprep.subr.mxu1 %v12014_v63 }
0x17c1   :  { %6055 = vmatpush1.msra.mxu0 %v12018_v6  ;;  %6126 = vmatpush1.msra.mxu1 %v12020_v32 }
0x17c2   :  { %6056 = vmatprep.subr.mxu0 %v12024_v2  ;;  %6127 = vmatprep.subr.mxu1 %v12026_v38 }
0x17c3   :  { %6057 = vmatpush1.msra.mxu0 %v12030_v23  ;;  %6128 = vmatpush1.msra.mxu1 %v12032_v48 }
0x17c4   :  { %6058 = vmatprep.subr.mxu0 %v12036_v35  ;;  %6129 = vmatprep.subr.mxu1 %v12038_v40 }
0x17c5   :  { %6059 = vmatpush1.msra.mxu0 %v12042_v45  ;;  %6130 = vmatpush1.msra.mxu1 %v12044_v26 }
0x17c6   :  { %6060 = vmatprep.subr.mxu0 %v12048_v20  ;;  %6131 = vmatprep.subr.mxu1 %v12050_v57 }
0x17c7   :  { %6061 = vmatpush1.msra.mxu0 %v12054_v58  ;;  %6132 = vmatpush1.msra.mxu1 %v12056_v46 }
0x17c8   :  { %6062 = vmatprep.subr.mxu0 %v12060_v34  ;;  %6133 = vmatprep.subr.mxu1 %v12062_v43 }
0x17c9   :  { %6063 = vmatpush1.msra.mxu0 %v12066_v49  ;;  %6134 = vmatpush1.msra.mxu1 %v12068_v56 }
0x17ca   :  { %6064 = vmatprep.subr.mxu0 %v12072_v59  ;;  %6135 = vmatprep.subr.mxu1 %v12074_v9 }
0x17cb   :  { %6065 = vmatpush1.msra.mxu0 %v12078_v16  ;;  %6136 = vmatpush1.msra.mxu1 %v12080_v27 }
0x17cc   :  { %6066 = vmatprep.subr.mxu0 %v12084_v28  ;;  %6137 = vmatprep.subr.mxu1 %v12086_v30 }
0x17cd   :  { %6067 = vmatpush1.msra.mxu0 %v12090_v31  ;;  %6138 = vmatpush1.msra.mxu1 %v12092_v41 }
0x17ce   :  { %6068 = vmatprep.subr.mxu0 %v12094_v42  ;;  %6139 = vmatprep.subr.mxu1 %v12098_v0 }
0x17cf   :  { %6069 = vmatpush1.msra.mxu0 %v12100_v61  ;;  %6140 = vmatpush1.msra.mxu1 %v12102_v47 }
0x17d0   :  { %6070 = vmatprep.subr.mxu0 %v12106_v8  ;;  %6141 = vmatprep.subr.mxu1 %v12108_v4 }
0x17d1   :  { %6071 = vmatpush1.msra.mxu0 %v12110_v54  ;;  %6142 = vmatpush1.msra.mxu1 %v12114_v62  ;;  %v12146_v62 = vld [vmem:[#allocation7 + $0x620] sm:$0xff] }
0x17d2   :  { %6072 = vmatprep.subr.mxu0 %v12116_v37  ;;  %6143 = vmatprep.subr.mxu1 %v12118_v11  ;;  %14068 = vst [vmem:[#allocation18_spill] sm:$0xff] %v12146_v62  ;;  %v12150_v11 = vld [vmem:[#allocation7 + $0x630] sm:$0xff]  ;;  %v12152_v37 = vld [vmem:[#allocation7 + $0x608] sm:$0xff] }
0x17d3   :  { %6073 = vmatpush1.msra.mxu0 %v12122_v29  ;;  %6144 = vmatpush1.msra.mxu1 %v12124_v44  ;;  %14069 = vst [vmem:[#allocation45_spill] sm:$0xff] %v12150_v11  ;;  %14070 = vst [vmem:[#allocation48_spill] sm:$0xff] %v12152_v37  ;;  %v12154_v29 = vld [vmem:[#allocation7 + $0x618] sm:$0xff] }
0x17d4   :  { %6074 = vmatprep.subr.mxu0 %v12128_v24  ;;  %6145 = vmatprep.subr.mxu1 %v12130_v39  ;;  %14071 = vst [vmem:[#allocation35_spill] sm:$0xff] %v12154_v29  ;;  %v12158_v39 = vld [vmem:[#allocation7 + $0x600] sm:$0xff]  ;;  %v12160_v24 = vld [vmem:[#allocation7 + $0x610] sm:$0xff] }
0x17d5   :  { %6075 = vmatpush1.msra.mxu0 %v12134_v53  ;;  %6146 = vmatpush1.msra.mxu1 %v12136_v52  ;;  %14072 = vst [vmem:[#allocation36_spill] sm:$0xff] %v12158_v39  ;;  %14073 = vst [vmem:[#allocation37_spill] sm:$0xff] %v12160_v24 }
0x17d6   :  { %6076 = vmatprep.subr.mxu0 %v12142_v51  ;;  %6147 = vmatprep.subr.mxu1 %v12144_v10 }
0x17d7   :  { %6077 = vmatpush1.msra.mxu0 %v12146_v62  ;;  %6148 = vmatpush1.msra.mxu1 %v12150_v11 }
0x17d8   :  { %6078 = vmatprep.subr.mxu0 %v12152_v37  ;;  %6149 = vmatprep.subr.mxu1 %v12154_v29 }
0x17d9   :  { %6079 = vmatpush1.msra.mxu0 %v12158_v39  ;;  %6150 = vmatpush1.msra.mxu1 %v12160_v24 }
0x17da   :  { %6219 = vmatprep.subr.mxu0 %v11976_v18  ;;  %6290 = vmatprep.subr.mxu1 %v11978_v36 }
0x1857   :  { %v5619_v10 = vpop.f32.mrf.mxu0  ;;  %v5690_v62 = vpop.f32.mrf.mxu1 }
0x1858   :  { %v5699_v51 = vrot.slane %v5619_v10, 2  ;;  %v5701_v18 = vrot.slane %v5690_v62, 2 }
0x1859   :  { %v5621_v52 = vpop.f32.mrf.mxu0  ;;  %v5692_v54 = vpop.f32.mrf.mxu1 }
0x185a   :  { %v5707_v53 = vadd.f32 %v5699_v51, %v14027_v13  ;;  %v5700_v44 = vrot.slane %v5621_v52, 2  ;;  %v5702_v39 = vrot.slane %v5692_v54, 2  ;;  %v5709_v10 = vadd.f32 %v5701_v18, %v11819_v5  ;;  %v14079_v52 = vld [vmem:[#allocation31_spill] sm:$0xff]  ;;  %v14080_v51 = vld [vmem:[#allocation34_spill] sm:$0xff] }
0x185c   :  { %v8093_v11 = vmul.f32 -1.442695, %v5707_v53  ;;  %v5708_v37 = vadd.f32 %v5700_v44, %v14028_v33  ;;  %v5710_v24 = vadd.f32 %v5702_v39, %v14029_v22  ;;  %v14077_v39 = vld [vmem:[#allocation44_spill] sm:$0xff]  ;;  %v14078_v53 = vld [vmem:[#allocation29_spill] sm:$0xff] }
0x185e   :  { %8649 = vpow2.f32 %v8093_v11  ;;  %v8094_v29 = vmul.f32 -1.442695, %v5708_v37  ;;  %v8095_v4 = vmul.f32 -1.442695, %v5710_v24 }
0x1860   :  { %8651 = vpow2.f32 %v8094_v29  ;;  %v5731_v29 = vrot.slane %v11969_v21, 6  ;;  %v14074_v21 = vld [vmem:[#allocation30_spill] sm:$0xff] }
0x1861   :  { %8653 = vpow2.f32 %v8095_v4  ;;  %v14076_v4 = vld [vmem:[#allocation32_spill] sm:$0xff] }
0x186b   :  { %v8650_v36 = vpop.eup %8649 }
0x186c   :  { %v5714_v8 = vadd.f32 1.0, %v8650_v36 }
0x186d   :  { %v8652_v47 = vpop.eup %8651 }
0x186e   :  { %8655 = vrcp.f32 %v5714_v8  ;;  %v5720_v13 = vadd.f32 1.0, %v8652_v47  ;;  %v8654_v33 = vpop.eup %8653  ;;  %v14075_v47 = vld [vmem:[#allocation33_spill] sm:$0xff] }
0x186f   :  { %8657 = vtanh.f32 %v5709_v10  ;;  %v5727_v44 = vadd.f32 1.0, %v8654_v33  ;;  %v14081_v10 = vld [vmem:[#allocation24_spill] sm:$0xff]  ;;  %v14083_v33 = vld [vmem:[#allocation26_spill] sm:$0xff] }
0x1870   :  { %8659 = vrcp.f32 %v5720_v13  ;;  %v14082_v13 = vld [vmem:[#allocation25_spill] sm:$0xff] }
0x1871   :  { %8661 = vrcp.f32 %v5727_v44  ;;  %v14088_v44 = vld [vmem:[#allocation49_spill] sm:$0xff] }
0x187b   :  { %v8656_v11 = vpop.eup %8655 }
0x187c   :  { %v8658_v37 = vpop.eup %8657 }
0x187d   :  { %v8660_v54 = vpop.eup %8659  ;;  %v5734_v22 = vmul.f32 %v8658_v37, %v8656_v11  ;;  %v14084_v11 = vld [vmem:[#allocation38_spill] sm:$0xff]  ;;  %v14085_v37 = vld [vmem:[#allocation39_spill] sm:$0xff] }
0x187e   :  { %v5733_v62 = vmul.f32 %v8660_v54, %v5731_v29  ;;  %v8662_v5 = vpop.eup %8661  ;;  %v14086_v29 = vld [vmem:[#allocation47_spill] sm:$0xff]  ;;  %v14087_v54 = vld [vmem:[#allocation46_spill] sm:$0xff] }
0x1880   :  { %v5735_v24 = vadd.f32 %v5734_v22, %v5733_v62  ;;  %v14089_v22 = vld [vmem:[#allocation18_spill] sm:$0xff]  ;;  %v14090_v62 = vld [vmem:[#allocation45_spill] sm:$0xff] }
0x1882   :  { %8663 = vtanh.f32 %v5735_v24  ;;  %v14091_v24 = vld [vmem:[#allocation48_spill] sm:$0xff] }
0x188f   :  { %v8664_v18 = vpop.eup %8663 }
0x1890   :  { %v5737_v36 = vmul.f32 %v8664_v18, %v8662_v5  ;;  %v14092_v5 = vld [vmem:[#allocation35_spill] sm:$0xff]  ;;  %v14093_v18 = vld [vmem:[#allocation36_spill] sm:$0xff] }
0x1892   :  { %5738 = vst [vmem:[#allocation2 + $0x8] sm:$0xc0] %v5737_v36  ;;  %v14094_v36 = vld [vmem:[#allocation37_spill] sm:$0xff] }
0x1899   :  { %v5740_v8 = vld [vmem:[#allocation2 + $0x8] sm:$0xff] }
0x189a   :  { %5900 = vmatmul.mubr.f32.gmra.mxu0 %v5740_v8  ;;  %5977 = vmatmul.mubr.f32.gmra.mxu1 %v5740_v8  ;;  %v14095_v8 = vld [vmem:[#allocation27_spill] sm:$0xff] }
0x189b   :  { %6112 = vmatprep.mubr.f32.mxu0 %v14050_v7  ;;  %6183 = vmatprep.mubr.f32.mxu1 %v14050_v7 }
0x189e   :  { %6113 = vmatmul.mubr.f32.vlgmr.msra.gmra.mxu0 %v14050_v7  ;;  %6184 = vmatmul.mubr.f32.vlgmr.msra.gmra.mxu1 %v14050_v7 }
0x189f   :  { %6220 = vmatpush1.msra.mxu0 %v11982_v17  ;;  %6291 = vmatpush1.msra.mxu1 %v11984_v50 }
0x18a0   :  { %6221 = vmatprep.subr.mxu0 %v11988_v25  ;;  %6292 = vmatprep.subr.mxu1 %v11990_v15 }
0x18a1   :  { %6222 = vmatpush1.msra.mxu0 %v11994_v55  ;;  %6293 = vmatpush1.msra.mxu1 %v11996_v60 }
0x18a2   :  { %6223 = vmatprep.subr.mxu0 %v12000_v14  ;;  %6294 = vmatprep.subr.mxu1 %v12002_v19 }
0x18a3   :  { %6224 = vmatpush1.msra.mxu0 %v12006_v1  ;;  %6295 = vmatpush1.msra.mxu1 %v12008_v3 }
0x18a4   :  { %6225 = vmatprep.subr.mxu0 %v12012_v12  ;;  %6296 = vmatprep.subr.mxu1 %v12014_v63 }
0x18a5   :  { %6226 = vmatpush1.msra.mxu0 %v12018_v6  ;;  %6297 = vmatpush1.msra.mxu1 %v12020_v32 }
0x18a6   :  { %6227 = vmatprep.subr.mxu0 %v12024_v2  ;;  %6298 = vmatprep.subr.mxu1 %v12026_v38 }
0x18a7   :  { %6228 = vmatpush1.msra.mxu0 %v12030_v23  ;;  %6299 = vmatpush1.msra.mxu1 %v12032_v48 }
0x18a8   :  { %6229 = vmatprep.subr.mxu0 %v12036_v35  ;;  %6300 = vmatprep.subr.mxu1 %v12038_v40 }
0x18a9   :  { %6230 = vmatpush1.msra.mxu0 %v12042_v45  ;;  %6301 = vmatpush1.msra.mxu1 %v12044_v26 }
0x18aa   :  { %6231 = vmatprep.subr.mxu0 %v12048_v20  ;;  %6302 = vmatprep.subr.mxu1 %v12050_v57 }
0x18ab   :  { %6232 = vmatpush1.msra.mxu0 %v12054_v58  ;;  %6303 = vmatpush1.msra.mxu1 %v12056_v46 }
0x18ac   :  { %6233 = vmatprep.subr.mxu0 %v12060_v34  ;;  %6304 = vmatprep.subr.mxu1 %v12062_v43 }
0x18ad   :  { %6234 = vmatpush1.msra.mxu0 %v12066_v49  ;;  %6305 = vmatpush1.msra.mxu1 %v12068_v56 }
0x18ae   :  { %6235 = vmatprep.subr.mxu0 %v12072_v59  ;;  %6306 = vmatprep.subr.mxu1 %v12074_v9 }
0x18af   :  { %6236 = vmatpush1.msra.mxu0 %v12078_v16  ;;  %6307 = vmatpush1.msra.mxu1 %v12080_v27 }
0x18b0   :  { %6237 = vmatprep.subr.mxu0 %v12084_v28  ;;  %6308 = vmatprep.subr.mxu1 %v12086_v30 }
0x18b1   :  { %6238 = vmatpush1.msra.mxu0 %v12090_v31  ;;  %6309 = vmatpush1.msra.mxu1 %v12092_v41 }
0x18b2   :  { %6239 = vmatprep.subr.mxu0 %v12094_v42  ;;  %6310 = vmatprep.subr.mxu1 %v12098_v0 }
0x18b3   :  { %6240 = vmatpush1.msra.mxu0 %v12100_v61  ;;  %6311 = vmatpush1.msra.mxu1 %v14074_v21 }
0x18b4   :  { %6241 = vmatprep.subr.mxu0 %v14075_v47  ;;  %6312 = vmatprep.subr.mxu1 %v14076_v4 }
0x18b5   :  { %6242 = vmatpush1.msra.mxu0 %v14077_v39  ;;  %6313 = vmatpush1.msra.mxu1 %v14078_v53  ;;  %v14106_v53 = vld [vmem:[#allocation16_spill] sm:$0xff] }
0x18b6   :  { %6243 = vmatprep.subr.mxu0 %v14079_v52  ;;  %6314 = vmatprep.subr.mxu1 %v14080_v51 }
0x18b7   :  { %6244 = vmatpush1.msra.mxu0 %v14081_v10  ;;  %6315 = vmatpush1.msra.mxu1 %v14082_v13 }
0x18b8   :  { %6245 = vmatprep.subr.mxu0 %v14083_v33  ;;  %6316 = vmatprep.subr.mxu1 %v14084_v11 }
0x18b9   :  { %6246 = vmatpush1.msra.mxu0 %v14085_v37  ;;  %6317 = vmatpush1.msra.mxu1 %v14086_v29 }
0x18ba   :  { %6247 = vmatprep.subr.mxu0 %v14087_v54  ;;  %6318 = vmatprep.subr.mxu1 %v14088_v44  ;;  %v14096_v54 = vld [vmem:[#allocation28_spill] sm:$0xff]  ;;  %v5895_v44 = vpop.f32.mrf.mxu0 }
0x18bb   :  { %6248 = vmatpush1.msra.mxu0 %v14089_v22  ;;  %6319 = vmatpush1.msra.mxu1 %v14090_v62  ;;  %v5972_v22 = vpop.f32.mrf.mxu1 }
0x18bc   :  { %6249 = vmatprep.subr.mxu0 %v14091_v24  ;;  %6320 = vmatprep.subr.mxu1 %v14092_v5  ;;  %v8096_v24 = vld [vmem:[%s13047_s4 + $0xc] sm:$0xf]  ;;  %v5897_v62 = vpop.f32.mrf.mxu0  ;;  %v14097_v5 = vld [vmem:[#allocation15_spill] sm:$0xff] }
0x18bd   :  { %6250 = vmatpush1.msra.mxu0 %v14093_v18  ;;  %6283 = vmatprep.mubr.f32.mxu0 %v14050_v7  ;;  %v12249_v29 = vrot.slane %v8096_v24, %v14097_v5  ;;  %v5974_v18 = vpop.f32.mrf.mxu1 }
0x18be   :  { %6321 = vmatpush1.msra.mxu1 %v14094_v36  ;;  %6354 = vmatprep.mubr.f32.mxu1 %v14050_v7  ;;  %v14100_v36 = vld [vmem:[#allocation17_spill] sm:$0xff] }
0x18bf   :  { %6408 = vmatprep.subr.mxu0 %v14095_v8  ;;  %6479 = vmatprep.subr.mxu1 %v14096_v54  ;;  %14098 = vst [vmem:[#allocation43_spill] sm:$0xff] %v12249_v29  ;;  %v12254_v11 = vrot.slane %v8096_v24, %v14100_v36  ;;  %v12261_v54 = vadd.f32 %v5895_v44, %v12249_v29 }
0x18c1   :  { %14101 = vst [vmem:[#allocation19_spill] sm:$0xff] %v12254_v11  ;;  %v12264_v13 = vadd.f32 %v5897_v62, %v12254_v11  ;;  %v14109_v62 = vld [vmem:[#allocation14_spill] sm:$0xff] }
0x18c2   :  { %v12277_v11 = vrot.slane %v8096_v24, %v14109_v62 }
0x18c3   :  { %14104 = vst [vmem:[#allocation20_spill] sm:$0xff] %v12264_v13 }
0x18c4   :  { %14110 = vst [vmem:[#allocation30_spill] sm:$0xff] %v12277_v11 }
0x195a   :  { %v12251_v37 = vpop.f32.mrf.mxu0  ;;  %v12256_v7 = vpop.f32.mrf.mxu1 }
0x195b   :  { %14099 = vst [vmem:[#allocation41_spill] sm:$0xff] %v12251_v37  ;;  %14102 = vst [vmem:[#allocation40_spill] sm:$0xff] %v12256_v7 }
0x195c   :  { %v12258_v8 = vpop.f32.mrf.mxu0  ;;  %v12266_v10 = vpop.f32.mrf.mxu1 }
0x195d   :  { %14103 = vst [vmem:[#allocation42_spill] sm:$0xff] %v12258_v8  ;;  %14105 = vst [vmem:[#allocation21_spill] sm:$0xff] %v12266_v10  ;;  %v12271_v8 = vrot.slane %v8096_v24, %v14106_v53 }
0x195e   :  { %v6114_v33 = vpop.f32.mrf.mxu0  ;;  %v6185_v52 = vpop.f32.mrf.mxu1 }
0x195f   :  { %v6190_v5 = vadd.f32 %v6114_v33, %v12261_v54  ;;  %14107 = vst [vmem:[#allocation22_spill] sm:$0xff] %v12271_v8  ;;  %v12274_v29 = vadd.f32 %v5974_v18, %v12271_v8 }
0x1960   :  { %v6116_v51 = vpop.f32.mrf.mxu0  ;;  %v6187_v44 = vpop.f32.mrf.mxu1 }
0x1961   :  { %v8097_v37 = vmul.f32 -1.442695, %v6190_v5  ;;  %v6191_v36 = vadd.f32 %v6116_v51, %v12264_v13  ;;  %14108 = vst [vmem:[#allocation23_spill] sm:$0xff] %v12274_v29  ;;  %v6193_v33 = vadd.f32 %v6187_v44, %v12274_v29  ;;  %v12281_v5 = vadd.f32 %v5972_v22, %v12277_v11  ;;  %v14126_v11 = vld [vmem:[#allocation36_spill] sm:$0xff] }
0x1963   :  { %8665 = vpow2.f32 %v8097_v37  ;;  %v8098_v7 = vmul.f32 -1.442695, %v6191_v36  ;;  %v8099_v51 = vmul.f32 -1.442695, %v6193_v33  ;;  %v6192_v36 = vadd.f32 %v6185_v52, %v12281_v5 }
0x1965   :  { %8667 = vpow2.f32 %v8098_v7 }
0x1966   :  { %8669 = vpow2.f32 %v8099_v51  ;;  %v14115_v51 = vld [vmem:[#allocation25_spill] sm:$0xff] }
0x1970   :  { %v8666_v37 = vpop.eup %8665 }
0x1971   :  { %v6197_v10 = vadd.f32 1.0, %v8666_v37 }
0x1972   :  { %v8668_v53 = vpop.eup %8667 }
0x1973   :  { %8671 = vrcp.f32 %v6197_v10  ;;  %v6203_v7 = vadd.f32 1.0, %v8668_v53  ;;  %v8670_v18 = vpop.eup %8669  ;;  %v14111_v10 = vld [vmem:[#allocation29_spill] sm:$0xff]  ;;  %v14117_v53 = vld [vmem:[#allocation38_spill] sm:$0xff] }
0x1974   :  { %8673 = vtanh.f32 %v6192_v36  ;;  %v6210_v13 = vadd.f32 1.0, %v8670_v18  ;;  %v14116_v36 = vld [vmem:[#allocation26_spill] sm:$0xff]  ;;  %v14119_v18 = vld [vmem:[#allocation47_spill] sm:$0xff] }
0x1975   :  { %8675 = vrcp.f32 %v6203_v7  ;;  %v14118_v7 = vld [vmem:[#allocation39_spill] sm:$0xff] }
0x1976   :  { %8677 = vrcp.f32 %v6210_v13  ;;  %v14112_v13 = vld [vmem:[#allocation31_spill] sm:$0xff] }
0x1980   :  { %v8672_v8 = vpop.eup %8671 }
0x1981   :  { %v8674_v24 = vpop.eup %8673 }
0x1982   :  { %v8676_v62 = vpop.eup %8675  ;;  %v6214_v29 = vmul.f32 %v8674_v24, %v8672_v8  ;;  %v14114_v8 = vld [vmem:[#allocation24_spill] sm:$0xff]  ;;  %v14120_v24 = vld [vmem:[#allocation46_spill] sm:$0xff] }
0x1983   :  { %v6213_v44 = vmul.f32 0.0, %v8676_v62  ;;  %v8678_v52 = vpop.eup %8677  ;;  %v14121_v62 = vld [vmem:[#allocation49_spill] sm:$0xff] }
0x1985   :  { %v12284_v22 = vadd.f32 %v6214_v29, %v6213_v44  ;;  %v14113_v29 = vld [vmem:[#allocation34_spill] sm:$0xff] }
0x1986   :  { %v14122_v44 = vld [vmem:[#allocation18_spill] sm:$0xff] }
0x1987   :  { %8679 = vtanh.f32 %v12284_v22 }
0x1994   :  { %v8680_v33 = vpop.eup %8679 }
0x1995   :  { %v6217_v37 = vmul.f32 %v8680_v33, %v8678_v52  ;;  %v14123_v52 = vld [vmem:[#allocation45_spill] sm:$0xff]  ;;  %v14124_v33 = vld [vmem:[#allocation48_spill] sm:$0xff] }
0x1997   :  { %6218 = vst [vmem:[#allocation2] sm:$0x3] %v6217_v37  ;;  %6284 = vmatmul.mubr.f32.vlgmr.msra.gmra.mxu0 %v6217_v37  ;;  %6355 = vmatmul.mubr.f32.vlgmr.msra.gmra.mxu1 %v6217_v37  ;;  %v14125_v37 = vld [vmem:[#allocation35_spill] sm:$0xff] }
0x1998   :  { %6409 = vmatpush1.msra.mxu0 %v11982_v17  ;;  %6480 = vmatpush1.msra.mxu1 %v11984_v50 }
0x1999   :  { %6410 = vmatprep.subr.mxu0 %v11988_v25  ;;  %6481 = vmatprep.subr.mxu1 %v11990_v15 }
0x199a   :  { %6411 = vmatpush1.msra.mxu0 %v11994_v55  ;;  %6482 = vmatpush1.msra.mxu1 %v11996_v60 }
0x199b   :  { %6412 = vmatprep.subr.mxu0 %v12000_v14  ;;  %6483 = vmatprep.subr.mxu1 %v12002_v19 }
0x199c   :  { %6413 = vmatpush1.msra.mxu0 %v12006_v1  ;;  %6484 = vmatpush1.msra.mxu1 %v12008_v3 }
0x199d   :  { %6414 = vmatprep.subr.mxu0 %v12012_v12  ;;  %6485 = vmatprep.subr.mxu1 %v12014_v63 }
0x199e   :  { %6415 = vmatpush1.msra.mxu0 %v12018_v6  ;;  %6486 = vmatpush1.msra.mxu1 %v12020_v32 }
0x199f   :  { %6416 = vmatprep.subr.mxu0 %v12024_v2  ;;  %6487 = vmatprep.subr.mxu1 %v12026_v38 }
0x19a0   :  { %6417 = vmatpush1.msra.mxu0 %v12030_v23  ;;  %6488 = vmatpush1.msra.mxu1 %v12032_v48 }
0x19a1   :  { %6418 = vmatprep.subr.mxu0 %v12036_v35  ;;  %6489 = vmatprep.subr.mxu1 %v12038_v40 }
0x19a2   :  { %6419 = vmatpush1.msra.mxu0 %v12042_v45  ;;  %6490 = vmatpush1.msra.mxu1 %v12044_v26 }
0x19a3   :  { %6420 = vmatprep.subr.mxu0 %v12048_v20  ;;  %6491 = vmatprep.subr.mxu1 %v12050_v57 }
0x19a4   :  { %6421 = vmatpush1.msra.mxu0 %v12054_v58  ;;  %6492 = vmatpush1.msra.mxu1 %v12056_v46 }
0x19a5   :  { %6422 = vmatprep.subr.mxu0 %v12060_v34  ;;  %6493 = vmatprep.subr.mxu1 %v12062_v43 }
0x19a6   :  { %6423 = vmatpush1.msra.mxu0 %v12066_v49  ;;  %6494 = vmatpush1.msra.mxu1 %v12068_v56 }
0x19a7   :  { %6424 = vmatprep.subr.mxu0 %v12072_v59  ;;  %6495 = vmatprep.subr.mxu1 %v12074_v9 }
0x19a8   :  { %6425 = vmatpush1.msra.mxu0 %v12078_v16  ;;  %6496 = vmatpush1.msra.mxu1 %v12080_v27 }
0x19a9   :  { %6426 = vmatprep.subr.mxu0 %v12084_v28  ;;  %6497 = vmatprep.subr.mxu1 %v12086_v30 }
0x19aa   :  { %6427 = vmatpush1.msra.mxu0 %v12090_v31  ;;  %6498 = vmatpush1.msra.mxu1 %v12092_v41 }
0x19ab   :  { %6428 = vmatprep.subr.mxu0 %v12094_v42  ;;  %6499 = vmatprep.subr.mxu1 %v12098_v0 }
0x19ac   :  { %6429 = vmatpush1.msra.mxu0 %v12100_v61  ;;  %6500 = vmatpush1.msra.mxu1 %v14074_v21 }
0x19ad   :  { %6430 = vmatprep.subr.mxu0 %v14075_v47  ;;  %6501 = vmatprep.subr.mxu1 %v14076_v4 }
0x19ae   :  { %6431 = vmatpush1.msra.mxu0 %v14077_v39  ;;  %6502 = vmatpush1.msra.mxu1 %v14111_v10 }
0x19af   :  { %6432 = vmatprep.subr.mxu0 %v14112_v13  ;;  %6503 = vmatprep.subr.mxu1 %v14113_v29 }
0x19b0   :  { %6433 = vmatpush1.msra.mxu0 %v14114_v8  ;;  %6504 = vmatpush1.msra.mxu1 %v14115_v51  ;;  %v14131_v8 = vld [vmem:[#allocation20_spill] sm:$0xff] }
0x19b1   :  { %6434 = vmatprep.subr.mxu0 %v14116_v36  ;;  %6505 = vmatprep.subr.mxu1 %v14117_v53  ;;  %v14127_v36 = vmov 0.0   ;;  %v14128_v53 = vld [vmem:[#allocation37_spill] sm:$0xff] }
0x19b2   :  { %6435 = vmatpush1.msra.mxu0 %v14118_v7  ;;  %6506 = vmatpush1.msra.mxu1 %v14119_v18  ;;  %v14129_v18 = vld [vmem:[#allocation27_spill] sm:$0xff] }
0x19b3   :  { %6436 = vmatprep.subr.mxu0 %v14120_v24  ;;  %6507 = vmatprep.subr.mxu1 %v14121_v62  ;;  %v14130_v24 = vld [vmem:[#allocation28_spill] sm:$0xff] }
0x19b4   :  { %6437 = vmatpush1.msra.mxu0 %v14122_v44  ;;  %6508 = vmatpush1.msra.mxu1 %v14123_v52 }
0x19b5   :  { %6438 = vmatprep.subr.mxu0 %v14124_v33  ;;  %6509 = vmatprep.subr.mxu1 %v14125_v37 }
0x19b6   :  { %6439 = vmatpush1.msra.mxu0 %v14126_v11  ;;  %6472 = vmatprep.mubr.f32.mxu0 %v14127_v36 }
0x19b7   :  { %6510 = vmatpush1.msra.mxu1 %v14128_v53  ;;  %6543 = vmatprep.mubr.f32.mxu1 %v14127_v36  ;;  %v14132_v36 = vld [vmem:[#allocation23_spill] sm:$0xff] }
0x19b8   :  { %6597 = vmatprep.subr.mxu0 %v14129_v18  ;;  %6668 = vmatprep.subr.mxu1 %v14130_v24 }
0x1a57   :  { %v6285_v62 = vpop.f32.mrf.mxu0  ;;  %v6356_v33 = vpop.f32.mrf.mxu1 }
0x1a58   :  { %v6365_v44 = vrot.slane %v6285_v62, 6  ;;  %v6367_v18 = vrot.slane %v6356_v33, 6 }
0x1a59   :  { %v6287_v7 = vpop.f32.mrf.mxu0  ;;  %v6358_v13 = vpop.f32.mrf.mxu1 }
0x1a5a   :  { %v6373_v52 = vadd.f32 %v6365_v44, %v12261_v54  ;;  %v6366_v51 = vrot.slane %v6287_v7, 6  ;;  %v6368_v53 = vrot.slane %v6358_v13, 6  ;;  %v6375_v62 = vadd.f32 %v6367_v18, %v12281_v5 }
0x1a5c   :  { %v8100_v37 = vmul.f32 -1.442695, %v6373_v52  ;;  %v6374_v11 = vadd.f32 %v6366_v51, %v14131_v8  ;;  %v6376_v10 = vadd.f32 %v6368_v53, %v14132_v36 }
0x1a5e   :  { %8681 = vpow2.f32 %v8100_v37  ;;  %v8101_v29 = vmul.f32 -1.442695, %v6374_v11  ;;  %v8102_v39 = vmul.f32 -1.442695, %v6376_v10  ;;  %v14135_v37 = vld [vmem:[#allocation44_spill] sm:$0xff] }
0x1a60   :  { %8683 = vpow2.f32 %v8101_v29  ;;  %v6397_v29 = vrot.slane %v12284_v22, 6  ;;  %v14133_v22 = vld [vmem:[#allocation33_spill] sm:$0xff] }
0x1a61   :  { %8685 = vpow2.f32 %v8102_v39 }
0x1a6b   :  { %v8682_v24 = vpop.eup %8681 }
0x1a6c   :  { %v6380_v4 = vadd.f32 1.0, %v8682_v24  ;;  %v14134_v24 = vld [vmem:[#allocation32_spill] sm:$0xff] }
0x1a6d   :  { %v8684_v47 = vpop.eup %8683 }
0x1a6e   :  { %8687 = vrcp.f32 %v6380_v4  ;;  %v6386_v7 = vadd.f32 1.0, %v8684_v47  ;;  %v8686_v51 = vpop.eup %8685 }
0x1a6f   :  { %8689 = vtanh.f32 %v6375_v62  ;;  %v6393_v52 = vadd.f32 1.0, %v8686_v51  ;;  %v14136_v62 = vld [vmem:[#allocation29_spill] sm:$0xff]  ;;  %v14138_v51 = vld [vmem:[#allocation34_spill] sm:$0xff] }
0x1a70   :  { %8691 = vrcp.f32 %v6386_v7  ;;  %v14137_v7 = vld [vmem:[#allocation31_spill] sm:$0xff] }
0x1a71   :  { %8693 = vrcp.f32 %v6393_v52  ;;  %v14143_v52 = vld [vmem:[#allocation39_spill] sm:$0xff] }
0x1a7b   :  { %v8688_v44 = vpop.eup %8687 }
0x1a7c   :  { %v8690_v11 = vpop.eup %8689 }
0x1a7d   :  { %v8692_v13 = vpop.eup %8691  ;;  %v6400_v53 = vmul.f32 %v8690_v11, %v8688_v44  ;;  %v14139_v44 = vld [vmem:[#allocation24_spill] sm:$0xff]  ;;  %v14140_v11 = vld [vmem:[#allocation25_spill] sm:$0xff] }
0x1a7e   :  { %v6399_v33 = vmul.f32 %v8692_v13, %v6397_v29  ;;  %v8694_v18 = vpop.eup %8693  ;;  %v14141_v29 = vld [vmem:[#allocation26_spill] sm:$0xff] }
0x1a7f   :  { %v14142_v13 = vld [vmem:[#allocation38_spill] sm:$0xff] }
0x1a80   :  { %v12358_v10 = vadd.f32 %v6400_v53, %v6399_v33  ;;  %v14144_v53 = vld [vmem:[#allocation47_spill] sm:$0xff]  ;;  %v14145_v33 = vld [vmem:[#allocation46_spill] sm:$0xff] }
0x1a82   :  { %8695 = vtanh.f32 %v12358_v10 }
0x1a8f   :  { %v8696_v39 = vpop.eup %8695 }
0x1a90   :  { %v6403_v4 = vmul.f32 %v8696_v39, %v8694_v18  ;;  %v14146_v18 = vld [vmem:[#allocation49_spill] sm:$0xff]  ;;  %v14147_v39 = vld [vmem:[#allocation18_spill] sm:$0xff] }
0x1a92   :  { %v6406_v47 = vrot.slane %v6403_v4, 2  ;;  %6404 = vst [vmem:[#allocation2] sm:$0xc] %v6403_v4  ;;  %v14148_v4 = vld [vmem:[#allocation45_spill] sm:$0xff] }
0x1a94   :  { %6473 = vmatmul.mubr.f32.vlgmr.msra.gmra.mxu0 %v6406_v47  ;;  %6544 = vmatmul.mubr.f32.vlgmr.msra.gmra.mxu1 %v6406_v47  ;;  %v14149_v47 = vld [vmem:[#allocation48_spill] sm:$0xff] }
0x1a95   :  { %6598 = vmatpush1.msra.mxu0 %v11982_v17  ;;  %6669 = vmatpush1.msra.mxu1 %v11984_v50 }
0x1a96   :  { %6599 = vmatprep.subr.mxu0 %v11988_v25  ;;  %6670 = vmatprep.subr.mxu1 %v11990_v15 }
0x1a97   :  { %6600 = vmatpush1.msra.mxu0 %v11994_v55  ;;  %6671 = vmatpush1.msra.mxu1 %v11996_v60 }
0x1a98   :  { %6601 = vmatprep.subr.mxu0 %v12000_v14  ;;  %6672 = vmatprep.subr.mxu1 %v12002_v19 }
0x1a99   :  { %6602 = vmatpush1.msra.mxu0 %v12006_v1  ;;  %6673 = vmatpush1.msra.mxu1 %v12008_v3 }
0x1a9a   :  { %6603 = vmatprep.subr.mxu0 %v12012_v12  ;;  %6674 = vmatprep.subr.mxu1 %v12014_v63 }
0x1a9b   :  { %6604 = vmatpush1.msra.mxu0 %v12018_v6  ;;  %6675 = vmatpush1.msra.mxu1 %v12020_v32 }
0x1a9c   :  { %6605 = vmatprep.subr.mxu0 %v12024_v2  ;;  %6676 = vmatprep.subr.mxu1 %v12026_v38 }
0x1a9d   :  { %6606 = vmatpush1.msra.mxu0 %v12030_v23  ;;  %6677 = vmatpush1.msra.mxu1 %v12032_v48 }
0x1a9e   :  { %6607 = vmatprep.subr.mxu0 %v12036_v35  ;;  %6678 = vmatprep.subr.mxu1 %v12038_v40 }
0x1a9f   :  { %6608 = vmatpush1.msra.mxu0 %v12042_v45  ;;  %6679 = vmatpush1.msra.mxu1 %v12044_v26 }
0x1aa0   :  { %6609 = vmatprep.subr.mxu0 %v12048_v20  ;;  %6680 = vmatprep.subr.mxu1 %v12050_v57 }
0x1aa1   :  { %6610 = vmatpush1.msra.mxu0 %v12054_v58  ;;  %6681 = vmatpush1.msra.mxu1 %v12056_v46 }
0x1aa2   :  { %6611 = vmatprep.subr.mxu0 %v12060_v34  ;;  %6682 = vmatprep.subr.mxu1 %v12062_v43 }
0x1aa3   :  { %6612 = vmatpush1.msra.mxu0 %v12066_v49  ;;  %6683 = vmatpush1.msra.mxu1 %v12068_v56 }
0x1aa4   :  { %6613 = vmatprep.subr.mxu0 %v12072_v59  ;;  %6684 = vmatprep.subr.mxu1 %v12074_v9 }
0x1aa5   :  { %6614 = vmatpush1.msra.mxu0 %v12078_v16  ;;  %6685 = vmatpush1.msra.mxu1 %v12080_v27 }
0x1aa6   :  { %6615 = vmatprep.subr.mxu0 %v12084_v28  ;;  %6686 = vmatprep.subr.mxu1 %v12086_v30 }
0x1aa7   :  { %6616 = vmatpush1.msra.mxu0 %v12090_v31  ;;  %6687 = vmatpush1.msra.mxu1 %v12092_v41 }
0x1aa8   :  { %6617 = vmatprep.subr.mxu0 %v12094_v42  ;;  %6688 = vmatprep.subr.mxu1 %v12098_v0 }
0x1aa9   :  { %6618 = vmatpush1.msra.mxu0 %v12100_v61  ;;  %6689 = vmatpush1.msra.mxu1 %v14074_v21 }
0x1aaa   :  { %6619 = vmatprep.subr.mxu0 %v14133_v22  ;;  %6690 = vmatprep.subr.mxu1 %v14134_v24 }
0x1aab   :  { %6620 = vmatpush1.msra.mxu0 %v14135_v37  ;;  %6691 = vmatpush1.msra.mxu1 %v14136_v62 }
0x1aac   :  { %6621 = vmatprep.subr.mxu0 %v14137_v7  ;;  %6692 = vmatprep.subr.mxu1 %v14138_v51 }
0x1aad   :  { %6622 = vmatpush1.msra.mxu0 %v14139_v44  ;;  %6693 = vmatpush1.msra.mxu1 %v14140_v11  ;;  %v14150_v44 = vld [vmem:[#allocation35_spill] sm:$0xff]  ;;  %v14151_v11 = vld [vmem:[#allocation36_spill] sm:$0xff] }
0x1aae   :  { %6623 = vmatprep.subr.mxu0 %v14141_v29  ;;  %6694 = vmatprep.subr.mxu1 %v14142_v13  ;;  %v14152_v29 = vmov 0.0   ;;  %v14153_v13 = vld [vmem:[#allocation37_spill] sm:$0xff] }
0x1aaf   :  { %6624 = vmatpush1.msra.mxu0 %v14143_v52  ;;  %6695 = vmatpush1.msra.mxu1 %v14144_v53  ;;  %v14154_v53 = vld [vmem:[#allocation27_spill] sm:$0xff] }
0x1ab0   :  { %6625 = vmatprep.subr.mxu0 %v14145_v33  ;;  %6696 = vmatprep.subr.mxu1 %v14146_v18  ;;  %v14155_v33 = vld [vmem:[#allocation28_spill] sm:$0xff] }
0x1ab1   :  { %6626 = vmatpush1.msra.mxu0 %v14147_v39  ;;  %6697 = vmatpush1.msra.mxu1 %v14148_v4 }
0x1ab2   :  { %6627 = vmatprep.subr.mxu0 %v14149_v47  ;;  %6698 = vmatprep.subr.mxu1 %v14150_v44 }
0x1ab3   :  { %6628 = vmatpush1.msra.mxu0 %v14151_v11  ;;  %6661 = vmatprep.mubr.f32.mxu0 %v14152_v29 }
0x1ab4   :  { %6699 = vmatpush1.msra.mxu1 %v14153_v13  ;;  %6732 = vmatprep.mubr.f32.mxu1 %v14152_v29 }
0x1ab5   :  { %6786 = vmatprep.subr.mxu0 %v14154_v53  ;;  %6857 = vmatprep.subr.mxu1 %v14155_v33 }
0x1b54   :  { %v6474_v18 = vpop.f32.mrf.mxu0  ;;  %v6545_v47 = vpop.f32.mrf.mxu1 }
0x1b55   :  { %v6554_v39 = vrot.slane %v6474_v18, 4  ;;  %v6556_v53 = vrot.slane %v6545_v47, 4 }
0x1b56   :  { %v6476_v52 = vpop.f32.mrf.mxu0  ;;  %v6547_v62 = vpop.f32.mrf.mxu1 }
0x1b57   :  { %v6562_v4 = vadd.f32 %v6554_v39, %v12261_v54  ;;  %v6555_v51 = vrot.slane %v6476_v52, 4  ;;  %v6557_v13 = vrot.slane %v6547_v62, 4  ;;  %v6564_v18 = vadd.f32 %v6556_v53, %v12281_v5 }
0x1b59   :  { %v8103_v44 = vmul.f32 -1.442695, %v6562_v4  ;;  %v6563_v11 = vadd.f32 %v6555_v51, %v14131_v8  ;;  %v6565_v29 = vadd.f32 %v6557_v13, %v14132_v36 }
0x1b5b   :  { %8697 = vpow2.f32 %v8103_v44  ;;  %v8104_v7 = vmul.f32 -1.442695, %v6563_v11  ;;  %v8105_v37 = vmul.f32 -1.442695, %v6565_v29 }
0x1b5d   :  { %8699 = vpow2.f32 %v8104_v7  ;;  %v6586_v7 = vrot.slane %v12358_v10, 6 }
0x1b5e   :  { %8701 = vpow2.f32 %v8105_v37 }
0x1b68   :  { %v8698_v33 = vpop.eup %8697 }
0x1b69   :  { %v6569_v24 = vadd.f32 1.0, %v8698_v33 }
0x1b6a   :  { %v8700_v22 = vpop.eup %8699 }
0x1b6b   :  { %8703 = vrcp.f32 %v6569_v24  ;;  %v6575_v52 = vadd.f32 1.0, %v8700_v22  ;;  %v8702_v51 = vpop.eup %8701 }
0x1b6c   :  { %8705 = vtanh.f32 %v6564_v18  ;;  %v6582_v39 = vadd.f32 1.0, %v8702_v51 }
0x1b6d   :  { %8707 = vrcp.f32 %v6575_v52 }
0x1b6e   :  { %8709 = vrcp.f32 %v6582_v39  ;;  %v12516_v39 = vld [vmem:[#allocation7 + $0x7f0] sm:$0xff] }
0x1b78   :  { %v8704_v44 = vpop.eup %8703 }
0x1b79   :  { %v8706_v11 = vpop.eup %8705 }
0x1b7a   :  { %v8708_v62 = vpop.eup %8707  ;;  %v6589_v13 = vmul.f32 %v8706_v11, %v8704_v44 }
0x1b7b   :  { %v6588_v4 = vmul.f32 %v8708_v62, %v6586_v7  ;;  %v8710_v47 = vpop.eup %8709  ;;  %v12513_v62 = vld [vmem:[#allocation7 + $0x7e0] sm:$0xff] }
0x1b7d   :  { %v12432_v29 = vadd.f32 %v6589_v13, %v6588_v4  ;;  %v12519_v13 = vld [vmem:[#allocation7 + $0x7c8] sm:$0xff]  ;;  %v12522_v4 = vld [vmem:[#allocation7 + $0x7d8] sm:$0xff] }
0x1b7f   :  { %8711 = vtanh.f32 %v12432_v29  ;;  %v6775_v53 = vrot.slane %v12432_v29, 6  ;;  %v12525_v29 = vld [vmem:[#allocation7 + $0x7c0] sm:$0xff] }
0x1b8c   :  { %v8712_v37 = vpop.eup %8711 }
0x1b8d   :  { %v6592_v24 = vmul.f32 %v8712_v37, %v8710_v47  ;;  %v12528_v47 = vld [vmem:[#allocation7 + $0x7d0] sm:$0xff]  ;;  %v12531_v37 = vld [vmem:[#allocation7 + $0x7a8] sm:$0xff] }
0x1b8f   :  { %v6595_v22 = vrot.slane %v6592_v24, 4  ;;  %6593 = vst [vmem:[#allocation2] sm:$0x30] %v6592_v24  ;;  %v12534_v24 = vld [vmem:[#allocation7 + $0x7b8] sm:$0xff] }
0x1b91   :  { %6662 = vmatmul.mubr.f32.vlgmr.msra.gmra.mxu0 %v6595_v22  ;;  %6733 = vmatmul.mubr.f32.vlgmr.msra.gmra.mxu1 %v6595_v22  ;;  %v12537_v22 = vld [vmem:[#allocation7 + $0x7a0] sm:$0xff] }
0x1b92   :  { %6787 = vmatpush1.msra.mxu0 %v11982_v17  ;;  %6858 = vmatpush1.msra.mxu1 %v11984_v50  ;;  %v14156_v17 = vld [vmem:[#allocation33_spill] sm:$0xff]  ;;  %v14157_v50 = vld [vmem:[#allocation32_spill] sm:$0xff] }
0x1b93   :  { %6788 = vmatprep.subr.mxu0 %v11988_v25  ;;  %6859 = vmatprep.subr.mxu1 %v11990_v15  ;;  %v14158_v25 = vld [vmem:[#allocation44_spill] sm:$0xff]  ;;  %v14159_v15 = vld [vmem:[#allocation29_spill] sm:$0xff] }
0x1b94   :  { %6789 = vmatpush1.msra.mxu0 %v11994_v55  ;;  %6860 = vmatpush1.msra.mxu1 %v11996_v60  ;;  %v14160_v55 = vld [vmem:[#allocation31_spill] sm:$0xff]  ;;  %v14161_v60 = vld [vmem:[#allocation34_spill] sm:$0xff] }
0x1b95   :  { %6790 = vmatprep.subr.mxu0 %v12000_v14  ;;  %6861 = vmatprep.subr.mxu1 %v12002_v19  ;;  %v14162_v14 = vld [vmem:[#allocation24_spill] sm:$0xff]  ;;  %v14163_v19 = vld [vmem:[#allocation25_spill] sm:$0xff] }
0x1b96   :  { %6791 = vmatpush1.msra.mxu0 %v12006_v1  ;;  %6862 = vmatpush1.msra.mxu1 %v12008_v3  ;;  %v14164_v1 = vld [vmem:[#allocation26_spill] sm:$0xff] }
0x1b97   :  { %6792 = vmatprep.subr.mxu0 %v12012_v12  ;;  %6863 = vmatprep.subr.mxu1 %v12014_v63  ;;  %v14165_v3 = vld [vmem:[#allocation38_spill] sm:$0xff]  ;;  %v14166_v12 = vld [vmem:[#allocation39_spill] sm:$0xff] }
0x1b98   :  { %6793 = vmatpush1.msra.mxu0 %v12018_v6  ;;  %6864 = vmatpush1.msra.mxu1 %v12020_v32  ;;  %v14167_v63 = vld [vmem:[#allocation47_spill] sm:$0xff]  ;;  %v14168_v6 = vld [vmem:[#allocation46_spill] sm:$0xff]  ;;  %v14169_v32 = vld [vmem:[#allocation49_spill] sm:$0xff] }
0x1b99   :  { %6794 = vmatprep.subr.mxu0 %v12024_v2  ;;  %6865 = vmatprep.subr.mxu1 %v12026_v38  ;;  %v14170_v2 = vld [vmem:[#allocation18_spill] sm:$0xff]  ;;  %v14171_v38 = vld [vmem:[#allocation45_spill] sm:$0xff] }
0x1b9a   :  { %6795 = vmatpush1.msra.mxu0 %v12030_v23  ;;  %6866 = vmatpush1.msra.mxu1 %v12032_v48  ;;  %v14172_v23 = vld [vmem:[#allocation48_spill] sm:$0xff]  ;;  %v14173_v48 = vld [vmem:[#allocation35_spill] sm:$0xff] }
0x1b9b   :  { %6796 = vmatprep.subr.mxu0 %v12036_v35  ;;  %6867 = vmatprep.subr.mxu1 %v12038_v40  ;;  %v14174_v35 = vld [vmem:[#allocation36_spill] sm:$0xff]  ;;  %v14175_v40 = vmov 0.0  }
0x1b9c   :  { %6797 = vmatpush1.msra.mxu0 %v12042_v45  ;;  %6868 = vmatpush1.msra.mxu1 %v12044_v26  ;;  %v14176_v45 = vld [vmem:[#allocation37_spill] sm:$0xff] }
0x1b9d   :  { %6798 = vmatprep.subr.mxu0 %v12048_v20  ;;  %6869 = vmatprep.subr.mxu1 %v12050_v57  ;;  %v12499_v26 = vld [vmem:[#allocation7 + $0x7e8] sm:$0xff]  ;;  %v12502_v20 = vld [vmem:[#allocation7 + $0x7f8] sm:$0xff] }
0x1b9e   :  { %6799 = vmatpush1.msra.mxu0 %v12054_v58  ;;  %6870 = vmatpush1.msra.mxu1 %v12056_v46  ;;  %14177 = vst [vmem:[#allocation15_spill] sm:$0xff] %v12499_v26  ;;  %14178 = vst [vmem:[#allocation17_spill] sm:$0xff] %v12502_v20 }
0x1b9f   :  { %6800 = vmatprep.subr.mxu0 %v12060_v34  ;;  %6871 = vmatprep.subr.mxu1 %v12062_v43 }
0x1ba0   :  { %6801 = vmatpush1.msra.mxu0 %v12066_v49  ;;  %6872 = vmatpush1.msra.mxu1 %v12068_v56 }
0x1ba1   :  { %6802 = vmatprep.subr.mxu0 %v12072_v59  ;;  %6873 = vmatprep.subr.mxu1 %v12074_v9 }
0x1ba2   :  { %6803 = vmatpush1.msra.mxu0 %v12078_v16  ;;  %6874 = vmatpush1.msra.mxu1 %v12080_v27 }
0x1ba3   :  { %6804 = vmatprep.subr.mxu0 %v12084_v28  ;;  %6875 = vmatprep.subr.mxu1 %v12086_v30 }
0x1ba4   :  { %6805 = vmatpush1.msra.mxu0 %v12090_v31  ;;  %6876 = vmatpush1.msra.mxu1 %v12092_v41 }
0x1ba5   :  { %6806 = vmatprep.subr.mxu0 %v12094_v42  ;;  %6877 = vmatprep.subr.mxu1 %v12098_v0 }
0x1ba6   :  { %6807 = vmatpush1.msra.mxu0 %v12100_v61  ;;  %6878 = vmatpush1.msra.mxu1 %v14074_v21 }
0x1ba7   :  { %6808 = vmatprep.subr.mxu0 %v14156_v17  ;;  %6879 = vmatprep.subr.mxu1 %v14157_v50  ;;  %v12540_v17 = vld [vmem:[#allocation7 + $0x7b0] sm:$0xff]  ;;  %v12543_v50 = vld [vmem:[#allocation7 + $0x788] sm:$0xff] }
0x1ba8   :  { %6809 = vmatpush1.msra.mxu0 %v14158_v25  ;;  %6880 = vmatpush1.msra.mxu1 %v14159_v15  ;;  %v12546_v25 = vld [vmem:[#allocation7 + $0x798] sm:$0xff]  ;;  %v12549_v15 = vld [vmem:[#allocation7 + $0x780] sm:$0xff] }
0x1ba9   :  { %6810 = vmatprep.subr.mxu0 %v14160_v55  ;;  %6881 = vmatprep.subr.mxu1 %v14161_v60  ;;  %v12552_v55 = vld [vmem:[#allocation7 + $0x790] sm:$0xff]  ;;  %v12555_v60 = vld [vmem:[#allocation7 + $0x768] sm:$0xff] }
0x1baa   :  { %6811 = vmatpush1.msra.mxu0 %v14162_v14  ;;  %6882 = vmatpush1.msra.mxu1 %v14163_v19  ;;  %v12558_v14 = vld [vmem:[#allocation7 + $0x778] sm:$0xff]  ;;  %v12561_v19 = vld [vmem:[#allocation7 + $0x760] sm:$0xff] }
0x1bab   :  { %6812 = vmatprep.subr.mxu0 %v14164_v1  ;;  %6883 = vmatprep.subr.mxu1 %v14165_v3  ;;  %v12564_v1 = vld [vmem:[#allocation7 + $0x770] sm:$0xff]  ;;  %v12567_v3 = vld [vmem:[#allocation7 + $0x748] sm:$0xff] }
0x1bac   :  { %6813 = vmatpush1.msra.mxu0 %v14166_v12  ;;  %6884 = vmatpush1.msra.mxu1 %v14167_v63  ;;  %v12570_v12 = vld [vmem:[#allocation7 + $0x758] sm:$0xff]  ;;  %v12573_v63 = vld [vmem:[#allocation7 + $0x740] sm:$0xff] }
0x1bad   :  { %6814 = vmatprep.subr.mxu0 %v14168_v6  ;;  %6885 = vmatprep.subr.mxu1 %v14169_v32  ;;  %v12576_v6 = vld [vmem:[#allocation7 + $0x750] sm:$0xff]  ;;  %v12579_v32 = vld [vmem:[#allocation7 + $0x728] sm:$0xff] }
0x1bae   :  { %6815 = vmatpush1.msra.mxu0 %v14170_v2  ;;  %6886 = vmatpush1.msra.mxu1 %v14171_v38  ;;  %v12582_v2 = vld [vmem:[#allocation7 + $0x738] sm:$0xff]  ;;  %v12585_v38 = vld [vmem:[#allocation7 + $0x720] sm:$0xff] }
0x1baf   :  { %6816 = vmatprep.subr.mxu0 %v14172_v23  ;;  %6887 = vmatprep.subr.mxu1 %v14173_v48  ;;  %v12588_v23 = vld [vmem:[#allocation7 + $0x730] sm:$0xff]  ;;  %v12591_v48 = vld [vmem:[#allocation7 + $0x708] sm:$0xff] }
0x1bb0   :  { %6817 = vmatpush1.msra.mxu0 %v14174_v35  ;;  %6850 = vmatprep.mubr.f32.mxu0 %v14175_v40  ;;  %v12594_v35 = vld [vmem:[#allocation7 + $0x718] sm:$0xff] }
0x1bb1   :  { %6888 = vmatpush1.msra.mxu1 %v14176_v45  ;;  %6921 = vmatprep.mubr.f32.mxu1 %v14175_v40  ;;  %v12597_v45 = vld [vmem:[#allocation7 + $0x700] sm:$0xff] }
0x1bb2   :  { %6960 = vmatprep.subr.mxu0 %v12499_v26  ;;  %7031 = vmatprep.subr.mxu1 %v12502_v20 }
0x1c51   :  { %v6663_v57 = vpop.f32.mrf.mxu0  ;;  %v6734_v43 = vpop.f32.mrf.mxu1 }
0x1c52   :  { %v6743_v58 = vrot.slane %v6663_v57, 2  ;;  %v6745_v30 = vrot.slane %v6734_v43, 2  ;;  %v12600_v57 = vld [vmem:[#allocation7 + $0x710] sm:$0xff] }
0x1c53   :  { %v6665_v46 = vpop.f32.mrf.mxu0  ;;  %v6736_v16 = vpop.f32.mrf.mxu1  ;;  %v12612_v43 = vld [vmem:[#allocation7 + $0x6f0] sm:$0xff] }
0x1c54   :  { %v6751_v34 = vadd.f32 %v6743_v58, %v12261_v54  ;;  %v6744_v49 = vrot.slane %v6665_v46, 2  ;;  %v6746_v27 = vrot.slane %v6736_v16, 2  ;;  %v6753_v42 = vadd.f32 %v6745_v30, %v12281_v5  ;;  %v12603_v58 = vld [vmem:[#allocation7 + $0x6e8] sm:$0xff]  ;;  %v12606_v46 = vld [vmem:[#allocation7 + $0x6f8] sm:$0xff]  ;;  %v12636_v30 = vld [vmem:[#allocation7 + $0x6b0] sm:$0xff] }
0x1c55   :  { %v12627_v16 = vld [vmem:[#allocation7 + $0x6a8] sm:$0xff] }
0x1c56   :  { %v8106_v56 = vmul.f32 -1.442695, %v6751_v34  ;;  %v6752_v59 = vadd.f32 %v6744_v49, %v14131_v8  ;;  %v6754_v28 = vadd.f32 %v6746_v27, %v14132_v36  ;;  %v12609_v34 = vld [vmem:[#allocation7 + $0x6e0] sm:$0xff]  ;;  %v12615_v49 = vld [vmem:[#allocation7 + $0x6c8] sm:$0xff]  ;;  %v12630_v27 = vld [vmem:[#allocation7 + $0x6b8] sm:$0xff] }
0x1c58   :  { %8713 = vpow2.f32 %v8106_v56  ;;  %v8107_v9 = vmul.f32 -1.442695, %v6752_v59  ;;  %v8108_v31 = vmul.f32 -1.442695, %v6754_v28  ;;  %v12618_v56 = vld [vmem:[#allocation7 + $0x6d8] sm:$0xff]  ;;  %v12621_v59 = vld [vmem:[#allocation7 + $0x6c0] sm:$0xff] }
0x1c59   :  { %v12633_v28 = vld [vmem:[#allocation7 + $0x6a0] sm:$0xff] }
0x1c5a   :  { %8715 = vpow2.f32 %v8107_v9  ;;  %v12624_v9 = vld [vmem:[#allocation7 + $0x6d0] sm:$0xff] }
0x1c5b   :  { %8717 = vpow2.f32 %v8108_v31  ;;  %v12639_v31 = vld [vmem:[#allocation7 + $0x688] sm:$0xff] }
0x1c5c   :  { %14179 = vst [vmem:[#allocation16_spill] sm:$0xff] %v12639_v31 }
0x1c65   :  { %v8714_v41 = vpop.eup %8713 }
0x1c66   :  { %v6758_v0 = vadd.f32 1.0, %v8714_v41  ;;  %v12642_v41 = vld [vmem:[#allocation7 + $0x698] sm:$0xff] }
0x1c67   :  { %v8716_v61 = vpop.eup %8715  ;;  %14180 = vst [vmem:[#allocation14_spill] sm:$0xff] %v12642_v41 }
0x1c68   :  { %8719 = vrcp.f32 %v6758_v0  ;;  %v6764_v21 = vadd.f32 1.0, %v8716_v61  ;;  %v8718_v54 = vpop.eup %8717  ;;  %v12648_v0 = vld [vmem:[#allocation7 + $0x690] sm:$0xff]  ;;  %v12651_v61 = vld [vmem:[#allocation7 + $0x668] sm:$0xff] }
0x1c69   :  { %8721 = vtanh.f32 %v6753_v42  ;;  %v6771_v18 = vadd.f32 1.0, %v8718_v54  ;;  %v12645_v42 = vld [vmem:[#allocation7 + $0x680] sm:$0xff]  ;;  %14182 = vst [vmem:[#allocation23_spill] sm:$0xff] %v12648_v0  ;;  %14183 = vst [vmem:[#allocation27_spill] sm:$0xff] %v12651_v61 }
0x1c6a   :  { %8723 = vrcp.f32 %v6764_v21  ;;  %14181 = vst [vmem:[#allocation20_spill] sm:$0xff] %v12645_v42  ;;  %v12654_v21 = vld [vmem:[#allocation7 + $0x678] sm:$0xff]  ;;  %v12657_v54 = vld [vmem:[#allocation7 + $0x660] sm:$0xff] }
0x1c6b   :  { %8725 = vrcp.f32 %v6771_v18  ;;  %14184 = vst [vmem:[#allocation28_spill] sm:$0xff] %v12654_v21  ;;  %14185 = vst [vmem:[#allocation33_spill] sm:$0xff] %v12657_v54  ;;  %v12672_v18 = vld [vmem:[#allocation7 + $0x650] sm:$0xff] }
0x1c6c   :  { %14190 = vst [vmem:[#allocation34_spill] sm:$0xff] %v12672_v18 }
0x1c75   :  { %v8720_v8 = vpop.eup %8719 }
0x1c76   :  { %v8722_v10 = vpop.eup %8721 }
0x1c77   :  { %v8724_v33 = vpop.eup %8723  ;;  %v6778_v36 = vmul.f32 %v8722_v10, %v8720_v8  ;;  %v12660_v8 = vld [vmem:[#allocation7 + $0x670] sm:$0xff]  ;;  %v12663_v10 = vld [vmem:[#allocation7 + $0x648] sm:$0xff] }
0x1c78   :  { %v6777_v52 = vmul.f32 %v8724_v33, %v6775_v53  ;;  %v8726_v5 = vpop.eup %8725  ;;  %14186 = vst [vmem:[#allocation32_spill] sm:$0xff] %v12660_v8  ;;  %14187 = vst [vmem:[#allocation44_spill] sm:$0xff] %v12663_v10  ;;  %v12666_v53 = vld [vmem:[#allocation7 + $0x658] sm:$0xff]  ;;  %v12669_v33 = vld [vmem:[#allocation7 + $0x640] sm:$0xff] }
0x1c79   :  { %14188 = vst [vmem:[#allocation29_spill] sm:$0xff] %v12666_v53  ;;  %14189 = vst [vmem:[#allocation31_spill] sm:$0xff] %v12669_v33 }
0x1c7a   :  { %v12510_v51 = vadd.f32 %v6778_v36, %v6777_v52  ;;  %v12675_v36 = vld [vmem:[#allocation7 + $0x628] sm:$0xff]  ;;  %v12678_v52 = vld [vmem:[#allocation7 + $0x638] sm:$0xff] }
0x1c7b   :  { %14191 = vst [vmem:[#allocation24_spill] sm:$0xff] %v12675_v36  ;;  %14192 = vst [vmem:[#allocation25_spill] sm:$0xff] %v12678_v52 }
0x1c7c   :  { %8727 = vtanh.f32 %v12510_v51 }
0x1c89   :  { %v8728_v44 = vpop.eup %8727 }
0x1c8a   :  { %v6781_v11 = vmul.f32 %v8728_v44, %v8726_v5  ;;  %v12681_v5 = vld [vmem:[#allocation7 + $0x620] sm:$0xff]  ;;  %v12684_v44 = vld [vmem:[#allocation7 + $0x630] sm:$0xff] }
0x1c8b   :  { %14193 = vst [vmem:[#allocation26_spill] sm:$0xff] %v12681_v5  ;;  %14194 = vst [vmem:[#allocation38_spill] sm:$0xff] %v12684_v44 }
0x1c8c   :  { %v6784_v7 = vrot.slane %v6781_v11, 6  ;;  %6782 = vst [vmem:[#allocation2] sm:$0xc0] %v6781_v11  ;;  %v12687_v11 = vld [vmem:[#allocation7 + $0x608] sm:$0xff] }
0x1c8d   :  { %14195 = vst [vmem:[#allocation39_spill] sm:$0xff] %v12687_v11 }
0x1c8e   :  { %6851 = vmatmul.mubr.f32.vlgmr.msra.gmra.mxu0 %v6784_v7  ;;  %6922 = vmatmul.mubr.f32.vlgmr.msra.gmra.mxu1 %v6784_v7  ;;  %v12690_v7 = vld [vmem:[#allocation7 + $0x618] sm:$0xff] }
0x1c8f   :  { %6961 = vmatpush1.msra.mxu0 %v12513_v62  ;;  %7032 = vmatpush1.msra.mxu1 %v12516_v39  ;;  %14196 = vst [vmem:[#allocation47_spill] sm:$0xff] %v12690_v7 }
0x1c90   :  { %6962 = vmatprep.subr.mxu0 %v12519_v13  ;;  %7033 = vmatprep.subr.mxu1 %v12522_v4 }
0x1c91   :  { %6963 = vmatpush1.msra.mxu0 %v12525_v29  ;;  %7034 = vmatpush1.msra.mxu1 %v12528_v47 }
0x1c92   :  { %6964 = vmatprep.subr.mxu0 %v12531_v37  ;;  %7035 = vmatprep.subr.mxu1 %v12534_v24 }
0x1c93   :  { %6965 = vmatpush1.msra.mxu0 %v12537_v22  ;;  %7036 = vmatpush1.msra.mxu1 %v12540_v17 }
0x1c94   :  { %6966 = vmatprep.subr.mxu0 %v12543_v50  ;;  %7037 = vmatprep.subr.mxu1 %v12546_v25 }
0x1c95   :  { %6967 = vmatpush1.msra.mxu0 %v12549_v15  ;;  %7038 = vmatpush1.msra.mxu1 %v12552_v55 }
0x1c96   :  { %6968 = vmatprep.subr.mxu0 %v12555_v60  ;;  %7039 = vmatprep.subr.mxu1 %v12558_v14 }
0x1c97   :  { %6969 = vmatpush1.msra.mxu0 %v12561_v19  ;;  %7040 = vmatpush1.msra.mxu1 %v12564_v1 }
0x1c98   :  { %6970 = vmatprep.subr.mxu0 %v12567_v3  ;;  %7041 = vmatprep.subr.mxu1 %v12570_v12 }
0x1c99   :  { %6971 = vmatpush1.msra.mxu0 %v12573_v63  ;;  %7042 = vmatpush1.msra.mxu1 %v12576_v6 }
0x1c9a   :  { %6972 = vmatprep.subr.mxu0 %v12579_v32  ;;  %7043 = vmatprep.subr.mxu1 %v12582_v2 }
0x1c9b   :  { %6973 = vmatpush1.msra.mxu0 %v12585_v38  ;;  %7044 = vmatpush1.msra.mxu1 %v12588_v23 }
0x1c9c   :  { %6974 = vmatprep.subr.mxu0 %v12591_v48  ;;  %7045 = vmatprep.subr.mxu1 %v12594_v35 }
0x1c9d   :  { %6975 = vmatpush1.msra.mxu0 %v12597_v45  ;;  %7046 = vmatpush1.msra.mxu1 %v12600_v57 }
0x1c9e   :  { %6976 = vmatprep.subr.mxu0 %v12603_v58  ;;  %7047 = vmatprep.subr.mxu1 %v12606_v46 }
0x1c9f   :  { %6977 = vmatpush1.msra.mxu0 %v12609_v34  ;;  %7048 = vmatpush1.msra.mxu1 %v12612_v43 }
0x1ca0   :  { %6978 = vmatprep.subr.mxu0 %v12615_v49  ;;  %7049 = vmatprep.subr.mxu1 %v12618_v56 }
0x1ca1   :  { %6979 = vmatpush1.msra.mxu0 %v12621_v59  ;;  %7050 = vmatpush1.msra.mxu1 %v12624_v9 }
0x1ca2   :  { %6980 = vmatprep.subr.mxu0 %v12627_v16  ;;  %7051 = vmatprep.subr.mxu1 %v12630_v27 }
0x1ca3   :  { %6981 = vmatpush1.msra.mxu0 %v12633_v28  ;;  %7052 = vmatpush1.msra.mxu1 %v12636_v30 }
0x1ca4   :  { %6982 = vmatprep.subr.mxu0 %v12639_v31  ;;  %7053 = vmatprep.subr.mxu1 %v12642_v41 }
0x1ca5   :  { %6983 = vmatpush1.msra.mxu0 %v12645_v42  ;;  %7054 = vmatpush1.msra.mxu1 %v12648_v0 }
0x1ca6   :  { %6984 = vmatprep.subr.mxu0 %v12651_v61  ;;  %7055 = vmatprep.subr.mxu1 %v12654_v21  ;;  %v14206_v21 = vld [vmem:[#allocation21_spill] sm:$0xff]  ;;  %v14208_v61 = vld [vmem:[#allocation30_spill] sm:$0xff] }
0x1ca7   :  { %6985 = vmatpush1.msra.mxu0 %v12657_v54  ;;  %7056 = vmatpush1.msra.mxu1 %v12660_v8  ;;  %v14205_v54 = vld [vmem:[#allocation22_spill] sm:$0xff] }
0x1ca8   :  { %6986 = vmatprep.subr.mxu0 %v12663_v10  ;;  %7057 = vmatprep.subr.mxu1 %v12666_v53 }
0x1ca9   :  { %6987 = vmatpush1.msra.mxu0 %v12669_v33  ;;  %7058 = vmatpush1.msra.mxu1 %v12672_v18  ;;  %v14202_v18 = vld [vmem:[#allocation19_spill] sm:$0xff]  ;;  %v14203_v33 = vld [vmem:[#allocation42_spill] sm:$0xff] }
0x1caa   :  { %6988 = vmatprep.subr.mxu0 %v12675_v36  ;;  %7059 = vmatprep.subr.mxu1 %v12678_v52  ;;  %v12693_v36 = vld [vmem:[#allocation7 + $0x600] sm:$0xff]  ;;  %v12697_v52 = vld [vmem:[#allocation7 + $0x610] sm:$0xff] }
0x1cab   :  { %6989 = vmatpush1.msra.mxu0 %v12681_v5  ;;  %7060 = vmatpush1.msra.mxu1 %v12684_v44  ;;  %14197 = vst [vmem:[#allocation46_spill] sm:$0xff] %v12693_v36  ;;  %14198 = vst [vmem:[#allocation49_spill] sm:$0xff] %v12697_v52  ;;  %v14200_v44 = vld [vmem:[#allocation41_spill] sm:$0xff] }
0x1cac   :  { %6990 = vmatprep.subr.mxu0 %v12687_v11  ;;  %7061 = vmatprep.subr.mxu1 %v12690_v7  ;;  %v14199_v11 = vld [vmem:[#allocation43_spill] sm:$0xff] }
0x1cad   :  { %6991 = vmatpush1.msra.mxu0 %v12693_v36  ;;  %7024 = vmatprep.mubr.f32.mxu0 %v14175_v40  ;;  %v12705_v5 = vadd.f32 %v14200_v44, %v14199_v11  ;;  %v12709_v36 = vadd.f32 %v14203_v33, %v14202_v18  ;;  %v12715_v44 = vadd.f32 %v14206_v21, %v14205_v54  ;;  %v14209_v33 = vld [vmem:[#allocation40_spill] sm:$0xff] }
0x1cae   :  { %7062 = vmatpush1.msra.mxu1 %v12697_v52  ;;  %7095 = vmatprep.mubr.f32.mxu1 %v14175_v40  ;;  %v12720_v18 = vadd.f32 %v14209_v33, %v14208_v61 }
0x1caf   :  { %7149 = vmatprep.subr.mxu0 %v12499_v26  ;;  %7220 = vmatprep.subr.mxu1 %v12502_v20  ;;  %14201 = vst [vmem:[#allocation18_spill] sm:$0xff] %v12705_v5  ;;  %14204 = vst [vmem:[#allocation45_spill] sm:$0xff] %v12709_v36 }
0x1cb0   :  { %14207 = vst [vmem:[#allocation48_spill] sm:$0xff] %v12715_v44 }
0x1d4e   :  { %v6852_v7 = vpop.f32.mrf.mxu0  ;;  %v6923_v40 = vpop.f32.mrf.mxu1 }
0x1d4f   :  { %v6928_v53 = vadd.f32 %v6852_v7, %v12705_v5 }
0x1d50   :  { %v6854_v10 = vpop.f32.mrf.mxu0  ;;  %v6925_v20 = vpop.f32.mrf.mxu1 }
0x1d51   :  { %v8109_v8 = vmul.f32 -1.442695, %v6928_v53  ;;  %v6929_v52 = vadd.f32 %v6854_v10, %v12709_v36  ;;  %v6931_v11 = vadd.f32 %v6925_v20, %v12715_v44  ;;  %v6930_v53 = vadd.f32 %v6923_v40, %v12720_v18 }
0x1d52   :  { %v6952_v20 = vrot.slane %v12510_v51, 6  ;;  %v14210_v51 = vld [vmem:[#allocation27_spill] sm:$0xff] }
0x1d53   :  { %8729 = vpow2.f32 %v8109_v8  ;;  %v8110_v26 = vmul.f32 -1.442695, %v6929_v52  ;;  %v8111_v7 = vmul.f32 -1.442695, %v6931_v11 }
0x1d55   :  { %8731 = vpow2.f32 %v8110_v26 }
0x1d56   :  { %8733 = vpow2.f32 %v8111_v7 }
0x1d60   :  { %v8730_v5 = vpop.eup %8729 }
0x1d61   :  { %v6935_v10 = vadd.f32 1.0, %v8730_v5 }
0x1d62   :  { %v8732_v8 = vpop.eup %8731 }
0x1d63   :  { %8735 = vrcp.f32 %v6935_v10  ;;  %v6941_v26 = vadd.f32 1.0, %v8732_v8  ;;  %v8734_v52 = vpop.eup %8733  ;;  %v14214_v10 = vld [vmem:[#allocation44_spill] sm:$0xff]  ;;  %v14215_v8 = vld [vmem:[#allocation29_spill] sm:$0xff] }
0x1d64   :  { %8737 = vtanh.f32 %v6930_v53  ;;  %v6948_v36 = vadd.f32 1.0, %v8734_v52  ;;  %v14213_v53 = vld [vmem:[#allocation32_spill] sm:$0xff]  ;;  %v14217_v52 = vld [vmem:[#allocation34_spill] sm:$0xff] }
0x1d65   :  { %8739 = vrcp.f32 %v6941_v26  ;;  %v14216_v26 = vld [vmem:[#allocation31_spill] sm:$0xff] }
0x1d66   :  { %8741 = vrcp.f32 %v6948_v36  ;;  %v14211_v36 = vld [vmem:[#allocation28_spill] sm:$0xff] }
0x1d70   :  { %v8736_v21 = vpop.eup %8735 }
0x1d71   :  { %v8738_v54 = vpop.eup %8737 }
0x1d72   :  { %v8740_v44 = vpop.eup %8739  ;;  %v6955_v61 = vmul.f32 %v8738_v54, %v8736_v21  ;;  %v14218_v21 = vld [vmem:[#allocation24_spill] sm:$0xff]  ;;  %v14219_v54 = vld [vmem:[#allocation25_spill] sm:$0xff] }
0x1d73   :  { %v6954_v33 = vmul.f32 %v8740_v44, %v6952_v20  ;;  %v8742_v40 = vpop.eup %8741  ;;  %v14212_v44 = vld [vmem:[#allocation33_spill] sm:$0xff]  ;;  %v14220_v20 = vld [vmem:[#allocation26_spill] sm:$0xff] }
0x1d75   :  { %v12724_v11 = vadd.f32 %v6955_v61, %v6954_v33  ;;  %v14221_v61 = vld [vmem:[#allocation38_spill] sm:$0xff]  ;;  %v14222_v33 = vld [vmem:[#allocation39_spill] sm:$0xff] }
0x1d77   :  { %8743 = vtanh.f32 %v12724_v11 }
0x1d84   :  { %v8744_v5 = vpop.eup %8743 }
0x1d85   :  { %v6958_v7 = vmul.f32 %v8744_v5, %v8742_v40  ;;  %v14223_v40 = vld [vmem:[#allocation47_spill] sm:$0xff]  ;;  %v14224_v5 = vld [vmem:[#allocation46_spill] sm:$0xff] }
0x1d87   :  { %6959 = vst [vmem:[#allocation2 + $0x8] sm:$0x3] %v6958_v7  ;;  %7025 = vmatmul.mubr.f32.vlgmr.msra.gmra.mxu0 %v6958_v7  ;;  %7096 = vmatmul.mubr.f32.vlgmr.msra.gmra.mxu1 %v6958_v7  ;;  %v14225_v7 = vmov 0.0  }
0x1d88   :  { %7150 = vmatpush1.msra.mxu0 %v12513_v62  ;;  %7221 = vmatpush1.msra.mxu1 %v12516_v39 }
0x1d89   :  { %7151 = vmatprep.subr.mxu0 %v12519_v13  ;;  %7222 = vmatprep.subr.mxu1 %v12522_v4 }
0x1d8a   :  { %7152 = vmatpush1.msra.mxu0 %v12525_v29  ;;  %7223 = vmatpush1.msra.mxu1 %v12528_v47 }
0x1d8b   :  { %7153 = vmatprep.subr.mxu0 %v12531_v37  ;;  %7224 = vmatprep.subr.mxu1 %v12534_v24 }
0x1d8c   :  { %7154 = vmatpush1.msra.mxu0 %v12537_v22  ;;  %7225 = vmatpush1.msra.mxu1 %v12540_v17 }
0x1d8d   :  { %7155 = vmatprep.subr.mxu0 %v12543_v50  ;;  %7226 = vmatprep.subr.mxu1 %v12546_v25 }
0x1d8e   :  { %7156 = vmatpush1.msra.mxu0 %v12549_v15  ;;  %7227 = vmatpush1.msra.mxu1 %v12552_v55 }
0x1d8f   :  { %7157 = vmatprep.subr.mxu0 %v12555_v60  ;;  %7228 = vmatprep.subr.mxu1 %v12558_v14 }
0x1d90   :  { %7158 = vmatpush1.msra.mxu0 %v12561_v19  ;;  %7229 = vmatpush1.msra.mxu1 %v12564_v1 }
0x1d91   :  { %7159 = vmatprep.subr.mxu0 %v12567_v3  ;;  %7230 = vmatprep.subr.mxu1 %v12570_v12 }
0x1d92   :  { %7160 = vmatpush1.msra.mxu0 %v12573_v63  ;;  %7231 = vmatpush1.msra.mxu1 %v12576_v6 }
0x1d93   :  { %7161 = vmatprep.subr.mxu0 %v12579_v32  ;;  %7232 = vmatprep.subr.mxu1 %v12582_v2 }
0x1d94   :  { %7162 = vmatpush1.msra.mxu0 %v12585_v38  ;;  %7233 = vmatpush1.msra.mxu1 %v12588_v23 }
0x1d95   :  { %7163 = vmatprep.subr.mxu0 %v12591_v48  ;;  %7234 = vmatprep.subr.mxu1 %v12594_v35 }
0x1d96   :  { %7164 = vmatpush1.msra.mxu0 %v12597_v45  ;;  %7235 = vmatpush1.msra.mxu1 %v12600_v57 }
0x1d97   :  { %7165 = vmatprep.subr.mxu0 %v12603_v58  ;;  %7236 = vmatprep.subr.mxu1 %v12606_v46 }
0x1d98   :  { %7166 = vmatpush1.msra.mxu0 %v12609_v34  ;;  %7237 = vmatpush1.msra.mxu1 %v12612_v43 }
0x1d99   :  { %7167 = vmatprep.subr.mxu0 %v12615_v49  ;;  %7238 = vmatprep.subr.mxu1 %v12618_v56 }
0x1d9a   :  { %7168 = vmatpush1.msra.mxu0 %v12621_v59  ;;  %7239 = vmatpush1.msra.mxu1 %v12624_v9 }
0x1d9b   :  { %7169 = vmatprep.subr.mxu0 %v12627_v16  ;;  %7240 = vmatprep.subr.mxu1 %v12630_v27 }
0x1d9c   :  { %7170 = vmatpush1.msra.mxu0 %v12633_v28  ;;  %7241 = vmatpush1.msra.mxu1 %v12636_v30 }
0x1d9d   :  { %7171 = vmatprep.subr.mxu0 %v12639_v31  ;;  %7242 = vmatprep.subr.mxu1 %v12642_v41 }
0x1d9e   :  { %7172 = vmatpush1.msra.mxu0 %v12645_v42  ;;  %7243 = vmatpush1.msra.mxu1 %v12648_v0 }
0x1d9f   :  { %7173 = vmatprep.subr.mxu0 %v14210_v51  ;;  %7244 = vmatprep.subr.mxu1 %v14211_v36 }
0x1da0   :  { %7174 = vmatpush1.msra.mxu0 %v14212_v44  ;;  %7245 = vmatpush1.msra.mxu1 %v14213_v53  ;;  %v14230_v44 = vld [vmem:[#allocation45_spill] sm:$0xff] }
0x1da1   :  { %7175 = vmatprep.subr.mxu0 %v14214_v10  ;;  %7246 = vmatprep.subr.mxu1 %v14215_v8  ;;  %v14226_v8 = vld [vmem:[#allocation49_spill] sm:$0xff] }
0x1da2   :  { %7176 = vmatpush1.msra.mxu0 %v14216_v26  ;;  %7247 = vmatpush1.msra.mxu1 %v14217_v52  ;;  %v14227_v52 = vld [vmem:[#allocation15_spill] sm:$0xff] }
0x1da3   :  { %7177 = vmatprep.subr.mxu0 %v14218_v21  ;;  %7248 = vmatprep.subr.mxu1 %v14219_v54  ;;  %v14228_v21 = vld [vmem:[#allocation17_spill] sm:$0xff] }
0x1da4   :  { %7178 = vmatpush1.msra.mxu0 %v14220_v20  ;;  %7249 = vmatpush1.msra.mxu1 %v14221_v61  ;;  %v14229_v61 = vld [vmem:[#allocation18_spill] sm:$0xff] }
0x1da5   :  { %7179 = vmatprep.subr.mxu0 %v14222_v33  ;;  %7250 = vmatprep.subr.mxu1 %v14223_v40 }
0x1da6   :  { %7180 = vmatpush1.msra.mxu0 %v14224_v5  ;;  %7213 = vmatprep.mubr.f32.mxu0 %v14225_v7 }
0x1da7   :  { %7251 = vmatpush1.msra.mxu1 %v14226_v8  ;;  %7284 = vmatprep.mubr.f32.mxu1 %v14225_v7  ;;  %v14231_v7 = vld [vmem:[#allocation48_spill] sm:$0xff] }
0x1da8   :  { %7338 = vmatprep.subr.mxu0 %v14227_v52  ;;  %7409 = vmatprep.subr.mxu1 %v14228_v21 }
0x1e47   :  { %v7026_v54 = vpop.f32.mrf.mxu0  ;;  %v7097_v33 = vpop.f32.mrf.mxu1 }
0x1e48   :  { %v7106_v20 = vrot.slane %v7026_v54, 6  ;;  %v7108_v52 = vrot.slane %v7097_v33, 6 }
0x1e49   :  { %v7028_v26 = vpop.f32.mrf.mxu0  ;;  %v7099_v51 = vpop.f32.mrf.mxu1 }
0x1e4a   :  { %v7114_v10 = vadd.f32 %v7106_v20, %v14229_v61  ;;  %v7107_v53 = vrot.slane %v7028_v26, 6  ;;  %v7109_v8 = vrot.slane %v7099_v51, 6  ;;  %v7116_v54 = vadd.f32 %v7108_v52, %v12720_v18 }
0x1e4c   :  { %v8112_v40 = vmul.f32 -1.442695, %v7114_v10  ;;  %v7115_v5 = vadd.f32 %v7107_v53, %v14230_v44  ;;  %v7117_v0 = vadd.f32 %v7109_v8, %v14231_v7 }
0x1e4e   :  { %8745 = vpow2.f32 %v8112_v40  ;;  %v8113_v36 = vmul.f32 -1.442695, %v7115_v5  ;;  %v8114_v42 = vmul.f32 -1.442695, %v7117_v0 }
0x1e50   :  { %8747 = vpow2.f32 %v8113_v36  ;;  %v7138_v36 = vrot.slane %v12724_v11, 6 }
0x1e51   :  { %8749 = vpow2.f32 %v8114_v42 }
0x1e5b   :  { %v8746_v21 = vpop.eup %8745 }
0x1e5c   :  { %v7121_v41 = vadd.f32 1.0, %v8746_v21 }
0x1e5d   :  { %v8748_v31 = vpop.eup %8747 }
0x1e5e   :  { %8751 = vrcp.f32 %v7121_v41  ;;  %v7127_v26 = vadd.f32 1.0, %v8748_v31  ;;  %v8750_v53 = vpop.eup %8749 }
0x1e5f   :  { %8753 = vtanh.f32 %v7116_v54  ;;  %v7134_v40 = vadd.f32 1.0, %v8750_v53 }
0x1e60   :  { %8755 = vrcp.f32 %v7127_v26 }
0x1e61   :  { %8757 = vrcp.f32 %v7134_v40 }
0x1e6b   :  { %v8752_v10 = vpop.eup %8751 }
0x1e6c   :  { %v8754_v20 = vpop.eup %8753 }
0x1e6d   :  { %v8756_v51 = vpop.eup %8755  ;;  %v7141_v8 = vmul.f32 %v8754_v20, %v8752_v10 }
0x1e6e   :  { %v7140_v33 = vmul.f32 %v8756_v51, %v7138_v36  ;;  %v8758_v5 = vpop.eup %8757 }
0x1e70   :  { %v12798_v0 = vadd.f32 %v7141_v8, %v7140_v33  ;;  %v12874_v8 = vld [vmem:[#allocation2] sm:$0xff]  ;;  %v7541_v33 = vld [vmem:[%s13048_s5 + $0x78] sm:$0xff] }
0x1e72   :  { %8759 = vtanh.f32 %v12798_v0  ;;  %v7327_v52 = vrot.slane %v12798_v0, 6  ;;  %v7540_v0 = vld [vmem:[%s13048_s5 + $0x70] sm:$0xff] }
0x1e7f   :  { %v8760_v42 = vpop.eup %8759 }
0x1e80   :  { %v7144_v41 = vmul.f32 %v8760_v42, %v8758_v5  ;;  %v7539_v5 = vld [vmem:[%s13048_s5 + $0x68] sm:$0xff]  ;;  %v7538_v42 = vld [vmem:[%s13048_s5 + $0x60] sm:$0xff] }
0x1e82   :  { %7145 = vst [vmem:[#allocation2 + $0x8] sm:$0xc] %v7144_v41  ;;  %v7147_v31 = vrot.slane %v7144_v41, 2  ;;  %v7537_v41 = vld [vmem:[%s13048_s5 + $0x58] sm:$0xff] }
0x1e84   :  { %7214 = vmatmul.mubr.f32.vlgmr.msra.gmra.mxu0 %v7147_v31  ;;  %7285 = vmatmul.mubr.f32.vlgmr.msra.gmra.mxu1 %v7147_v31  ;;  %v7536_v31 = vld [vmem:[%s13048_s5 + $0x50] sm:$0xff] }
0x1e85   :  { %7339 = vmatpush1.msra.mxu0 %v12513_v62  ;;  %7410 = vmatpush1.msra.mxu1 %v12516_v39  ;;  %v14232_v62 = vld [vmem:[#allocation16_spill] sm:$0xff]  ;;  %v14233_v39 = vld [vmem:[#allocation14_spill] sm:$0xff] }
0x1e86   :  { %7340 = vmatprep.subr.mxu0 %v12519_v13  ;;  %7411 = vmatprep.subr.mxu1 %v12522_v4  ;;  %v14234_v13 = vld [vmem:[#allocation20_spill] sm:$0xff]  ;;  %v14235_v4 = vld [vmem:[#allocation23_spill] sm:$0xff] }
0x1e87   :  { %7341 = vmatpush1.msra.mxu0 %v12525_v29  ;;  %7412 = vmatpush1.msra.mxu1 %v12528_v47  ;;  %v14236_v29 = vld [vmem:[#allocation27_spill] sm:$0xff]  ;;  %v14237_v47 = vld [vmem:[#allocation28_spill] sm:$0xff] }
0x1e88   :  { %7342 = vmatprep.subr.mxu0 %v12531_v37  ;;  %7413 = vmatprep.subr.mxu1 %v12534_v24  ;;  %v14238_v37 = vld [vmem:[#allocation33_spill] sm:$0xff]  ;;  %v14239_v24 = vld [vmem:[#allocation32_spill] sm:$0xff] }
0x1e89   :  { %7343 = vmatpush1.msra.mxu0 %v12537_v22  ;;  %7414 = vmatpush1.msra.mxu1 %v12540_v17  ;;  %v14240_v22 = vld [vmem:[#allocation44_spill] sm:$0xff]  ;;  %v14241_v17 = vld [vmem:[#allocation29_spill] sm:$0xff] }
0x1e8a   :  { %7344 = vmatprep.subr.mxu0 %v12543_v50  ;;  %7415 = vmatprep.subr.mxu1 %v12546_v25  ;;  %v14242_v50 = vld [vmem:[#allocation31_spill] sm:$0xff]  ;;  %v14243_v25 = vld [vmem:[#allocation34_spill] sm:$0xff] }
0x1e8b   :  { %7345 = vmatpush1.msra.mxu0 %v12549_v15  ;;  %7416 = vmatpush1.msra.mxu1 %v12552_v55  ;;  %v14244_v15 = vld [vmem:[#allocation24_spill] sm:$0xff]  ;;  %v14245_v55 = vld [vmem:[#allocation25_spill] sm:$0xff] }
0x1e8c   :  { %7346 = vmatprep.subr.mxu0 %v12555_v60  ;;  %7417 = vmatprep.subr.mxu1 %v12558_v14  ;;  %v14246_v60 = vld [vmem:[#allocation26_spill] sm:$0xff] }
0x1e8d   :  { %7347 = vmatpush1.msra.mxu0 %v12561_v19  ;;  %7418 = vmatpush1.msra.mxu1 %v12564_v1  ;;  %v14247_v14 = vld [vmem:[#allocation38_spill] sm:$0xff]  ;;  %v14248_v19 = vld [vmem:[#allocation39_spill] sm:$0xff] }
0x1e8e   :  { %7348 = vmatprep.subr.mxu0 %v12567_v3  ;;  %7419 = vmatprep.subr.mxu1 %v12570_v12  ;;  %v14249_v1 = vld [vmem:[#allocation47_spill] sm:$0xff]  ;;  %v14250_v3 = vld [vmem:[#allocation46_spill] sm:$0xff]  ;;  %v14251_v12 = vmov 0.0  }
0x1e8f   :  { %7349 = vmatpush1.msra.mxu0 %v12573_v63  ;;  %7420 = vmatpush1.msra.mxu1 %v12576_v6  ;;  %v14252_v63 = vld [vmem:[#allocation49_spill] sm:$0xff] }
0x1e90   :  { %7350 = vmatprep.subr.mxu0 %v12579_v32  ;;  %7421 = vmatprep.subr.mxu1 %v12582_v2 }
0x1e91   :  { %7351 = vmatpush1.msra.mxu0 %v12585_v38  ;;  %7422 = vmatpush1.msra.mxu1 %v12588_v23 }
0x1e92   :  { %7352 = vmatprep.subr.mxu0 %v12591_v48  ;;  %7423 = vmatprep.subr.mxu1 %v12594_v35 }
0x1e93   :  { %7353 = vmatpush1.msra.mxu0 %v12597_v45  ;;  %7424 = vmatpush1.msra.mxu1 %v12600_v57 }
0x1e94   :  { %7354 = vmatprep.subr.mxu0 %v12603_v58  ;;  %7425 = vmatprep.subr.mxu1 %v12606_v46 }
0x1e95   :  { %7355 = vmatpush1.msra.mxu0 %v12609_v34  ;;  %7426 = vmatpush1.msra.mxu1 %v12612_v43 }
0x1e96   :  { %7356 = vmatprep.subr.mxu0 %v12615_v49  ;;  %7427 = vmatprep.subr.mxu1 %v12618_v56 }
0x1e97   :  { %7357 = vmatpush1.msra.mxu0 %v12621_v59  ;;  %7428 = vmatpush1.msra.mxu1 %v12624_v9 }
0x1e98   :  { %7358 = vmatprep.subr.mxu0 %v12627_v16  ;;  %7429 = vmatprep.subr.mxu1 %v12630_v27 }
0x1e99   :  { %7359 = vmatpush1.msra.mxu0 %v12633_v28  ;;  %7430 = vmatpush1.msra.mxu1 %v12636_v30 }
0x1e9a   :  { %7360 = vmatprep.subr.mxu0 %v14232_v62  ;;  %7431 = vmatprep.subr.mxu1 %v14233_v39  ;;  %v7535_v62 = vld [vmem:[%s13048_s5 + $0x48] sm:$0xff]  ;;  %v7534_v39 = vld [vmem:[%s13048_s5 + $0x40] sm:$0xff] }
0x1e9b   :  { %7361 = vmatpush1.msra.mxu0 %v14234_v13  ;;  %7432 = vmatpush1.msra.mxu1 %v14235_v4  ;;  %v7533_v13 = vld [vmem:[%s13048_s5 + $0x38] sm:$0xff]  ;;  %v7532_v4 = vld [vmem:[%s13048_s5 + $0x30] sm:$0xff] }
0x1e9c   :  { %7362 = vmatprep.subr.mxu0 %v14236_v29  ;;  %7433 = vmatprep.subr.mxu1 %v14237_v47  ;;  %v7531_v29 = vld [vmem:[%s13048_s5 + $0x28] sm:$0xff]  ;;  %v7530_v47 = vld [vmem:[%s13048_s5 + $0x20] sm:$0xff] }
0x1e9d   :  { %7363 = vmatpush1.msra.mxu0 %v14238_v37  ;;  %7434 = vmatpush1.msra.mxu1 %v14239_v24  ;;  %v7529_v37 = vld [vmem:[%s13048_s5 + $0x18] sm:$0xff]  ;;  %v7528_v24 = vld [vmem:[%s13048_s5 + $0x10] sm:$0xff] }
0x1e9e   :  { %7364 = vmatprep.subr.mxu0 %v14240_v22  ;;  %7435 = vmatprep.subr.mxu1 %v14241_v17  ;;  %v7527_v22 = vld [vmem:[%s13048_s5 + $0x8] sm:$0xff]  ;;  %v7526_v17 = vld [vmem:[%s13048_s5] sm:$0xff] }
0x1e9f   :  { %7365 = vmatpush1.msra.mxu0 %v14242_v50  ;;  %7436 = vmatpush1.msra.mxu1 %v14243_v25  ;;  %v7633_v50 = vld [vmem:[%s13050_s7 + $0x38] sm:$0xff] }
0x1ea0   :  { %7366 = vmatprep.subr.mxu0 %v14244_v15  ;;  %7437 = vmatprep.subr.mxu1 %v14245_v55 }
0x1ea1   :  { %7367 = vmatpush1.msra.mxu0 %v14246_v60  ;;  %7438 = vmatpush1.msra.mxu1 %v14247_v14 }
0x1ea2   :  { %7368 = vmatprep.subr.mxu0 %v14248_v19  ;;  %7439 = vmatprep.subr.mxu1 %v14249_v1 }
0x1ea3   :  { %7369 = vmatpush1.msra.mxu0 %v14250_v3  ;;  %7402 = vmatprep.mubr.f32.mxu0 %v14251_v12 }
0x1ea4   :  { %7440 = vmatpush1.msra.mxu1 %v14252_v63  ;;  %7473 = vmatprep.mubr.f32.mxu1 %v14251_v12 }
0x1ea5   :  { %8229 = vmatprep.subr.mxu1 %v14251_v12  ;;  %8175 = vmatprep.subr.mxu0 %v7541_v33 }
0x1f44   :  { %v7215_v6 = vpop.f32.mrf.mxu0  ;;  %v7286_v23 = vpop.f32.mrf.mxu1 }
0x1f45   :  { %v7295_v32 = vrot.slane %v7215_v6, 4  ;;  %v7297_v43 = vrot.slane %v7286_v23, 4 }
0x1f46   :  { %v7217_v2 = vpop.f32.mrf.mxu0  ;;  %v7288_v58 = vpop.f32.mrf.mxu1 }
0x1f47   :  { %v7303_v38 = vadd.f32 %v7295_v32, %v14229_v61  ;;  %v7296_v48 = vrot.slane %v7217_v2, 4  ;;  %v7298_v46 = vrot.slane %v7288_v58, 4  ;;  %v7305_v59 = vadd.f32 %v7297_v43, %v12720_v18 }
0x1f49   :  { %v8115_v35 = vmul.f32 -1.442695, %v7303_v38  ;;  %v7304_v45 = vadd.f32 %v7296_v48, %v14230_v44  ;;  %v7306_v34 = vadd.f32 %v7298_v46, %v14231_v7 }
0x1f4b   :  { %8761 = vpow2.f32 %v8115_v35  ;;  %v8116_v57 = vmul.f32 -1.442695, %v7304_v45  ;;  %v8117_v49 = vmul.f32 -1.442695, %v7306_v34 }
0x1f4d   :  { %8763 = vpow2.f32 %v8116_v57 }
0x1f4e   :  { %8765 = vpow2.f32 %v8117_v49 }
0x1f58   :  { %v8762_v56 = vpop.eup %8761 }
0x1f59   :  { %v7310_v9 = vadd.f32 1.0, %v8762_v56 }
0x1f5a   :  { %v8764_v16 = vpop.eup %8763 }
0x1f5b   :  { %8767 = vrcp.f32 %v7310_v9  ;;  %v7316_v27 = vadd.f32 1.0, %v8764_v16  ;;  %v8766_v28 = vpop.eup %8765 }
0x1f5c   :  { %8769 = vtanh.f32 %v7305_v59  ;;  %v7323_v54 = vadd.f32 1.0, %v8766_v28  ;;  %v7632_v28 = vld [vmem:[%s13050_s7 + $0x30] sm:$0xff] }
0x1f5d   :  { %8771 = vrcp.f32 %v7316_v27 }
0x1f5e   :  { %8773 = vrcp.f32 %v7323_v54  ;;  %v7627_v54 = vld [vmem:[%s13050_s7 + $0x8] sm:$0xff] }
0x1f68   :  { %v8768_v30 = vpop.eup %8767 }
0x1f69   :  { %v8770_v11 = vpop.eup %8769 }
0x1f6a   :  { %v8772_v21 = vpop.eup %8771  ;;  %v7330_v26 = vmul.f32 %v8770_v11, %v8768_v30  ;;  %v7631_v30 = vld [vmem:[%s13050_s7 + $0x28] sm:$0xff]  ;;  %v7630_v11 = vld [vmem:[%s13050_s7 + $0x20] sm:$0xff] }
0x1f6b   :  { %v7329_v53 = vmul.f32 %v8772_v21, %v7327_v52  ;;  %v8774_v20 = vpop.eup %8773  ;;  %v7629_v52 = vld [vmem:[%s13050_s7 + $0x18] sm:$0xff]  ;;  %v7628_v21 = vld [vmem:[%s13050_s7 + $0x10] sm:$0xff] }
0x1f6d   :  { %v12871_v10 = vadd.f32 %v7330_v26, %v7329_v53  ;;  %v7626_v26 = vld [vmem:[%s13050_s7] sm:$0xff] }
0x1f6e   :  { %v8121_v53 = vld [vmem:[%s13049_s6] ss:$0 sm:$0xff] }
0x1f6f   :  { %8775 = vtanh.f32 %v12871_v10  ;;  %v7516_v34 = vrot.slane %v12871_v10, 6 }
0x1f7c   :  { %v8776_v36 = vpop.eup %8775 }
0x1f7d   :  { %v7333_v51 = vmul.f32 %v8776_v36, %v8774_v20 }
0x1f7f   :  { %7334 = vst [vmem:[#allocation2 + $0x8] sm:$0x30] %v7333_v51  ;;  %v7336_v40 = vrot.slane %v7333_v51, 4 }
0x1f81   :  { %7403 = vmatmul.mubr.f32.vlgmr.msra.gmra.mxu0 %v7336_v40  ;;  %7474 = vmatmul.mubr.f32.vlgmr.msra.gmra.mxu1 %v7336_v40 }
0x1f82   :  { %8207 = vmatprep.mubr.f32.mxu0 %v12874_v8  ;;  %8176 = vmatpush3.msra.mxu0 %v7541_v33  ;;  %v9130_v33 = vmov 0  }
0x1f83   :  { %8177 = vmatprep.subr.mxu0 %v7540_v0  ;;  %8280 = vset.pattern.permute.xlu1 %v9130_v33 }
0x1f84   :  { %8178 = vmatpush3.msra.mxu0 %v7540_v0  ;;  %8279 = vset.pattern.permute.xlu0 %v9130_v33  ;;  %v8122_v0 = vld [vmem:[#allocation3] ss:$0 sm:$0xff] }
0x1f85   :  { %8179 = vmatprep.subr.mxu0 %v7539_v5  ;;  %8233 = vmatprep.mubr.msk.f32.mxu1 %vm9131_vm9, %v14251_v12 }
0x1f86   :  { %8180 = vmatpush3.msra.mxu0 %v7539_v5 }
0x1f87   :  { %8181 = vmatprep.subr.mxu0 %v7538_v42 }
0x1f88   :  { %8182 = vmatpush3.msra.mxu0 %v7538_v42 }
0x1f89   :  { %8183 = vmatprep.subr.mxu0 %v7537_v41 }
0x1f8a   :  { %8184 = vmatpush3.msra.mxu0 %v7537_v41 }
0x1f8b   :  { %8185 = vmatprep.subr.mxu0 %v7536_v31 }
0x1f8c   :  { %8186 = vmatpush3.msra.mxu0 %v7536_v31 }
0x1f8d   :  { %8187 = vmatprep.subr.mxu0 %v7535_v62 }
0x1f8e   :  { %8188 = vmatpush3.msra.mxu0 %v7535_v62  ;;  %v14253_v62 = vld [vmem:[#allocation13_spill] sm:$0xff] }
0x1f8f   :  { %8189 = vmatprep.subr.mxu0 %v7534_v39 }
0x1f90   :  { %8190 = vmatpush3.msra.mxu0 %v7534_v39  ;;  %v7725_v39 = vadd.s32 8, %v14253_v62 }
0x1f91   :  { %8191 = vmatprep.subr.mxu0 %v7533_v13 }
0x1f92   :  { %8192 = vmatpush3.msra.mxu0 %v7533_v13  ;;  %v14254_v13 = vlaneseq }
0x1f93   :  { %8193 = vmatprep.subr.mxu0 %v7532_v4 }
0x1f94   :  { %8194 = vmatpush3.msra.mxu0 %v7532_v4  ;;  %v7727_v4 = vand.u32 127, %v14254_v13 }
0x1f95   :  { %8195 = vmatprep.subr.mxu0 %v7531_v29 }
0x1f96   :  { %8196 = vmatpush3.msra.mxu0 %v7531_v29  ;;  %v7739_v29 = vand.u32 1, %v7725_v39 }
0x1f97   :  { %8197 = vmatprep.subr.mxu0 %v7530_v47 }
0x1f98   :  { %8198 = vmatpush3.msra.mxu0 %v7530_v47  ;;  %v7732_v47 = vand.u32 1, %v14253_v62  ;;  %vm7753_vm10 = vcmp.eq.s32.totalorder %v7739_v29, %v7727_v4 }
0x1f99   :  { %8199 = vmatprep.subr.mxu0 %v7529_v37 }
0x1f9a   :  { %8200 = vmatpush3.msra.mxu0 %v7529_v37  ;;  %vm7752_vm11 = vcmp.eq.s32.totalorder %v7732_v47, %v7727_v4 }
0x1f9b   :  { %8201 = vmatprep.subr.mxu0 %v7528_v24 }
0x1f9c   :  { %8202 = vmatpush3.msra.mxu0 %v7528_v24 }
0x1f9d   :  { %8203 = vmatprep.subr.mxu0 %v7527_v22 }
0x1f9e   :  { %8204 = vmatpush3.msra.mxu0 %v7527_v22 }
0x1f9f   :  { %8205 = vmatprep.subr.mxu0 %v7526_v17 }
0x1fa0   :  { %8206 = vmatpush3.msra.mxu0 %v7526_v17 }
0x1fa1   :  { %8210 = vmatprep.subr.mxu0 %v7633_v50 }
0x2041   :  { %v7404_v25 = vpop.f32.mrf.mxu0  ;;  %v7475_v14 = vpop.f32.mrf.mxu1 }
0x2042   :  { %v7484_v15 = vrot.slane %v7404_v25, 2  ;;  %v7486_v38 = vrot.slane %v7475_v14, 2 }
0x2043   :  { %v7406_v55 = vpop.f32.mrf.mxu0  ;;  %v7477_v6 = vpop.f32.mrf.mxu1 }
0x2044   :  { %v7492_v60 = vadd.f32 %v7484_v15, %v14229_v61  ;;  %v7485_v19 = vrot.slane %v7406_v55, 2  ;;  %v7487_v32 = vrot.slane %v7477_v6, 2  ;;  %v7494_v35 = vadd.f32 %v7486_v38, %v12720_v18 }
0x2046   :  { %v8118_v1 = vmul.f32 -1.442695, %v7492_v60  ;;  %v7493_v3 = vadd.f32 %v7485_v19, %v14230_v44  ;;  %v7495_v2 = vadd.f32 %v7487_v32, %v14231_v7 }
0x2048   :  { %8777 = vpow2.f32 %v8118_v1  ;;  %v8119_v63 = vmul.f32 -1.442695, %v7493_v3  ;;  %v8120_v23 = vmul.f32 -1.442695, %v7495_v2 }
0x204a   :  { %8779 = vpow2.f32 %v8119_v63 }
0x204b   :  { %8781 = vpow2.f32 %v8120_v23 }
0x2055   :  { %v8778_v48 = vpop.eup %8777 }
0x2056   :  { %v7499_v45 = vadd.f32 1.0, %v8778_v48 }
0x2057   :  { %v8780_v57 = vpop.eup %8779 }
0x2058   :  { %8783 = vrcp.f32 %v7499_v45  ;;  %v7505_v61 = vadd.f32 1.0, %v8780_v57  ;;  %v8782_v44 = vpop.eup %8781 }
0x2059   :  { %8785 = vtanh.f32 %v7494_v35  ;;  %v7512_v49 = vadd.f32 1.0, %v8782_v44 }
0x205a   :  { %8787 = vrcp.f32 %v7505_v61 }
0x205b   :  { %8789 = vrcp.f32 %v7512_v49 }
0x2065   :  { %v8784_v58 = vpop.eup %8783 }
0x2066   :  { %v8786_v46 = vpop.eup %8785 }
0x2067   :  { %v8788_v43 = vpop.eup %8787  ;;  %v7519_v7 = vmul.f32 %v8786_v46, %v8784_v58 }
0x2068   :  { %v7518_v56 = vmul.f32 %v8788_v43, %v7516_v34  ;;  %v8790_v18 = vpop.eup %8789 }
0x206a   :  { %v7520_v59 = vadd.f32 %v7519_v7, %v7518_v56  ;;  %v7915_v56 = vld [vmem:[%s13052_s9 + $0x78] sm:$0xff] }
0x206c   :  { %8791 = vtanh.f32 %v7520_v59 }
0x2079   :  { %v8792_v9 = vpop.eup %8791 }
0x207a   :  { %v7522_v16 = vmul.f32 %v8792_v9, %v8790_v18  ;;  %v7914_v18 = vld [vmem:[%s13052_s9 + $0x70] sm:$0xff]  ;;  %v7913_v9 = vld [vmem:[%s13052_s9 + $0x68] sm:$0xff] }
0x207c   :  { %7523 = vst [vmem:[#allocation2 + $0x8] sm:$0xc0] %v7522_v16  ;;  %v7912_v16 = vld [vmem:[%s13052_s9 + $0x60] sm:$0xff] }
0x2083   :  { %v7525_v27 = vld [vmem:[#allocation2 + $0x8] sm:$0xff] }
0x2084   :  { %8208 = vmatmul.mubr.f32.vlgmr.msra.gmra.mxu0 %v7525_v27  ;;  %8230 = vmatpush3.msra.mxu1 %v7525_v27  ;;  %v7911_v27 = vld [vmem:[%s13052_s9 + $0x58] sm:$0xff] }
0x2085   :  { %8231 = vmatprep.subr.mxu1 %v14251_v12  ;;  %8211 = vmatpush3.msra.mxu0 %v7633_v50 }
0x2086   :  { %8232 = vmatpush3.msra.mxu1 %v12874_v8  ;;  %8212 = vmatprep.subr.mxu0 %v7632_v28 }
0x2087   :  { %8213 = vmatpush3.msra.mxu0 %v7632_v28  ;;  %8236 = vmatprep.subr.mxu1 %v14251_v12  ;;  %v7910_v28 = vld [vmem:[%s13052_s9 + $0x50] sm:$0xff] }
0x2088   :  { %8214 = vmatprep.subr.mxu0 %v7631_v30 }
0x2089   :  { %8215 = vmatpush3.msra.mxu0 %v7631_v30  ;;  %v7909_v30 = vld [vmem:[%s13052_s9 + $0x48] sm:$0xff] }
0x208a   :  { %8216 = vmatprep.subr.mxu0 %v7630_v11 }
0x208b   :  { %8217 = vmatpush3.msra.mxu0 %v7630_v11  ;;  %v7908_v11 = vld [vmem:[%s13052_s9 + $0x40] sm:$0xff] }
0x208c   :  { %8218 = vmatprep.subr.mxu0 %v7629_v52 }
0x208d   :  { %8219 = vmatpush3.msra.mxu0 %v7629_v52  ;;  %v7907_v52 = vld [vmem:[%s13052_s9 + $0x38] sm:$0xff] }
0x208e   :  { %8220 = vmatprep.subr.mxu0 %v7628_v21 }
0x208f   :  { %8221 = vmatpush3.msra.mxu0 %v7628_v21  ;;  %v7906_v21 = vld [vmem:[%s13052_s9 + $0x30] sm:$0xff] }
0x2090   :  { %8222 = vmatprep.subr.mxu0 %v7627_v54 }
0x2091   :  { %8223 = vmatpush3.msra.mxu0 %v7627_v54  ;;  %v7905_v54 = vld [vmem:[%s13052_s9 + $0x28] sm:$0xff] }
0x2092   :  { %8224 = vmatprep.subr.mxu0 %v7626_v26 }
0x2093   :  { %8225 = vmatpush3.msra.mxu0 %v7626_v26  ;;  %v7904_v26 = vld [vmem:[%s13052_s9 + $0x20] sm:$0xff] }
0x2144   :  { %v8209_v10 = vpop.f32.mrf.mxu0 }
0x2145   :  { %v7621_v20 = vadd.f32 %v8209_v10, %v8121_v53  ;;  %v7902_v10 = vld [vmem:[%s13052_s9 + $0x10] sm:$0xff] }
0x2146   :  { %v7615_v36 = vpop.f32.mrf.mxu0 }
0x2147   :  { %v7616_v51 = vadd.f32 %v8121_v53, %v7615_v36  ;;  %v7625_v8 = vmax.f32 %v7621_v20, 0.0  ;;  %v7903_v53 = vld [vmem:[%s13052_s9 + $0x18] sm:$0xff]  ;;  %v7901_v20 = vld [vmem:[%s13052_s9 + $0x8] sm:$0xff]  ;;  %v7900_v36 = vld [vmem:[%s13052_s9] sm:$0xff]  ;;  %s9132_s9 = smov [#allocation9]  }
0x2148   :  { %s8012_s23 = sshll.u32 %s9132_s9, 4  ;;  %s8013_s23 = int_to_ptr.vmem [resolvable:$true] %s8012_s23 }
0x2149   :  { %v7624_v40 = vmax.f32 %v7616_v51, 0.0  ;;  %p9104_p11 = scmp.lt.s32.totalorder %s8013_s23, %s8013_s23 }
0x214b   :  { %8226 = vmatprep.mubr.msk.f32.mxu0 %vm7641_vm8, %v7624_v40 }
0x214c   :  { %8227 = vmatmul.mubr.msk.f32.vlgmr.msra.gmra.mxu0 %vm7641_vm8, %v7625_v8  ;;  %v8126_v8 = vld [vmem:[%s13053_s10] ss:$0 sm:$0xff]  ;;  %s9099_s10 = scalar_lea.vmem %s8013_s23, 32 }
0x214d   :  { %p9100_p10 = scmp.ne.s32.totalorder %s8013_s23, %s9099_s10  ;;  %p9105_p12 = scmp.lt.s32.totalorder %s9099_s10, %s9099_s10 }
0x214f   :  { %p9106_p13 = por %p9105_p12, %p9104_p11 }
0x2151   :  { %p9107_p0 = pnand %p9106_p13, %p9100_p10 }
0x220c   :  { %v8228_v5 = vpop.f32.mrf.mxu0 }
0x220d   :  { %v7720_v42 = vadd.f32 %v8228_v5, %v8122_v0 }
0x220e   :  { %v7714_v41 = vpop.f32.mrf.mxu0 }
0x220f   :  { %v7715_v31 = vadd.f32 %v8122_v0, %v7714_v41  ;;  %7761 = vperm.xlu1 %8280, %v7720_v42  }
0x2211   :  { %7756 = vperm.xlu0 %8279, %v7715_v31  }
0x228a   :  { %v7762_v37 = vpop.permute.xlu1 %7761 }
0x228b   :  { %v7765_v24 = vsel %vm7753_vm10, %v7762_v37, -inf }
0x228c   :  { %v7757_v22 = vpop.permute.xlu0 %7756  ;;  %v7768_v50 = vsel %vm7766_vm12, %v7765_v24, -inf }
0x228d   :  { %v7764_v17 = vsel %vm7752_vm11, %v7757_v22, -inf }
0x228e   :  { %v7767_v25 = vsel %vm7766_vm12, %v7764_v17, -inf }
0x228f   :  { %v7769_v15 = vmax.f32 %v7767_v25, %v7768_v50 }
0x2291   :  { %v7770_v55 = vrot.slane %v7769_v15, 4 }
0x2293   :  { %v7771_v60 = vmax.f32 %v7769_v15, %v7770_v55 }
0x2295   :  { %v7772_v14 = vrot.slane %v7771_v60, 2 }
0x2297   :  { %v7773_v19 = vmax.f32 %v7771_v60, %v7772_v14 }
0x2299   :  { %v7774_v1 = vrot.slane %v7773_v19, 1 }
0x229b   :  { %v7775_v3 = vmax.f32 %v7773_v19, %v7774_v1 }
0x229d   :  { %v7776_v63 = vsub.f32 %v7764_v17, %v7775_v3  ;;  %v7777_v6 = vsub.f32 %v7765_v24, %v7775_v3 }
0x229f   :  { %v7778_v32 = vmul.f32 1.442695, %v7776_v63  ;;  %v7780_v2 = vmul.f32 1.442695, %v7777_v6 }
0x22a1   :  { %8793 = vpow2.f32 %v7778_v32 }
0x22a2   :  { %8795 = vpow2.f32 %v7780_v2 }
0x22ae   :  { %v8794_v38 = vpop.eup %8793 }
0x22af   :  { %v8796_v23 = vpop.eup %8795  ;;  %v7782_v48 = vsel %vm7766_vm12, %v8794_v38, 0.0 }
0x22b0   :  { %v7783_v35 = vsel %vm7766_vm12, %v8796_v23, 0.0 }
0x22b1   :  { %v7784_v45 = vadd.f32 %v7783_v35, %v7782_v48 }
0x22b3   :  { %v7785_v57 = vrot.slane %v7784_v45, 4 }
0x22b5   :  { %v7786_v61 = vadd.f32 %v7785_v57, %v7784_v45 }
0x22b7   :  { %v7787_v44 = vrot.slane %v7786_v61, 2 }
0x22b9   :  { %v7788_v58 = vadd.f32 %v7787_v44, %v7786_v61 }
0x22bb   :  { %v7789_v46 = vrot.slane %v7788_v58, 1 }
0x22bd   :  { %v7790_v34 = vadd.f32 %v7789_v46, %v7788_v58 }
0x22bf   :  { %8797 = vrcp.f32 %v7790_v34 }
0x22cc   :  { %v8798_v43 = vpop.eup %8797 }
0x22cd   :  { %v7792_v49 = vmul.f32 %v8798_v43, %v8794_v38  ;;  %v7793_v7 = vmul.f32 %v8798_v43, %v8796_v23 }
0x22cf   :  { %7794 = vxpose.xlu1.b32.start [1/2] (short) (narrow) %v7792_v49, 8 }
0x22d3   :  { %7795 = vxpose.xlu1.b32.end [2/2] (short) (narrow) %v7793_v7, 8 }
0x234b   :  { %v7810_v59 = vpop.trf.xlu1 }
0x234c   :  { %8234 = vmatmul.mubr.msk.f32.vlgmr.msra.gmra.mxu1 %vm7826_vm13, %v7810_v59 }
0x234d   :  { %8237 = vmatpush3.msra.mxu1 %v7915_v56  ;;  %8268 = vmatprep.mubr.msk.f32.mxu1 %vm9131_vm9, %v14251_v12 }
0x234e   :  { %8238 = vmatprep.subr.mxu1 %v14251_v12 }
0x234f   :  { %8239 = vmatpush3.msra.mxu1 %v7914_v18 }
0x2350   :  { %8240 = vmatprep.subr.mxu1 %v14251_v12 }
0x2351   :  { %8241 = vmatpush3.msra.mxu1 %v7913_v9 }
0x2352   :  { %8242 = vmatprep.subr.mxu1 %v14251_v12 }
0x2353   :  { %8243 = vmatpush3.msra.mxu1 %v7912_v16 }
0x2354   :  { %8244 = vmatprep.subr.mxu1 %v14251_v12 }
0x2355   :  { %8245 = vmatpush3.msra.mxu1 %v7911_v27 }
0x2356   :  { %8246 = vmatprep.subr.mxu1 %v14251_v12 }
0x2357   :  { %8247 = vmatpush3.msra.mxu1 %v7910_v28 }
0x2358   :  { %8248 = vmatprep.subr.mxu1 %v14251_v12 }
0x2359   :  { %8249 = vmatpush3.msra.mxu1 %v7909_v30 }
0x235a   :  { %8250 = vmatprep.subr.mxu1 %v14251_v12 }
0x235b   :  { %8251 = vmatpush3.msra.mxu1 %v7908_v11 }
0x235c   :  { %8252 = vmatprep.subr.mxu1 %v14251_v12 }
0x235d   :  { %8253 = vmatpush3.msra.mxu1 %v7907_v52 }
0x235e   :  { %8254 = vmatprep.subr.mxu1 %v14251_v12 }
0x235f   :  { %8255 = vmatpush3.msra.mxu1 %v7906_v21 }
0x2360   :  { %8256 = vmatprep.subr.mxu1 %v14251_v12 }
0x2361   :  { %8257 = vmatpush3.msra.mxu1 %v7905_v54 }
0x2362   :  { %8258 = vmatprep.subr.mxu1 %v14251_v12 }
0x2363   :  { %8259 = vmatpush3.msra.mxu1 %v7904_v26 }
0x2364   :  { %8260 = vmatprep.subr.mxu1 %v14251_v12 }
0x2365   :  { %8261 = vmatpush3.msra.mxu1 %v7903_v53 }
0x2366   :  { %8262 = vmatprep.subr.mxu1 %v14251_v12 }
0x2367   :  { %8263 = vmatpush3.msra.mxu1 %v7902_v10 }
0x2368   :  { %8264 = vmatprep.subr.mxu1 %v14251_v12 }
0x2369   :  { %8265 = vmatpush3.msra.mxu1 %v7901_v20 }
0x236a   :  { %8266 = vmatprep.subr.mxu1 %v14251_v12 }
0x236b   :  { %8267 = vmatpush3.msra.mxu1 %v7900_v36 }
0x240c   :  { %v7896_v51 = vpop.f32.mrf.mxu1 }
0x240d   :  { %8269 = vmatmul.mubr.f32.vlgmr.msra.gmra.mxu1 %v7896_v51 }
0x240e   :  { %v8235_v40 = vpop.f32.mrf.mxu1 }
0x24cd   :  { %v7989_v33 = vpop.f32.mrf.mxu1 }
0x24ce   :  { %v7990_v0 = vadd.f32 %v8126_v8, %v7989_v33 }
0x24cf   :  { %v8270_v5 = vpop.f32.mrf.mxu1 }
0x24d0   :  { %v7994_v42 = vsel %vm7993_vm14, %v7990_v0, -inf }
0x24d1   :  { %7995 = vmax.xlane.f32.xlu0 %v7994_v42 }
0x255a   :  { %v7996_v12 = vpop.xlane.xlu0 %7995 }
0x255b   :  { %v7997_v41 = vsub.f32 %v7990_v0, %v7996_v12 }
0x255d   :  { %v7998_v31 = vmul.f32 1.442695, %v7997_v41 }
0x255f   :  { %8799 = vpow2.f32 %v7998_v31 }
0x256c   :  { %v8800_v62 = vpop.eup %8799 }
0x256d   :  { %v8000_v39 = vsel %vm7993_vm14, %v8800_v62, 0.0 }
0x256e   :  { %8001 = vadd.xlane.f32.xlu0 %v8000_v39 }
0x25f7   :  { %v8002_v13 = vpop.xlane.xlu0 %8001 }
0x25f8   :  { %8801 = vrcp.f32 %v8002_v13 }
0x2605   :  { %v8802_v4 = vpop.eup %8801 }
0x2606   :  { %v8004_v29 = vmul.f32 %v8802_v4, %v8800_v62 }
0x2608   :  { %8005 = vst.msk [vmem:[#allocation9] sm:$0x3] %vm7993_vm14, %v8004_v29 }
0x2609   :  { %9110 = shalt.err (!%p9107_p0)
}
0x260a   :  { %8015 = dma.vmem_to_hbm [thread:$0]  %s8013_s23, 32, %s13054_s11, [#allocation6]  }
0x260b   :  { %9123 = dma.done.wait [#allocation6], 32  }
0x260c   :  { %9124 = vsyncadd [#allocation6], 4294967264 }
0x260d   :  { %8019 = vsyncpa [#allocation5], 1 }
0x260e   :  { %8020 = vsyncpa [#allocation8], 1 }
0x260f   :  { %8021 = vsyncpa [#allocation6], 1 }

</bundles_post_ra>
